<compile_context>
chip_gen: v7x
topology: tpu7x:2x2x1
jax: 0.10.0
libtpu: 0.0.40
codegen_flags: <defaults>
</compile_context>

<pallas_src>
import functools

import jax
import jax.numpy as jnp
from jax import lax
from jax.experimental import pallas as pl
from jax.experimental.pallas import tpu as pltpu

K_SIZE = 3
N_FILTERS = 64
MP_SIZE = 2
BN_EPS = 1e-5
N_BLOCKS = 4

# MXU operand dtype. bf16 operands + f32 accumulation is native-peak on
# v6e/v7x and fully supported by the v5e MXU; everything outside the dot
# (BN, ReLU, softmax) stays f32 (v5e has no bf16 VPU/EUP path).
MXU_DTYPE = jnp.bfloat16


# ---------------------------------------------------------------------------
# Kernel helpers
# ---------------------------------------------------------------------------
def _bn_relu_pool(acc, gamma, beta, n, h, w):
    """Training-mode BatchNorm (single-pass batch stats) -> ReLU -> MaxPool2d(2).

    acc:          (n*h*w, Cout) f32 accumulator straight from the MXU.
    gamma / beta: (1, Cout) f32 BN affine parameters.
    returns:      (n, h//2, w//2, Cout) f32.
    """
    cout = acc.shape[-1]

    # Single-pass stats: E[x] and E[x^2]; biased variance matches
    # F.batch_norm(training=True) normalization. Conv bias is dropped
    # upstream since a per-channel constant shift cancels exactly here.
    mean = jnp.mean(acc, axis=0, keepdims=True)
    var = jnp.maximum(jnp.mean(acc * acc, axis=0, keepdims=True) - mean * mean,
                      0.0)
    scale = gamma * lax.rsqrt(var + BN_EPS)
    shift = beta - mean * scale
    y = jnp.maximum(acc * scale + shift, 0.0)

    # MaxPool2d(2): H-pool (outer-dim regroup, pure VPU), then W-pool
    # (sublane-pair reduce); channels stay on the 128-lane axis.
    # TODO(synk): a strided-slice W-pool (jnp.maximum(y[:,:,0::2,:],
    # y[:,:,1::2,:])) would avoid the (2, Cout) minor reshape repack, but
    # non-unit-stride value slices are not a proven Mosaic lowering path here.
    y = y.reshape(n, h, w, cout)
    y = jnp.max(y.reshape(n, h // MP_SIZE, MP_SIZE, w, cout), axis=2)
    y = jnp.max(y.reshape(n, h // MP_SIZE, w // MP_SIZE, MP_SIZE, cout), axis=3)
    return y


def _conv_block(pad_ref, patch_ref, w_ref, gamma_ref, beta_ref, act):
    """conv3x3(pad=1) -> BN(batch stats) -> ReLU -> maxpool2, all in VMEM.

    pad_ref:            (N, H+2, W+2, 64)  f32 scratch (halo-zeroed staging)
    patch_ref:          (N, H, W, 9*64)    f32 scratch (explicit im2col slab)
    w_ref:              (9*64, 64)         bf16 weight slab
    gamma_ref/beta_ref: (1, 64)            f32
    act:                (N, H, W, 64)      f32 previous-layer activation
    returns:            (N, H//2, W//2, 64) f32
    """
    n, h, w, cin = act.shape

    # Zero ONLY the 1-pixel halo (top/bottom rows, left/right columns) and
    # write the activation into the interior — roughly halves padding-stage
    # store traffic vs. a full-buffer memset + overwrite.
    zrow = jnp.zeros((n, 1, w + 2, cin), pad_ref.dtype)
    zcol = jnp.zeros((n, h, 1, cin), pad_ref.dtype)
    pad_ref[:, 0:1, :, :] = zrow
    pad_ref[:, h + 1:h + 2, :, :] = zrow
    pad_ref[:, 1:1 + h, 0:1, :] = zcol
    pad_ref[:, 1:1 + h, w + 1:w + 2, :] = zcol
    pad_ref[:, 1:1 + h, 1:1 + w, :] = act

    # Explicit im2col: 9 shifted-window copies into a VMEM slab, each landing
    # at a 64-lane-aligned column offset (no value-level concatenate, no
    # hidden spill temp, low vreg pressure).
    for kh in range(K_SIZE):
        for kw in range(K_SIZE):
            t = kh * K_SIZE + kw
            patch_ref[:, :, :, t * cin:(t + 1) * cin] = (
                pad_ref[:, kh:kh + h, kw:kw + w, :])

    m = n * h * w
    patches = patch_ref[...].reshape(m, K_SIZE * K_SIZE * cin)
    acc = jnp.dot(patches.astype(MXU_DTYPE), w_ref[...],
                  preferred_element_type=jnp.float32)
    return _bn_relu_pool(acc, gamma_ref[...], beta_ref[...], n, h, w)


def _conv4net_kernel(n, h0, w0,
                     p0_ref,
                     w0_ref, g0_ref, be0_ref,
                     w1_ref, g1_ref, be1_ref,
                     w2_ref, g2_ref, be2_ref,
                     w3_ref, g3_ref, be3_ref,
                     fcw_ref, fcb_ref,
                     o_ref,
                     pad1_ref, patch1_ref,
                     pad2_ref, patch2_ref,
                     pad3_ref, patch3_ref):
    # Block 0: the im2col slab was built lane-dense in the wrapper (Cin is
    # tiny, so an in-kernel NHWC pad/tap path would be ~3% lane-utilized);
    # only the deep MXU dot + BN/ReLU/pool run here.
    acc0 = jnp.dot(p0_ref[...], w0_ref[...], preferred_element_type=jnp.float32)
    act = _bn_relu_pool(acc0, g0_ref[...], be0_ref[...], n, h0, w0)

    act = _conv_block(pad1_ref, patch1_ref, w1_ref, g1_ref, be1_ref, act)
    act = _conv_block(pad2_ref, patch2_ref, w2_ref, g2_ref, be2_ref, act)
    act = _conv_block(pad3_ref, patch3_ref, w3_ref, g3_ref, be3_ref, act)

    # Final spatial size is 1x1 (checked statically in the wrapper), so the
    # NHWC flatten order equals PyTorch's NCHW flatten order.
    feat = act.reshape(n, N_FILTERS).astype(MXU_DTYPE)
    logits = jnp.dot(feat, fcw_ref[...], preferred_element_type=jnp.float32)
    logits = logits + fcb_ref[...]

    m = jnp.max(logits, axis=1, keepdims=True)
    s = logits - m
    lse = jnp.log(jnp.sum(jnp.exp(s), axis=1, keepdims=True))
    o_ref[...] = (s - lse).astype(o_ref.dtype)


# ---------------------------------------------------------------------------
# Wrapper
# ---------------------------------------------------------------------------
_VMEM_SPEC = pl.BlockSpec(memory_space=pltpu.MemorySpace.VMEM)


@jax.jit
def conv4net_forward(x_nchw, params):
    """Conv4Net.forward(X) with adapted_params=None (Omniglot-style head)."""
    N, cin0, H, W = x_nchw.shape

    # Static shape checks: PyTorch MaxPool2d floors odd dims, this kernel
    # requires even dims; the 64-feature fc head needs a 1x1 final map.
    h, w = H, W
    for _ in range(N_BLOCKS):
        if h % MP_SIZE or w % MP_SIZE:
            raise ValueError("spatial dims must be divisible by 2 at every pool")
        h //= MP_SIZE
        w //= MP_SIZE
    if h != 1 or w != 1:
        raise ValueError("Omniglot-style fc head expects a 1x1 final feature map")

    num_classes = params["fc_w"].shape[-1]

    # ---- Block-0 im2col in the wrapper (cheap XLA op) ----------------------
    # With Cin=4 (or 3) minor-most, an in-kernel pad buffer is (8,128)-tile
    # padded ~32x and every VPU op on it uses ~3% of lanes. A lane-dense
    # (N*H*W, 9*Cin) bf16 slab removes that traffic entirely.
    x_nhwc = jnp.transpose(x_nchw, (0, 2, 3, 1)).astype(jnp.float32)
    xp = jnp.pad(x_nhwc, ((0, 0), (1, 1), (1, 1), (0, 0)))
    taps0 = [xp[:, kh:kh + H, kw:kw + W, :]
             for kh in range(K_SIZE) for kw in range(K_SIZE)]
    patches0 = jnp.concatenate(taps0, axis=-1).reshape(
        N * H * W, K_SIZE * K_SIZE * cin0).astype(MXU_DTYPE)

    # ---- Kernel inputs: bf16 weight slabs, f32 BN affines. Conv biases are
    # intentionally NOT passed: they cancel exactly under batch-stat BN. -----
    inputs = [patches0]
    cin = cin0
    for i in range(N_BLOCKS):
        inputs += [
            # (3,3,Cin,Cout) -> (9*Cin, Cout) slab matching the im2col order.
            params[f"conv{i}_w"].reshape(
                K_SIZE * K_SIZE * cin, N_FILTERS).astype(MXU_DTYPE),
            params[f"bn{i}_gamma"],
            params[f"bn{i}_beta"],
        ]
        cin = N_FILTERS
    inputs += [params["fc_w"].astype(MXU_DTYPE), params["fc_b"]]

    # ---- VMEM scratch: per 64-channel block one halo pad buffer and one
    # explicit im2col slab; block 0 needs none. ------------------------------
    scratch = []
    h, w = H // MP_SIZE, W // MP_SIZE
    for _ in range(1, N_BLOCKS):
        scratch.append(pltpu.VMEM((N, h + 2, w + 2, N_FILTERS), jnp.float32))
        scratch.append(
            pltpu.VMEM((N, h, w, K_SIZE * K_SIZE * N_FILTERS), jnp.float32))
        h, w = h // MP_SIZE, w // MP_SIZE

    # Single fused pallas_call: every inter-layer activation stays in VMEM.
    # No grid on purpose — training-mode BatchNorm couples the whole batch,
    # so splitting N would change semantics.
    # TODO(synk): for multi-task MAML batches (per-task BN) add a leading
    # 'parallel' task grid so v7x's second TensorCore is used, and re-derive
    # the VMEM budget (64 MiB physical on v7x) before enabling 84x84 inputs.
    kernel = functools.partial(_conv4net_kernel, N, H, W)
    return pl.pallas_call(
        kernel,
        out_shape=jax.ShapeDtypeStruct((N, num_classes), jnp.float32),
        in_specs=[_VMEM_SPEC] * len(inputs),
        out_specs=_VMEM_SPEC,
        scratch_shapes=scratch,
        compiler_params=pltpu.CompilerParams(
            # Explicit scoped-VMEM limit: v5e's default is only 16 MiB;
            # everything here is ~1 MiB, so 32 MiB is generous headroom and
            # safe on all of v5e/v6e/v7x.
            vmem_limit_bytes=32 * 1024 * 1024),
    )(*inputs)


def init_params(key, in_channels, num_classes):
    """Deterministic synthetic parameters mirroring Net.__init__ shapes."""
    params = {}
    cin = in_channels
    for i in range(N_BLOCKS):
        key, kw = jax.random.split(key)
        fan_in = cin * K_SIZE * K_SIZE
        # conv weight stored as (kh, kw, Cin, Cout); from PyTorch
        # (Cout,Cin,kh,kw) use w.permute(2, 3, 1, 0).
        params[f"conv{i}_w"] = (jax.random.normal(
            kw, (K_SIZE, K_SIZE, cin, N_FILTERS), jnp.float32) *
            (2.0 / fan_in) ** 0.5)
        # Conv bias is kept for module parity but is mathematically a no-op
        # under training-mode BatchNorm (the kernel ignores it).
        params[f"conv{i}_b"] = jnp.zeros((1, N_FILTERS), jnp.float32)
        params[f"bn{i}_gamma"] = jnp.ones((1, N_FILTERS), jnp.float32)
        params[f"bn{i}_beta"] = jnp.zeros((1, N_FILTERS), jnp.float32)
        cin = N_FILTERS
    key, kfc = jax.random.split(key)
    # fc weight stored transposed: (64, num_classes) (PyTorch: (num_classes, 64))
    params["fc_w"] = jax.random.normal(
        kfc, (N_FILTERS, num_classes), jnp.float32) * (1.0 / N_FILTERS) ** 0.5
    params["fc_b"] = jnp.zeros((1, num_classes), jnp.float32)
    return params


if __name__ == "__main__":
    key = jax.random.PRNGKey(0)
    kx, kp = jax.random.split(key)

    batch, in_channels, spatial, num_classes = 2, 4, 16, 5
    x = jax.random.normal(kx, (batch, in_channels, spatial, spatial),
                          jnp.float32)
    params = init_params(kp, in_channels, num_classes)

    out = conv4net_forward(x, params)
    jax.block_until_ready(out)
    assert out.shape == (batch, num_classes)
    # log_softmax rows should sum to ~1 in prob space
    assert jnp.allclose(jnp.sum(jnp.exp(out), axis=1), 1.0, atol=1e-4)
    print("KERNEL_OK")
</pallas_src>

<mosaic_0001>
module attributes {stable_mosaic.version = 11 : i64} {
  func.func @_conv4net_kernel(%arg0: memref<512x36xbf16, #tpu.memory_space<vmem>>, %arg1: memref<36x64xbf16, #tpu.memory_space<vmem>>, %arg2: memref<1x64xf32, #tpu.memory_space<vmem>>, %arg3: memref<1x64xf32, #tpu.memory_space<vmem>>, %arg4: memref<576x64xbf16, #tpu.memory_space<vmem>>, %arg5: memref<1x64xf32, #tpu.memory_space<vmem>>, %arg6: memref<1x64xf32, #tpu.memory_space<vmem>>, %arg7: memref<576x64xbf16, #tpu.memory_space<vmem>>, %arg8: memref<1x64xf32, #tpu.memory_space<vmem>>, %arg9: memref<1x64xf32, #tpu.memory_space<vmem>>, %arg10: memref<576x64xbf16, #tpu.memory_space<vmem>>, %arg11: memref<1x64xf32, #tpu.memory_space<vmem>>, %arg12: memref<1x64xf32, #tpu.memory_space<vmem>>, %arg13: memref<64x5xbf16, #tpu.memory_space<vmem>>, %arg14: memref<1x5xf32, #tpu.memory_space<vmem>>, %arg15: memref<2x5xf32, #tpu.memory_space<vmem>>, %arg16: memref<2x10x10x64xf32, #tpu.memory_space<vmem>>, %arg17: memref<2x8x8x576xf32, #tpu.memory_space<vmem>>, %arg18: memref<2x6x6x64xf32, #tpu.memory_space<vmem>>, %arg19: memref<2x4x4x576xf32, #tpu.memory_space<vmem>>, %arg20: memref<2x4x4x64xf32, #tpu.memory_space<vmem>>, %arg21: memref<2x2x2x576xf32, #tpu.memory_space<vmem>>) attributes {dimension_semantics = [], scalar_prefetch = 0 : i64, scratch_operands = 6 : i64, tpu.core_type = #tpu.core_type<tc>} {
    %c0 = arith.constant 0 : index
    %c0_0 = arith.constant 0 : index
    %0 = vector.load %arg0[%c0, %c0_0] : memref<512x36xbf16, #tpu.memory_space<vmem>>, vector<512x36xbf16>
    %c0_1 = arith.constant 0 : index
    %c0_2 = arith.constant 0 : index
    %1 = vector.load %arg1[%c0_1, %c0_2] : memref<36x64xbf16, #tpu.memory_space<vmem>>, vector<36x64xbf16>
    %cst = arith.constant dense<0.000000e+00> : vector<512x64xf32>
    %2 = tpu.matmul %0, %1, %cst {dimension_numbers = #tpu.dot_dimension_numbers<[1], [0], [0], [1], [0, 0, 1, 1], [], []>} : vector<512x36xbf16>, vector<36x64xbf16>, vector<512x64xf32> -> vector<512x64xf32>
    %c0_3 = arith.constant 0 : index
    %c0_4 = arith.constant 0 : index
    %3 = vector.load %arg2[%c0_3, %c0_4] : memref<1x64xf32, #tpu.memory_space<vmem>>, vector<1x64xf32>
    %c0_5 = arith.constant 0 : index
    %c0_6 = arith.constant 0 : index
    %4 = vector.load %arg3[%c0_5, %c0_6] : memref<1x64xf32, #tpu.memory_space<vmem>>, vector<1x64xf32>
    %cst_7 = arith.constant dense<0.000000e+00> : vector<64xf32>
    %5 = vector.multi_reduction <add>, %2, %cst_7 [0] : vector<512x64xf32> to vector<64xf32>
    %6 = vector.shape_cast %5 : vector<64xf32> to vector<1x64xf32>
    %cst_8 = arith.constant 5.120000e+02 : f32
    %7 = vector.broadcast %cst_8 : f32 to vector<1x64xf32>
    %8 = arith.divf %6, %7 : vector<1x64xf32>
    %9 = arith.mulf %2, %2 : vector<512x64xf32>
    %cst_9 = arith.constant dense<0.000000e+00> : vector<64xf32>
    %10 = vector.multi_reduction <add>, %9, %cst_9 [0] : vector<512x64xf32> to vector<64xf32>
    %11 = vector.shape_cast %10 : vector<64xf32> to vector<1x64xf32>
    %cst_10 = arith.constant 5.120000e+02 : f32
    %12 = vector.broadcast %cst_10 : f32 to vector<1x64xf32>
    %13 = arith.divf %11, %12 : vector<1x64xf32>
    %14 = arith.mulf %8, %8 : vector<1x64xf32>
    %15 = arith.subf %13, %14 : vector<1x64xf32>
    %cst_11 = arith.constant 0.000000e+00 : f32
    %16 = vector.broadcast %cst_11 : f32 to vector<1x64xf32>
    %17 = arith.maximumf %15, %16 : vector<1x64xf32>
    %cst_12 = arith.constant 9.99999974E-6 : f32
    %18 = vector.broadcast %cst_12 : f32 to vector<1x64xf32>
    %19 = arith.addf %17, %18 : vector<1x64xf32>
    %20 = math.rsqrt %19 : vector<1x64xf32>
    %21 = arith.mulf %3, %20 : vector<1x64xf32>
    %22 = arith.mulf %8, %21 : vector<1x64xf32>
    %23 = arith.subf %4, %22 : vector<1x64xf32>
    %24 = vector.broadcast %21 : vector<1x64xf32> to vector<512x64xf32>
    %25 = arith.mulf %2, %24 : vector<512x64xf32>
    %26 = vector.broadcast %23 : vector<1x64xf32> to vector<512x64xf32>
    %27 = arith.addf %25, %26 : vector<512x64xf32>
    %cst_13 = arith.constant 0.000000e+00 : f32
    %28 = vector.broadcast %cst_13 : f32 to vector<512x64xf32>
    %29 = arith.maximumf %27, %28 : vector<512x64xf32>
    %30 = vector.shape_cast %29 : vector<512x64xf32> to vector<2x16x16x64xf32>
    %31 = vector.shape_cast %30 : vector<2x16x16x64xf32> to vector<2x8x2x16x64xf32>
    %cst_14 = arith.constant dense<0xFF800000> : vector<2x8x16x64xf32>
    %32 = vector.multi_reduction <maximumf>, %31, %cst_14 [2] : vector<2x8x2x16x64xf32> to vector<2x8x16x64xf32>
    %33 = vector.shape_cast %32 : vector<2x8x16x64xf32> to vector<2x8x8x2x64xf32>
    %cst_15 = arith.constant dense<0xFF800000> : vector<2x8x8x64xf32>
    %34 = vector.multi_reduction <maximumf>, %33, %cst_15 [3] : vector<2x8x8x2x64xf32> to vector<2x8x8x64xf32>
    %cst_16 = arith.constant 0.000000e+00 : f32
    %35 = vector.broadcast %cst_16 : f32 to vector<2x1x10x64xf32>
    %cst_17 = arith.constant 0.000000e+00 : f32
    %36 = vector.broadcast %cst_17 : f32 to vector<2x8x1x64xf32>
    %c0_18 = arith.constant 0 : index
    %c0_19 = arith.constant 0 : index
    %c0_20 = arith.constant 0 : index
    %c0_21 = arith.constant 0 : index
    %37 = vector.load %arg16[%c0_18, %c0_19, %c0_20, %c0_21] : memref<2x10x10x64xf32, #tpu.memory_space<vmem>>, vector<2x1x10x64xf32>
    tpu.vector_store %arg16[%c0_18, %c0_19, %c0_20, %c0_21], %35 {strides = array<i32>} : memref<2x10x10x64xf32, #tpu.memory_space<vmem>>, vector<2x1x10x64xf32>,
    %c0_22 = arith.constant 0 : index
    %c9 = arith.constant 9 : index
    %c0_23 = arith.constant 0 : index
    %c0_24 = arith.constant 0 : index
    %38 = vector.load %arg16[%c0_22, %c9, %c0_23, %c0_24] : memref<2x10x10x64xf32, #tpu.memory_space<vmem>>, vector<2x1x10x64xf32>
    tpu.vector_store %arg16[%c0_22, %c9, %c0_23, %c0_24], %35 {strides = array<i32>} : memref<2x10x10x64xf32, #tpu.memory_space<vmem>>, vector<2x1x10x64xf32>,
    %c0_25 = arith.constant 0 : index
    %c1 = arith.constant 1 : index
    %c0_26 = arith.constant 0 : index
    %c0_27 = arith.constant 0 : index
    %39 = vector.load %arg16[%c0_25, %c1, %c0_26, %c0_27] : memref<2x10x10x64xf32, #tpu.memory_space<vmem>>, vector<2x8x1x64xf32>
    tpu.vector_store %arg16[%c0_25, %c1, %c0_26, %c0_27], %36 {strides = array<i32>} : memref<2x10x10x64xf32, #tpu.memory_space<vmem>>, vector<2x8x1x64xf32>,
    %c0_28 = arith.constant 0 : index
    %c1_29 = arith.constant 1 : index
    %c9_30 = arith.constant 9 : index
    %c0_31 = arith.constant 0 : index
    %40 = vector.load %arg16[%c0_28, %c1_29, %c9_30, %c0_31] : memref<2x10x10x64xf32, #tpu.memory_space<vmem>>, vector<2x8x1x64xf32>
    tpu.vector_store %arg16[%c0_28, %c1_29, %c9_30, %c0_31], %36 {strides = array<i32>} : memref<2x10x10x64xf32, #tpu.memory_space<vmem>>, vector<2x8x1x64xf32>,
    %c0_32 = arith.constant 0 : index
    %c1_33 = arith.constant 1 : index
    %c1_34 = arith.constant 1 : index
    %c0_35 = arith.constant 0 : index
    %41 = vector.load %arg16[%c0_32, %c1_33, %c1_34, %c0_35] : memref<2x10x10x64xf32, #tpu.memory_space<vmem>>, vector<2x8x8x64xf32>
    tpu.vector_store %arg16[%c0_32, %c1_33, %c1_34, %c0_35], %34 {strides = array<i32>} : memref<2x10x10x64xf32, #tpu.memory_space<vmem>>, vector<2x8x8x64xf32>,
    %c0_36 = arith.constant 0 : index
    %c0_37 = arith.constant 0 : index
    %c0_38 = arith.constant 0 : index
    %c0_39 = arith.constant 0 : index
    %42 = vector.load %arg16[%c0_36, %c0_37, %c0_38, %c0_39] : memref<2x10x10x64xf32, #tpu.memory_space<vmem>>, vector<2x8x8x64xf32>
    %c0_40 = arith.constant 0 : index
    %c0_41 = arith.constant 0 : index
    %c0_42 = arith.constant 0 : index
    %c0_43 = arith.constant 0 : index
    %43 = vector.load %arg17[%c0_40, %c0_41, %c0_42, %c0_43] : memref<2x8x8x576xf32, #tpu.memory_space<vmem>>, vector<2x8x8x64xf32>
    tpu.vector_store %arg17[%c0_40, %c0_41, %c0_42, %c0_43], %42 {strides = array<i32>} : memref<2x8x8x576xf32, #tpu.memory_space<vmem>>, vector<2x8x8x64xf32>,
    %c0_44 = arith.constant 0 : index
    %c0_45 = arith.constant 0 : index
    %c1_46 = arith.constant 1 : index
    %c0_47 = arith.constant 0 : index
    %44 = vector.load %arg16[%c0_44, %c0_45, %c1_46, %c0_47] : memref<2x10x10x64xf32, #tpu.memory_space<vmem>>, vector<2x8x8x64xf32>
    %c0_48 = arith.constant 0 : index
    %c0_49 = arith.constant 0 : index
    %c0_50 = arith.constant 0 : index
    %c64 = arith.constant 64 : index
    %45 = vector.load %arg17[%c0_48, %c0_49, %c0_50, %c64] : memref<2x8x8x576xf32, #tpu.memory_space<vmem>>, vector<2x8x8x64xf32>
    tpu.vector_store %arg17[%c0_48, %c0_49, %c0_50, %c64], %44 {strides = array<i32>} : memref<2x8x8x576xf32, #tpu.memory_space<vmem>>, vector<2x8x8x64xf32>,
    %c0_51 = arith.constant 0 : index
    %c0_52 = arith.constant 0 : index
    %c2 = arith.constant 2 : index
    %c0_53 = arith.constant 0 : index
    %46 = vector.load %arg16[%c0_51, %c0_52, %c2, %c0_53] : memref<2x10x10x64xf32, #tpu.memory_space<vmem>>, vector<2x8x8x64xf32>
    %c0_54 = arith.constant 0 : index
    %c0_55 = arith.constant 0 : index
    %c0_56 = arith.constant 0 : index
    %c128 = arith.constant 128 : index
    %47 = vector.load %arg17[%c0_54, %c0_55, %c0_56, %c128] : memref<2x8x8x576xf32, #tpu.memory_space<vmem>>, vector<2x8x8x64xf32>
    tpu.vector_store %arg17[%c0_54, %c0_55, %c0_56, %c128], %46 {strides = array<i32>} : memref<2x8x8x576xf32, #tpu.memory_space<vmem>>, vector<2x8x8x64xf32>,
    %c0_57 = arith.constant 0 : index
    %c1_58 = arith.constant 1 : index
    %c0_59 = arith.constant 0 : index
    %c0_60 = arith.constant 0 : index
    %48 = vector.load %arg16[%c0_57, %c1_58, %c0_59, %c0_60] : memref<2x10x10x64xf32, #tpu.memory_space<vmem>>, vector<2x8x8x64xf32>
    %c0_61 = arith.constant 0 : index
    %c0_62 = arith.constant 0 : index
    %c0_63 = arith.constant 0 : index
    %c192 = arith.constant 192 : index
    %49 = vector.load %arg17[%c0_61, %c0_62, %c0_63, %c192] : memref<2x8x8x576xf32, #tpu.memory_space<vmem>>, vector<2x8x8x64xf32>
    tpu.vector_store %arg17[%c0_61, %c0_62, %c0_63, %c192], %48 {strides = array<i32>} : memref<2x8x8x576xf32, #tpu.memory_space<vmem>>, vector<2x8x8x64xf32>,
    %c0_64 = arith.constant 0 : index
    %c1_65 = arith.constant 1 : index
    %c1_66 = arith.constant 1 : index
    %c0_67 = arith.constant 0 : index
    %50 = vector.load %arg16[%c0_64, %c1_65, %c1_66, %c0_67] : memref<2x10x10x64xf32, #tpu.memory_space<vmem>>, vector<2x8x8x64xf32>
    %c0_68 = arith.constant 0 : index
    %c0_69 = arith.constant 0 : index
    %c0_70 = arith.constant 0 : index
    %c256 = arith.constant 256 : index
    %51 = vector.load %arg17[%c0_68, %c0_69, %c0_70, %c256] : memref<2x8x8x576xf32, #tpu.memory_space<vmem>>, vector<2x8x8x64xf32>
    tpu.vector_store %arg17[%c0_68, %c0_69, %c0_70, %c256], %50 {strides = array<i32>} : memref<2x8x8x576xf32, #tpu.memory_space<vmem>>, vector<2x8x8x64xf32>,
    %c0_71 = arith.constant 0 : index
    %c1_72 = arith.constant 1 : index
    %c2_73 = arith.constant 2 : index
    %c0_74 = arith.constant 0 : index
    %52 = vector.load %arg16[%c0_71, %c1_72, %c2_73, %c0_74] : memref<2x10x10x64xf32, #tpu.memory_space<vmem>>, vector<2x8x8x64xf32>
    %c0_75 = arith.constant 0 : index
    %c0_76 = arith.constant 0 : index
    %c0_77 = arith.constant 0 : index
    %c320 = arith.constant 320 : index
    %53 = vector.load %arg17[%c0_75, %c0_76, %c0_77, %c320] : memref<2x8x8x576xf32, #tpu.memory_space<vmem>>, vector<2x8x8x64xf32>
    tpu.vector_store %arg17[%c0_75, %c0_76, %c0_77, %c320], %52 {strides = array<i32>} : memref<2x8x8x576xf32, #tpu.memory_space<vmem>>, vector<2x8x8x64xf32>,
    %c0_78 = arith.constant 0 : index
    %c2_79 = arith.constant 2 : index
    %c0_80 = arith.constant 0 : index
    %c0_81 = arith.constant 0 : index
    %54 = vector.load %arg16[%c0_78, %c2_79, %c0_80, %c0_81] : memref<2x10x10x64xf32, #tpu.memory_space<vmem>>, vector<2x8x8x64xf32>
    %c0_82 = arith.constant 0 : index
    %c0_83 = arith.constant 0 : index
    %c0_84 = arith.constant 0 : index
    %c384 = arith.constant 384 : index
    %55 = vector.load %arg17[%c0_82, %c0_83, %c0_84, %c384] : memref<2x8x8x576xf32, #tpu.memory_space<vmem>>, vector<2x8x8x64xf32>
    tpu.vector_store %arg17[%c0_82, %c0_83, %c0_84, %c384], %54 {strides = array<i32>} : memref<2x8x8x576xf32, #tpu.memory_space<vmem>>, vector<2x8x8x64xf32>,
    %c0_85 = arith.constant 0 : index
    %c2_86 = arith.constant 2 : index
    %c1_87 = arith.constant 1 : index
    %c0_88 = arith.constant 0 : index
    %56 = vector.load %arg16[%c0_85, %c2_86, %c1_87, %c0_88] : memref<2x10x10x64xf32, #tpu.memory_space<vmem>>, vector<2x8x8x64xf32>
    %c0_89 = arith.constant 0 : index
    %c0_90 = arith.constant 0 : index
    %c0_91 = arith.constant 0 : index
    %c448 = arith.constant 448 : index
    %57 = vector.load %arg17[%c0_89, %c0_90, %c0_91, %c448] : memref<2x8x8x576xf32, #tpu.memory_space<vmem>>, vector<2x8x8x64xf32>
    tpu.vector_store %arg17[%c0_89, %c0_90, %c0_91, %c448], %56 {strides = array<i32>} : memref<2x8x8x576xf32, #tpu.memory_space<vmem>>, vector<2x8x8x64xf32>,
    %c0_92 = arith.constant 0 : index
    %c2_93 = arith.constant 2 : index
    %c2_94 = arith.constant 2 : index
    %c0_95 = arith.constant 0 : index
    %58 = vector.load %arg16[%c0_92, %c2_93, %c2_94, %c0_95] : memref<2x10x10x64xf32, #tpu.memory_space<vmem>>, vector<2x8x8x64xf32>
    %c0_96 = arith.constant 0 : index
    %c0_97 = arith.constant 0 : index
    %c0_98 = arith.constant 0 : index
    %c512 = arith.constant 512 : index
    %59 = vector.load %arg17[%c0_96, %c0_97, %c0_98, %c512] : memref<2x8x8x576xf32, #tpu.memory_space<vmem>>, vector<2x8x8x64xf32>
    tpu.vector_store %arg17[%c0_96, %c0_97, %c0_98, %c512], %58 {strides = array<i32>} : memref<2x8x8x576xf32, #tpu.memory_space<vmem>>, vector<2x8x8x64xf32>,
    %c0_99 = arith.constant 0 : index
    %c0_100 = arith.constant 0 : index
    %c0_101 = arith.constant 0 : index
    %c0_102 = arith.constant 0 : index
    %60 = vector.load %arg17[%c0_99, %c0_100, %c0_101, %c0_102] : memref<2x8x8x576xf32, #tpu.memory_space<vmem>>, vector<2x8x8x576xf32>
    %61 = vector.shape_cast %60 : vector<2x8x8x576xf32> to vector<128x576xf32>
    %62 = arith.truncf %61 : vector<128x576xf32> to vector<128x576xbf16>
    %c0_103 = arith.constant 0 : index
    %c0_104 = arith.constant 0 : index
    %63 = vector.load %arg4[%c0_103, %c0_104] : memref<576x64xbf16, #tpu.memory_space<vmem>>, vector<576x64xbf16>
    %cst_105 = arith.constant dense<0.000000e+00> : vector<128x64xf32>
    %64 = tpu.matmul %62, %63, %cst_105 {dimension_numbers = #tpu.dot_dimension_numbers<[1], [0], [0], [1], [0, 0, 1, 1], [], []>} : vector<128x576xbf16>, vector<576x64xbf16>, vector<128x64xf32> -> vector<128x64xf32>
    %c0_106 = arith.constant 0 : index
    %c0_107 = arith.constant 0 : index
    %65 = vector.load %arg5[%c0_106, %c0_107] : memref<1x64xf32, #tpu.memory_space<vmem>>, vector<1x64xf32>
    %c0_108 = arith.constant 0 : index
    %c0_109 = arith.constant 0 : index
    %66 = vector.load %arg6[%c0_108, %c0_109] : memref<1x64xf32, #tpu.memory_space<vmem>>, vector<1x64xf32>
    %cst_110 = arith.constant dense<0.000000e+00> : vector<64xf32>
    %67 = vector.multi_reduction <add>, %64, %cst_110 [0] : vector<128x64xf32> to vector<64xf32>
    %68 = vector.shape_cast %67 : vector<64xf32> to vector<1x64xf32>
    %cst_111 = arith.constant 1.280000e+02 : f32
    %69 = vector.broadcast %cst_111 : f32 to vector<1x64xf32>
    %70 = arith.divf %68, %69 : vector<1x64xf32>
    %71 = arith.mulf %64, %64 : vector<128x64xf32>
    %cst_112 = arith.constant dense<0.000000e+00> : vector<64xf32>
    %72 = vector.multi_reduction <add>, %71, %cst_112 [0] : vector<128x64xf32> to vector<64xf32>
    %73 = vector.shape_cast %72 : vector<64xf32> to vector<1x64xf32>
    %cst_113 = arith.constant 1.280000e+02 : f32
    %74 = vector.broadcast %cst_113 : f32 to vector<1x64xf32>
    %75 = arith.divf %73, %74 : vector<1x64xf32>
    %76 = arith.mulf %70, %70 : vector<1x64xf32>
    %77 = arith.subf %75, %76 : vector<1x64xf32>
    %cst_114 = arith.constant 0.000000e+00 : f32
    %78 = vector.broadcast %cst_114 : f32 to vector<1x64xf32>
    %79 = arith.maximumf %77, %78 : vector<1x64xf32>
    %cst_115 = arith.constant 9.99999974E-6 : f32
    %80 = vector.broadcast %cst_115 : f32 to vector<1x64xf32>
    %81 = arith.addf %79, %80 : vector<1x64xf32>
    %82 = math.rsqrt %81 : vector<1x64xf32>
    %83 = arith.mulf %65, %82 : vector<1x64xf32>
    %84 = arith.mulf %70, %83 : vector<1x64xf32>
    %85 = arith.subf %66, %84 : vector<1x64xf32>
    %86 = vector.broadcast %83 : vector<1x64xf32> to vector<128x64xf32>
    %87 = arith.mulf %64, %86 : vector<128x64xf32>
    %88 = vector.broadcast %85 : vector<1x64xf32> to vector<128x64xf32>
    %89 = arith.addf %87, %88 : vector<128x64xf32>
    %cst_116 = arith.constant 0.000000e+00 : f32
    %90 = vector.broadcast %cst_116 : f32 to vector<128x64xf32>
    %91 = arith.maximumf %89, %90 : vector<128x64xf32>
    %92 = vector.shape_cast %91 : vector<128x64xf32> to vector<2x8x8x64xf32>
    %93 = vector.shape_cast %92 : vector<2x8x8x64xf32> to vector<2x4x2x8x64xf32>
    %cst_117 = arith.constant dense<0xFF800000> : vector<2x4x8x64xf32>
    %94 = vector.multi_reduction <maximumf>, %93, %cst_117 [2] : vector<2x4x2x8x64xf32> to vector<2x4x8x64xf32>
    %95 = vector.shape_cast %94 : vector<2x4x8x64xf32> to vector<2x4x4x2x64xf32>
    %cst_118 = arith.constant dense<0xFF800000> : vector<2x4x4x64xf32>
    %96 = vector.multi_reduction <maximumf>, %95, %cst_118 [3] : vector<2x4x4x2x64xf32> to vector<2x4x4x64xf32>
    %cst_119 = arith.constant 0.000000e+00 : f32
    %97 = vector.broadcast %cst_119 : f32 to vector<2x1x6x64xf32>
    %cst_120 = arith.constant 0.000000e+00 : f32
    %98 = vector.broadcast %cst_120 : f32 to vector<2x4x1x64xf32>
    %c0_121 = arith.constant 0 : index
    %c0_122 = arith.constant 0 : index
    %c0_123 = arith.constant 0 : index
    %c0_124 = arith.constant 0 : index
    %99 = vector.load %arg18[%c0_121, %c0_122, %c0_123, %c0_124] : memref<2x6x6x64xf32, #tpu.memory_space<vmem>>, vector<2x1x6x64xf32>
    tpu.vector_store %arg18[%c0_121, %c0_122, %c0_123, %c0_124], %97 {strides = array<i32>} : memref<2x6x6x64xf32, #tpu.memory_space<vmem>>, vector<2x1x6x64xf32>,
    %c0_125 = arith.constant 0 : index
    %c5 = arith.constant 5 : index
    %c0_126 = arith.constant 0 : index
    %c0_127 = arith.constant 0 : index
    %100 = vector.load %arg18[%c0_125, %c5, %c0_126, %c0_127] : memref<2x6x6x64xf32, #tpu.memory_space<vmem>>, vector<2x1x6x64xf32>
    tpu.vector_store %arg18[%c0_125, %c5, %c0_126, %c0_127], %97 {strides = array<i32>} : memref<2x6x6x64xf32, #tpu.memory_space<vmem>>, vector<2x1x6x64xf32>,
    %c0_128 = arith.constant 0 : index
    %c1_129 = arith.constant 1 : index
    %c0_130 = arith.constant 0 : index
    %c0_131 = arith.constant 0 : index
    %101 = vector.load %arg18[%c0_128, %c1_129, %c0_130, %c0_131] : memref<2x6x6x64xf32, #tpu.memory_space<vmem>>, vector<2x4x1x64xf32>
    tpu.vector_store %arg18[%c0_128, %c1_129, %c0_130, %c0_131], %98 {strides = array<i32>} : memref<2x6x6x64xf32, #tpu.memory_space<vmem>>, vector<2x4x1x64xf32>,
    %c0_132 = arith.constant 0 : index
    %c1_133 = arith.constant 1 : index
    %c5_134 = arith.constant 5 : index
    %c0_135 = arith.constant 0 : index
    %102 = vector.load %arg18[%c0_132, %c1_133, %c5_134, %c0_135] : memref<2x6x6x64xf32, #tpu.memory_space<vmem>>, vector<2x4x1x64xf32>
    tpu.vector_store %arg18[%c0_132, %c1_133, %c5_134, %c0_135], %98 {strides = array<i32>} : memref<2x6x6x64xf32, #tpu.memory_space<vmem>>, vector<2x4x1x64xf32>,
    %c0_136 = arith.constant 0 : index
    %c1_137 = arith.constant 1 : index
    %c1_138 = arith.constant 1 : index
    %c0_139 = arith.constant 0 : index
    %103 = vector.load %arg18[%c0_136, %c1_137, %c1_138, %c0_139] : memref<2x6x6x64xf32, #tpu.memory_space<vmem>>, vector<2x4x4x64xf32>
    tpu.vector_store %arg18[%c0_136, %c1_137, %c1_138, %c0_139], %96 {strides = array<i32>} : memref<2x6x6x64xf32, #tpu.memory_space<vmem>>, vector<2x4x4x64xf32>,
    %c0_140 = arith.constant 0 : index
    %c0_141 = arith.constant 0 : index
    %c0_142 = arith.constant 0 : index
    %c0_143 = arith.constant 0 : index
    %104 = vector.load %arg18[%c0_140, %c0_141, %c0_142, %c0_143] : memref<2x6x6x64xf32, #tpu.memory_space<vmem>>, vector<2x4x4x64xf32>
    %c0_144 = arith.constant 0 : index
    %c0_145 = arith.constant 0 : index
    %c0_146 = arith.constant 0 : index
    %c0_147 = arith.constant 0 : index
    %105 = vector.load %arg19[%c0_144, %c0_145, %c0_146, %c0_147] : memref<2x4x4x576xf32, #tpu.memory_space<vmem>>, vector<2x4x4x64xf32>
    tpu.vector_store %arg19[%c0_144, %c0_145, %c0_146, %c0_147], %104 {strides = array<i32>} : memref<2x4x4x576xf32, #tpu.memory_space<vmem>>, vector<2x4x4x64xf32>,
    %c0_148 = arith.constant 0 : index
    %c0_149 = arith.constant 0 : index
    %c1_150 = arith.constant 1 : index
    %c0_151 = arith.constant 0 : index
    %106 = vector.load %arg18[%c0_148, %c0_149, %c1_150, %c0_151] : memref<2x6x6x64xf32, #tpu.memory_space<vmem>>, vector<2x4x4x64xf32>
    %c0_152 = arith.constant 0 : index
    %c0_153 = arith.constant 0 : index
    %c0_154 = arith.constant 0 : index
    %c64_155 = arith.constant 64 : index
    %107 = vector.load %arg19[%c0_152, %c0_153, %c0_154, %c64_155] : memref<2x4x4x576xf32, #tpu.memory_space<vmem>>, vector<2x4x4x64xf32>
    tpu.vector_store %arg19[%c0_152, %c0_153, %c0_154, %c64_155], %106 {strides = array<i32>} : memref<2x4x4x576xf32, #tpu.memory_space<vmem>>, vector<2x4x4x64xf32>,
    %c0_156 = arith.constant 0 : index
    %c0_157 = arith.constant 0 : index
    %c2_158 = arith.constant 2 : index
    %c0_159 = arith.constant 0 : index
    %108 = vector.load %arg18[%c0_156, %c0_157, %c2_158, %c0_159] : memref<2x6x6x64xf32, #tpu.memory_space<vmem>>, vector<2x4x4x64xf32>
    %c0_160 = arith.constant 0 : index
    %c0_161 = arith.constant 0 : index
    %c0_162 = arith.constant 0 : index
    %c128_163 = arith.constant 128 : index
    %109 = vector.load %arg19[%c0_160, %c0_161, %c0_162, %c128_163] : memref<2x4x4x576xf32, #tpu.memory_space<vmem>>, vector<2x4x4x64xf32>
    tpu.vector_store %arg19[%c0_160, %c0_161, %c0_162, %c128_163], %108 {strides = array<i32>} : memref<2x4x4x576xf32, #tpu.memory_space<vmem>>, vector<2x4x4x64xf32>,
    %c0_164 = arith.constant 0 : index
    %c1_165 = arith.constant 1 : index
    %c0_166 = arith.constant 0 : index
    %c0_167 = arith.constant 0 : index
    %110 = vector.load %arg18[%c0_164, %c1_165, %c0_166, %c0_167] : memref<2x6x6x64xf32, #tpu.memory_space<vmem>>, vector<2x4x4x64xf32>
    %c0_168 = arith.constant 0 : index
    %c0_169 = arith.constant 0 : index
    %c0_170 = arith.constant 0 : index
    %c192_171 = arith.constant 192 : index
    %111 = vector.load %arg19[%c0_168, %c0_169, %c0_170, %c192_171] : memref<2x4x4x576xf32, #tpu.memory_space<vmem>>, vector<2x4x4x64xf32>
    tpu.vector_store %arg19[%c0_168, %c0_169, %c0_170, %c192_171], %110 {strides = array<i32>} : memref<2x4x4x576xf32, #tpu.memory_space<vmem>>, vector<2x4x4x64xf32>,
    %c0_172 = arith.constant 0 : index
    %c1_173 = arith.constant 1 : index
    %c1_174 = arith.constant 1 : index
    %c0_175 = arith.constant 0 : index
    %112 = vector.load %arg18[%c0_172, %c1_173, %c1_174, %c0_175] : memref<2x6x6x64xf32, #tpu.memory_space<vmem>>, vector<2x4x4x64xf32>
    %c0_176 = arith.constant 0 : index
    %c0_177 = arith.constant 0 : index
    %c0_178 = arith.constant 0 : index
    %c256_179 = arith.constant 256 : index
    %113 = vector.load %arg19[%c0_176, %c0_177, %c0_178, %c256_179] : memref<2x4x4x576xf32, #tpu.memory_space<vmem>>, vector<2x4x4x64xf32>
    tpu.vector_store %arg19[%c0_176, %c0_177, %c0_178, %c256_179], %112 {strides = array<i32>} : memref<2x4x4x576xf32, #tpu.memory_space<vmem>>, vector<2x4x4x64xf32>,
    %c0_180 = arith.constant 0 : index
    %c1_181 = arith.constant 1 : index
    %c2_182 = arith.constant 2 : index
    %c0_183 = arith.constant 0 : index
    %114 = vector.load %arg18[%c0_180, %c1_181, %c2_182, %c0_183] : memref<2x6x6x64xf32, #tpu.memory_space<vmem>>, vector<2x4x4x64xf32>
    %c0_184 = arith.constant 0 : index
    %c0_185 = arith.constant 0 : index
    %c0_186 = arith.constant 0 : index
    %c320_187 = arith.constant 320 : index
    %115 = vector.load %arg19[%c0_184, %c0_185, %c0_186, %c320_187] : memref<2x4x4x576xf32, #tpu.memory_space<vmem>>, vector<2x4x4x64xf32>
    tpu.vector_store %arg19[%c0_184, %c0_185, %c0_186, %c320_187], %114 {strides = array<i32>} : memref<2x4x4x576xf32, #tpu.memory_space<vmem>>, vector<2x4x4x64xf32>,
    %c0_188 = arith.constant 0 : index
    %c2_189 = arith.constant 2 : index
    %c0_190 = arith.constant 0 : index
    %c0_191 = arith.constant 0 : index
    %116 = vector.load %arg18[%c0_188, %c2_189, %c0_190, %c0_191] : memref<2x6x6x64xf32, #tpu.memory_space<vmem>>, vector<2x4x4x64xf32>
    %c0_192 = arith.constant 0 : index
    %c0_193 = arith.constant 0 : index
    %c0_194 = arith.constant 0 : index
    %c384_195 = arith.constant 384 : index
    %117 = vector.load %arg19[%c0_192, %c0_193, %c0_194, %c384_195] : memref<2x4x4x576xf32, #tpu.memory_space<vmem>>, vector<2x4x4x64xf32>
    tpu.vector_store %arg19[%c0_192, %c0_193, %c0_194, %c384_195], %116 {strides = array<i32>} : memref<2x4x4x576xf32, #tpu.memory_space<vmem>>, vector<2x4x4x64xf32>,
    %c0_196 = arith.constant 0 : index
    %c2_197 = arith.constant 2 : index
    %c1_198 = arith.constant 1 : index
    %c0_199 = arith.constant 0 : index
    %118 = vector.load %arg18[%c0_196, %c2_197, %c1_198, %c0_199] : memref<2x6x6x64xf32, #tpu.memory_space<vmem>>, vector<2x4x4x64xf32>
    %c0_200 = arith.constant 0 : index
    %c0_201 = arith.constant 0 : index
    %c0_202 = arith.constant 0 : index
    %c448_203 = arith.constant 448 : index
    %119 = vector.load %arg19[%c0_200, %c0_201, %c0_202, %c448_203] : memref<2x4x4x576xf32, #tpu.memory_space<vmem>>, vector<2x4x4x64xf32>
    tpu.vector_store %arg19[%c0_200, %c0_201, %c0_202, %c448_203], %118 {strides = array<i32>} : memref<2x4x4x576xf32, #tpu.memory_space<vmem>>, vector<2x4x4x64xf32>,
    %c0_204 = arith.constant 0 : index
    %c2_205 = arith.constant 2 : index
    %c2_206 = arith.constant 2 : index
    %c0_207 = arith.constant 0 : index
    %120 = vector.load %arg18[%c0_204, %c2_205, %c2_206, %c0_207] : memref<2x6x6x64xf32, #tpu.memory_space<vmem>>, vector<2x4x4x64xf32>
    %c0_208 = arith.constant 0 : index
    %c0_209 = arith.constant 0 : index
    %c0_210 = arith.constant 0 : index
    %c512_211 = arith.constant 512 : index
    %121 = vector.load %arg19[%c0_208, %c0_209, %c0_210, %c512_211] : memref<2x4x4x576xf32, #tpu.memory_space<vmem>>, vector<2x4x4x64xf32>
    tpu.vector_store %arg19[%c0_208, %c0_209, %c0_210, %c512_211], %120 {strides = array<i32>} : memref<2x4x4x576xf32, #tpu.memory_space<vmem>>, vector<2x4x4x64xf32>,
    %c0_212 = arith.constant 0 : index
    %c0_213 = arith.constant 0 : index
    %c0_214 = arith.constant 0 : index
    %c0_215 = arith.constant 0 : index
    %122 = vector.load %arg19[%c0_212, %c0_213, %c0_214, %c0_215] : memref<2x4x4x576xf32, #tpu.memory_space<vmem>>, vector<2x4x4x576xf32>
    %123 = vector.shape_cast %122 : vector<2x4x4x576xf32> to vector<32x576xf32>
    %124 = arith.truncf %123 : vector<32x576xf32> to vector<32x576xbf16>
    %c0_216 = arith.constant 0 : index
    %c0_217 = arith.constant 0 : index
    %125 = vector.load %arg7[%c0_216, %c0_217] : memref<576x64xbf16, #tpu.memory_space<vmem>>, vector<576x64xbf16>
    %cst_218 = arith.constant dense<0.000000e+00> : vector<32x64xf32>
    %126 = tpu.matmul %124, %125, %cst_218 {dimension_numbers = #tpu.dot_dimension_numbers<[1], [0], [0], [1], [0, 0, 1, 1], [], []>} : vector<32x576xbf16>, vector<576x64xbf16>, vector<32x64xf32> -> vector<32x64xf32>
    %c0_219 = arith.constant 0 : index
    %c0_220 = arith.constant 0 : index
    %127 = vector.load %arg8[%c0_219, %c0_220] : memref<1x64xf32, #tpu.memory_space<vmem>>, vector<1x64xf32>
    %c0_221 = arith.constant 0 : index
    %c0_222 = arith.constant 0 : index
    %128 = vector.load %arg9[%c0_221, %c0_222] : memref<1x64xf32, #tpu.memory_space<vmem>>, vector<1x64xf32>
    %cst_223 = arith.constant dense<0.000000e+00> : vector<64xf32>
    %129 = vector.multi_reduction <add>, %126, %cst_223 [0] : vector<32x64xf32> to vector<64xf32>
    %130 = vector.shape_cast %129 : vector<64xf32> to vector<1x64xf32>
    %cst_224 = arith.constant 3.200000e+01 : f32
    %131 = vector.broadcast %cst_224 : f32 to vector<1x64xf32>
    %132 = arith.divf %130, %131 : vector<1x64xf32>
    %133 = arith.mulf %126, %126 : vector<32x64xf32>
    %cst_225 = arith.constant dense<0.000000e+00> : vector<64xf32>
    %134 = vector.multi_reduction <add>, %133, %cst_225 [0] : vector<32x64xf32> to vector<64xf32>
    %135 = vector.shape_cast %134 : vector<64xf32> to vector<1x64xf32>
    %cst_226 = arith.constant 3.200000e+01 : f32
    %136 = vector.broadcast %cst_226 : f32 to vector<1x64xf32>
    %137 = arith.divf %135, %136 : vector<1x64xf32>
    %138 = arith.mulf %132, %132 : vector<1x64xf32>
    %139 = arith.subf %137, %138 : vector<1x64xf32>
    %cst_227 = arith.constant 0.000000e+00 : f32
    %140 = vector.broadcast %cst_227 : f32 to vector<1x64xf32>
    %141 = arith.maximumf %139, %140 : vector<1x64xf32>
    %cst_228 = arith.constant 9.99999974E-6 : f32
    %142 = vector.broadcast %cst_228 : f32 to vector<1x64xf32>
    %143 = arith.addf %141, %142 : vector<1x64xf32>
    %144 = math.rsqrt %143 : vector<1x64xf32>
    %145 = arith.mulf %127, %144 : vector<1x64xf32>
    %146 = arith.mulf %132, %145 : vector<1x64xf32>
    %147 = arith.subf %128, %146 : vector<1x64xf32>
    %148 = vector.broadcast %145 : vector<1x64xf32> to vector<32x64xf32>
    %149 = arith.mulf %126, %148 : vector<32x64xf32>
    %150 = vector.broadcast %147 : vector<1x64xf32> to vector<32x64xf32>
    %151 = arith.addf %149, %150 : vector<32x64xf32>
    %cst_229 = arith.constant 0.000000e+00 : f32
    %152 = vector.broadcast %cst_229 : f32 to vector<32x64xf32>
    %153 = arith.maximumf %151, %152 : vector<32x64xf32>
    %154 = vector.shape_cast %153 : vector<32x64xf32> to vector<2x4x4x64xf32>
    %155 = vector.shape_cast %154 : vector<2x4x4x64xf32> to vector<2x2x2x4x64xf32>
    %cst_230 = arith.constant dense<0xFF800000> : vector<2x2x4x64xf32>
    %156 = vector.multi_reduction <maximumf>, %155, %cst_230 [2] : vector<2x2x2x4x64xf32> to vector<2x2x4x64xf32>
    %157 = vector.shape_cast %156 : vector<2x2x4x64xf32> to vector<2x2x2x2x64xf32>
    %cst_231 = arith.constant dense<0xFF800000> : vector<2x2x2x64xf32>
    %158 = vector.multi_reduction <maximumf>, %157, %cst_231 [3] : vector<2x2x2x2x64xf32> to vector<2x2x2x64xf32>
    %cst_232 = arith.constant 0.000000e+00 : f32
    %159 = vector.broadcast %cst_232 : f32 to vector<2x1x4x64xf32>
    %cst_233 = arith.constant 0.000000e+00 : f32
    %160 = vector.broadcast %cst_233 : f32 to vector<2x2x1x64xf32>
    %c0_234 = arith.constant 0 : index
    %c0_235 = arith.constant 0 : index
    %c0_236 = arith.constant 0 : index
    %c0_237 = arith.constant 0 : index
    %161 = vector.load %arg20[%c0_234, %c0_235, %c0_236, %c0_237] : memref<2x4x4x64xf32, #tpu.memory_space<vmem>>, vector<2x1x4x64xf32>
    tpu.vector_store %arg20[%c0_234, %c0_235, %c0_236, %c0_237], %159 {strides = array<i32>} : memref<2x4x4x64xf32, #tpu.memory_space<vmem>>, vector<2x1x4x64xf32>,
    %c0_238 = arith.constant 0 : index
    %c3 = arith.constant 3 : index
    %c0_239 = arith.constant 0 : index
    %c0_240 = arith.constant 0 : index
    %162 = vector.load %arg20[%c0_238, %c3, %c0_239, %c0_240] : memref<2x4x4x64xf32, #tpu.memory_space<vmem>>, vector<2x1x4x64xf32>
    tpu.vector_store %arg20[%c0_238, %c3, %c0_239, %c0_240], %159 {strides = array<i32>} : memref<2x4x4x64xf32, #tpu.memory_space<vmem>>, vector<2x1x4x64xf32>,
    %c0_241 = arith.constant 0 : index
    %c1_242 = arith.constant 1 : index
    %c0_243 = arith.constant 0 : index
    %c0_244 = arith.constant 0 : index
    %163 = vector.load %arg20[%c0_241, %c1_242, %c0_243, %c0_244] : memref<2x4x4x64xf32, #tpu.memory_space<vmem>>, vector<2x2x1x64xf32>
    tpu.vector_store %arg20[%c0_241, %c1_242, %c0_243, %c0_244], %160 {strides = array<i32>} : memref<2x4x4x64xf32, #tpu.memory_space<vmem>>, vector<2x2x1x64xf32>,
    %c0_245 = arith.constant 0 : index
    %c1_246 = arith.constant 1 : index
    %c3_247 = arith.constant 3 : index
    %c0_248 = arith.constant 0 : index
    %164 = vector.load %arg20[%c0_245, %c1_246, %c3_247, %c0_248] : memref<2x4x4x64xf32, #tpu.memory_space<vmem>>, vector<2x2x1x64xf32>
    tpu.vector_store %arg20[%c0_245, %c1_246, %c3_247, %c0_248], %160 {strides = array<i32>} : memref<2x4x4x64xf32, #tpu.memory_space<vmem>>, vector<2x2x1x64xf32>,
    %c0_249 = arith.constant 0 : index
    %c1_250 = arith.constant 1 : index
    %c1_251 = arith.constant 1 : index
    %c0_252 = arith.constant 0 : index
    %165 = vector.load %arg20[%c0_249, %c1_250, %c1_251, %c0_252] : memref<2x4x4x64xf32, #tpu.memory_space<vmem>>, vector<2x2x2x64xf32>
    tpu.vector_store %arg20[%c0_249, %c1_250, %c1_251, %c0_252], %158 {strides = array<i32>} : memref<2x4x4x64xf32, #tpu.memory_space<vmem>>, vector<2x2x2x64xf32>,
    %c0_253 = arith.constant 0 : index
    %c0_254 = arith.constant 0 : index
    %c0_255 = arith.constant 0 : index
    %c0_256 = arith.constant 0 : index
    %166 = vector.load %arg20[%c0_253, %c0_254, %c0_255, %c0_256] : memref<2x4x4x64xf32, #tpu.memory_space<vmem>>, vector<2x2x2x64xf32>
    %c0_257 = arith.constant 0 : index
    %c0_258 = arith.constant 0 : index
    %c0_259 = arith.constant 0 : index
    %c0_260 = arith.constant 0 : index
    %167 = vector.load %arg21[%c0_257, %c0_258, %c0_259, %c0_260] : memref<2x2x2x576xf32, #tpu.memory_space<vmem>>, vector<2x2x2x64xf32>
    tpu.vector_store %arg21[%c0_257, %c0_258, %c0_259, %c0_260], %166 {strides = array<i32>} : memref<2x2x2x576xf32, #tpu.memory_space<vmem>>, vector<2x2x2x64xf32>,
    %c0_261 = arith.constant 0 : index
    %c0_262 = arith.constant 0 : index
    %c1_263 = arith.constant 1 : index
    %c0_264 = arith.constant 0 : index
    %168 = vector.load %arg20[%c0_261, %c0_262, %c1_263, %c0_264] : memref<2x4x4x64xf32, #tpu.memory_space<vmem>>, vector<2x2x2x64xf32>
    %c0_265 = arith.constant 0 : index
    %c0_266 = arith.constant 0 : index
    %c0_267 = arith.constant 0 : index
    %c64_268 = arith.constant 64 : index
    %169 = vector.load %arg21[%c0_265, %c0_266, %c0_267, %c64_268] : memref<2x2x2x576xf32, #tpu.memory_space<vmem>>, vector<2x2x2x64xf32>
    tpu.vector_store %arg21[%c0_265, %c0_266, %c0_267, %c64_268], %168 {strides = array<i32>} : memref<2x2x2x576xf32, #tpu.memory_space<vmem>>, vector<2x2x2x64xf32>,
    %c0_269 = arith.constant 0 : index
    %c0_270 = arith.constant 0 : index
    %c2_271 = arith.constant 2 : index
    %c0_272 = arith.constant 0 : index
    %170 = vector.load %arg20[%c0_269, %c0_270, %c2_271, %c0_272] : memref<2x4x4x64xf32, #tpu.memory_space<vmem>>, vector<2x2x2x64xf32>
    %c0_273 = arith.constant 0 : index
    %c0_274 = arith.constant 0 : index
    %c0_275 = arith.constant 0 : index
    %c128_276 = arith.constant 128 : index
    %171 = vector.load %arg21[%c0_273, %c0_274, %c0_275, %c128_276] : memref<2x2x2x576xf32, #tpu.memory_space<vmem>>, vector<2x2x2x64xf32>
    tpu.vector_store %arg21[%c0_273, %c0_274, %c0_275, %c128_276], %170 {strides = array<i32>} : memref<2x2x2x576xf32, #tpu.memory_space<vmem>>, vector<2x2x2x64xf32>,
    %c0_277 = arith.constant 0 : index
    %c1_278 = arith.constant 1 : index
    %c0_279 = arith.constant 0 : index
    %c0_280 = arith.constant 0 : index
    %172 = vector.load %arg20[%c0_277, %c1_278, %c0_279, %c0_280] : memref<2x4x4x64xf32, #tpu.memory_space<vmem>>, vector<2x2x2x64xf32>
    %c0_281 = arith.constant 0 : index
    %c0_282 = arith.constant 0 : index
    %c0_283 = arith.constant 0 : index
    %c192_284 = arith.constant 192 : index
    %173 = vector.load %arg21[%c0_281, %c0_282, %c0_283, %c192_284] : memref<2x2x2x576xf32, #tpu.memory_space<vmem>>, vector<2x2x2x64xf32>
    tpu.vector_store %arg21[%c0_281, %c0_282, %c0_283, %c192_284], %172 {strides = array<i32>} : memref<2x2x2x576xf32, #tpu.memory_space<vmem>>, vector<2x2x2x64xf32>,
    %c0_285 = arith.constant 0 : index
    %c1_286 = arith.constant 1 : index
    %c1_287 = arith.constant 1 : index
    %c0_288 = arith.constant 0 : index
    %174 = vector.load %arg20[%c0_285, %c1_286, %c1_287, %c0_288] : memref<2x4x4x64xf32, #tpu.memory_space<vmem>>, vector<2x2x2x64xf32>
    %c0_289 = arith.constant 0 : index
    %c0_290 = arith.constant 0 : index
    %c0_291 = arith.constant 0 : index
    %c256_292 = arith.constant 256 : index
    %175 = vector.load %arg21[%c0_289, %c0_290, %c0_291, %c256_292] : memref<2x2x2x576xf32, #tpu.memory_space<vmem>>, vector<2x2x2x64xf32>
    tpu.vector_store %arg21[%c0_289, %c0_290, %c0_291, %c256_292], %174 {strides = array<i32>} : memref<2x2x2x576xf32, #tpu.memory_space<vmem>>, vector<2x2x2x64xf32>,
    %c0_293 = arith.constant 0 : index
    %c1_294 = arith.constant 1 : index
    %c2_295 = arith.constant 2 : index
    %c0_296 = arith.constant 0 : index
    %176 = vector.load %arg20[%c0_293, %c1_294, %c2_295, %c0_296] : memref<2x4x4x64xf32, #tpu.memory_space<vmem>>, vector<2x2x2x64xf32>
    %c0_297 = arith.constant 0 : index
    %c0_298 = arith.constant 0 : index
    %c0_299 = arith.constant 0 : index
    %c320_300 = arith.constant 320 : index
    %177 = vector.load %arg21[%c0_297, %c0_298, %c0_299, %c320_300] : memref<2x2x2x576xf32, #tpu.memory_space<vmem>>, vector<2x2x2x64xf32>
    tpu.vector_store %arg21[%c0_297, %c0_298, %c0_299, %c320_300], %176 {strides = array<i32>} : memref<2x2x2x576xf32, #tpu.memory_space<vmem>>, vector<2x2x2x64xf32>,
    %c0_301 = arith.constant 0 : index
    %c2_302 = arith.constant 2 : index
    %c0_303 = arith.constant 0 : index
    %c0_304 = arith.constant 0 : index
    %178 = vector.load %arg20[%c0_301, %c2_302, %c0_303, %c0_304] : memref<2x4x4x64xf32, #tpu.memory_space<vmem>>, vector<2x2x2x64xf32>
    %c0_305 = arith.constant 0 : index
    %c0_306 = arith.constant 0 : index
    %c0_307 = arith.constant 0 : index
    %c384_308 = arith.constant 384 : index
    %179 = vector.load %arg21[%c0_305, %c0_306, %c0_307, %c384_308] : memref<2x2x2x576xf32, #tpu.memory_space<vmem>>, vector<2x2x2x64xf32>
    tpu.vector_store %arg21[%c0_305, %c0_306, %c0_307, %c384_308], %178 {strides = array<i32>} : memref<2x2x2x576xf32, #tpu.memory_space<vmem>>, vector<2x2x2x64xf32>,
    %c0_309 = arith.constant 0 : index
    %c2_310 = arith.constant 2 : index
    %c1_311 = arith.constant 1 : index
    %c0_312 = arith.constant 0 : index
    %180 = vector.load %arg20[%c0_309, %c2_310, %c1_311, %c0_312] : memref<2x4x4x64xf32, #tpu.memory_space<vmem>>, vector<2x2x2x64xf32>
    %c0_313 = arith.constant 0 : index
    %c0_314 = arith.constant 0 : index
    %c0_315 = arith.constant 0 : index
    %c448_316 = arith.constant 448 : index
    %181 = vector.load %arg21[%c0_313, %c0_314, %c0_315, %c448_316] : memref<2x2x2x576xf32, #tpu.memory_space<vmem>>, vector<2x2x2x64xf32>
    tpu.vector_store %arg21[%c0_313, %c0_314, %c0_315, %c448_316], %180 {strides = array<i32>} : memref<2x2x2x576xf32, #tpu.memory_space<vmem>>, vector<2x2x2x64xf32>,
    %c0_317 = arith.constant 0 : index
    %c2_318 = arith.constant 2 : index
    %c2_319 = arith.constant 2 : index
    %c0_320 = arith.constant 0 : index
    %182 = vector.load %arg20[%c0_317, %c2_318, %c2_319, %c0_320] : memref<2x4x4x64xf32, #tpu.memory_space<vmem>>, vector<2x2x2x64xf32>
    %c0_321 = arith.constant 0 : index
    %c0_322 = arith.constant 0 : index
    %c0_323 = arith.constant 0 : index
    %c512_324 = arith.constant 512 : index
    %183 = vector.load %arg21[%c0_321, %c0_322, %c0_323, %c512_324] : memref<2x2x2x576xf32, #tpu.memory_space<vmem>>, vector<2x2x2x64xf32>
    tpu.vector_store %arg21[%c0_321, %c0_322, %c0_323, %c512_324], %182 {strides = array<i32>} : memref<2x2x2x576xf32, #tpu.memory_space<vmem>>, vector<2x2x2x64xf32>,
    %c0_325 = arith.constant 0 : index
    %c0_326 = arith.constant 0 : index
    %c0_327 = arith.constant 0 : index
    %c0_328 = arith.constant 0 : index
    %184 = vector.load %arg21[%c0_325, %c0_326, %c0_327, %c0_328] : memref<2x2x2x576xf32, #tpu.memory_space<vmem>>, vector<2x2x2x576xf32>
    %185 = vector.shape_cast %184 : vector<2x2x2x576xf32> to vector<8x576xf32>
    %186 = arith.truncf %185 : vector<8x576xf32> to vector<8x576xbf16>
    %c0_329 = arith.constant 0 : index
    %c0_330 = arith.constant 0 : index
    %187 = vector.load %arg10[%c0_329, %c0_330] : memref<576x64xbf16, #tpu.memory_space<vmem>>, vector<576x64xbf16>
    %cst_331 = arith.constant dense<0.000000e+00> : vector<8x64xf32>
    %188 = tpu.matmul %186, %187, %cst_331 {dimension_numbers = #tpu.dot_dimension_numbers<[1], [0], [0], [1], [0, 0, 1, 1], [], []>} : vector<8x576xbf16>, vector<576x64xbf16>, vector<8x64xf32> -> vector<8x64xf32>
    %c0_332 = arith.constant 0 : index
    %c0_333 = arith.constant 0 : index
    %189 = vector.load %arg11[%c0_332, %c0_333] : memref<1x64xf32, #tpu.memory_space<vmem>>, vector<1x64xf32>
    %c0_334 = arith.constant 0 : index
    %c0_335 = arith.constant 0 : index
    %190 = vector.load %arg12[%c0_334, %c0_335] : memref<1x64xf32, #tpu.memory_space<vmem>>, vector<1x64xf32>
    %cst_336 = arith.constant dense<0.000000e+00> : vector<64xf32>
    %191 = vector.multi_reduction <add>, %188, %cst_336 [0] : vector<8x64xf32> to vector<64xf32>
    %192 = vector.shape_cast %191 : vector<64xf32> to vector<1x64xf32>
    %cst_337 = arith.constant 8.000000e+00 : f32
    %193 = vector.broadcast %cst_337 : f32 to vector<1x64xf32>
    %194 = arith.divf %192, %193 : vector<1x64xf32>
    %195 = arith.mulf %188, %188 : vector<8x64xf32>
    %cst_338 = arith.constant dense<0.000000e+00> : vector<64xf32>
    %196 = vector.multi_reduction <add>, %195, %cst_338 [0] : vector<8x64xf32> to vector<64xf32>
    %197 = vector.shape_cast %196 : vector<64xf32> to vector<1x64xf32>
    %cst_339 = arith.constant 8.000000e+00 : f32
    %198 = vector.broadcast %cst_339 : f32 to vector<1x64xf32>
    %199 = arith.divf %197, %198 : vector<1x64xf32>
    %200 = arith.mulf %194, %194 : vector<1x64xf32>
    %201 = arith.subf %199, %200 : vector<1x64xf32>
    %cst_340 = arith.constant 0.000000e+00 : f32
    %202 = vector.broadcast %cst_340 : f32 to vector<1x64xf32>
    %203 = arith.maximumf %201, %202 : vector<1x64xf32>
    %cst_341 = arith.constant 9.99999974E-6 : f32
    %204 = vector.broadcast %cst_341 : f32 to vector<1x64xf32>
    %205 = arith.addf %203, %204 : vector<1x64xf32>
    %206 = math.rsqrt %205 : vector<1x64xf32>
    %207 = arith.mulf %189, %206 : vector<1x64xf32>
    %208 = arith.mulf %194, %207 : vector<1x64xf32>
    %209 = arith.subf %190, %208 : vector<1x64xf32>
    %210 = vector.broadcast %207 : vector<1x64xf32> to vector<8x64xf32>
    %211 = arith.mulf %188, %210 : vector<8x64xf32>
    %212 = vector.broadcast %209 : vector<1x64xf32> to vector<8x64xf32>
    %213 = arith.addf %211, %212 : vector<8x64xf32>
    %cst_342 = arith.constant 0.000000e+00 : f32
    %214 = vector.broadcast %cst_342 : f32 to vector<8x64xf32>
    %215 = arith.maximumf %213, %214 : vector<8x64xf32>
    %216 = vector.shape_cast %215 : vector<8x64xf32> to vector<2x2x2x64xf32>
    %217 = vector.shape_cast %216 : vector<2x2x2x64xf32> to vector<2x1x2x2x64xf32>
    %cst_343 = arith.constant dense<0xFF800000> : vector<2x1x2x64xf32>
    %218 = vector.multi_reduction <maximumf>, %217, %cst_343 [2] : vector<2x1x2x2x64xf32> to vector<2x1x2x64xf32>
    %219 = vector.shape_cast %218 : vector<2x1x2x64xf32> to vector<2x1x1x2x64xf32>
    %cst_344 = arith.constant dense<0xFF800000> : vector<2x1x1x64xf32>
    %220 = vector.multi_reduction <maximumf>, %219, %cst_344 [3] : vector<2x1x1x2x64xf32> to vector<2x1x1x64xf32>
    %221 = vector.shape_cast %220 : vector<2x1x1x64xf32> to vector<2x64xf32>
    %222 = arith.truncf %221 : vector<2x64xf32> to vector<2x64xbf16>
    %c0_345 = arith.constant 0 : index
    %c0_346 = arith.constant 0 : index
    %223 = vector.load %arg13[%c0_345, %c0_346] : memref<64x5xbf16, #tpu.memory_space<vmem>>, vector<64x5xbf16>
    %cst_347 = arith.constant dense<0.000000e+00> : vector<2x5xf32>
    %224 = tpu.matmul %222, %223, %cst_347 {dimension_numbers = #tpu.dot_dimension_numbers<[1], [0], [0], [1], [0, 0, 1, 1], [], []>} : vector<2x64xbf16>, vector<64x5xbf16>, vector<2x5xf32> -> vector<2x5xf32>
    %c0_348 = arith.constant 0 : index
    %c0_349 = arith.constant 0 : index
    %225 = vector.load %arg14[%c0_348, %c0_349] : memref<1x5xf32, #tpu.memory_space<vmem>>, vector<1x5xf32>
    %226 = vector.broadcast %225 : vector<1x5xf32> to vector<2x5xf32>
    %227 = arith.addf %224, %226 : vector<2x5xf32>
    %cst_350 = arith.constant dense<0xFF800000> : vector<2xf32>
    %228 = vector.multi_reduction <maximumf>, %227, %cst_350 [1] : vector<2x5xf32> to vector<2xf32>
    %229 = vector.shape_cast %228 : vector<2xf32> to vector<2x1xf32>
    %230 = vector.broadcast %229 : vector<2x1xf32> to vector<2x5xf32>
    %231 = arith.subf %227, %230 : vector<2x5xf32>
    %232 = math.exp %231 : vector<2x5xf32>
    %cst_351 = arith.constant dense<0.000000e+00> : vector<2xf32>
    %233 = vector.multi_reduction <add>, %232, %cst_351 [1] : vector<2x5xf32> to vector<2xf32>
    %234 = vector.shape_cast %233 : vector<2xf32> to vector<2x1xf32>
    %235 = math.log %234 : vector<2x1xf32>
    %236 = vector.broadcast %235 : vector<2x1xf32> to vector<2x5xf32>
    %237 = arith.subf %231, %236 : vector<2x5xf32>
    %c0_352 = arith.constant 0 : index
    %c0_353 = arith.constant 0 : index
    %238 = vector.load %arg15[%c0_352, %c0_353] : memref<2x5xf32, #tpu.memory_space<vmem>>, vector<2x5xf32>
    tpu.vector_store %arg15[%c0_352, %c0_353], %237 {strides = array<i32>} : memref<2x5xf32, #tpu.memory_space<vmem>>, vector<2x5xf32>,
    return
  }
}

</mosaic_0001>

<bundles_post_ra>
// kernel: conv4net_forward.1
= control target key start
LH: loop header
LB: loop body
LE: loop exit
PB: predicated region body
PF: predicated region fallthrough
CT: control target
= control target key end

     0   :  { %vm296_vm0 = vcmask 293888   ;;  %vm393_vm1 = vcmask 1041408   ;;  %s13994_s0 = inlined_call_operand.vmem [shape: bf16[512,36], index: 0, kind: input, shape index: {}]   ;;  %s13995_s1 = inlined_call_operand.vmem [shape: bf16[36,64], index: 1, kind: input, shape index: {}]   ;;  %s13996_s2 = inlined_call_operand.vmem [shape: f32[1,64], index: 2, kind: input, shape index: {}]   ;;  %s13997_s3 = inlined_call_operand.vmem [shape: f32[1,64], index: 3, kind: input, shape index: {}]   ;;  %s13998_s4 = inlined_call_operand.vmem [shape: bf16[576,64], index: 4, kind: input, shape index: {}]   ;;  %s13999_s5 = inlined_call_operand.vmem [shape: f32[1,64], index: 5, kind: input, shape index: {}]   ;;  %s14000_s6 = inlined_call_operand.vmem [shape: f32[1,64], index: 6, kind: input, shape index: {}]   ;;  %s14001_s7 = inlined_call_operand.vmem [shape: bf16[576,64], index: 7, kind: input, shape index: {}]   ;;  %s14002_s8 = inlined_call_operand.vmem [shape: f32[1,64], index: 8, kind: input, shape index: {}]   ;;  %s14003_s9 = inlined_call_operand.vmem [shape: f32[1,64], index: 9, kind: input, shape index: {}]   ;;  %s14004_s10 = inlined_call_operand.vmem [shape: bf16[576,64], index: 10, kind: input, shape index: {}]   ;;  %s14005_s11 = inlined_call_operand.vmem [shape: f32[1,64], index: 11, kind: input, shape index: {}]   ;;  %s14006_s12 = inlined_call_operand.vmem [shape: f32[1,64], index: 12, kind: input, shape index: {}]   ;;  %s14007_s13 = inlined_call_operand.vmem [shape: bf16[64,5], index: 13, kind: input, shape index: {}]   ;;  %s14008_s14 = inlined_call_operand.vmem [shape: f32[1,5], index: 14, kind: input, shape index: {}]   ;;  %s14009_s15 = inlined_call_operand.hbm [shape: f32[2,5], index: 15, kind: output, shape index: {}]  }
   0x1   :  { %v7821_v0 = vld [vmem:[%s13995_s1] sm:$0xff]   ;;  %v7822_v1 = vld [vmem:[%s13995_s1 + $0x8] sm:$0xff]   ;;  %v7823_v2 = vld [vmem:[%s13995_s1 + $0x10] ss:$0 sps:$4 sm:$0x33]  }
   0x2   :  { %7685 = vmatprep.subr.bf16.mxu0 %v7821_v0  ;;  %v7824_v3 = vld [vmem:[%s13994_s0] sm:$0xff]   ;;  %v395_v4 = vsel %vm393_vm1, %v7823_v2, 0  ;;  %v7825_v5 = vld [vmem:[%s13994_s0 + $0x8] sm:$0xff]   ;;  %v7826_v6 = vld [vmem:[%s13994_s0 + $0x10] sm:$0xff]  }
   0x3   :  { %7686 = vmatpush3.bf16.msra.mxu0 %v7821_v0  ;;  %7691 = vmatprep.mubr.msk.bf16.mxu0 %vm296_vm0, %v7824_v3  ;;  %v7827_v7 = vld [vmem:[%s13994_s0 + $0x18] sm:$0xff]   ;;  %v7828_v8 = vld [vmem:[%s13994_s0 + $0x20] sm:$0xff]   ;;  %v7829_v9 = vld [vmem:[%s13994_s0 + $0x28] sm:$0xff]  }
   0x4   :  { %7687 = vmatprep.subr.bf16.mxu0 %v7822_v1  ;;  %v7830_v10 = vld [vmem:[%s13994_s0 + $0x30] sm:$0xff]   ;;  %v7831_v11 = vld [vmem:[%s13994_s0 + $0x38] sm:$0xff]   ;;  %v7832_v12 = vld [vmem:[%s13994_s0 + $0x40] sm:$0xff]  }
   0x5   :  { %v7833_v13 = vld [vmem:[%s13994_s0 + $0x48] sm:$0xff]   ;;  %v7834_v14 = vld [vmem:[%s13994_s0 + $0x50] sm:$0xff]   ;;  %v7835_v15 = vld [vmem:[%s13994_s0 + $0x58] sm:$0xff]  }
   0x6   :  { %v7836_v16 = vld [vmem:[%s13994_s0 + $0x60] sm:$0xff]   ;;  %v7837_v17 = vld [vmem:[%s13994_s0 + $0x68] sm:$0xff]   ;;  %v7838_v18 = vld [vmem:[%s13994_s0 + $0x70] sm:$0xff]  }
   0x7   :  { %7688 = vmatpush3.bf16.msra.mxu0 %v7822_v1  ;;  %v7839_v19 = vld [vmem:[%s13994_s0 + $0x78] sm:$0xff]   ;;  %v7840_v20 = vld [vmem:[%s13994_s0 + $0x80] sm:$0xff]   ;;  %v7841_v21 = vld [vmem:[%s13994_s0 + $0x88] sm:$0xff]  }
   0x8   :  { %7815 = vmatprep.subr.msk.bf16.mxu0 %vm393_vm1, %v7823_v2  ;;  %v7842_v22 = vld [vmem:[%s13994_s0 + $0x90] sm:$0xff]   ;;  %v7843_v23 = vld [vmem:[%s13994_s0 + $0x98] sm:$0xff]   ;;  %v7844_v24 = vld [vmem:[%s13994_s0 + $0xa0] sm:$0xff]  }
   0x9   :  { %v7845_v25 = vld [vmem:[%s13994_s0 + $0xa8] sm:$0xff]   ;;  %v7846_v26 = vld [vmem:[%s13994_s0 + $0xb0] sm:$0xff]   ;;  %v7847_v27 = vld [vmem:[%s13994_s0 + $0xb8] sm:$0xff]  }
   0xa   :  { %v7848_v28 = vld [vmem:[%s13994_s0 + $0xc0] sm:$0xff]   ;;  %v7849_v29 = vld [vmem:[%s13994_s0 + $0xc8] sm:$0xff]   ;;  %v7850_v30 = vld [vmem:[%s13994_s0 + $0xd0] sm:$0xff]  }
   0xb   :  { %7690 = vmatpush3.bf16.msra.mxu0 %v395_v4 }
   0xe   :  { %7692 = vmatmul.mubr.msk.bf16.vlgmr.msra.gmra.mrb[0].mxu0 %vm296_vm0, %v7825_v5 }
   0xf   :  { %7695 = vmatprep.mubr.msk.bf16.mxu0 %vm296_vm0, %v7826_v6 }
  0x16   :  { %7696 = vmatmul.mubr.msk.bf16.gmra.mrb[4].mxu0 %vm296_vm0, %v7827_v7 }
  0x17   :  { %7699 = vmatprep.mubr.msk.bf16.mxu0 %vm296_vm0, %v7828_v8 }
  0x1e   :  { %7700 = vmatmul.mubr.msk.bf16.gmra.mrb[8].mxu0 %vm296_vm0, %v7829_v9 }
  0x1f   :  { %7703 = vmatprep.mubr.msk.bf16.mxu0 %vm296_vm0, %v7830_v10 }
  0x26   :  { %7704 = vmatmul.mubr.msk.bf16.gmra.mrb[12].mxu0 %vm296_vm0, %v7831_v11 }
  0x27   :  { %7707 = vmatprep.mubr.msk.bf16.mxu0 %vm296_vm0, %v7832_v12 }
  0x2e   :  { %7708 = vmatmul.mubr.msk.bf16.gmra.mrb[16].mxu0 %vm296_vm0, %v7833_v13 }
  0x2f   :  { %7711 = vmatprep.mubr.msk.bf16.mxu0 %vm296_vm0, %v7834_v14 }
  0x36   :  { %7712 = vmatmul.mubr.msk.bf16.gmra.mrb[20].mxu0 %vm296_vm0, %v7835_v15 }
  0x37   :  { %7715 = vmatprep.mubr.msk.bf16.mxu0 %vm296_vm0, %v7836_v16 }
  0x3e   :  { %7716 = vmatmul.mubr.msk.bf16.gmra.mrb[24].mxu0 %vm296_vm0, %v7837_v17 }
  0x3f   :  { %7719 = vmatprep.mubr.msk.bf16.mxu0 %vm296_vm0, %v7838_v18 }
  0x46   :  { %7720 = vmatmul.mubr.msk.bf16.gmra.mrb[28].mxu0 %vm296_vm0, %v7839_v19 }
  0x47   :  { %7723 = vmatprep.mubr.msk.bf16.mxu0 %vm296_vm0, %v7840_v20 }
  0x4e   :  { %7724 = vmatmul.mubr.msk.bf16.gmra.mrb[32].mxu0 %vm296_vm0, %v7841_v21 }
  0x4f   :  { %7727 = vmatprep.mubr.msk.bf16.mxu0 %vm296_vm0, %v7842_v22 }
  0x56   :  { %7728 = vmatmul.mubr.msk.bf16.gmra.mrb[36].mxu0 %vm296_vm0, %v7843_v23 }
  0x57   :  { %7731 = vmatprep.mubr.msk.bf16.mxu0 %vm296_vm0, %v7844_v24 }
  0x5e   :  { %7732 = vmatmul.mubr.msk.bf16.gmra.mrb[40].mxu0 %vm296_vm0, %v7845_v25 }
  0x5f   :  { %7735 = vmatprep.mubr.msk.bf16.mxu0 %vm296_vm0, %v7846_v26 }
  0x66   :  { %7736 = vmatmul.mubr.msk.bf16.gmra.mrb[44].mxu0 %vm296_vm0, %v7847_v27 }
  0x67   :  { %7739 = vmatprep.mubr.msk.bf16.mxu0 %vm296_vm0, %v7848_v28 }
  0x6e   :  { %7740 = vmatmul.mubr.msk.bf16.gmra.mrb[48].mxu0 %vm296_vm0, %v7849_v29 }
  0x6f   :  { %7743 = vmatprep.mubr.msk.bf16.mxu0 %vm296_vm0, %v7850_v30 }
  0x70   :  { %20 = vsyncpa [#allocation9], 0  ;;  %v7851_v31 = vld [vmem:[%s13994_s0 + $0xd8] sm:$0xff]   ;;  %v7852_v32 = vld [vmem:[%s13994_s0 + $0xe0] sm:$0xff]   ;;  %vm688_vm2 = vcmask 523264   ;;  %vm2034_vm3 = vcmask 517120  }
  0x71   :  { %v7853_v33 = vld [vmem:[%s13994_s0 + $0xe8] sm:$0xff]   ;;  %v7854_v34 = vld [vmem:[%s13994_s0 + $0xf0] sm:$0xff]   ;;  %v7855_v35 = vld [vmem:[%s13994_s0 + $0xf8] sm:$0xff]   ;;  %s8041_s25 = smov 64   ;;  %vm2941_vm4 = vcmask 516096   ;;  %vm3102_vm5 = vcmask 1041409  }
  0x72   :  { %vm3104_vm6 = vcmask 1042434   ;;  %vm3106_vm7 = vcmask 1043459   ;;  %vm3108_vm8 = vcmask 1044484   ;;  %vm3110_vm9 = vcmask 1045509  }
  0x73   :  { %vm3112_vm10 = vcmask 1046534   ;;  %vm3114_vm11 = vcmask 1047559   ;;  %vm3365_vm12 = vcmask 1048064   ;;  %vm5196_vm13 = vcmask 519168  }
  0x74   :  { %vm5109_vm14 = vcmask 521216   ;;  %vm5261_vm15 = vcmask 1043968   ;;  %vm8043_vm1 = vmmov 0  }
  0x76   :  { %7744 = vmatmul.mubr.msk.bf16.gmra.mrb[52].mxu0 %vm296_vm0, %v7851_v31 }
  0x77   :  { %7747 = vmatprep.mubr.msk.bf16.mxu0 %vm296_vm0, %v7852_v32 }
  0x7e   :  { %7748 = vmatmul.mubr.msk.bf16.gmra.mrb[56].mxu0 %vm296_vm0, %v7853_v33 }
  0x7f   :  { %7751 = vmatprep.mubr.msk.bf16.mxu0 %vm296_vm0, %v7854_v34 }
  0x86   :  { %7752 = vmatmul.mubr.msk.bf16.gmra.mrb[60].mxu0 %vm296_vm0, %v7855_v35  ;;  %vm6299_vm0 = vcmask 1041920  }
  0xe1   :  { %v8262_v36 = vpop.f32.mrb[0].mxu0 }
  0xe2   :  { %v8264_v37 = vpop.f32.mrb[1].mxu0  ;;  %v826_v41 = vmul.f32 %v8262_v36, %v8262_v36  ;;  %v692_v46 = vsel %vm688_vm2, %v8262_v36, 0.0 }
  0xe3   :  { %v824_v38 = vmul.f32 %v8264_v37, %v8264_v37  ;;  %v8268_v39 = vpop.f32.mrb[2].mxu0  ;;  %v689_v42 = vsel %vm688_vm2, %v8264_v37, 0.0 }
  0xe4   :  { %v8270_v40 = vpop.f32.mrb[3].mxu0  ;;  %v827_v48 = vmul.f32 %v8268_v39, %v8268_v39  ;;  %v891_v52 = vsel %vm688_vm2, %v826_v41, 0.0  ;;  %v694_v53 = vsel %vm688_vm2, %v8268_v39, 0.0 }
  0xe5   :  { %v690_v43 = vsel %vm688_vm2, %v8270_v40, 0.0  ;;  %v825_v44 = vmul.f32 %v8270_v40, %v8270_v40  ;;  %v888_v47 = vsel %vm688_vm2, %v824_v38, 0.0 }
  0xe6   :  { %v691_v45 = vadd.f32 %v690_v43, %v689_v42  ;;  %v893_v58 = vsel %vm688_vm2, %v827_v48, 0.0 }
  0xe7   :  { %v889_v49 = vsel %vm688_vm2, %v825_v44, 0.0 }
  0xe8   :  { %v693_v50 = vadd.f32 %v692_v46, %v691_v45  ;;  %v890_v51 = vadd.f32 %v889_v49, %v888_v47 }
  0xe9   :  { %v8289_v54 = vpop.f32.mrb[4].mxu0 }
  0xea   :  { %v892_v55 = vadd.f32 %v891_v52, %v890_v51  ;;  %v8291_v56 = vpop.f32.mrb[5].mxu0  ;;  %v695_v57 = vadd.f32 %v694_v53, %v693_v50  ;;  %v830_v1 = vmul.f32 %v8289_v54, %v8289_v54  ;;  %v700_v7 = vsel %vm688_vm2, %v8289_v54, 0.0 }
  0xeb   :  { %v696_v59 = vsel %vm688_vm2, %v8291_v56, 0.0  ;;  %v828_v60 = vmul.f32 %v8291_v56, %v8291_v56  ;;  %v8298_v61 = vpop.f32.mrb[6].mxu0 }
  0xec   :  { %v697_v62 = vadd.f32 %v696_v59, %v695_v57  ;;  %v894_v63 = vadd.f32 %v893_v58, %v892_v55  ;;  %v8300_v0 = vpop.f32.mrb[7].mxu0  ;;  %v831_v8 = vmul.f32 %v8298_v61, %v8298_v61  ;;  %v899_v12 = vsel %vm688_vm2, %v830_v1, 0.0 }
  0xed   :  { %v895_v2 = vsel %vm688_vm2, %v828_v60, 0.0  ;;  %v698_v3 = vsel %vm688_vm2, %v8300_v0, 0.0  ;;  %v829_v4 = vmul.f32 %v8300_v0, %v8300_v0  ;;  %v702_v13 = vsel %vm688_vm2, %v8298_v61, 0.0 }
  0xee   :  { %v896_v5 = vadd.f32 %v895_v2, %v894_v63  ;;  %v699_v6 = vadd.f32 %v698_v3, %v697_v62  ;;  %v901_v18 = vsel %vm688_vm2, %v831_v8, 0.0 }
  0xef   :  { %v897_v9 = vsel %vm688_vm2, %v829_v4, 0.0 }
  0xf0   :  { %v701_v10 = vadd.f32 %v700_v7, %v699_v6  ;;  %v898_v11 = vadd.f32 %v897_v9, %v896_v5 }
  0xf1   :  { %v8317_v14 = vpop.f32.mrb[8].mxu0 }
  0xf2   :  { %v900_v15 = vadd.f32 %v899_v12, %v898_v11  ;;  %v8319_v16 = vpop.f32.mrb[9].mxu0  ;;  %v703_v17 = vadd.f32 %v702_v13, %v701_v10  ;;  %v834_v25 = vmul.f32 %v8317_v14, %v8317_v14  ;;  %v708_v31 = vsel %vm688_vm2, %v8317_v14, 0.0 }
  0xf3   :  { %v704_v19 = vsel %vm688_vm2, %v8319_v16, 0.0  ;;  %v832_v20 = vmul.f32 %v8319_v16, %v8319_v16  ;;  %v8326_v21 = vpop.f32.mrb[10].mxu0 }
  0xf4   :  { %v705_v22 = vadd.f32 %v704_v19, %v703_v17  ;;  %v902_v23 = vadd.f32 %v901_v18, %v900_v15  ;;  %v8328_v24 = vpop.f32.mrb[11].mxu0  ;;  %v835_v32 = vmul.f32 %v8326_v21, %v8326_v21  ;;  %v907_v38 = vsel %vm688_vm2, %v834_v25, 0.0 }
  0xf5   :  { %v903_v26 = vsel %vm688_vm2, %v832_v20, 0.0  ;;  %v706_v27 = vsel %vm688_vm2, %v8328_v24, 0.0  ;;  %v833_v28 = vmul.f32 %v8328_v24, %v8328_v24  ;;  %v710_v41 = vsel %vm688_vm2, %v8326_v21, 0.0 }
  0xf6   :  { %v904_v29 = vadd.f32 %v903_v26, %v902_v23  ;;  %v707_v30 = vadd.f32 %v706_v27, %v705_v22  ;;  %v909_v46 = vsel %vm688_vm2, %v835_v32, 0.0 }
  0xf7   :  { %v905_v33 = vsel %vm688_vm2, %v833_v28, 0.0 }
  0xf8   :  { %v709_v34 = vadd.f32 %v708_v31, %v707_v30  ;;  %v906_v35 = vadd.f32 %v905_v33, %v904_v29 }
  0xf9   :  { %v8345_v42 = vpop.f32.mrb[12].mxu0 }
  0xfa   :  { %v908_v43 = vadd.f32 %v907_v38, %v906_v35  ;;  %v8347_v44 = vpop.f32.mrb[13].mxu0  ;;  %v711_v45 = vadd.f32 %v710_v41, %v709_v34  ;;  %v838_v53 = vmul.f32 %v8345_v42, %v8345_v42  ;;  %v716_v62 = vsel %vm688_vm2, %v8345_v42, 0.0 }
  0xfb   :  { %v712_v47 = vsel %vm688_vm2, %v8347_v44, 0.0  ;;  %v836_v48 = vmul.f32 %v8347_v44, %v8347_v44  ;;  %v8354_v49 = vpop.f32.mrb[14].mxu0 }
  0xfc   :  { %v713_v50 = vadd.f32 %v712_v47, %v711_v45  ;;  %v910_v51 = vadd.f32 %v909_v46, %v908_v43  ;;  %v8356_v52 = vpop.f32.mrb[15].mxu0  ;;  %v839_v63 = vmul.f32 %v8354_v49, %v8354_v49  ;;  %v915_v4 = vsel %vm688_vm2, %v838_v53, 0.0 }
  0xfd   :  { %v911_v55 = vsel %vm688_vm2, %v836_v48, 0.0  ;;  %v714_v57 = vsel %vm688_vm2, %v8356_v52, 0.0  ;;  %v837_v58 = vmul.f32 %v8356_v52, %v8356_v52  ;;  %v718_v5 = vsel %vm688_vm2, %v8354_v49, 0.0 }
  0xfe   :  { %v912_v59 = vadd.f32 %v911_v55, %v910_v51  ;;  %v715_v60 = vadd.f32 %v714_v57, %v713_v50  ;;  %v917_v10 = vsel %vm688_vm2, %v839_v63, 0.0 }
  0xff   :  { %v913_v1 = vsel %vm688_vm2, %v837_v58, 0.0 }
 0x100   :  { %v717_v2 = vadd.f32 %v716_v62, %v715_v60  ;;  %v914_v3 = vadd.f32 %v913_v1, %v912_v59 }
 0x101   :  { %v8373_v6 = vpop.f32.mrb[16].mxu0 }
 0x102   :  { %v916_v7 = vadd.f32 %v915_v4, %v914_v3  ;;  %v8375_v8 = vpop.f32.mrb[17].mxu0  ;;  %v719_v9 = vadd.f32 %v718_v5, %v717_v2  ;;  %v842_v19 = vmul.f32 %v8373_v6, %v8373_v6  ;;  %v724_v27 = vsel %vm688_vm2, %v8373_v6, 0.0 }
 0x103   :  { %v720_v11 = vsel %vm688_vm2, %v8375_v8, 0.0  ;;  %v840_v12 = vmul.f32 %v8375_v8, %v8375_v8  ;;  %v8382_v13 = vpop.f32.mrb[18].mxu0 }
 0x104   :  { %v721_v15 = vadd.f32 %v720_v11, %v719_v9  ;;  %v918_v17 = vadd.f32 %v917_v10, %v916_v7  ;;  %v8384_v18 = vpop.f32.mrb[19].mxu0  ;;  %v843_v28 = vmul.f32 %v8382_v13, %v8382_v13  ;;  %v923_v32 = vsel %vm688_vm2, %v842_v19, 0.0 }
 0x105   :  { %v919_v20 = vsel %vm688_vm2, %v840_v12, 0.0  ;;  %v722_v22 = vsel %vm688_vm2, %v8384_v18, 0.0  ;;  %v841_v23 = vmul.f32 %v8384_v18, %v8384_v18  ;;  %v726_v33 = vsel %vm688_vm2, %v8382_v13, 0.0 }
 0x106   :  { %v920_v25 = vadd.f32 %v919_v20, %v918_v17  ;;  %v723_v26 = vadd.f32 %v722_v22, %v721_v15  ;;  %v925_v43 = vsel %vm688_vm2, %v843_v28, 0.0 }
 0x107   :  { %v921_v29 = vsel %vm688_vm2, %v841_v23, 0.0 }
 0x108   :  { %v725_v30 = vadd.f32 %v724_v27, %v723_v26  ;;  %v922_v31 = vadd.f32 %v921_v29, %v920_v25 }
 0x109   :  { %v8401_v34 = vpop.f32.mrb[20].mxu0 }
 0x10a   :  { %v924_v35 = vadd.f32 %v923_v32, %v922_v31  ;;  %v8403_v38 = vpop.f32.mrb[21].mxu0  ;;  %v727_v41 = vadd.f32 %v726_v33, %v725_v30  ;;  %v846_v53 = vmul.f32 %v8401_v34, %v8401_v34  ;;  %v732_v62 = vsel %vm688_vm2, %v8401_v34, 0.0 }
 0x10b   :  { %v728_v45 = vsel %vm688_vm2, %v8403_v38, 0.0  ;;  %v844_v46 = vmul.f32 %v8403_v38, %v8403_v38  ;;  %v8410_v47 = vpop.f32.mrb[22].mxu0 }
 0x10c   :  { %v729_v48 = vadd.f32 %v728_v45, %v727_v41  ;;  %v926_v50 = vadd.f32 %v925_v43, %v924_v35  ;;  %v8412_v51 = vpop.f32.mrb[23].mxu0  ;;  %v847_v63 = vmul.f32 %v8410_v47, %v8410_v47  ;;  %v931_v4 = vsel %vm688_vm2, %v846_v53, 0.0 }
 0x10d   :  { %v927_v55 = vsel %vm688_vm2, %v844_v46, 0.0  ;;  %v730_v57 = vsel %vm688_vm2, %v8412_v51, 0.0  ;;  %v845_v58 = vmul.f32 %v8412_v51, %v8412_v51  ;;  %v734_v5 = vsel %vm688_vm2, %v8410_v47, 0.0 }
 0x10e   :  { %v928_v59 = vadd.f32 %v927_v55, %v926_v50  ;;  %v731_v60 = vadd.f32 %v730_v57, %v729_v48  ;;  %v933_v12 = vsel %vm688_vm2, %v847_v63, 0.0 }
 0x10f   :  { %v929_v1 = vsel %vm688_vm2, %v845_v58, 0.0 }
 0x110   :  { %v733_v2 = vadd.f32 %v732_v62, %v731_v60  ;;  %v930_v3 = vadd.f32 %v929_v1, %v928_v59 }
 0x111   :  { %v8429_v7 = vpop.f32.mrb[24].mxu0 }
 0x112   :  { %v932_v9 = vadd.f32 %v931_v4, %v930_v3  ;;  %v8431_v10 = vpop.f32.mrb[25].mxu0  ;;  %v735_v11 = vadd.f32 %v734_v5, %v733_v2  ;;  %v850_v25 = vmul.f32 %v8429_v7, %v8429_v7  ;;  %v740_v31 = vsel %vm688_vm2, %v8429_v7, 0.0 }
 0x113   :  { %v736_v15 = vsel %vm688_vm2, %v8431_v10, 0.0  ;;  %v848_v17 = vmul.f32 %v8431_v10, %v8431_v10  ;;  %v8438_v19 = vpop.f32.mrb[26].mxu0 }
 0x114   :  { %v737_v20 = vadd.f32 %v736_v15, %v735_v11  ;;  %v934_v22 = vadd.f32 %v933_v12, %v932_v9  ;;  %v8440_v23 = vpop.f32.mrb[27].mxu0  ;;  %v851_v32 = vmul.f32 %v8438_v19, %v8438_v19  ;;  %v939_v43 = vsel %vm688_vm2, %v850_v25, 0.0 }
 0x115   :  { %v935_v26 = vsel %vm688_vm2, %v848_v17, 0.0  ;;  %v738_v27 = vsel %vm688_vm2, %v8440_v23, 0.0  ;;  %v849_v28 = vmul.f32 %v8440_v23, %v8440_v23  ;;  %v742_v45 = vsel %vm688_vm2, %v8438_v19, 0.0 }
 0x116   :  { %v936_v29 = vadd.f32 %v935_v26, %v934_v22  ;;  %v739_v30 = vadd.f32 %v738_v27, %v737_v20  ;;  %v941_v55 = vsel %vm688_vm2, %v851_v32, 0.0 }
 0x117   :  { %v937_v33 = vsel %vm688_vm2, %v849_v28, 0.0 }
 0x118   :  { %v741_v35 = vadd.f32 %v740_v31, %v739_v30  ;;  %v938_v41 = vadd.f32 %v937_v33, %v936_v29 }
 0x119   :  { %v8457_v46 = vpop.f32.mrb[28].mxu0 }
 0x11a   :  { %v940_v48 = vadd.f32 %v939_v43, %v938_v41  ;;  %v8459_v50 = vpop.f32.mrb[29].mxu0  ;;  %v743_v53 = vadd.f32 %v742_v45, %v741_v35  ;;  %v854_v1 = vmul.f32 %v8457_v46, %v8457_v46  ;;  %v748_v11 = vsel %vm688_vm2, %v8457_v46, 0.0 }
 0x11b   :  { %v744_v57 = vsel %vm688_vm2, %v8459_v50, 0.0  ;;  %v852_v58 = vmul.f32 %v8459_v50, %v8459_v50  ;;  %v8466_v59 = vpop.f32.mrb[30].mxu0 }
 0x11c   :  { %v745_v60 = vadd.f32 %v744_v57, %v743_v53  ;;  %v942_v62 = vadd.f32 %v941_v55, %v940_v48  ;;  %v8468_v63 = vpop.f32.mrb[31].mxu0  ;;  %v855_v12 = vmul.f32 %v8466_v59, %v8466_v59  ;;  %v947_v22 = vsel %vm688_vm2, %v854_v1, 0.0 }
 0x11d   :  { %v943_v2 = vsel %vm688_vm2, %v852_v58, 0.0  ;;  %v746_v3 = vsel %vm688_vm2, %v8468_v63, 0.0  ;;  %v853_v4 = vmul.f32 %v8468_v63, %v8468_v63  ;;  %v750_v25 = vsel %vm688_vm2, %v8466_v59, 0.0 }
 0x11e   :  { %v944_v5 = vadd.f32 %v943_v2, %v942_v62  ;;  %v747_v9 = vadd.f32 %v746_v3, %v745_v60  ;;  %v949_v30 = vsel %vm688_vm2, %v855_v12, 0.0 }
 0x11f   :  { %v945_v15 = vsel %vm688_vm2, %v853_v4, 0.0 }
 0x120   :  { %v749_v17 = vadd.f32 %v748_v11, %v747_v9  ;;  %v946_v20 = vadd.f32 %v945_v15, %v944_v5 }
 0x121   :  { %v8485_v26 = vpop.f32.mrb[32].mxu0 }
 0x122   :  { %v948_v27 = vadd.f32 %v947_v22, %v946_v20  ;;  %v8487_v28 = vpop.f32.mrb[33].mxu0  ;;  %v751_v29 = vadd.f32 %v750_v25, %v749_v17  ;;  %v858_v45 = vmul.f32 %v8485_v26, %v8485_v26  ;;  %v756_v60 = vsel %vm688_vm2, %v8485_v26, 0.0 }
 0x123   :  { %v752_v31 = vsel %vm688_vm2, %v8487_v28, 0.0  ;;  %v856_v32 = vmul.f32 %v8487_v28, %v8487_v28  ;;  %v8494_v33 = vpop.f32.mrb[34].mxu0 }
 0x124   :  { %v753_v35 = vadd.f32 %v752_v31, %v751_v29  ;;  %v950_v41 = vadd.f32 %v949_v30, %v948_v27  ;;  %v8496_v43 = vpop.f32.mrb[35].mxu0  ;;  %v859_v62 = vmul.f32 %v8494_v33, %v8494_v33  ;;  %v955_v4 = vsel %vm688_vm2, %v858_v45, 0.0 }
 0x125   :  { %v951_v48 = vsel %vm688_vm2, %v856_v32, 0.0  ;;  %v754_v53 = vsel %vm688_vm2, %v8496_v43, 0.0  ;;  %v857_v55 = vmul.f32 %v8496_v43, %v8496_v43  ;;  %v758_v5 = vsel %vm688_vm2, %v8494_v33, 0.0 }
 0x126   :  { %v952_v57 = vadd.f32 %v951_v48, %v950_v41  ;;  %v755_v58 = vadd.f32 %v754_v53, %v753_v35  ;;  %v957_v17 = vsel %vm688_vm2, %v859_v62, 0.0 }
 0x127   :  { %v953_v1 = vsel %vm688_vm2, %v857_v55, 0.0 }
 0x128   :  { %v757_v2 = vadd.f32 %v756_v60, %v755_v58  ;;  %v954_v3 = vadd.f32 %v953_v1, %v952_v57  ;;  %v7856_v58 = vld [vmem:[%s13998_s4 + $0x100] sm:$0xff]  }
 0x129   :  { %v8513_v9 = vpop.f32.mrb[36].mxu0  ;;  %7755 = vmatprep.subr.bf16.mxu0 %v7856_v58 }
 0x12a   :  { %14458 = vst [vmem:[#allocation11_spill] sm:$0xff] %v8513_v9  ;;  %v956_v11 = vadd.f32 %v955_v4, %v954_v3  ;;  %v8515_v12 = vpop.f32.mrb[37].mxu0  ;;  %v759_v15 = vadd.f32 %v758_v5, %v757_v2  ;;  %v862_v31 = vmul.f32 %v8513_v9, %v8513_v9  ;;  %v764_v53 = vsel %vm688_vm2, %v8513_v9, 0.0  ;;  %7756 = vmatpush3.bf16.msra.mxu0 %v7856_v58 }
 0x12b   :  { %v760_v20 = vsel %vm688_vm2, %v8515_v12, 0.0  ;;  %v860_v22 = vmul.f32 %v8515_v12, %v8515_v12  ;;  %v8522_v25 = vpop.f32.mrb[38].mxu0 }
 0x12c   :  { %14459 = vst [vmem:[#allocation12_spill] sm:$0xff] %v8522_v25  ;;  %v761_v27 = vadd.f32 %v760_v20, %v759_v15  ;;  %v958_v29 = vadd.f32 %v957_v17, %v956_v11  ;;  %v8524_v30 = vpop.f32.mrb[39].mxu0  ;;  %v863_v55 = vmul.f32 %v8522_v25, %v8522_v25  ;;  %v963_v1 = vsel %vm688_vm2, %v862_v31, 0.0 }
 0x12d   :  { %14460 = vst [vmem:[#allocation13_spill] sm:$0xff] %v8524_v30  ;;  %v959_v32 = vsel %vm688_vm2, %v860_v22, 0.0  ;;  %v762_v35 = vsel %vm688_vm2, %v8524_v30, 0.0  ;;  %v861_v41 = vmul.f32 %v8524_v30, %v8524_v30  ;;  %v766_v2 = vsel %vm688_vm2, %v8522_v25, 0.0 }
 0x12e   :  { %v960_v45 = vadd.f32 %v959_v32, %v958_v29  ;;  %v763_v48 = vadd.f32 %v762_v35, %v761_v27  ;;  %v965_v15 = vsel %vm688_vm2, %v863_v55, 0.0 }
 0x12f   :  { %v961_v57 = vsel %vm688_vm2, %v861_v41, 0.0 }
 0x130   :  { %v765_v60 = vadd.f32 %v764_v53, %v763_v48  ;;  %v962_v62 = vadd.f32 %v961_v57, %v960_v45 }
 0x131   :  { %v8544_v3 = vpop.f32.mrb[40].mxu0 }
 0x132   :  { %14461 = vst [vmem:[#allocation14_spill] sm:$0xff] %v8544_v3  ;;  %v964_v4 = vadd.f32 %v963_v1, %v962_v62  ;;  %v8546_v5 = vpop.f32.mrb[41].mxu0  ;;  %v767_v11 = vadd.f32 %v766_v2, %v765_v60  ;;  %v866_v32 = vmul.f32 %v8544_v3, %v8544_v3  ;;  %v772_v55 = vsel %vm688_vm2, %v8544_v3, 0.0 }
 0x133   :  { %14462 = vst [vmem:[#allocation15_spill] sm:$0xff] %v8546_v5  ;;  %v768_v17 = vsel %vm688_vm2, %v8546_v5, 0.0  ;;  %v864_v20 = vmul.f32 %v8546_v5, %v8546_v5  ;;  %v8553_v22 = vpop.f32.mrb[42].mxu0 }
 0x134   :  { %14463 = vst [vmem:[#allocation16_spill] sm:$0xff] %v8553_v22  ;;  %v769_v27 = vadd.f32 %v768_v17, %v767_v11  ;;  %v966_v29 = vadd.f32 %v965_v15, %v964_v4  ;;  %v8555_v31 = vpop.f32.mrb[43].mxu0  ;;  %v867_v57 = vmul.f32 %v8553_v22, %v8553_v22  ;;  %v971_v1 = vsel %vm688_vm2, %v866_v32, 0.0 }
 0x135   :  { %14464 = vst [vmem:[#allocation17_spill] sm:$0xff] %v8555_v31  ;;  %v967_v35 = vsel %vm688_vm2, %v864_v20, 0.0  ;;  %v770_v41 = vsel %vm688_vm2, %v8555_v31, 0.0  ;;  %v865_v45 = vmul.f32 %v8555_v31, %v8555_v31  ;;  %v774_v2 = vsel %vm688_vm2, %v8553_v22, 0.0 }
 0x136   :  { %v968_v48 = vadd.f32 %v967_v35, %v966_v29  ;;  %v771_v53 = vadd.f32 %v770_v41, %v769_v27  ;;  %v973_v20 = vsel %vm688_vm2, %v867_v57, 0.0 }
 0x137   :  { %v969_v58 = vsel %vm688_vm2, %v865_v45, 0.0 }
 0x138   :  { %v773_v60 = vadd.f32 %v772_v55, %v771_v53  ;;  %v970_v62 = vadd.f32 %v969_v58, %v968_v48 }
 0x139   :  { %v8572_v4 = vpop.f32.mrb[44].mxu0 }
 0x13a   :  { %14465 = vst [vmem:[#allocation18_spill] sm:$0xff] %v8572_v4  ;;  %v972_v11 = vadd.f32 %v971_v1, %v970_v62  ;;  %v8574_v15 = vpop.f32.mrb[45].mxu0  ;;  %v775_v17 = vadd.f32 %v774_v2, %v773_v60  ;;  %v870_v48 = vmul.f32 %v8572_v4, %v8572_v4  ;;  %v780_v62 = vsel %vm688_vm2, %v8572_v4, 0.0 }
 0x13b   :  { %14466 = vst [vmem:[#allocation19_spill] sm:$0xff] %v8574_v15  ;;  %v776_v27 = vsel %vm688_vm2, %v8574_v15, 0.0  ;;  %v868_v29 = vmul.f32 %v8574_v15, %v8574_v15  ;;  %v8581_v35 = vpop.f32.mrb[46].mxu0 }
 0x13c   :  { %14467 = vst [vmem:[#allocation20_spill] sm:$0xff] %v8581_v35  ;;  %v777_v32 = vadd.f32 %v776_v27, %v775_v17  ;;  %v974_v41 = vadd.f32 %v973_v20, %v972_v11  ;;  %v8583_v45 = vpop.f32.mrb[47].mxu0  ;;  %v871_v1 = vmul.f32 %v8581_v35, %v8581_v35  ;;  %v14011_v11 = vmov 0.0  }
 0x13d   :  { %14468 = vst [vmem:[#allocation21_spill] sm:$0xff] %v8583_v45  ;;  %v975_v53 = vsel %vm688_vm2, %v868_v29, 0.0  ;;  %v778_v55 = vsel %vm688_vm2, %v8583_v45, 0.0  ;;  %v869_v57 = vmul.f32 %v8583_v45, %v8583_v45  ;;  %2931 = vst.msk [vmem:[#allocation2] sm:$0xff] %vm688_vm2, %v14011_v11  ;;  %v979_v27 = vsel %vm688_vm2, %v870_v48, 0.0 }
 0x13e   :  { %v976_v58 = vadd.f32 %v975_v53, %v974_v41  ;;  %v779_v60 = vadd.f32 %v778_v55, %v777_v32  ;;  %2932 = vst.msk [vmem:[#allocation2 + $0x8] sm:$0x3] %vm2034_vm3, %v14011_v11  ;;  %2934 = vst.msk [vmem:[#allocation2 + $0xa8] sm:$0x3] %vm2034_vm3, %v14011_v11  ;;  %v782_v29 = vsel %vm688_vm2, %v8581_v35, 0.0 }
 0x13f   :  { %v977_v2 = vsel %vm688_vm2, %v869_v57, 0.0  ;;  %2933 = vst.msk [vmem:[#allocation2 + $0xa0] sm:$0xff] %vm688_vm2, %v14011_v11  ;;  %2936 = vst.msk [vmem:[#allocation2 + $0x90] sm:$0xff] %vm688_vm2, %v14011_v11  ;;  %v981_v57 = vsel %vm688_vm2, %v871_v1, 0.0 }
 0x140   :  { %2937 = vst.msk [vmem:[#allocation2 + $0x98] sm:$0x3] %vm2034_vm3, %v14011_v11  ;;  %2939 = vst.msk [vmem:[#allocation2 + $0x138] sm:$0x3] %vm2034_vm3, %v14011_v11  ;;  %v781_v17 = vadd.f32 %v780_v62, %v779_v60  ;;  %v978_v20 = vadd.f32 %v977_v2, %v976_v58 }
 0x141   :  { %2938 = vst.msk [vmem:[#allocation2 + $0x130] sm:$0xff] %vm688_vm2, %v14011_v11  ;;  %v8616_v32 = vpop.f32.mrb[48].mxu0 }
 0x142   :  { %14469 = vst [vmem:[#allocation22_spill] sm:$0xff] %v8616_v32  ;;  %v980_v41 = vadd.f32 %v979_v27, %v978_v20  ;;  %v8618_v53 = vpop.f32.mrb[49].mxu0  ;;  %v783_v55 = vadd.f32 %v782_v29, %v781_v17  ;;  %v874_v20 = vmul.f32 %v8616_v32, %v8616_v32 }
 0x143   :  { %14470 = vst [vmem:[#allocation23_spill] sm:$0xff] %v8618_v53  ;;  %v784_v4 = vsel %vm688_vm2, %v8618_v53, 0.0  ;;  %v872_v60 = vmul.f32 %v8618_v53, %v8618_v53  ;;  %v8625_v58 = vpop.f32.mrb[50].mxu0 }
 0x144   :  { %14471 = vst [vmem:[#allocation24_spill] sm:$0xff] %v8625_v58  ;;  %v785_v48 = vadd.f32 %v784_v4, %v783_v55  ;;  %v982_v62 = vadd.f32 %v981_v57, %v980_v41  ;;  %v8627_v2 = vpop.f32.mrb[51].mxu0  ;;  %v788_v4 = vsel %vm688_vm2, %v8616_v32, 0.0  ;;  %v875_v41 = vmul.f32 %v8625_v58, %v8625_v58 }
 0x145   :  { %14472 = vst [vmem:[#allocation25_spill] sm:$0xff] %v8627_v2  ;;  %v983_v27 = vsel %vm688_vm2, %v872_v60, 0.0  ;;  %v786_v1 = vsel %vm688_vm2, %v8627_v2, 0.0  ;;  %v873_v17 = vmul.f32 %v8627_v2, %v8627_v2  ;;  %v3285_v53 = vld [vmem:[#allocation2 + $0x1] sm:$0xff]  ;;  %v987_v35 = vsel %vm688_vm2, %v874_v20, 0.0 }
 0x146   :  { %v984_v29 = vadd.f32 %v983_v27, %v982_v62  ;;  %v787_v11 = vadd.f32 %v786_v1, %v785_v48  ;;  %3317 = vrot.lane.b32.xlu1 %v3285_v53, %s8041_s25  ;;  %v790_v62 = vsel %vm688_vm2, %v8625_v58, 0.0  ;;  %v989_v2 = vsel %vm688_vm2, %v875_v41, 0.0 }
 0x147   :  { %v985_v55 = vsel %vm688_vm2, %v873_v17, 0.0 }
 0x148   :  { %v789_v57 = vadd.f32 %v788_v4, %v787_v11  ;;  %v986_v60 = vadd.f32 %v985_v55, %v984_v29 }
 0x149   :  { %v8645_v48 = vpop.f32.mrb[52].mxu0 }
 0x14a   :  { %14473 = vst [vmem:[#allocation26_spill] sm:$0xff] %v8645_v48  ;;  %v988_v27 = vadd.f32 %v987_v35, %v986_v60  ;;  %v8647_v1 = vpop.f32.mrb[53].mxu0  ;;  %v791_v32 = vadd.f32 %v790_v62, %v789_v57  ;;  %v878_v35 = vmul.f32 %v8645_v48, %v8645_v48 }
 0x14b   :  { %14474 = vst [vmem:[#allocation27_spill] sm:$0xff] %v8647_v1  ;;  %v792_v17 = vsel %vm688_vm2, %v8647_v1, 0.0  ;;  %v876_v11 = vmul.f32 %v8647_v1, %v8647_v1  ;;  %v8654_v53 = vpop.f32.mrb[54].mxu0  ;;  %v796_v1 = vsel %vm688_vm2, %v8645_v48, 0.0 }
 0x14c   :  { %14475 = vst [vmem:[#allocation28_spill] sm:$0xff] %v8654_v53  ;;  %v793_v20 = vadd.f32 %v792_v17, %v791_v32  ;;  %v990_v29 = vadd.f32 %v989_v2, %v988_v27  ;;  %v8656_v4 = vpop.f32.mrb[55].mxu0  ;;  %v879_v32 = vmul.f32 %v8654_v53, %v8654_v53  ;;  %v798_v58 = vsel %vm688_vm2, %v8654_v53, 0.0 }
 0x14d   :  { %14476 = vst [vmem:[#allocation29_spill] sm:$0xff] %v8656_v4  ;;  %v991_v55 = vsel %vm688_vm2, %v876_v11, 0.0  ;;  %v794_v41 = vsel %vm688_vm2, %v8656_v4, 0.0  ;;  %v877_v57 = vmul.f32 %v8656_v4, %v8656_v4  ;;  %v995_v11 = vsel %vm688_vm2, %v878_v35, 0.0 }
 0x14e   :  { %v992_v60 = vadd.f32 %v991_v55, %v990_v29  ;;  %v795_v62 = vadd.f32 %v794_v41, %v793_v20  ;;  %v997_v55 = vsel %vm688_vm2, %v879_v32, 0.0 }
 0x14f   :  { %v993_v2 = vsel %vm688_vm2, %v877_v57, 0.0 }
 0x150   :  { %v797_v27 = vadd.f32 %v796_v1, %v795_v62  ;;  %v994_v17 = vadd.f32 %v993_v2, %v992_v60 }
 0x151   :  { %v8673_v45 = vpop.f32.mrb[56].mxu0 }
 0x152   :  { %14477 = vst [vmem:[#allocation30_spill] sm:$0xff] %v8673_v45  ;;  %v996_v4 = vadd.f32 %v995_v11, %v994_v17  ;;  %v8675_v29 = vpop.f32.mrb[57].mxu0  ;;  %v799_v20 = vadd.f32 %v798_v58, %v797_v27  ;;  %v882_v2 = vmul.f32 %v8673_v45, %v8673_v45 }
 0x153   :  { %14478 = vst [vmem:[#allocation31_spill] sm:$0xff] %v8675_v29  ;;  %v800_v41 = vsel %vm688_vm2, %v8675_v29, 0.0  ;;  %v880_v1 = vmul.f32 %v8675_v29, %v8675_v29  ;;  %v8682_v57 = vpop.f32.mrb[58].mxu0  ;;  %v804_v29 = vsel %vm688_vm2, %v8673_v45, 0.0 }
 0x154   :  { %14479 = vst [vmem:[#allocation32_spill] sm:$0xff] %v8682_v57  ;;  %v801_v35 = vadd.f32 %v800_v41, %v799_v20  ;;  %v998_v60 = vadd.f32 %v997_v55, %v996_v4  ;;  %v8684_v62 = vpop.f32.mrb[59].mxu0  ;;  %v883_v4 = vmul.f32 %v8682_v57, %v8682_v57  ;;  %v806_v53 = vsel %vm688_vm2, %v8682_v57, 0.0 }
 0x155   :  { %14480 = vst [vmem:[#allocation33_spill] sm:$0xff] %v8684_v62  ;;  %v999_v17 = vsel %vm688_vm2, %v880_v1, 0.0  ;;  %v802_v58 = vsel %vm688_vm2, %v8684_v62, 0.0  ;;  %v881_v32 = vmul.f32 %v8684_v62, %v8684_v62  ;;  %v1003_v1 = vsel %vm688_vm2, %v882_v2, 0.0 }
 0x156   :  { %v1000_v27 = vadd.f32 %v999_v17, %v998_v60  ;;  %v803_v11 = vadd.f32 %v802_v58, %v801_v35  ;;  %v1005_v17 = vsel %vm688_vm2, %v883_v4, 0.0 }
 0x157   :  { %v1001_v20 = vsel %vm688_vm2, %v881_v32, 0.0 }
 0x158   :  { %v805_v55 = vadd.f32 %v804_v29, %v803_v11  ;;  %v1002_v41 = vadd.f32 %v1001_v20, %v1000_v27  ;;  %v7857_v20 = vld [vmem:[%s13998_s4 + $0x108] sm:$0xff]  }
 0x159   :  { %v8701_v48 = vpop.f32.mrb[60].mxu0  ;;  %7757 = vmatprep.subr.bf16.mxu0 %v7857_v20 }
 0x15a   :  { %v1004_v62 = vadd.f32 %v1003_v1, %v1002_v41  ;;  %v8703_v60 = vpop.f32.mrb[61].mxu0  ;;  %v807_v35 = vadd.f32 %v806_v53, %v805_v55  ;;  %v886_v53 = vmul.f32 %v8701_v48, %v8701_v48  ;;  %7758 = vmatpush3.bf16.msra.mxu0 %v7857_v20 }
 0x15b   :  { %v808_v58 = vsel %vm688_vm2, %v8703_v60, 0.0  ;;  %v884_v29 = vmul.f32 %v8703_v60, %v8703_v60  ;;  %v8710_v32 = vpop.f32.mrb[62].mxu0 }
 0x15c   :  { %v809_v2 = vadd.f32 %v808_v58, %v807_v35  ;;  %v1006_v27 = vadd.f32 %v1005_v17, %v1004_v62  ;;  %v8712_v11 = vpop.f32.mrb[63].mxu0  ;;  %v812_v62 = vsel %vm688_vm2, %v8701_v48, 0.0  ;;  %v887_v17 = vmul.f32 %v8710_v32, %v8710_v32 }
 0x15d   :  { %v1007_v4 = vsel %vm688_vm2, %v884_v29, 0.0  ;;  %v810_v55 = vsel %vm688_vm2, %v8712_v11, 0.0  ;;  %v885_v41 = vmul.f32 %v8712_v11, %v8712_v11  ;;  %v1011_v45 = vsel %vm688_vm2, %v886_v53, 0.0 }
 0x15e   :  { %v1008_v1 = vadd.f32 %v1007_v4, %v1006_v27  ;;  %v811_v35 = vadd.f32 %v810_v55, %v809_v2  ;;  %v814_v15 = vsel %vm688_vm2, %v8710_v32, 0.0  ;;  %v1013_v2 = vsel %vm688_vm2, %v887_v17, 0.0 }
 0x15f   :  { %v1009_v58 = vsel %vm688_vm2, %v885_v41, 0.0 }
 0x160   :  { %v813_v57 = vadd.f32 %v812_v62, %v811_v35  ;;  %v1010_v29 = vadd.f32 %v1009_v58, %v1008_v1 }
 0x162   :  { %v815_v22 = vadd.f32 %v814_v15, %v813_v57  ;;  %v1012_v27 = vadd.f32 %v1011_v45, %v1010_v29 }
 0x164   :  { %v816_v4 = vrot.slane %v815_v22, 4  ;;  %v1014_v55 = vadd.f32 %v1013_v2, %v1012_v27  ;;  %v14482_v2 = vmov 0.0  }
 0x165   :  { %2942 = vst.msk [vmem:[#allocation2 + $0x10] sm:$0x1] %vm2941_vm4, %v14482_v2  ;;  %2943 = vst.msk [vmem:[#allocation2 + $0x20] sm:$0x1] %vm2941_vm4, %v14482_v2 }
 0x166   :  { %v817_v3 = vadd.f32 %v816_v4, %v815_v22  ;;  %v1015_v31 = vrot.slane %v1014_v55, 4  ;;  %v1031_v22 = vlaneseq  ;;  %2944 = vst.msk [vmem:[#allocation2 + $0x30] sm:$0x1] %vm2941_vm4, %v14482_v2  ;;  %2945 = vst.msk [vmem:[#allocation2 + $0x40] sm:$0x1] %vm2941_vm4, %v14482_v2 }
 0x167   :  { %2946 = vst.msk [vmem:[#allocation2 + $0x50] sm:$0x1] %vm2941_vm4, %v14482_v2  ;;  %2947 = vst.msk [vmem:[#allocation2 + $0x60] sm:$0x1] %vm2941_vm4, %v14482_v2  ;;  %v687_v4 = vld [vmem:[%s13997_s3] sm:$0x1] }
 0x168   :  { %v818_v5 = vrot.slane %v817_v3, 2  ;;  %v1016_v25 = vadd.f32 %v1015_v31, %v1014_v55  ;;  %v8737_v29 = vshrl.u32 %v1031_v22, 7  ;;  %2948 = vst.msk [vmem:[#allocation2 + $0x70] sm:$0x1] %vm2941_vm4, %v14482_v2  ;;  %2949 = vst.msk [vmem:[#allocation2 + $0x80] sm:$0x1] %vm2941_vm4, %v14482_v2 }
 0x169   :  { %2950 = vst.msk [vmem:[#allocation2 + $0xb0] sm:$0x1] %vm2941_vm4, %v14482_v2  ;;  %2951 = vst.msk [vmem:[#allocation2 + $0xc0] sm:$0x1] %vm2941_vm4, %v14482_v2 }
 0x16a   :  { %v819_v9 = vadd.f32 %v818_v5, %v817_v3  ;;  %v1017_v41 = vrot.slane %v1016_v25, 2  ;;  %v8042_v3 = vmov 1983009808   ;;  %2952 = vst.msk [vmem:[#allocation2 + $0xd0] sm:$0x1] %vm2941_vm4, %v14482_v2 }
 0x16b   :  { %v8739_v5 = vunpack.c.l.s4 %v8042_v3  ;;  %2953 = vst.msk [vmem:[#allocation2 + $0xe0] sm:$0x1] %vm2941_vm4, %v14482_v2  ;;  %2954 = vst.msk [vmem:[#allocation2 + $0xf0] sm:$0x1] %vm2941_vm4, %v14482_v2 }
 0x16c   :  { %v820_v20 = vrot.slane %v819_v9, 1  ;;  %v1018_v35 = vadd.f32 %v1017_v41, %v1016_v25  ;;  %v8745_v25 = vsub.s32 0, %v8737_v29  ;;  %2955 = vst.msk [vmem:[#allocation2 + $0x100] sm:$0x1] %vm2941_vm4, %v14482_v2  ;;  %2956 = vst.msk [vmem:[#allocation2 + $0x110] sm:$0x1] %vm2941_vm4, %v14482_v2 }
 0x16d   :  { %v1365_v27 = vunpack.c.0.s8 %v8739_v5  ;;  %2957 = vst.msk [vmem:[#allocation2 + $0x120] sm:$0x1] %vm2941_vm4, %v14482_v2  ;;  %2958 = vst.msk [vmem:[#allocation2 + $0x19] sm:$0x1] %vm2941_vm4, %v14482_v2 }
 0x16e   :  { %v821_v1 = vadd.f32 %v820_v20, %v819_v9  ;;  %v1019_v62 = vrot.slane %v1018_v35, 1  ;;  %v686_v9 = vld [vmem:[%s13996_s2] sm:$0x1]  ;;  %14481 = vst [vmem:[#allocation34_spill] sm:$0xff] %v8745_v25  ;;  %2959 = vst.msk [vmem:[#allocation2 + $0x29] sm:$0x1] %vm2941_vm4, %v14482_v2 }
 0x16f   :  { %2960 = vst.msk [vmem:[#allocation2 + $0x39] sm:$0x1] %vm2941_vm4, %v14482_v2  ;;  %2961 = vst.msk [vmem:[#allocation2 + $0x49] sm:$0x1] %vm2941_vm4, %v14482_v2  ;;  %v8868_v20 = vsub.s32 %v1365_v27, %v8737_v29 }
 0x170   :  { %v8733_v53 = vmul.f32 0.001953125, %v821_v1  ;;  %v1020_v58 = vadd.f32 %v1019_v62, %v1018_v35  ;;  %2962 = vst.msk [vmem:[#allocation2 + $0x59] sm:$0x1] %vm2941_vm4, %v14482_v2  ;;  %2963 = vst.msk [vmem:[#allocation2 + $0x69] sm:$0x1] %vm2941_vm4, %v14482_v2 }
 0x171   :  { %2964 = vst.msk [vmem:[#allocation2 + $0x79] sm:$0x1] %vm2941_vm4, %v14482_v2  ;;  %2965 = vst.msk [vmem:[#allocation2 + $0x89] sm:$0x1] %vm2941_vm4, %v14482_v2 }
 0x172   :  { %v1021_v30 = vmul.f32 0.001953125, %v1020_v58  ;;  %v1022_v15 = vmul.f32 %v8733_v53, %v8733_v53  ;;  %2966 = vst.msk [vmem:[#allocation2 + $0xb9] sm:$0x1] %vm2941_vm4, %v14482_v2  ;;  %2967 = vst.msk [vmem:[#allocation2 + $0xc9] sm:$0x1] %vm2941_vm4, %v14482_v2 }
 0x173   :  { %2968 = vst.msk [vmem:[#allocation2 + $0xd9] sm:$0x1] %vm2941_vm4, %v14482_v2  ;;  %2969 = vst.msk [vmem:[#allocation2 + $0xe9] sm:$0x1] %vm2941_vm4, %v14482_v2 }
 0x174   :  { %v1023_v45 = vsub.f32 %v1021_v30, %v1022_v15  ;;  %2970 = vst.msk [vmem:[#allocation2 + $0xf9] sm:$0x1] %vm2941_vm4, %v14482_v2  ;;  %2971 = vst.msk [vmem:[#allocation2 + $0x109] sm:$0x1] %vm2941_vm4, %v14482_v2 }
 0x175   :  { %2972 = vst.msk [vmem:[#allocation2 + $0x119] sm:$0x1] %vm2941_vm4, %v14482_v2  ;;  %2973 = vst.msk [vmem:[#allocation2 + $0x129] sm:$0x1] %vm2941_vm4, %v14482_v2 }
 0x176   :  { %v1024_v57 = vmax.f32 %v1023_v45, 0.0  ;;  %5116 = vst.msk [vmem:[#allocation4 + $0x8] sm:$0x1] %vm2941_vm4, %v14482_v2  ;;  %5117 = vst.msk [vmem:[#allocation4 + $0x10] sm:$0x1] %vm2941_vm4, %v14482_v2 }
 0x177   :  { %5118 = vst.msk [vmem:[#allocation4 + $0x18] sm:$0x1] %vm2941_vm4, %v14482_v2  ;;  %5119 = vst.msk [vmem:[#allocation4 + $0x20] sm:$0x1] %vm2941_vm4, %v14482_v2 }
 0x178   :  { %v1025_v17 = vadd.f32 1e-05, %v1024_v57  ;;  %5120 = vst.msk [vmem:[#allocation4 + $0x38] sm:$0x1] %vm2941_vm4, %v14482_v2  ;;  %5121 = vst.msk [vmem:[#allocation4 + $0x40] sm:$0x1] %vm2941_vm4, %v14482_v2 }
 0x179   :  { %5122 = vst.msk [vmem:[#allocation4 + $0x48] sm:$0x1] %vm2941_vm4, %v14482_v2  ;;  %5123 = vst.msk [vmem:[#allocation4 + $0x50] sm:$0x1] %vm2941_vm4, %v14482_v2 }
 0x17a   :  { %8004 = vrsqrt.f32 %v1025_v17  ;;  %5124 = vst.msk [vmem:[#allocation4 + $0xd] sm:$0x1] %vm2941_vm4, %v14482_v2  ;;  %5125 = vst.msk [vmem:[#allocation4 + $0x15] sm:$0x1] %vm2941_vm4, %v14482_v2 }
 0x17b   :  { %5126 = vst.msk [vmem:[#allocation4 + $0x1d] sm:$0x1] %vm2941_vm4, %v14482_v2  ;;  %5127 = vst.msk [vmem:[#allocation4 + $0x25] sm:$0x1] %vm2941_vm4, %v14482_v2 }
 0x17c   :  { %5128 = vst.msk [vmem:[#allocation4 + $0x3d] sm:$0x1] %vm2941_vm4, %v14482_v2  ;;  %5129 = vst.msk [vmem:[#allocation4 + $0x45] sm:$0x1] %vm2941_vm4, %v14482_v2 }
 0x17d   :  { %5130 = vst.msk [vmem:[#allocation4 + $0x4d] sm:$0x1] %vm2941_vm4, %v14482_v2  ;;  %5131 = vst.msk [vmem:[#allocation4 + $0x55] sm:$0x1] %vm2941_vm4, %v14482_v2 }
 0x17e   :  { %6215 = vst.msk [vmem:[#allocation6 + $0x4] sm:$0x1] %vm2941_vm4, %v14482_v2  ;;  %6216 = vst.msk [vmem:[#allocation6 + $0x8] sm:$0x1] %vm2941_vm4, %v14482_v2 }
 0x17f   :  { %6217 = vst.msk [vmem:[#allocation6 + $0x14] sm:$0x1] %vm2941_vm4, %v14482_v2  ;;  %6218 = vst.msk [vmem:[#allocation6 + $0x18] sm:$0x1] %vm2941_vm4, %v14482_v2 }
 0x180   :  { %6219 = vst.msk [vmem:[#allocation6 + $0x7] sm:$0x1] %vm2941_vm4, %v14482_v2  ;;  %6220 = vst.msk [vmem:[#allocation6 + $0xb] sm:$0x1] %vm2941_vm4, %v14482_v2 }
 0x181   :  { %6221 = vst.msk [vmem:[#allocation6 + $0x17] sm:$0x1] %vm2941_vm4, %v14482_v2  ;;  %6222 = vst.msk [vmem:[#allocation6 + $0x1b] sm:$0x1] %vm2941_vm4, %v14482_v2 }
 0x182   :  { %14483 = vst [vmem:[#allocation35_spill] sm:$0xff] %v8868_v20 }
 0x184   :  { %v8005_v31 = vpop.eup %8004 }
 0x185   :  { %v1027_v30 = vmul.f32 %v8005_v31, %v686_v9 }
 0x187   :  { %v1028_v55 = vmul.f32 %v1027_v30, %v8733_v53  ;;  %v8865_v41 = vrot.slane %v1027_v30, %v8745_v25 }
 0x189   :  { %v1029_v35 = vsub.f32 %v687_v4, %v1028_v55  ;;  %v1096_v1 = vmul.f32 %v8865_v41, %v8703_v60  ;;  %v1097_v62 = vmul.f32 %v8865_v41, %v8712_v11  ;;  %v1098_v58 = vmul.f32 %v8701_v48, %v8865_v41 }
 0x18a   :  { %v1099_v15 = vmul.f32 %v8710_v32, %v8865_v41  ;;  %v8880_v53 = vmul.f32 %v8865_v41, %v8264_v37  ;;  %v8884_v45 = vmul.f32 %v8865_v41, %v8270_v40  ;;  %v8888_v60 = vmul.f32 %v8262_v36, %v8865_v41 }
 0x18b   :  { %v8891_v11 = vrot.slane %v1029_v35, %v8745_v25  ;;  %v8895_v48 = vmul.f32 %v8268_v39, %v8865_v41  ;;  %v8899_v32 = vmul.f32 %v8865_v41, %v8291_v56  ;;  %v8903_v37 = vmul.f32 %v8865_v41, %v8300_v0 }
 0x18c   :  { %v8907_v40 = vmul.f32 %v8289_v54, %v8865_v41  ;;  %v8911_v36 = vmul.f32 %v8298_v61, %v8865_v41  ;;  %v8915_v39 = vmul.f32 %v8865_v41, %v8319_v16  ;;  %v8919_v56 = vmul.f32 %v8865_v41, %v8328_v24 }
 0x18d   :  { %v1166_v57 = vadd.f32 %v8891_v11, %v1096_v1  ;;  %v1167_v0 = vadd.f32 %v8891_v11, %v1097_v62  ;;  %v1168_v17 = vadd.f32 %v8891_v11, %v1098_v58  ;;  %v1169_v54 = vadd.f32 %v8891_v11, %v1099_v15 }
 0x18e   :  { %v8927_v61 = vmul.f32 %v8317_v14, %v8865_v41  ;;  %v8931_v16 = vmul.f32 %v8326_v21, %v8865_v41  ;;  %v8935_v24 = vmul.f32 %v8865_v41, %v8347_v44  ;;  %v8939_v22 = vmul.f32 %v8865_v41, %v8356_v52 }
 0x18f   :  { %v1230_v29 = vmax.f32 %v1166_v57, 0.0  ;;  %v1231_v3 = vmax.f32 %v1167_v0, 0.0  ;;  %v1232_v5 = vmax.f32 %v1168_v17, 0.0  ;;  %v1233_v9 = vmax.f32 %v1169_v54, 0.0 }
 0x190   :  { %v8943_v14 = vmul.f32 %v8345_v42, %v8865_v41  ;;  %v8947_v21 = vmul.f32 %v8354_v49, %v8865_v41  ;;  %v8951_v44 = vmul.f32 %v8865_v41, %v8375_v8  ;;  %v8955_v52 = vmul.f32 %v8865_v41, %v8384_v18 }
 0x191   :  { %v1324_v31 = vsel %vm688_vm2, %v1230_v29, -inf  ;;  %v1325_v27 = vsel %vm688_vm2, %v1232_v5, -inf  ;;  %v1327_v30 = vsel %vm688_vm2, %v1231_v3, -inf  ;;  %v1328_v42 = vsel %vm688_vm2, %v1233_v9, -inf }
 0x192   :  { %v1326_v4 = vmax.f32 %v1324_v31, %v1325_v27  ;;  %v1329_v55 = vmax.f32 %v1327_v30, %v1328_v42  ;;  %v8963_v49 = vmul.f32 %v8373_v6, %v8865_v41  ;;  %v8967_v8 = vmul.f32 %v8382_v13, %v8865_v41 }
 0x193   :  { %v8971_v18 = vmul.f32 %v8865_v41, %v8403_v38  ;;  %v8975_v35 = vmul.f32 %v8865_v41, %v8412_v51  ;;  %v8979_v1 = vmul.f32 %v8401_v34, %v8865_v41  ;;  %v8983_v6 = vmul.f32 %v8410_v47, %v8865_v41 }
 0x194   :  { %v1872_v62 = vcombine.high %v1326_v4, %v1326_v4  ;;  %v1879_v13 = vrot.slane %v1326_v4, %v8868_v20  ;;  %v1889_v58 = vcombine.high %v1329_v55, %v1329_v55  ;;  %v1896_v15 = vrot.slane %v1329_v55, %v8868_v20 }
 0x195   :  { %v8989_v38 = vmul.f32 %v8865_v41, %v8431_v10  ;;  %v8993_v51 = vmul.f32 %v8865_v41, %v8440_v23  ;;  %v8997_v34 = vmul.f32 %v8429_v7, %v8865_v41  ;;  %v9001_v47 = vmul.f32 %v8438_v19, %v8865_v41 }
 0x196   :  { %v1886_v57 = vrot.slane %v1872_v62, %v8868_v20  ;;  %v1887_v0 = vcombine.high %v1879_v13, %v1879_v13  ;;  %v1903_v17 = vrot.slane %v1889_v58, %v8868_v20  ;;  %v1904_v54 = vcombine.high %v1896_v15, %v1896_v15 }
 0x197   :  { %14484 = vst [vmem:[#allocation36_spill] sm:$0xff] %v8989_v38  ;;  %14485 = vst [vmem:[#allocation37_spill] sm:$0xff] %v8993_v51  ;;  %v2875_v10 = vsel %vm2034_vm3, %v1879_v13, -inf  ;;  %v2903_v29 = vsel %vm2034_vm3, %v1896_v15, -inf  ;;  %v9009_v23 = vmul.f32 %v8865_v41, %v8459_v50  ;;  %v9013_v7 = vmul.f32 %v8865_v41, %v8468_v63 }
 0x198   :  { %14486 = vst [vmem:[#allocation38_spill] sm:$0xff] %v8997_v34  ;;  %14487 = vst [vmem:[#allocation39_spill] sm:$0xff] %v9001_v47  ;;  %v1888_v19 = vcombine.high %v1886_v57, %v1886_v57  ;;  %v1905_v3 = vcombine.high %v1903_v17, %v1903_v17  ;;  %v2876_v5 = vrot.slane %v2875_v10, 4  ;;  %v2882_v9 = vsel %vm2034_vm3, %v1887_v0, -inf }
 0x199   :  { %14488 = vst [vmem:[#allocation40_spill] sm:$0xff] %v9009_v23  ;;  %14489 = vst [vmem:[#allocation41_spill] sm:$0xff] %v9013_v7  ;;  %v2883_v31 = vrot.slane %v2882_v9, 4  ;;  %v2889_v27 = vsel %vm2034_vm3, %v1886_v57, -inf  ;;  %v2904_v30 = vrot.slane %v2903_v29, 4  ;;  %v2910_v42 = vsel %vm2034_vm3, %v1904_v54, -inf }
 0x19a   :  { %v2877_v4 = vmax.f32 %v2875_v10, %v2876_v5  ;;  %v2890_v55 = vrot.slane %v2889_v27, 4  ;;  %v2896_v50 = vsel %vm2034_vm3, %v1888_v19, -inf  ;;  %v2911_v62 = vrot.slane %v2910_v42, 4 }
 0x19b   :  { %v2884_v63 = vmax.f32 %v2882_v9, %v2883_v31  ;;  %v2897_v13 = vrot.slane %v2896_v50, 4  ;;  %v2905_v58 = vmax.f32 %v2903_v29, %v2904_v30  ;;  %v2917_v15 = vsel %vm2034_vm3, %v1903_v17, -inf }
 0x19c   :  { %v2878_v0 = vrot.slane %v2877_v4, 2  ;;  %v2891_v25 = vmax.f32 %v2889_v27, %v2890_v55  ;;  %v2912_v2 = vmax.f32 %v2910_v42, %v2911_v62  ;;  %v2918_v57 = vrot.slane %v2917_v15, 4 }
 0x19d   :  { %v2885_v20 = vrot.slane %v2884_v63, 2  ;;  %v2898_v54 = vmax.f32 %v2896_v50, %v2897_v13  ;;  %v2906_v7 = vrot.slane %v2905_v58, 2  ;;  %v2924_v10 = vsel %vm2034_vm3, %v1905_v3, -inf }
 0x19e   :  { %v2879_v19 = vmax.f32 %v2877_v4, %v2878_v0  ;;  %v2892_v5 = vrot.slane %v2891_v25, 2  ;;  %v2913_v23 = vrot.slane %v2912_v2, 2  ;;  %v2919_v9 = vmax.f32 %v2917_v15, %v2918_v57 }
 0x19f   :  { %v2886_v29 = vmax.f32 %v2884_v63, %v2885_v20  ;;  %v2899_v31 = vrot.slane %v2898_v54, 2  ;;  %v2907_v17 = vmax.f32 %v2905_v58, %v2906_v7  ;;  %v2925_v30 = vrot.slane %v2924_v10, 4 }
 0x1a0   :  { %v2880_v27 = vrot.slane %v2879_v19, 1  ;;  %v2893_v42 = vmax.f32 %v2891_v25, %v2892_v5  ;;  %v2914_v55 = vmax.f32 %v2912_v2, %v2913_v23  ;;  %v2920_v62 = vrot.slane %v2919_v9, 2 }
 0x1a1   :  { %v2887_v47 = vrot.slane %v2886_v29, 1  ;;  %v2900_v50 = vmax.f32 %v2898_v54, %v2899_v31  ;;  %v2908_v13 = vrot.slane %v2907_v17, 1  ;;  %v2926_v34 = vmax.f32 %v2924_v10, %v2925_v30  ;;  %v14491_v31 = vld [vmem:[#allocation11_spill] sm:$0xff] }
 0x1a2   :  { %v2881_v3 = vmax.f32 %v2879_v19, %v2880_v27  ;;  %v2894_v51 = vrot.slane %v2893_v42, 1  ;;  %v2915_v4 = vrot.slane %v2914_v55, 1  ;;  %v2921_v0 = vmax.f32 %v2919_v9, %v2920_v62  ;;  %v14494_v62 = vld [vmem:[#allocation17_spill] sm:$0xff] }
 0x1a3   :  { %v2888_v38 = vmax.f32 %v2886_v29, %v2887_v47  ;;  %v2901_v15 = vrot.slane %v2900_v50, 1  ;;  %v2909_v57 = vmax.f32 %v2907_v17, %v2908_v13  ;;  %v2927_v20 = vrot.slane %v2926_v34, 2  ;;  %v14490_v29 = vld [vmem:[#allocation13_spill] sm:$0xff]  ;;  %v14495_v13 = vld [vmem:[#allocation14_spill] sm:$0xff] }
 0x1a4   :  { %v2895_v63 = vmax.f32 %v2893_v42, %v2894_v51  ;;  %v2916_v7 = vmax.f32 %v2914_v55, %v2915_v4  ;;  %v2922_v58 = vrot.slane %v2921_v0, 1  ;;  %v9023_v25 = vmul.f32 %v8457_v46, %v8865_v41  ;;  %v14493_v42 = vld [vmem:[#allocation15_spill] sm:$0xff]  ;;  %v14496_v4 = vld [vmem:[#allocation16_spill] sm:$0xff] }
 0x1a5   :  { %v2902_v2 = vmax.f32 %v2900_v50, %v2901_v15  ;;  %v2928_v23 = vmax.f32 %v2926_v34, %v2927_v20  ;;  %v3214_v54 = vsel %vm3102_vm5, %v2888_v38, %v2881_v3  ;;  %v9028_v10 = vmul.f32 %v8466_v59, %v8865_v41 }
 0x1a6   :  { %v2923_v19 = vmax.f32 %v2921_v0, %v2922_v58  ;;  %v3215_v47 = vsel %vm3104_vm6, %v2895_v63, %v3214_v54  ;;  %v9033_v51 = vmul.f32 %v8865_v41, %v8487_v28  ;;  %v9037_v5 = vmul.f32 %v8865_v41, %v8496_v43  ;;  %v14498_v63 = vld [vmem:[#allocation21_spill] sm:$0xff]  ;;  %v14499_v58 = vld [vmem:[#allocation18_spill] sm:$0xff] }
 0x1a7   :  { %v2929_v46 = vrot.slane %v2928_v23, 1  ;;  %v3216_v34 = vsel %vm3106_vm7, %v2902_v2, %v3215_v47  ;;  %v9042_v38 = vmul.f32 %v8485_v26, %v8865_v41  ;;  %v9046_v59 = vmul.f32 %v8494_v33, %v8865_v41  ;;  %v14492_v33 = vld [vmem:[#allocation12_spill] sm:$0xff] }
 0x1a8   :  { %v3217_v9 = vsel %vm3108_vm8, %v2909_v57, %v3216_v34  ;;  %v9051_v28 = vmul.f32 %v8865_v41, %v8515_v12  ;;  %v9055_v43 = vmul.f32 %v8865_v41, %v14490_v29  ;;  %v9059_v17 = vmul.f32 %v14491_v31, %v8865_v41  ;;  %v14497_v57 = vld [vmem:[#allocation19_spill] sm:$0xff]  ;;  %v14504_v31 = vld [vmem:[#allocation24_spill] sm:$0xff] }
 0x1a9   :  { %v2930_v26 = vmax.f32 %v2928_v23, %v2929_v46  ;;  %v3218_v30 = vsel %vm3110_vm9, %v2916_v7, %v3217_v9  ;;  %v9064_v27 = vmul.f32 %v14492_v33, %v8865_v41  ;;  %v9068_v55 = vmul.f32 %v8865_v41, %v14493_v42  ;;  %v14500_v23 = vld [vmem:[#allocation20_spill] sm:$0xff]  ;;  %v14502_v46 = vld [vmem:[#allocation25_spill] sm:$0xff]  ;;  %v14503_v9 = vld [vmem:[#allocation22_spill] sm:$0xff] }
 0x1aa   :  { %v3219_v12 = vsel %vm3112_vm10, %v2923_v19, %v3218_v30  ;;  %v9073_v50 = vmul.f32 %v8865_v41, %v14494_v62  ;;  %v9077_v3 = vmul.f32 %v14495_v13, %v8865_v41  ;;  %v9081_v0 = vmul.f32 %v14496_v4, %v8865_v41  ;;  %v14501_v19 = vld [vmem:[#allocation23_spill] sm:$0xff]  ;;  %v14506_v42 = vld [vmem:[#allocation29_spill] sm:$0xff]  ;;  %v14507_v62 = vld [vmem:[#allocation26_spill] sm:$0xff] }
 0x1ab   :  { %v3220_v15 = vsel %vm3114_vm11, %v2930_v26, %v3219_v12  ;;  %v9086_v20 = vmul.f32 %v8865_v41, %v14497_v57  ;;  %v9090_v7 = vmul.f32 %v8865_v41, %v14498_v63  ;;  %v9094_v2 = vmul.f32 %v14499_v58, %v8865_v41  ;;  %v14505_v30 = vld [vmem:[#allocation27_spill] sm:$0xff]  ;;  %v14508_v4 = vld [vmem:[#allocation28_spill] sm:$0xff]  ;;  %v14510_v58 = vld [vmem:[#allocation33_spill] sm:$0xff] }
 0x1ac   :  { %3252 = vst.msk [vmem:[#allocation2 + $0x121] sm:$0xff] %vm688_vm2, %v3220_v15  ;;  %v9099_v54 = vmul.f32 %v14500_v23, %v8865_v41  ;;  %v9103_v47 = vmul.f32 %v8865_v41, %v14501_v19  ;;  %v9107_v34 = vmul.f32 %v8865_v41, %v14502_v46  ;;  %v9111_v29 = vmul.f32 %v14503_v9, %v8865_v41  ;;  %v14509_v57 = vld [vmem:[#allocation31_spill] sm:$0xff]  ;;  %v14511_v19 = vld [vmem:[#allocation30_spill] sm:$0xff]  ;;  %v14512_v9 = vld [vmem:[#allocation32_spill] sm:$0xff] }
 0x1ad   :  { %v9115_v26 = vmul.f32 %v14504_v31, %v8865_v41  ;;  %v9119_v33 = vmul.f32 %v8865_v41, %v14505_v30  ;;  %v9123_v12 = vmul.f32 %v8865_v41, %v14506_v42  ;;  %v9127_v13 = vmul.f32 %v14507_v62, %v8865_v41 }
 0x1ae   :  { %v9131_v15 = vmul.f32 %v14508_v4, %v8865_v41  ;;  %v9135_v63 = vmul.f32 %v8865_v41, %v14509_v57  ;;  %v9139_v23 = vmul.f32 %v8865_v41, %v14510_v58  ;;  %v9143_v46 = vmul.f32 %v14511_v19, %v8865_v41  ;;  %v14516_v57 = vld [vmem:[#allocation36_spill] sm:$0xff]  ;;  %v14517_v58 = vld [vmem:[#allocation37_spill] sm:$0xff]  ;;  %v14518_v19 = vld [vmem:[#allocation38_spill] sm:$0xff] }
 0x1af   :  { %v9147_v31 = vmul.f32 %v14512_v9, %v8865_v41  ;;  %v9151_v30 = vadd.f32 %v8891_v11, %v8880_v53  ;;  %v9155_v42 = vadd.f32 %v8891_v11, %v8884_v45  ;;  %v9159_v62 = vadd.f32 %v8891_v11, %v8888_v60  ;;  %v14519_v9 = vld [vmem:[#allocation39_spill] sm:$0xff] }
 0x1b0   :  { %v9163_v4 = vadd.f32 %v8891_v11, %v8895_v48  ;;  %v9167_v41 = vadd.f32 %v8891_v11, %v8899_v32  ;;  %v9171_v53 = vadd.f32 %v8891_v11, %v8903_v37  ;;  %v9175_v45 = vadd.f32 %v8891_v11, %v8907_v40 }
 0x1b1   :  { %v9179_v60 = vadd.f32 %v8891_v11, %v8911_v36  ;;  %v9183_v48 = vadd.f32 %v8891_v11, %v8915_v39  ;;  %v9187_v32 = vadd.f32 %v8891_v11, %v8919_v56  ;;  %v9191_v37 = vadd.f32 %v8891_v11, %v8927_v61 }
 0x1b2   :  { %v9195_v40 = vadd.f32 %v8891_v11, %v8931_v16  ;;  %v9199_v36 = vadd.f32 %v8891_v11, %v8935_v24  ;;  %v9203_v39 = vadd.f32 %v8891_v11, %v8939_v22  ;;  %v9207_v56 = vadd.f32 %v8891_v11, %v8943_v14 }
 0x1b3   :  { %v9211_v61 = vadd.f32 %v8891_v11, %v8947_v21  ;;  %v9215_v16 = vadd.f32 %v8891_v11, %v8951_v44  ;;  %v9219_v24 = vadd.f32 %v8891_v11, %v8955_v52  ;;  %v9223_v22 = vadd.f32 %v8891_v11, %v8963_v49  ;;  %v7858_v49 = vld [vmem:[%s13998_s4 + $0x110] sm:$0xff]  }
 0x1b4   :  { %v9227_v14 = vadd.f32 %v8891_v11, %v8967_v8  ;;  %v9231_v21 = vadd.f32 %v8891_v11, %v8971_v18  ;;  %v9235_v44 = vadd.f32 %v8891_v11, %v8975_v35  ;;  %v9239_v52 = vadd.f32 %v8891_v11, %v8979_v1  ;;  %7759 = vmatprep.subr.bf16.mxu0 %v7858_v49 }
 0x1b5   :  { %v9246_v8 = vadd.f32 %v8891_v11, %v8983_v6  ;;  %v9250_v18 = vadd.f32 %v8891_v11, %v14516_v57  ;;  %v9254_v35 = vadd.f32 %v8891_v11, %v14517_v58  ;;  %v9258_v1 = vadd.f32 %v8891_v11, %v14518_v19  ;;  %7760 = vmatpush3.bf16.msra.mxu0 %v7858_v49 }
 0x1b6   :  { %14513 = vst [vmem:[#allocation13_spill] sm:$0xff] %v9235_v44  ;;  %14514 = vst [vmem:[#allocation11_spill] sm:$0xff] %v9239_v52  ;;  %v9262_v52 = vadd.f32 %v8891_v11, %v14519_v9  ;;  %v14520_v44 = vld [vmem:[#allocation40_spill] sm:$0xff]  ;;  %v9274_v58 = vadd.f32 %v8891_v11, %v9023_v25  ;;  %v9278_v19 = vadd.f32 %v8891_v11, %v9028_v10  ;;  %v1170_v49 = vmax.f32 %v9151_v30, 0.0 }
 0x1b7   :  { %14515 = vst [vmem:[#allocation12_spill] sm:$0xff] %v9246_v8  ;;  %v9266_v6 = vadd.f32 %v8891_v11, %v14520_v44  ;;  %v14521_v8 = vld [vmem:[#allocation41_spill] sm:$0xff]  ;;  %v9282_v9 = vadd.f32 %v8891_v11, %v9033_v51  ;;  %v9286_v44 = vadd.f32 %v8891_v11, %v9037_v5  ;;  %v9294_v25 = vadd.f32 %v8891_v11, %v9046_v59 }
 0x1b8   :  { %v9270_v57 = vadd.f32 %v8891_v11, %v14521_v8  ;;  %v9290_v8 = vadd.f32 %v8891_v11, %v9042_v38  ;;  %v9298_v10 = vadd.f32 %v8891_v11, %v9051_v28  ;;  %v9302_v51 = vadd.f32 %v8891_v11, %v9055_v43 }
 0x1b9   :  { %v9306_v5 = vadd.f32 %v8891_v11, %v9059_v17  ;;  %v9310_v38 = vadd.f32 %v8891_v11, %v9064_v27  ;;  %v9314_v59 = vadd.f32 %v8891_v11, %v9068_v55  ;;  %v9318_v28 = vadd.f32 %v8891_v11, %v9073_v50 }
 0x1ba   :  { %v9322_v43 = vadd.f32 %v8891_v11, %v9077_v3  ;;  %v9326_v17 = vadd.f32 %v8891_v11, %v9081_v0  ;;  %v9330_v27 = vadd.f32 %v8891_v11, %v9086_v20  ;;  %v9334_v55 = vadd.f32 %v8891_v11, %v9090_v7 }
 0x1bb   :  { %v9338_v50 = vadd.f32 %v8891_v11, %v9094_v2  ;;  %v9342_v3 = vadd.f32 %v8891_v11, %v9099_v54  ;;  %v9346_v0 = vadd.f32 %v8891_v11, %v9103_v47  ;;  %v9350_v20 = vadd.f32 %v8891_v11, %v9107_v34 }
 0x1bc   :  { %v9354_v7 = vadd.f32 %v8891_v11, %v9111_v29  ;;  %v9358_v2 = vadd.f32 %v8891_v11, %v9115_v26  ;;  %v9362_v54 = vadd.f32 %v8891_v11, %v9119_v33  ;;  %v9366_v47 = vadd.f32 %v8891_v11, %v9123_v12 }
 0x1bd   :  { %v9370_v34 = vadd.f32 %v8891_v11, %v9127_v13  ;;  %v9374_v29 = vadd.f32 %v8891_v11, %v9131_v15  ;;  %v9378_v26 = vadd.f32 %v8891_v11, %v9135_v63  ;;  %v9382_v33 = vadd.f32 %v8891_v11, %v9139_v23 }
 0x1be   :  { %v9386_v12 = vadd.f32 %v8891_v11, %v9143_v46  ;;  %v9390_v13 = vadd.f32 %v8891_v11, %v9147_v31  ;;  %v1171_v15 = vmax.f32 %v9155_v42, 0.0  ;;  %v1173_v63 = vmax.f32 %v9163_v4, 0.0 }
 0x1bf   :  { %14522 = vst [vmem:[#allocation15_spill] sm:$0xff] %v9370_v34  ;;  %14523 = vst [vmem:[#allocation17_spill] sm:$0xff] %v9374_v29  ;;  %v1172_v29 = vmax.f32 %v9159_v62, 0.0  ;;  %v1175_v23 = vmax.f32 %v9171_v53, 0.0  ;;  %v1177_v46 = vmax.f32 %v9179_v60, 0.0  ;;  %v1179_v11 = vmax.f32 %v9187_v32, 0.0 }
 0x1c0   :  { %14524 = vst [vmem:[#allocation14_spill] sm:$0xff] %v9378_v26  ;;  %14525 = vst [vmem:[#allocation16_spill] sm:$0xff] %v9382_v33  ;;  %v1174_v26 = vmax.f32 %v9167_v41, 0.0  ;;  %v1176_v33 = vmax.f32 %v9175_v45, 0.0  ;;  %v1180_v31 = vmax.f32 %v9191_v37, 0.0  ;;  %v1181_v30 = vmax.f32 %v9195_v40, 0.0 }
 0x1c1   :  { %14526 = vst [vmem:[#allocation19_spill] sm:$0xff] %v9386_v12  ;;  %14527 = vst [vmem:[#allocation21_spill] sm:$0xff] %v9390_v13  ;;  %v1178_v12 = vmax.f32 %v9183_v48, 0.0  ;;  %v1182_v42 = vmax.f32 %v9199_v36, 0.0  ;;  %v1183_v62 = vmax.f32 %v9203_v39, 0.0  ;;  %v1184_v4 = vmax.f32 %v9207_v56, 0.0 }
 0x1c2   :  { %v1185_v41 = vmax.f32 %v9211_v61, 0.0  ;;  %v1186_v53 = vmax.f32 %v9215_v16, 0.0  ;;  %v1187_v45 = vmax.f32 %v9219_v24, 0.0  ;;  %v1188_v60 = vmax.f32 %v9223_v22, 0.0  ;;  %v14528_v37 = vld [vmem:[#allocation13_spill] sm:$0xff]  ;;  %v14529_v13 = vld [vmem:[#allocation11_spill] sm:$0xff] }
 0x1c3   :  { %v1189_v48 = vmax.f32 %v9227_v14, 0.0  ;;  %v1190_v32 = vmax.f32 %v9231_v21, 0.0  ;;  %v1191_v40 = vmax.f32 %v14528_v37, 0.0  ;;  %v1192_v36 = vmax.f32 %v14529_v13, 0.0  ;;  %v14530_v34 = vld [vmem:[#allocation12_spill] sm:$0xff] }
 0x1c4   :  { %v1193_v39 = vmax.f32 %v14530_v34, 0.0  ;;  %v1194_v56 = vmax.f32 %v9250_v18, 0.0  ;;  %v1195_v61 = vmax.f32 %v9254_v35, 0.0  ;;  %v1196_v16 = vmax.f32 %v9258_v1, 0.0 }
 0x1c5   :  { %v1197_v24 = vmax.f32 %v9262_v52, 0.0  ;;  %v1198_v22 = vmax.f32 %v9266_v6, 0.0  ;;  %v1199_v14 = vmax.f32 %v9270_v57, 0.0  ;;  %v1200_v21 = vmax.f32 %v9274_v58, 0.0 }
 0x1c6   :  { %v1201_v37 = vmax.f32 %v9278_v19, 0.0  ;;  %v1202_v13 = vmax.f32 %v9282_v9, 0.0  ;;  %v1203_v34 = vmax.f32 %v9286_v44, 0.0  ;;  %v1204_v18 = vmax.f32 %v9290_v8, 0.0 }
 0x1c7   :  { %v1205_v35 = vmax.f32 %v9294_v25, 0.0  ;;  %v1206_v1 = vmax.f32 %v9298_v10, 0.0  ;;  %v1207_v52 = vmax.f32 %v9302_v51, 0.0  ;;  %v1208_v6 = vmax.f32 %v9306_v5, 0.0 }
 0x1c8   :  { %v1209_v57 = vmax.f32 %v9310_v38, 0.0  ;;  %v1210_v58 = vmax.f32 %v9314_v59, 0.0  ;;  %v1211_v19 = vmax.f32 %v9318_v28, 0.0  ;;  %v1212_v9 = vmax.f32 %v9322_v43, 0.0 }
 0x1c9   :  { %v1213_v44 = vmax.f32 %v9326_v17, 0.0  ;;  %v1214_v8 = vmax.f32 %v9330_v27, 0.0  ;;  %v1215_v25 = vmax.f32 %v9334_v55, 0.0  ;;  %v1216_v10 = vmax.f32 %v9338_v50, 0.0  ;;  %v14531_v27 = vld [vmem:[#allocation15_spill] sm:$0xff]  ;;  %v14532_v50 = vld [vmem:[#allocation17_spill] sm:$0xff] }
 0x1ca   :  { %v1217_v51 = vmax.f32 %v9342_v3, 0.0  ;;  %v1218_v5 = vmax.f32 %v9346_v0, 0.0  ;;  %v1219_v38 = vmax.f32 %v9350_v20, 0.0  ;;  %v1220_v59 = vmax.f32 %v9354_v7, 0.0  ;;  %v14533_v0 = vld [vmem:[#allocation14_spill] sm:$0xff]  ;;  %v14534_v7 = vld [vmem:[#allocation16_spill] sm:$0xff] }
 0x1cb   :  { %v1221_v28 = vmax.f32 %v9358_v2, 0.0  ;;  %v1222_v43 = vmax.f32 %v9362_v54, 0.0  ;;  %v1223_v17 = vmax.f32 %v9366_v47, 0.0  ;;  %v1224_v55 = vmax.f32 %v14531_v27, 0.0  ;;  %v14535_v54 = vld [vmem:[#allocation19_spill] sm:$0xff]  ;;  %v14536_v27 = vld [vmem:[#allocation21_spill] sm:$0xff] }
 0x1cc   :  { %v1225_v3 = vmax.f32 %v14532_v50, 0.0  ;;  %v1226_v20 = vmax.f32 %v14533_v0, 0.0  ;;  %v1227_v2 = vmax.f32 %v14534_v7, 0.0  ;;  %v1228_v47 = vmax.f32 %v14535_v54, 0.0 }
 0x1cd   :  { %v1229_v50 = vmax.f32 %v14536_v27, 0.0  ;;  %v1234_v0 = vsel %vm688_vm2, %v1170_v49, -inf  ;;  %v1235_v7 = vsel %vm688_vm2, %v1172_v29, -inf  ;;  %v1237_v54 = vsel %vm688_vm2, %v1171_v15, -inf }
 0x1ce   :  { %v1238_v27 = vsel %vm688_vm2, %v1173_v63, -inf  ;;  %v1240_v49 = vsel %vm688_vm2, %v1174_v26, -inf  ;;  %v1241_v29 = vsel %vm688_vm2, %v1176_v33, -inf  ;;  %v1243_v15 = vsel %vm688_vm2, %v1175_v23, -inf }
 0x1cf   :  { %v1244_v63 = vsel %vm688_vm2, %v1177_v46, -inf  ;;  %v1246_v26 = vsel %vm688_vm2, %v1178_v12, -inf  ;;  %v1247_v33 = vsel %vm688_vm2, %v1180_v31, -inf  ;;  %v1249_v23 = vsel %vm688_vm2, %v1179_v11, -inf }
 0x1d0   :  { %v1250_v46 = vsel %vm688_vm2, %v1181_v30, -inf  ;;  %v1252_v12 = vsel %vm688_vm2, %v1182_v42, -inf  ;;  %v1253_v31 = vsel %vm688_vm2, %v1184_v4, -inf  ;;  %v1255_v11 = vsel %vm688_vm2, %v1183_v62, -inf }
 0x1d1   :  { %v1256_v30 = vsel %vm688_vm2, %v1185_v41, -inf  ;;  %v1258_v42 = vsel %vm688_vm2, %v1186_v53, -inf  ;;  %v1259_v4 = vsel %vm688_vm2, %v1188_v60, -inf  ;;  %v1261_v62 = vsel %vm688_vm2, %v1187_v45, -inf }
 0x1d2   :  { %v1262_v41 = vsel %vm688_vm2, %v1189_v48, -inf  ;;  %v1264_v53 = vsel %vm688_vm2, %v1190_v32, -inf  ;;  %v1265_v60 = vsel %vm688_vm2, %v1192_v36, -inf  ;;  %v1267_v45 = vsel %vm688_vm2, %v1191_v40, -inf }
 0x1d3   :  { %v1268_v48 = vsel %vm688_vm2, %v1193_v39, -inf  ;;  %v1270_v32 = vsel %vm688_vm2, %v1194_v56, -inf  ;;  %v1271_v36 = vsel %vm688_vm2, %v1196_v16, -inf  ;;  %v1273_v40 = vsel %vm688_vm2, %v1195_v61, -inf }
 0x1d4   :  { %v1274_v39 = vsel %vm688_vm2, %v1197_v24, -inf  ;;  %v1276_v56 = vsel %vm688_vm2, %v1198_v22, -inf  ;;  %v1277_v16 = vsel %vm688_vm2, %v1200_v21, -inf  ;;  %v1279_v61 = vsel %vm688_vm2, %v1199_v14, -inf }
 0x1d5   :  { %v1280_v24 = vsel %vm688_vm2, %v1201_v37, -inf  ;;  %v1282_v22 = vsel %vm688_vm2, %v1202_v13, -inf  ;;  %v1283_v21 = vsel %vm688_vm2, %v1204_v18, -inf  ;;  %v1285_v14 = vsel %vm688_vm2, %v1203_v34, -inf }
 0x1d6   :  { %v1286_v37 = vsel %vm688_vm2, %v1205_v35, -inf  ;;  %v1288_v13 = vsel %vm688_vm2, %v1206_v1, -inf  ;;  %v1289_v18 = vsel %vm688_vm2, %v1208_v6, -inf  ;;  %v1291_v34 = vsel %vm688_vm2, %v1207_v52, -inf }
 0x1d7   :  { %v1292_v35 = vsel %vm688_vm2, %v1209_v57, -inf  ;;  %v1294_v1 = vsel %vm688_vm2, %v1210_v58, -inf  ;;  %v1295_v6 = vsel %vm688_vm2, %v1212_v9, -inf  ;;  %v1297_v52 = vsel %vm688_vm2, %v1211_v19, -inf }
 0x1d8   :  { %v1298_v57 = vsel %vm688_vm2, %v1213_v44, -inf  ;;  %v1300_v58 = vsel %vm688_vm2, %v1214_v8, -inf  ;;  %v1301_v9 = vsel %vm688_vm2, %v1216_v10, -inf  ;;  %v1303_v19 = vsel %vm688_vm2, %v1215_v25, -inf }
 0x1d9   :  { %v1304_v44 = vsel %vm688_vm2, %v1217_v51, -inf  ;;  %v1306_v8 = vsel %vm688_vm2, %v1218_v5, -inf  ;;  %v1307_v10 = vsel %vm688_vm2, %v1220_v59, -inf  ;;  %v1309_v25 = vsel %vm688_vm2, %v1219_v38, -inf }
 0x1da   :  { %v1310_v51 = vsel %vm688_vm2, %v1221_v28, -inf  ;;  %v1312_v5 = vsel %vm688_vm2, %v1222_v43, -inf  ;;  %v1313_v59 = vsel %vm688_vm2, %v1224_v55, -inf  ;;  %v1315_v38 = vsel %vm688_vm2, %v1223_v17, -inf }
 0x1db   :  { %v1316_v28 = vsel %vm688_vm2, %v1225_v3, -inf  ;;  %v1318_v43 = vsel %vm688_vm2, %v1226_v20, -inf  ;;  %v1319_v55 = vsel %vm688_vm2, %v1228_v47, -inf  ;;  %v1321_v17 = vsel %vm688_vm2, %v1227_v2, -inf }
 0x1dc   :  { %v1322_v3 = vsel %vm688_vm2, %v1229_v50, -inf  ;;  %v9512_v20 = vmax.f32 %v1234_v0, %v1235_v7  ;;  %v9514_v47 = vmax.f32 %v1237_v54, %v1238_v27  ;;  %v9516_v2 = vmax.f32 %v1240_v49, %v1241_v29 }
 0x1dd   :  { %v9518_v50 = vmax.f32 %v1243_v15, %v1244_v63  ;;  %v9520_v0 = vmax.f32 %v1246_v26, %v1247_v33  ;;  %v9522_v7 = vmax.f32 %v1249_v23, %v1250_v46  ;;  %v9526_v27 = vmax.f32 %v1255_v11, %v1256_v30 }
 0x1de   :  { %14537 = vst [vmem:[#allocation18_spill] sm:$0xff] %v9512_v20  ;;  %14538 = vst [vmem:[#allocation20_spill] sm:$0xff] %v9514_v47  ;;  %v9524_v20 = vmax.f32 %v1252_v12, %v1253_v31  ;;  %v9528_v54 = vmax.f32 %v1258_v42, %v1259_v4  ;;  %v9530_v47 = vmax.f32 %v1261_v62, %v1262_v41 }
 0x1df   :  { %14539 = vst [vmem:[#allocation23_spill] sm:$0xff] %v9516_v2  ;;  %v9532_v29 = vmax.f32 %v1264_v53, %v1265_v60  ;;  %v9534_v49 = vmax.f32 %v1267_v45, %v1268_v48  ;;  %v9536_v2 = vmax.f32 %v1270_v32, %v1271_v36  ;;  %v9538_v15 = vmax.f32 %v1273_v40, %v1274_v39  ;;  %v14554_v36 = vld [vmem:[#allocation35_spill] sm:$0xff] }
 0x1e0   :  { %v9540_v63 = vmax.f32 %v1276_v56, %v1277_v16  ;;  %v9542_v26 = vmax.f32 %v1279_v61, %v1280_v24  ;;  %v9544_v33 = vmax.f32 %v1282_v22, %v1283_v21  ;;  %v9546_v23 = vmax.f32 %v1285_v14, %v1286_v37 }
 0x1e1   :  { %v9548_v46 = vmax.f32 %v1288_v13, %v1289_v18  ;;  %v9550_v12 = vmax.f32 %v1291_v34, %v1292_v35  ;;  %v9552_v31 = vmax.f32 %v1294_v1, %v1295_v6  ;;  %v9554_v11 = vmax.f32 %v1297_v52, %v1298_v57 }
 0x1e2   :  { %14540 = vst [vmem:[#allocation25_spill] sm:$0xff] %v9546_v23  ;;  %v9556_v30 = vmax.f32 %v1300_v58, %v1301_v9  ;;  %v9558_v42 = vmax.f32 %v1303_v19, %v1304_v44  ;;  %v9560_v4 = vmax.f32 %v1306_v8, %v1307_v10  ;;  %v9562_v62 = vmax.f32 %v1309_v25, %v1310_v51 }
 0x1e3   :  { %14541 = vst [vmem:[#allocation22_spill] sm:$0xff] %v9548_v46  ;;  %14542 = vst [vmem:[#allocation24_spill] sm:$0xff] %v9550_v12  ;;  %v9564_v41 = vmax.f32 %v1312_v5, %v1313_v59  ;;  %v9566_v53 = vmax.f32 %v1315_v38, %v1316_v28  ;;  %v9568_v60 = vmax.f32 %v1318_v43, %v1319_v55 }
 0x1e4   :  { %14543 = vst [vmem:[#allocation27_spill] sm:$0xff] %v9552_v31  ;;  %14544 = vst [vmem:[#allocation29_spill] sm:$0xff] %v9554_v11  ;;  %v9570_v45 = vmax.f32 %v1321_v17, %v1322_v3  ;;  %v9594_v14 = vrot.slane %v9518_v50, %v14554_v36  ;;  %v9600_v13 = vrot.slane %v9520_v0, %v14554_v36 }
 0x1e5   :  { %14545 = vst [vmem:[#allocation26_spill] sm:$0xff] %v9556_v30  ;;  %14546 = vst [vmem:[#allocation28_spill] sm:$0xff] %v9558_v42  ;;  %v14553_v48 = vld [vmem:[#allocation18_spill] sm:$0xff]  ;;  %v14555_v39 = vld [vmem:[#allocation20_spill] sm:$0xff]  ;;  %v9606_v34 = vrot.slane %v9522_v7, %v14554_v36  ;;  %v9612_v1 = vrot.slane %v9524_v20, %v14554_v36  ;;  %v9618_v52 = vrot.slane %v9526_v27, %v14554_v36 }
 0x1e6   :  { %14547 = vst [vmem:[#allocation31_spill] sm:$0xff] %v9560_v4  ;;  %14548 = vst [vmem:[#allocation33_spill] sm:$0xff] %v9562_v62  ;;  %v1362_v32 = vcombine.high %v14553_v48, %v14553_v48  ;;  %v9576_v40 = vrot.slane %v14553_v48, %v14554_v36  ;;  %v1379_v56 = vcombine.high %v14555_v39, %v14555_v39  ;;  %v14556_v61 = vld [vmem:[#allocation23_spill] sm:$0xff] }
 0x1e7   :  { %14549 = vst [vmem:[#allocation30_spill] sm:$0xff] %v9564_v41  ;;  %14550 = vst [vmem:[#allocation32_spill] sm:$0xff] %v9566_v53  ;;  %v9582_v16 = vrot.slane %v14555_v39, %v14554_v36  ;;  %v9588_v22 = vrot.slane %v14556_v61, %v14554_v36  ;;  %v9624_v58 = vrot.slane %v9528_v54, %v14554_v36 }
 0x1e8   :  { %14551 = vst [vmem:[#allocation36_spill] sm:$0xff] %v9568_v60  ;;  %14552 = vst [vmem:[#allocation37_spill] sm:$0xff] %v9570_v45  ;;  %v9630_v19 = vrot.slane %v9530_v47, %v14554_v36  ;;  %v9636_v8 = vrot.slane %v9532_v29, %v14554_v36  ;;  %v9642_v25 = vrot.slane %v9534_v49, %v14554_v36 }
 0x1e9   :  { %14557 = vst [vmem:[#allocation38_spill] sm:$0xff] %v9606_v34  ;;  %14558 = vst [vmem:[#allocation39_spill] sm:$0xff] %v9618_v52  ;;  %v9648_v5 = vrot.slane %v9536_v2, %v14554_v36  ;;  %v9654_v38 = vrot.slane %v9538_v15, %v14554_v36  ;;  %v9660_v43 = vrot.slane %v9540_v63, %v14554_v36 }
 0x1ea   :  { %14559 = vst [vmem:[#allocation40_spill] sm:$0xff] %v9624_v58  ;;  %14560 = vst [vmem:[#allocation41_spill] sm:$0xff] %v9630_v19  ;;  %v9666_v17 = vrot.slane %v9542_v26, %v14554_v36  ;;  %v9672_v48 = vrot.slane %v9544_v33, %v14554_v36  ;;  %v9678_v28 = vrot.slane %v9546_v23, %v14554_v36 }
 0x1eb   :  { %14561 = vst [vmem:[#allocation13_spill] sm:$0xff] %v9636_v8  ;;  %14562 = vst [vmem:[#allocation11_spill] sm:$0xff] %v9642_v25  ;;  %v9684_v59 = vrot.slane %v9548_v46, %v14554_v36  ;;  %v9690_v51 = vrot.slane %v9550_v12, %v14554_v36  ;;  %v9696_v10 = vrot.slane %v9552_v31, %v14554_v36 }
 0x1ec   :  { %14563 = vst [vmem:[#allocation12_spill] sm:$0xff] %v9648_v5  ;;  %14564 = vst [vmem:[#allocation15_spill] sm:$0xff] %v9654_v38  ;;  %v9702_v44 = vrot.slane %v9554_v11, %v14554_v36  ;;  %v9708_v9 = vrot.slane %v9556_v30, %v14554_v36  ;;  %v9714_v57 = vrot.slane %v9558_v42, %v14554_v36 }
 0x1ed   :  { %14565 = vst [vmem:[#allocation17_spill] sm:$0xff] %v9660_v43  ;;  %14566 = vst [vmem:[#allocation14_spill] sm:$0xff] %v9666_v17  ;;  %v9720_v6 = vrot.slane %v9560_v4, %v14554_v36  ;;  %v9726_v35 = vrot.slane %v9562_v62, %v14554_v36  ;;  %v9732_v18 = vrot.slane %v9564_v41, %v14554_v36 }
 0x1ee   :  { %14567 = vst [vmem:[#allocation16_spill] sm:$0xff] %v9672_v48  ;;  %14568 = vst [vmem:[#allocation19_spill] sm:$0xff] %v9678_v28  ;;  %v9738_v37 = vrot.slane %v9566_v53, %v14554_v36  ;;  %v9744_v21 = vrot.slane %v9568_v60, %v14554_v36  ;;  %v9750_v24 = vrot.slane %v9570_v45, %v14554_v36 }
 0x1ef   :  { %14569 = vst [vmem:[#allocation21_spill] sm:$0xff] %v9684_v59  ;;  %14570 = vst [vmem:[#allocation18_spill] sm:$0xff] %v9690_v51  ;;  %v1376_v55 = vrot.slane %v1362_v32, %v14554_v36  ;;  %v1377_v53 = vcombine.high %v9576_v40, %v9576_v40  ;;  %v1394_v3 = vcombine.high %v9582_v16, %v9582_v16 }
 0x1f0   :  { %14571 = vst [vmem:[#allocation20_spill] sm:$0xff] %v9696_v10  ;;  %14572 = vst [vmem:[#allocation23_spill] sm:$0xff] %v9702_v44 }
 0x1f1   :  { %14573 = vst [vmem:[#allocation42_spill] sm:$0xff] %v9708_v9  ;;  %14574 = vst [vmem:[#allocation43_spill] sm:$0xff] %v9714_v57  ;;  %v1378_v60 = vcombine.high %v1376_v55, %v1376_v55  ;;  %v2049_v39 = vsel %vm2034_vm3, %v1376_v55, -inf  ;;  %v2042_v32 = vsel %vm2034_vm3, %v1377_v53, -inf  ;;  %v2070_v4 = vsel %vm2034_vm3, %v1394_v3, -inf }
 0x1f2   :  { %14575 = vst [vmem:[#allocation44_spill] sm:$0xff] %v9720_v6  ;;  %14576 = vst [vmem:[#allocation45_spill] sm:$0xff] %v9726_v35  ;;  %v2050_v41 = vrot.slane %v2049_v39, 4  ;;  %v2071_v9 = vrot.slane %v2070_v4, 4 }
 0x1f3   :  { %14577 = vst [vmem:[#allocation46_spill] sm:$0xff] %v9732_v18  ;;  %14578 = vst [vmem:[#allocation47_spill] sm:$0xff] %v9738_v37  ;;  %v1393_v37 = vrot.slane %v1379_v56, %v14554_v36  ;;  %v2043_v56 = vrot.slane %v2042_v32, 4  ;;  %v2056_v6 = vsel %vm2034_vm3, %v1378_v60, -inf }
 0x1f4   :  { %14579 = vst [vmem:[#allocation48_spill] sm:$0xff] %v9744_v21  ;;  %14580 = vst [vmem:[#allocation49_spill] sm:$0xff] %v9750_v24  ;;  %v2035_v21 = vsel %vm2034_vm3, %v9576_v40, -inf  ;;  %v2063_v24 = vsel %vm2034_vm3, %v9582_v16, -inf  ;;  %v2051_v57 = vmax.f32 %v2049_v39, %v2050_v41  ;;  %v2057_v40 = vrot.slane %v2056_v6, 4 }
 0x1f5   :  { %v2036_v18 = vrot.slane %v2035_v21, 4  ;;  %v1395_v45 = vcombine.high %v1393_v37, %v1393_v37  ;;  %v2064_v35 = vrot.slane %v2063_v24, 4  ;;  %v2044_v55 = vmax.f32 %v2042_v32, %v2043_v56 }
 0x1f6   :  { %v2077_v44 = vsel %vm2034_vm3, %v1393_v37, -inf  ;;  %v2052_v11 = vrot.slane %v2051_v57, 2  ;;  %v2058_v53 = vmax.f32 %v2056_v6, %v2057_v40  ;;  %v2072_v31 = vmax.f32 %v2070_v4, %v2071_v9 }
 0x1f7   :  { %v2037_v62 = vmax.f32 %v2035_v21, %v2036_v18  ;;  %v2065_v42 = vmax.f32 %v2063_v24, %v2064_v35  ;;  %v2084_v16 = vsel %vm2034_vm3, %v1395_v45, -inf  ;;  %v2045_v18 = vrot.slane %v2044_v55, 2 }
 0x1f8   :  { %v2078_v51 = vrot.slane %v2077_v44, 4  ;;  %v2085_v60 = vrot.slane %v2084_v16, 4  ;;  %v2053_v12 = vmax.f32 %v2051_v57, %v2052_v11  ;;  %v2059_v3 = vrot.slane %v2058_v53, 2 }
 0x1f9   :  { %v2038_v30 = vrot.slane %v2037_v62, 2  ;;  %v2066_v10 = vrot.slane %v2065_v42, 2  ;;  %v2073_v39 = vrot.slane %v2072_v31, 2  ;;  %v2046_v35 = vmax.f32 %v2044_v55, %v2045_v18 }
 0x1fa   :  { %v2079_v59 = vmax.f32 %v2077_v44, %v2078_v51  ;;  %v2086_v32 = vmax.f32 %v2084_v16, %v2085_v60  ;;  %v2054_v56 = vrot.slane %v2053_v12, 1  ;;  %v2060_v37 = vmax.f32 %v2058_v53, %v2059_v3 }
 0x1fb   :  { %v2039_v21 = vmax.f32 %v2037_v62, %v2038_v30  ;;  %v2067_v41 = vmax.f32 %v2065_v42, %v2066_v10  ;;  %v2074_v45 = vmax.f32 %v2072_v31, %v2073_v39  ;;  %v2047_v6 = vrot.slane %v2046_v35, 1  ;;  %v14658_v31 = vld [vmem:[#allocation37_spill] sm:$0xff] }
 0x1fc   :  { %v2080_v40 = vrot.slane %v2079_v59, 2  ;;  %v2087_v4 = vrot.slane %v2086_v32, 2  ;;  %v2055_v30 = vmax.f32 %v2053_v12, %v2054_v56  ;;  %v2061_v62 = vrot.slane %v2060_v37, 1 }
 0x1fd   :  { %v2040_v24 = vrot.slane %v2039_v21, 1  ;;  %v2068_v46 = vrot.slane %v2067_v41, 1  ;;  %v2075_v23 = vrot.slane %v2074_v45, 1  ;;  %v2048_v11 = vmax.f32 %v2046_v35, %v2047_v6 }
 0x1fe   :  { %v2081_v57 = vmax.f32 %v2079_v59, %v2080_v40  ;;  %v2088_v42 = vmax.f32 %v2086_v32, %v2087_v4  ;;  %v14581_v44 = vcombine.high %v14556_v61, %v14556_v61  ;;  %v2062_v51 = vmax.f32 %v2060_v37, %v2061_v62  ;;  %v14657_v61 = vld [vmem:[#allocation48_spill] sm:$0xff] }
 0x1ff   :  { %v2041_v28 = vmax.f32 %v2039_v21, %v2040_v24  ;;  %v2069_v9 = vmax.f32 %v2067_v41, %v2068_v46  ;;  %v2076_v55 = vmax.f32 %v2074_v45, %v2075_v23  ;;  %v14582_v12 = vcombine.high %v9518_v50, %v9518_v50  ;;  %v14654_v50 = vld [vmem:[#allocation36_spill] sm:$0xff] }
 0x200   :  { %v9772_v10 = vrot.slane %v14581_v44, %v14554_v36  ;;  %v2082_v16 = vrot.slane %v2081_v57, 1  ;;  %v2089_v59 = vrot.slane %v2088_v42, 1  ;;  %v14584_v23 = vcombine.high %v9520_v0, %v9520_v0 }
 0x201   :  { %v9780_v46 = vrot.slane %v14582_v12, %v14554_v36  ;;  %v3103_v53 = vsel %vm3102_vm5, %v2048_v11, %v2041_v28  ;;  %v14586_v60 = vcombine.high %v9522_v7, %v9522_v7  ;;  %v14588_v35 = vcombine.high %v9524_v20, %v9524_v20 }
 0x202   :  { %v3105_v21 = vsel %vm3104_vm6, %v2055_v30, %v3103_v53  ;;  %v9790_v18 = vrot.slane %v14584_v23, %v14554_v36  ;;  %v2083_v28 = vmax.f32 %v2081_v57, %v2082_v16  ;;  %v2090_v41 = vmax.f32 %v2088_v42, %v2089_v59 }
 0x203   :  { %14583 = vst [vmem:[#allocation50_spill] sm:$0xff] %v9780_v46  ;;  %v9798_v3 = vrot.slane %v14586_v60, %v14554_v36  ;;  %v3107_v39 = vsel %vm3106_vm7, %v2062_v51, %v3105_v21  ;;  %v9808_v32 = vrot.slane %v14588_v35, %v14554_v36  ;;  %v14590_v56 = vcombine.high %v9526_v27, %v9526_v27 }
 0x204   :  { %14585 = vst [vmem:[#allocation51_spill] sm:$0xff] %v9790_v18  ;;  %v3109_v0 = vsel %vm3108_vm8, %v2069_v9, %v3107_v39  ;;  %v14592_v20 = vcombine.high %v9528_v54, %v9528_v54  ;;  %v14594_v27 = vcombine.high %v9530_v47, %v9530_v47  ;;  %v14596_v54 = vcombine.high %v9532_v29, %v9532_v29  ;;  %v14610_v39 = vld [vmem:[#allocation25_spill] sm:$0xff] }
 0x205   :  { %14587 = vst [vmem:[#allocation52_spill] sm:$0xff] %v9798_v3  ;;  %14589 = vst [vmem:[#allocation53_spill] sm:$0xff] %v9808_v32  ;;  %v9816_v37 = vrot.slane %v14590_v56, %v14554_v36  ;;  %v3111_v45 = vsel %vm3110_vm9, %v2076_v55, %v3109_v0  ;;  %v14598_v47 = vcombine.high %v9534_v49, %v9534_v49  ;;  %v10024_v24 = vsel %vm2034_vm3, %v9618_v52, -inf }
 0x206   :  { %v9825_v40 = vrot.slane %v14592_v20, %v14554_v36  ;;  %v3113_v30 = vsel %vm3112_vm10, %v2083_v28, %v3111_v45  ;;  %v9834_v62 = vrot.slane %v14594_v27, %v14554_v36  ;;  %v9842_v11 = vrot.slane %v14596_v54, %v14554_v36  ;;  %v14614_v45 = vld [vmem:[#allocation22_spill] sm:$0xff]  ;;  %v14618_v54 = vld [vmem:[#allocation24_spill] sm:$0xff] }
 0x207   :  { %14591 = vst [vmem:[#allocation54_spill] sm:$0xff] %v9816_v37  ;;  %v3115_v57 = vsel %vm3114_vm11, %v2090_v41, %v3113_v30  ;;  %v9851_v44 = vrot.slane %v14598_v47, %v14554_v36  ;;  %v14600_v29 = vcombine.high %v9536_v2, %v9536_v2  ;;  %v14602_v49 = vcombine.high %v9538_v15, %v9538_v15 }
 0x208   :  { %14593 = vst [vmem:[#allocation55_spill] sm:$0xff] %v9825_v40  ;;  %14595 = vst [vmem:[#allocation56_spill] sm:$0xff] %v9834_v62  ;;  %v14604_v53 = vcombine.high %v9540_v63, %v9540_v63  ;;  %v14606_v23 = vcombine.high %v9542_v26, %v9542_v26  ;;  %v14608_v28 = vcombine.high %v9544_v33, %v9544_v33  ;;  %v14613_v26 = vld [vmem:[#allocation19_spill] sm:$0xff]  ;;  %v14617_v33 = vld [vmem:[#allocation21_spill] sm:$0xff]  ;;  %v10028_v6 = vsel %vm2034_vm3, %v9624_v58, -inf }
 0x209   :  { %14597 = vst [vmem:[#allocation57_spill] sm:$0xff] %v9842_v11  ;;  %14599 = vst [vmem:[#allocation58_spill] sm:$0xff] %v9851_v44  ;;  %v9860_v55 = vrot.slane %v14600_v29, %v14554_v36  ;;  %v9868_v16 = vrot.slane %v14602_v49, %v14554_v36  ;;  %v14611_v0 = vcombine.high %v14610_v39, %v14610_v39  ;;  %v14621_v29 = vld [vmem:[#allocation18_spill] sm:$0xff]  ;;  %v14625_v39 = vld [vmem:[#allocation20_spill] sm:$0xff]  ;;  %v10044_v52 = vsel %vm2034_vm3, %v9648_v5, -inf }
 0x20a   :  { %3237 = vst.msk [vmem:[#allocation2 + $0x11] sm:$0xff] %vm688_vm2, %v3115_v57  ;;  %v9876_v21 = vrot.slane %v14604_v53, %v14554_v36  ;;  %v9884_v60 = vrot.slane %v14606_v23, %v14554_v36  ;;  %v9892_v41 = vrot.slane %v14608_v28, %v14554_v36  ;;  %v14615_v20 = vcombine.high %v14614_v45, %v14614_v45  ;;  %v14622_v53 = vld [vmem:[#allocation27_spill] sm:$0xff]  ;;  %v14626_v45 = vld [vmem:[#allocation29_spill] sm:$0xff]  ;;  %v14630_v49 = vld [vmem:[#allocation26_spill] sm:$0xff] }
 0x20b   :  { %14601 = vst [vmem:[#allocation59_spill] sm:$0xff] %v9860_v55  ;;  %14603 = vst [vmem:[#allocation60_spill] sm:$0xff] %v9868_v16  ;;  %v9900_v35 = vrot.slane %v14611_v0, %v14554_v36  ;;  %v14619_v57 = vcombine.high %v14618_v54, %v14618_v54  ;;  %v14623_v23 = vcombine.high %v14622_v53, %v14622_v53  ;;  %v14629_v54 = vld [vmem:[#allocation23_spill] sm:$0xff]  ;;  %v14633_v53 = vld [vmem:[#allocation42_spill] sm:$0xff]  ;;  %v10048_v58 = vsel %vm2034_vm3, %v9654_v38, -inf }
 0x20c   :  { %14605 = vst [vmem:[#allocation61_spill] sm:$0xff] %v9876_v21  ;;  %14607 = vst [vmem:[#allocation62_spill] sm:$0xff] %v9884_v60  ;;  %v9908_v30 = vrot.slane %v14615_v20, %v14554_v36  ;;  %v14627_v20 = vcombine.high %v14626_v45, %v14626_v45  ;;  %v14631_v56 = vcombine.high %v14630_v49, %v14630_v49  ;;  %v14634_v0 = vld [vmem:[#allocation28_spill] sm:$0xff]  ;;  %v14637_v45 = vld [vmem:[#allocation43_spill] sm:$0xff]  ;;  %v10064_v5 = vsel %vm2034_vm3, %v14613_v26, -inf }
 0x20d   :  { %14609 = vst [vmem:[#allocation63_spill] sm:$0xff] %v9892_v41  ;;  %14612 = vst [vmem:[#allocation25_spill] sm:$0xff] %v9900_v35  ;;  %v9916_v47 = vrot.slane %v14619_v57, %v14554_v36  ;;  %v9924_v28 = vrot.slane %v14623_v23, %v14554_v36  ;;  %v14635_v15 = vcombine.high %v14634_v0, %v14634_v0  ;;  %v14638_v57 = vld [vmem:[#allocation31_spill] sm:$0xff]  ;;  %v14642_v23 = vld [vmem:[#allocation33_spill] sm:$0xff]  ;;  %v10068_v38 = vsel %vm2034_vm3, %v14617_v33, -inf }
 0x20e   :  { %14616 = vst [vmem:[#allocation22_spill] sm:$0xff] %v9908_v30  ;;  %v9932_v27 = vrot.slane %v14627_v20, %v14554_v36  ;;  %v9940_v63 = vrot.slane %v14631_v56, %v14554_v36  ;;  %v14639_v59 = vcombine.high %v14638_v57, %v14638_v57  ;;  %v14641_v56 = vld [vmem:[#allocation44_spill] sm:$0xff]  ;;  %v14643_v51 = vcombine.high %v14642_v23, %v14642_v23  ;;  %v14646_v20 = vld [vmem:[#allocation30_spill] sm:$0xff] }
 0x20f   :  { %14620 = vst [vmem:[#allocation24_spill] sm:$0xff] %v9916_v47  ;;  %14624 = vst [vmem:[#allocation27_spill] sm:$0xff] %v9924_v28  ;;  %v9948_v2 = vrot.slane %v14635_v15, %v14554_v36  ;;  %v14645_v15 = vld [vmem:[#allocation45_spill] sm:$0xff]  ;;  %v14647_v4 = vcombine.high %v14646_v20, %v14646_v20  ;;  %v14650_v49 = vld [vmem:[#allocation32_spill] sm:$0xff]  ;;  %v10084_v26 = vsel %vm2034_vm3, %v14633_v53, -inf  ;;  %v10088_v33 = vsel %vm2034_vm3, %v14637_v45, -inf }
 0x210   :  { %14628 = vst [vmem:[#allocation29_spill] sm:$0xff] %v9932_v27  ;;  %14632 = vst [vmem:[#allocation26_spill] sm:$0xff] %v9940_v63  ;;  %v9956_v12 = vrot.slane %v14639_v59, %v14554_v36  ;;  %v9964_v42 = vrot.slane %v14643_v51, %v14554_v36  ;;  %v14649_v59 = vld [vmem:[#allocation46_spill] sm:$0xff]  ;;  %v14651_v7 = vcombine.high %v14650_v49, %v14650_v49  ;;  %v14653_v51 = vld [vmem:[#allocation47_spill] sm:$0xff]  ;;  %v10108_v45 = vsel %vm2034_vm3, %v14657_v61, -inf }
 0x211   :  { %14636 = vst [vmem:[#allocation28_spill] sm:$0xff] %v9948_v2  ;;  %v3414_v9 = vld [vmem:[#allocation2 + $0x10] sm:$0xff]  ;;  %v9972_v57 = vrot.slane %v14647_v4, %v14554_v36  ;;  %v14655_v4 = vcombine.high %v14654_v50, %v14654_v50  ;;  %v10007_v50 = vsel %vm2034_vm3, %v9594_v14, -inf  ;;  %v10104_v53 = vsel %vm2034_vm3, %v14653_v51, -inf  ;;  %14666 = vst [vmem:[#allocation68_spill] sm:$0xff] %v10108_v45 }
 0x212   :  { %14640 = vst [vmem:[#allocation31_spill] sm:$0xff] %v9956_v12  ;;  %14644 = vst [vmem:[#allocation33_spill] sm:$0xff] %v9964_v42  ;;  %v9980_v23 = vrot.slane %v14651_v7, %v14554_v36  ;;  %v3286_v0 = vld [vmem:[#allocation2 + $0x11] sm:$0xff]  ;;  %3446 = vrot.lane.b32.xlu0 %v3414_v9, %s8041_s25  ;;  %v14659_v7 = vcombine.high %v14658_v31, %v14658_v31  ;;  %v10003_v9 = vsel %vm2034_vm3, %v9588_v22, -inf  ;;  %v10015_v31 = vsel %vm2034_vm3, %v9606_v34, -inf }
 0x213   :  { %14648 = vst [vmem:[#allocation30_spill] sm:$0xff] %v9972_v57  ;;  %v9989_v20 = vrot.slane %v14655_v4, %v14554_v36  ;;  %v10011_v4 = vsel %vm2034_vm3, %v9600_v13, -inf  ;;  %3319 = vrot.lane.b32.xlu1 %v3286_v0, %s8041_s25  ;;  %v10036_v34 = vsel %vm2034_vm3, %v9636_v8, -inf  ;;  %v10040_v0 = vsel %vm2034_vm3, %v9642_v25, -inf  ;;  %14665 = vst [vmem:[#allocation67_spill] sm:$0xff] %v10104_v53 }
 0x214   :  { %14652 = vst [vmem:[#allocation32_spill] sm:$0xff] %v9980_v23  ;;  %v9997_v49 = vrot.slane %v14659_v7, %v14554_v36  ;;  %v14661_v23 = vld [vmem:[#allocation49_spill] sm:$0xff]  ;;  %v10020_v7 = vsel %vm2034_vm3, %v9612_v1, -inf  ;;  %v10032_v36 = vsel %vm2034_vm3, %v9630_v19, -inf  ;;  %v10052_v19 = vsel %vm2034_vm3, %v9660_v43, -inf }
 0x215   :  { %14656 = vst [vmem:[#allocation36_spill] sm:$0xff] %v9989_v20  ;;  %v10056_v8 = vsel %vm2034_vm3, %v9666_v17, -inf  ;;  %v10060_v25 = vsel %vm2034_vm3, %v9672_v48, -inf  ;;  %v10072_v43 = vsel %vm2034_vm3, %v14621_v29, -inf  ;;  %v10076_v17 = vsel %vm2034_vm3, %v14625_v39, -inf }
 0x216   :  { %14660 = vst [vmem:[#allocation37_spill] sm:$0xff] %v9997_v49  ;;  %v10080_v48 = vsel %vm2034_vm3, %v14629_v54, -inf  ;;  %v10092_v29 = vsel %vm2034_vm3, %v14641_v56, -inf  ;;  %v10096_v39 = vsel %vm2034_vm3, %v14645_v15, -inf  ;;  %v10100_v54 = vsel %vm2034_vm3, %v14649_v59, -inf }
 0x217   :  { %14662 = vst [vmem:[#allocation64_spill] sm:$0xff] %v10092_v29  ;;  %14663 = vst [vmem:[#allocation65_spill] sm:$0xff] %v10096_v39  ;;  %v10112_v56 = vsel %vm2034_vm3, %v14661_v23, -inf  ;;  %v14669_v39 = vcombine.high %v9588_v22, %v9588_v22  ;;  %v10179_v51 = vsel %vm2034_vm3, %v9772_v10, -inf  ;;  %v14670_v45 = vcombine.high %v9594_v14, %v9594_v14 }
 0x218   :  { %14664 = vst [vmem:[#allocation66_spill] sm:$0xff] %v10100_v54  ;;  %14667 = vst [vmem:[#allocation69_spill] sm:$0xff] %v10112_v56  ;;  %v10190_v23 = vsel %vm2034_vm3, %v9780_v46, -inf  ;;  %v10201_v61 = vsel %vm2034_vm3, %v9790_v18, -inf  ;;  %v10212_v22 = vsel %vm2034_vm3, %v9798_v3, -inf  ;;  %v10223_v14 = vsel %vm2034_vm3, %v9808_v32, -inf }
 0x219   :  { %v10175_v53 = vsel %vm2034_vm3, %v14669_v39, -inf  ;;  %v10186_v59 = vsel %vm2034_vm3, %v14670_v45, -inf  ;;  %14672 = vst [vmem:[#allocation71_spill] sm:$0xff] %v10190_v23  ;;  %v14673_v39 = vcombine.high %v9600_v13, %v9600_v13  ;;  %14674 = vst [vmem:[#allocation72_spill] sm:$0xff] %v10201_v61  ;;  %v14675_v45 = vld [vmem:[#allocation38_spill] sm:$0xff]  ;;  %v10234_v13 = vsel %vm2034_vm3, %v9816_v37, -inf }
 0x21a   :  { %14671 = vst [vmem:[#allocation70_spill] sm:$0xff] %v10186_v59  ;;  %v14676_v59 = vcombine.high %v14675_v45, %v14675_v45  ;;  %14678 = vst [vmem:[#allocation73_spill] sm:$0xff] %v10212_v22  ;;  %v10245_v45 = vsel %vm2034_vm3, %v9825_v40, -inf }
 0x21b   :  { %v14668_v56 = vld [vmem:[#allocation32_spill] sm:$0xff]  ;;  %v10197_v15 = vsel %vm2034_vm3, %v14673_v39, -inf  ;;  %v14679_v39 = vcombine.high %v9612_v1, %v9612_v1  ;;  %14681 = vst [vmem:[#allocation75_spill] sm:$0xff] %v10223_v14  ;;  %14685 = vst [vmem:[#allocation76_spill] sm:$0xff] %v10234_v13  ;;  %v10256_v1 = vsel %vm2034_vm3, %v9834_v62, -inf }
 0x21c   :  { %v10208_v46 = vsel %vm2034_vm3, %v14676_v59, -inf  ;;  %v14682_v59 = vld [vmem:[#allocation39_spill] sm:$0xff]  ;;  %14689 = vst [vmem:[#allocation77_spill] sm:$0xff] %v10245_v45  ;;  %14693 = vst [vmem:[#allocation78_spill] sm:$0xff] %v10256_v1 }
 0x21d   :  { %14677 = vst [vmem:[#allocation38_spill] sm:$0xff] %v10208_v46  ;;  %v10219_v18 = vsel %vm2034_vm3, %v14679_v39, -inf  ;;  %v14683_v46 = vcombine.high %v14682_v59, %v14682_v59  ;;  %v14686_v39 = vld [vmem:[#allocation40_spill] sm:$0xff]  ;;  %v10267_v59 = vsel %vm2034_vm3, %v9842_v11, -inf }
 0x21e   :  { %14680 = vst [vmem:[#allocation74_spill] sm:$0xff] %v10219_v18  ;;  %v14687_v18 = vcombine.high %v14686_v39, %v14686_v39  ;;  %14697 = vst [vmem:[#allocation79_spill] sm:$0xff] %v10267_v59  ;;  %v10278_v39 = vsel %vm2034_vm3, %v9851_v44, -inf }
 0x21f   :  { %v10230_v3 = vsel %vm2034_vm3, %v14683_v46, -inf  ;;  %v14690_v46 = vld [vmem:[#allocation41_spill] sm:$0xff]  ;;  %14701 = vst [vmem:[#allocation80_spill] sm:$0xff] %v10278_v39 }
 0x220   :  { %14684 = vst [vmem:[#allocation39_spill] sm:$0xff] %v10230_v3  ;;  %v10241_v32 = vsel %vm2034_vm3, %v14687_v18, -inf  ;;  %v14691_v3 = vcombine.high %v14690_v46, %v14690_v46  ;;  %v14694_v18 = vld [vmem:[#allocation13_spill] sm:$0xff]  ;;  %v10289_v46 = vsel %vm2034_vm3, %v9860_v55, -inf }
 0x221   :  { %14688 = vst [vmem:[#allocation40_spill] sm:$0xff] %v10241_v32  ;;  %v14695_v32 = vcombine.high %v14694_v18, %v14694_v18  ;;  %14705 = vst [vmem:[#allocation81_spill] sm:$0xff] %v10289_v46  ;;  %v10300_v18 = vsel %vm2034_vm3, %v9868_v16, -inf }
 0x222   :  { %v10252_v37 = vsel %vm2034_vm3, %v14691_v3, -inf  ;;  %v14698_v3 = vld [vmem:[#allocation11_spill] sm:$0xff]  ;;  %14709 = vst [vmem:[#allocation82_spill] sm:$0xff] %v10300_v18 }
 0x223   :  { %14692 = vst [vmem:[#allocation41_spill] sm:$0xff] %v10252_v37  ;;  %v10263_v40 = vsel %vm2034_vm3, %v14695_v32, -inf  ;;  %v14699_v37 = vcombine.high %v14698_v3, %v14698_v3  ;;  %v14702_v32 = vld [vmem:[#allocation12_spill] sm:$0xff]  ;;  %v10311_v3 = vsel %vm2034_vm3, %v9876_v21, -inf }
 0x224   :  { %14696 = vst [vmem:[#allocation13_spill] sm:$0xff] %v10263_v40  ;;  %v14703_v40 = vcombine.high %v14702_v32, %v14702_v32  ;;  %14713 = vst [vmem:[#allocation83_spill] sm:$0xff] %v10311_v3  ;;  %v10322_v32 = vsel %vm2034_vm3, %v9884_v60, -inf }
 0x225   :  { %v10274_v62 = vsel %vm2034_vm3, %v14699_v37, -inf  ;;  %v14706_v37 = vld [vmem:[#allocation15_spill] sm:$0xff]  ;;  %14717 = vst [vmem:[#allocation84_spill] sm:$0xff] %v10322_v32 }
 0x226   :  { %14700 = vst [vmem:[#allocation11_spill] sm:$0xff] %v10274_v62  ;;  %v10285_v11 = vsel %vm2034_vm3, %v14703_v40, -inf  ;;  %v14707_v62 = vcombine.high %v14706_v37, %v14706_v37  ;;  %v14710_v40 = vld [vmem:[#allocation17_spill] sm:$0xff]  ;;  %v10333_v37 = vsel %vm2034_vm3, %v9892_v41, -inf }
 0x227   :  { %14704 = vst [vmem:[#allocation12_spill] sm:$0xff] %v10285_v11  ;;  %v14711_v11 = vcombine.high %v14710_v40, %v14710_v40  ;;  %14721 = vst [vmem:[#allocation85_spill] sm:$0xff] %v10333_v37  ;;  %v10344_v40 = vsel %vm2034_vm3, %v9900_v35, -inf }
 0x228   :  { %v10296_v44 = vsel %vm2034_vm3, %v14707_v62, -inf  ;;  %v14714_v62 = vld [vmem:[#allocation14_spill] sm:$0xff]  ;;  %14725 = vst [vmem:[#allocation86_spill] sm:$0xff] %v10344_v40 }
 0x229   :  { %14708 = vst [vmem:[#allocation15_spill] sm:$0xff] %v10296_v44  ;;  %v10307_v55 = vsel %vm2034_vm3, %v14711_v11, -inf  ;;  %v14715_v44 = vcombine.high %v14714_v62, %v14714_v62  ;;  %v14718_v11 = vld [vmem:[#allocation16_spill] sm:$0xff]  ;;  %v10355_v62 = vsel %vm2034_vm3, %v9908_v30, -inf }
 0x22a   :  { %14712 = vst [vmem:[#allocation17_spill] sm:$0xff] %v10307_v55  ;;  %v14719_v55 = vcombine.high %v14718_v11, %v14718_v11  ;;  %14729 = vst [vmem:[#allocation87_spill] sm:$0xff] %v10355_v62  ;;  %v10366_v11 = vsel %vm2034_vm3, %v9916_v47, -inf }
 0x22b   :  { %v10318_v16 = vsel %vm2034_vm3, %v14715_v44, -inf  ;;  %v14722_v44 = vld [vmem:[#allocation19_spill] sm:$0xff]  ;;  %14733 = vst [vmem:[#allocation88_spill] sm:$0xff] %v10366_v11 }
 0x22c   :  { %14716 = vst [vmem:[#allocation14_spill] sm:$0xff] %v10318_v16  ;;  %v10329_v21 = vsel %vm2034_vm3, %v14719_v55, -inf  ;;  %v14723_v16 = vcombine.high %v14722_v44, %v14722_v44  ;;  %v14726_v55 = vld [vmem:[#allocation21_spill] sm:$0xff]  ;;  %v10377_v44 = vsel %vm2034_vm3, %v9924_v28, -inf }
 0x22d   :  { %14720 = vst [vmem:[#allocation16_spill] sm:$0xff] %v10329_v21  ;;  %v14727_v21 = vcombine.high %v14726_v55, %v14726_v55  ;;  %14737 = vst [vmem:[#allocation89_spill] sm:$0xff] %v10377_v44  ;;  %v10388_v55 = vsel %vm2034_vm3, %v9932_v27, -inf }
 0x22e   :  { %v10340_v60 = vsel %vm2034_vm3, %v14723_v16, -inf  ;;  %v14730_v16 = vld [vmem:[#allocation18_spill] sm:$0xff]  ;;  %14741 = vst [vmem:[#allocation90_spill] sm:$0xff] %v10388_v55 }
 0x22f   :  { %14724 = vst [vmem:[#allocation19_spill] sm:$0xff] %v10340_v60  ;;  %v10351_v41 = vsel %vm2034_vm3, %v14727_v21, -inf  ;;  %v14731_v60 = vcombine.high %v14730_v16, %v14730_v16  ;;  %v14734_v21 = vld [vmem:[#allocation20_spill] sm:$0xff]  ;;  %v10399_v16 = vsel %vm2034_vm3, %v9940_v63, -inf }
 0x230   :  { %14728 = vst [vmem:[#allocation21_spill] sm:$0xff] %v10351_v41  ;;  %v14735_v41 = vcombine.high %v14734_v21, %v14734_v21  ;;  %14745 = vst [vmem:[#allocation91_spill] sm:$0xff] %v10399_v16  ;;  %v10410_v21 = vsel %vm2034_vm3, %v9948_v2, -inf  ;;  %v14755_v2 = vld [vmem:[#allocation45_spill] sm:$0xff]  ;;  %v14905_v16 = vld [vmem:[#allocation64_spill] sm:$0xff] }
 0x231   :  { %v10362_v35 = vsel %vm2034_vm3, %v14731_v60, -inf  ;;  %v14738_v60 = vld [vmem:[#allocation23_spill] sm:$0xff]  ;;  %14749 = vst [vmem:[#allocation92_spill] sm:$0xff] %v10410_v21  ;;  %v14756_v21 = vcombine.high %v14755_v2, %v14755_v2 }
 0x232   :  { %14732 = vst [vmem:[#allocation18_spill] sm:$0xff] %v10362_v35  ;;  %v10373_v30 = vsel %vm2034_vm3, %v14735_v41, -inf  ;;  %v14739_v35 = vcombine.high %v14738_v60, %v14738_v60  ;;  %v14742_v41 = vld [vmem:[#allocation42_spill] sm:$0xff]  ;;  %v7859_v60 = vld [vmem:[%s13998_s4 + $0x118] sm:$0xff]  }
 0x233   :  { %14736 = vst [vmem:[#allocation20_spill] sm:$0xff] %v10373_v30  ;;  %v14743_v30 = vcombine.high %v14742_v41, %v14742_v41  ;;  %v10431_v41 = vsel %vm2034_vm3, %v14756_v21, -inf  ;;  %7761 = vmatprep.subr.bf16.mxu0 %v7859_v60  ;;  %v14763_v21 = vld [vmem:[#allocation47_spill] sm:$0xff] }
 0x234   :  { %v10384_v47 = vsel %vm2034_vm3, %v14739_v35, -inf  ;;  %v14746_v35 = vld [vmem:[#allocation43_spill] sm:$0xff]  ;;  %14757 = vst [vmem:[#allocation45_spill] sm:$0xff] %v10431_v41  ;;  %v14764_v41 = vcombine.high %v14763_v21, %v14763_v21  ;;  %7762 = vmatpush3.bf16.msra.mxu0 %v7859_v60  ;;  %v14770_v21 = vld [vmem:[#allocation69_spill] sm:$0xff] }
 0x235   :  { %14740 = vst [vmem:[#allocation23_spill] sm:$0xff] %v10384_v47  ;;  %v10395_v28 = vsel %vm2034_vm3, %v14743_v30, -inf  ;;  %v14747_v47 = vcombine.high %v14746_v35, %v14746_v35  ;;  %v14750_v30 = vld [vmem:[#allocation44_spill] sm:$0xff]  ;;  %v10468_v35 = vsel %vm2034_vm3, %v9989_v20, -inf }
 0x236   :  { %14744 = vst [vmem:[#allocation42_spill] sm:$0xff] %v10395_v28  ;;  %v14751_v28 = vcombine.high %v14750_v30, %v14750_v30  ;;  %v10457_v30 = vsel %vm2034_vm3, %v14668_v56, -inf }
 0x237   :  { %v10406_v27 = vsel %vm2034_vm3, %v14747_v47, -inf  ;;  %v10424_v47 = vsel %vm2034_vm3, %v9956_v12, -inf  ;;  %14766 = vst [vmem:[#allocation95_spill] sm:$0xff] %v10457_v30 }
 0x238   :  { %14748 = vst [vmem:[#allocation43_spill] sm:$0xff] %v10406_v27  ;;  %v10417_v63 = vsel %vm2034_vm3, %v14751_v28, -inf  ;;  %14753 = vst [vmem:[#allocation93_spill] sm:$0xff] %v10424_v47  ;;  %v10435_v28 = vsel %vm2034_vm3, %v9964_v42, -inf  ;;  %v10446_v27 = vsel %vm2034_vm3, %v9972_v57, -inf  ;;  %v10453_v42 = vsel %vm2034_vm3, %v14764_v41, -inf }
 0x239   :  { %14752 = vst [vmem:[#allocation44_spill] sm:$0xff] %v10417_v63  ;;  %14758 = vst [vmem:[#allocation94_spill] sm:$0xff] %v10435_v28  ;;  %v14759_v63 = vld [vmem:[#allocation46_spill] sm:$0xff]  ;;  %v14777_v41 = vcombine.high %v9772_v10, %v9772_v10  ;;  %v14785_v10 = vrot.slane %v10011_v4, 4  ;;  %v14926_v28 = vld [vmem:[#allocation67_spill] sm:$0xff] }
 0x23a   :  { %v14760_v29 = vcombine.high %v14759_v63, %v14759_v63  ;;  %14765 = vst [vmem:[#allocation47_spill] sm:$0xff] %v10453_v42  ;;  %v14767_v63 = vld [vmem:[#allocation68_spill] sm:$0xff]  ;;  %v14771_v42 = vld [vmem:[#allocation49_spill] sm:$0xff]  ;;  %v14919_v47 = vld [vmem:[#allocation66_spill] sm:$0xff] }
 0x23b   :  { %v14772_v2 = vcombine.high %v14771_v42, %v14771_v42  ;;  %v10492_v42 = vsel %vm2034_vm3, %v14777_v41, -inf  ;;  %v10510_v41 = vmax.f32 %v10011_v4, %v14785_v10  ;;  %v14793_v10 = vld [vmem:[#allocation52_spill] sm:$0xff] }
 0x23c   :  { %v10442_v12 = vsel %vm2034_vm3, %v14760_v29, -inf  ;;  %v10479_v29 = vsel %vm2034_vm3, %v9997_v49, -inf  ;;  %14778 = vst [vmem:[#allocation49_spill] sm:$0xff] %v10492_v42  ;;  %v14794_v42 = vcombine.high %v14793_v10, %v14793_v10  ;;  %v14802_v10 = vrot.slane %v10024_v24, 4 }
 0x23d   :  { %14761 = vst [vmem:[#allocation46_spill] sm:$0xff] %v10442_v12  ;;  %v14768_v12 = vld [vmem:[#allocation48_spill] sm:$0xff]  ;;  %v10475_v56 = vsel %vm2034_vm3, %v14772_v2, -inf  ;;  %v14779_v2 = vrot.slane %v10007_v50, 4 }
 0x23e   :  { %v14769_v54 = vcombine.high %v14768_v12, %v14768_v12  ;;  %14773 = vst [vmem:[#allocation68_spill] sm:$0xff] %v10475_v56  ;;  %14774 = vst [vmem:[#allocation48_spill] sm:$0xff] %v10479_v29  ;;  %v14775_v12 = vrot.slane %v10003_v9, 4  ;;  %v14781_v29 = vld [vmem:[#allocation70_spill] sm:$0xff] }
 0x23f   :  { %v10497_v49 = vmax.f32 %v10007_v50, %v14779_v2  ;;  %v14787_v2 = vld [vmem:[#allocation51_spill] sm:$0xff]  ;;  %v10531_v50 = vsel %vm2034_vm3, %v14794_v42, -inf  ;;  %v10549_v42 = vmax.f32 %v10024_v24, %v14802_v10 }
 0x240   :  { %v10464_v57 = vsel %vm2034_vm3, %v14769_v54, -inf  ;;  %v10484_v54 = vmax.f32 %v10003_v9, %v14775_v12  ;;  %v14782_v12 = vld [vmem:[#allocation50_spill] sm:$0xff]  ;;  %v14788_v56 = vcombine.high %v14787_v2, %v14787_v2  ;;  %v14796_v2 = vrot.slane %v10020_v7, 4  ;;  %v14811_v10 = vld [vmem:[#allocation55_spill] sm:$0xff] }
 0x241   :  { %14780 = vst [vmem:[#allocation96_spill] sm:$0xff] %v10497_v49  ;;  %v14783_v60 = vcombine.high %v14782_v12, %v14782_v12  ;;  %14786 = vst [vmem:[#allocation50_spill] sm:$0xff] %v10510_v41  ;;  %v14790_v12 = vrot.slane %v10015_v31, 4  ;;  %v14812_v22 = vcombine.high %v14811_v10, %v14811_v10  ;;  %v14820_v10 = vrot.slane %v10036_v34, 4 }
 0x242   :  { %14776 = vst [vmem:[#allocation69_spill] sm:$0xff] %v10484_v54  ;;  %v10518_v9 = vsel %vm2034_vm3, %v14788_v56, -inf  ;;  %v10536_v56 = vmax.f32 %v10020_v7, %v14796_v2  ;;  %v14805_v2 = vld [vmem:[#allocation54_spill] sm:$0xff] }
 0x243   :  { %v10505_v20 = vsel %vm2034_vm3, %v14783_v60, -inf  ;;  %14789 = vst [vmem:[#allocation51_spill] sm:$0xff] %v10518_v9  ;;  %v10523_v60 = vmax.f32 %v10015_v31, %v14790_v12  ;;  %v14798_v9 = vld [vmem:[#allocation74_spill] sm:$0xff]  ;;  %v14799_v12 = vld [vmem:[#allocation53_spill] sm:$0xff]  ;;  %v14806_v61 = vcombine.high %v14805_v2, %v14805_v2  ;;  %v10570_v7 = vsel %vm2034_vm3, %v14812_v22, -inf }
 0x244   :  { %14784 = vst [vmem:[#allocation70_spill] sm:$0xff] %v10505_v20  ;;  %v14792_v20 = vld [vmem:[#allocation38_spill] sm:$0xff]  ;;  %14797 = vst [vmem:[#allocation52_spill] sm:$0xff] %v10536_v56  ;;  %v14800_v23 = vcombine.high %v14799_v12, %v14799_v12  ;;  %v14808_v12 = vrot.slane %v10028_v6, 4  ;;  %v14814_v2 = vrot.slane %v10032_v36, 4  ;;  %v10588_v22 = vmax.f32 %v10036_v34, %v14820_v10  ;;  %v14948_v30 = vld [vmem:[#allocation49_spill] sm:$0xff] }
 0x245   :  { %14791 = vst [vmem:[#allocation97_spill] sm:$0xff] %v10523_v60  ;;  %14795 = vst [vmem:[#allocation38_spill] sm:$0xff] %v10531_v50  ;;  %v14804_v50 = vld [vmem:[#allocation39_spill] sm:$0xff]  ;;  %v10557_v31 = vsel %vm2034_vm3, %v14806_v61, -inf  ;;  %v14829_v10 = vld [vmem:[#allocation58_spill] sm:$0xff] }
 0x246   :  { %v10544_v4 = vsel %vm2034_vm3, %v14800_v23, -inf  ;;  %14803 = vst [vmem:[#allocation53_spill] sm:$0xff] %v10549_v42  ;;  %14807 = vst [vmem:[#allocation39_spill] sm:$0xff] %v10557_v31  ;;  %v10562_v23 = vmax.f32 %v10028_v6, %v14808_v12  ;;  %v10575_v61 = vmax.f32 %v10032_v36, %v14814_v2  ;;  %v14816_v31 = vld [vmem:[#allocation41_spill] sm:$0xff]  ;;  %v14817_v12 = vld [vmem:[#allocation56_spill] sm:$0xff]  ;;  %v14830_v45 = vcombine.high %v14829_v10, %v14829_v10 }
 0x247   :  { %14801 = vst [vmem:[#allocation74_spill] sm:$0xff] %v10544_v4  ;;  %v14810_v4 = vld [vmem:[#allocation40_spill] sm:$0xff]  ;;  %v14818_v14 = vcombine.high %v14817_v12, %v14817_v12  ;;  %14821 = vst [vmem:[#allocation56_spill] sm:$0xff] %v10588_v22  ;;  %v14823_v2 = vld [vmem:[#allocation57_spill] sm:$0xff]  ;;  %v14826_v12 = vrot.slane %v10040_v0, 4  ;;  %v14838_v10 = vrot.slane %v10048_v58, 4 }
 0x248   :  { %14809 = vst [vmem:[#allocation54_spill] sm:$0xff] %v10562_v23  ;;  %14813 = vst [vmem:[#allocation40_spill] sm:$0xff] %v10570_v7  ;;  %v14822_v7 = vld [vmem:[#allocation13_spill] sm:$0xff]  ;;  %v14824_v13 = vcombine.high %v14823_v2, %v14823_v2  ;;  %v10609_v36 = vsel %vm2034_vm3, %v14830_v45, -inf  ;;  %v14832_v2 = vrot.slane %v10044_v52, 4 }
 0x249   :  { %14815 = vst [vmem:[#allocation55_spill] sm:$0xff] %v10575_v61  ;;  %v10583_v24 = vsel %vm2034_vm3, %v14818_v14, -inf  ;;  %v10601_v14 = vmax.f32 %v10040_v0, %v14826_v12  ;;  %v14835_v12 = vld [vmem:[#allocation59_spill] sm:$0xff]  ;;  %v10627_v45 = vmax.f32 %v10048_v58, %v14838_v10  ;;  %v14847_v10 = vld [vmem:[#allocation61_spill] sm:$0xff] }
 0x24a   :  { %14819 = vst [vmem:[#allocation41_spill] sm:$0xff] %v10583_v24  ;;  %v10596_v6 = vsel %vm2034_vm3, %v14824_v13, -inf  ;;  %v14828_v24 = vld [vmem:[#allocation11_spill] sm:$0xff]  ;;  %v10614_v13 = vmax.f32 %v10044_v52, %v14832_v2  ;;  %v14836_v1 = vcombine.high %v14835_v12, %v14835_v12  ;;  %v14841_v2 = vld [vmem:[#allocation60_spill] sm:$0xff]  ;;  %v14844_v12 = vrot.slane %v10052_v19, 4 }
 0x24b   :  { %14825 = vst [vmem:[#allocation13_spill] sm:$0xff] %v10596_v6  ;;  %14827 = vst [vmem:[#allocation57_spill] sm:$0xff] %v10601_v14  ;;  %v14834_v6 = vld [vmem:[#allocation12_spill] sm:$0xff]  ;;  %v14842_v59 = vcombine.high %v14841_v2, %v14841_v2  ;;  %v14848_v39 = vcombine.high %v14847_v10, %v14847_v10  ;;  %v14850_v2 = vrot.slane %v10056_v8, 4  ;;  %v14856_v10 = vrot.slane %v10060_v25, 4 }
 0x24c   :  { %14831 = vst [vmem:[#allocation11_spill] sm:$0xff] %v10609_v36  ;;  %14833 = vst [vmem:[#allocation58_spill] sm:$0xff] %v10614_v13  ;;  %v10622_v34 = vsel %vm2034_vm3, %v14836_v1, -inf  ;;  %v14840_v36 = vld [vmem:[#allocation15_spill] sm:$0xff]  ;;  %v10640_v1 = vmax.f32 %v10052_v19, %v14844_v12  ;;  %v14853_v12 = vld [vmem:[#allocation62_spill] sm:$0xff] }
 0x24d   :  { %14837 = vst [vmem:[#allocation12_spill] sm:$0xff] %v10622_v34  ;;  %14839 = vst [vmem:[#allocation59_spill] sm:$0xff] %v10627_v45  ;;  %v10635_v0 = vsel %vm2034_vm3, %v14842_v59, -inf  ;;  %v14846_v34 = vld [vmem:[#allocation17_spill] sm:$0xff]  ;;  %v10648_v52 = vsel %vm2034_vm3, %v14848_v39, -inf  ;;  %v10653_v59 = vmax.f32 %v10056_v8, %v14850_v2  ;;  %v14854_v46 = vcombine.high %v14853_v12, %v14853_v12  ;;  %v14859_v2 = vld [vmem:[#allocation63_spill] sm:$0xff] }
 0x24e   :  { %14843 = vst [vmem:[#allocation15_spill] sm:$0xff] %v10635_v0  ;;  %14845 = vst [vmem:[#allocation60_spill] sm:$0xff] %v10640_v1  ;;  %v14852_v0 = vld [vmem:[#allocation14_spill] sm:$0xff]  ;;  %v10666_v39 = vmax.f32 %v10060_v25, %v14856_v10  ;;  %v14860_v18 = vcombine.high %v14859_v2, %v14859_v2  ;;  %v14862_v12 = vrot.slane %v10064_v5, 4  ;;  %v14865_v10 = vld [vmem:[#allocation25_spill] sm:$0xff]  ;;  %v14868_v2 = vrot.slane %v10068_v38, 4 }
 0x24f   :  { %14849 = vst [vmem:[#allocation17_spill] sm:$0xff] %v10648_v52  ;;  %14851 = vst [vmem:[#allocation61_spill] sm:$0xff] %v10653_v59  ;;  %v10661_v58 = vsel %vm2034_vm3, %v14854_v46, -inf  ;;  %v14858_v52 = vld [vmem:[#allocation16_spill] sm:$0xff]  ;;  %v14866_v3 = vcombine.high %v14865_v10, %v14865_v10  ;;  %v14874_v10 = vrot.slane %v10072_v43, 4 }
 0x250   :  { %14855 = vst [vmem:[#allocation14_spill] sm:$0xff] %v10661_v58  ;;  %14857 = vst [vmem:[#allocation62_spill] sm:$0xff] %v10666_v39  ;;  %v10674_v19 = vsel %vm2034_vm3, %v14860_v18, -inf  ;;  %v10679_v46 = vmax.f32 %v10064_v5, %v14862_v12  ;;  %v14864_v58 = vld [vmem:[#allocation19_spill] sm:$0xff]  ;;  %v10692_v18 = vmax.f32 %v10068_v38, %v14868_v2  ;;  %v14871_v12 = vld [vmem:[#allocation22_spill] sm:$0xff] }
 0x251   :  { %14861 = vst [vmem:[#allocation16_spill] sm:$0xff] %v10674_v19  ;;  %v10687_v8 = vsel %vm2034_vm3, %v14866_v3, -inf  ;;  %v14870_v19 = vld [vmem:[#allocation21_spill] sm:$0xff]  ;;  %v14872_v32 = vcombine.high %v14871_v12, %v14871_v12  ;;  %v10705_v3 = vmax.f32 %v10072_v43, %v14874_v10  ;;  %v14877_v2 = vld [vmem:[#allocation24_spill] sm:$0xff]  ;;  %v14880_v12 = vrot.slane %v10076_v17, 4  ;;  %v14883_v10 = vld [vmem:[#allocation27_spill] sm:$0xff] }
 0x252   :  { %14863 = vst [vmem:[#allocation63_spill] sm:$0xff] %v10679_v46  ;;  %14867 = vst [vmem:[#allocation19_spill] sm:$0xff] %v10687_v8  ;;  %v14876_v8 = vld [vmem:[#allocation18_spill] sm:$0xff]  ;;  %v14878_v37 = vcombine.high %v14877_v2, %v14877_v2  ;;  %v14884_v40 = vcombine.high %v14883_v10, %v14883_v10  ;;  %v14886_v2 = vrot.slane %v10080_v48, 4  ;;  %v14892_v10 = vrot.slane %v10084_v26, 4 }
 0x253   :  { %14869 = vst [vmem:[#allocation25_spill] sm:$0xff] %v10692_v18  ;;  %v10700_v25 = vsel %vm2034_vm3, %v14872_v32, -inf  ;;  %14875 = vst [vmem:[#allocation22_spill] sm:$0xff] %v10705_v3  ;;  %v10718_v32 = vmax.f32 %v10076_v17, %v14880_v12  ;;  %v14889_v12 = vld [vmem:[#allocation29_spill] sm:$0xff] }
 0x254   :  { %14873 = vst [vmem:[#allocation21_spill] sm:$0xff] %v10700_v25  ;;  %v10713_v5 = vsel %vm2034_vm3, %v14878_v37, -inf  ;;  %v14882_v25 = vld [vmem:[#allocation20_spill] sm:$0xff]  ;;  %v10726_v38 = vsel %vm2034_vm3, %v14884_v40, -inf  ;;  %v10731_v37 = vmax.f32 %v10080_v48, %v14886_v2  ;;  %v14890_v62 = vcombine.high %v14889_v12, %v14889_v12  ;;  %v14895_v2 = vld [vmem:[#allocation26_spill] sm:$0xff] }
 0x255   :  { %14879 = vst [vmem:[#allocation18_spill] sm:$0xff] %v10713_v5  ;;  %14881 = vst [vmem:[#allocation24_spill] sm:$0xff] %v10718_v32  ;;  %v10744_v40 = vmax.f32 %v10084_v26, %v14892_v10  ;;  %v14896_v11 = vcombine.high %v14895_v2, %v14895_v2  ;;  %v14898_v12 = vrot.slane %v10088_v33, 4  ;;  %v14902_v10 = vld [vmem:[#allocation28_spill] sm:$0xff]  ;;  %v14906_v2 = vrot.slane %v14905_v16, 4  ;;  %v14912_v5 = vld [vmem:[#allocation65_spill] sm:$0xff] }
 0x256   :  { %14885 = vst [vmem:[#allocation20_spill] sm:$0xff] %v10726_v38  ;;  %14887 = vst [vmem:[#allocation27_spill] sm:$0xff] %v10731_v37  ;;  %v10739_v43 = vsel %vm2034_vm3, %v14890_v62, -inf  ;;  %v14903_v44 = vcombine.high %v14902_v10, %v14902_v10  ;;  %v14913_v10 = vrot.slane %v14912_v5, 4 }
 0x257   :  { %14891 = vst [vmem:[#allocation29_spill] sm:$0xff] %v10739_v43  ;;  %14893 = vst [vmem:[#allocation98_spill] sm:$0xff] %v10744_v40  ;;  %v10752_v17 = vsel %vm2034_vm3, %v14896_v11, -inf  ;;  %v10757_v62 = vmax.f32 %v10088_v33, %v14898_v12  ;;  %v10770_v11 = vmax.f32 %v14905_v16, %v14906_v2  ;;  %v14909_v12 = vld [vmem:[#allocation31_spill] sm:$0xff]  ;;  %v14916_v2 = vld [vmem:[#allocation33_spill] sm:$0xff] }
 0x258   :  { %14897 = vst [vmem:[#allocation26_spill] sm:$0xff] %v10752_v17  ;;  %v10765_v48 = vsel %vm2034_vm3, %v14903_v44, -inf  ;;  %v14910_v55 = vcombine.high %v14909_v12, %v14909_v12  ;;  %v10783_v44 = vmax.f32 %v14912_v5, %v14913_v10  ;;  %v14917_v38 = vcombine.high %v14916_v2, %v14916_v2  ;;  %v14923_v10 = vld [vmem:[#allocation30_spill] sm:$0xff] }
 0x259   :  { %14899 = vst [vmem:[#allocation99_spill] sm:$0xff] %v10757_v62  ;;  %14904 = vst [vmem:[#allocation28_spill] sm:$0xff] %v10765_v48  ;;  %v14920_v12 = vrot.slane %v14919_v47, 4  ;;  %v14924_v43 = vcombine.high %v14923_v10, %v14923_v10  ;;  %v14927_v2 = vrot.slane %v14926_v28, 4  ;;  %v14933_v10 = vrot.slane %v14767_v63, 4 }
 0x25a   :  { %14907 = vst [vmem:[#allocation64_spill] sm:$0xff] %v10770_v11  ;;  %v10778_v26 = vsel %vm2034_vm3, %v14910_v55, -inf  ;;  %14914 = vst [vmem:[#allocation65_spill] sm:$0xff] %v10783_v44  ;;  %v10791_v33 = vsel %vm2034_vm3, %v14917_v38, -inf }
 0x25b   :  { %14911 = vst [vmem:[#allocation31_spill] sm:$0xff] %v10778_v26  ;;  %14918 = vst [vmem:[#allocation33_spill] sm:$0xff] %v10791_v33  ;;  %v10796_v55 = vmax.f32 %v14919_v47, %v14920_v12  ;;  %v14922_v26 = vld [vmem:[#allocation46_spill] sm:$0xff]  ;;  %v10804_v16 = vsel %vm2034_vm3, %v14924_v43, -inf  ;;  %v10809_v38 = vmax.f32 %v14926_v28, %v14927_v2  ;;  %v14930_v12 = vld [vmem:[#allocation32_spill] sm:$0xff]  ;;  %v10822_v43 = vmax.f32 %v14767_v63, %v14933_v10 }
 0x25c   :  { %14925 = vst [vmem:[#allocation46_spill] sm:$0xff] %v10804_v16  ;;  %v14931_v17 = vcombine.high %v14930_v12, %v14930_v12  ;;  %v14935_v2 = vld [vmem:[#allocation36_spill] sm:$0xff]  ;;  %v14938_v12 = vrot.slane %v14770_v21, 4  ;;  %v14942_v10 = vld [vmem:[#allocation37_spill] sm:$0xff] }
 0x25d   :  { %14921 = vst [vmem:[#allocation66_spill] sm:$0xff] %v10796_v55  ;;  %14928 = vst [vmem:[#allocation30_spill] sm:$0xff] %v10809_v38  ;;  %v14936_v48 = vcombine.high %v14935_v2, %v14935_v2  ;;  %v14943_v16 = vcombine.high %v14942_v10, %v14942_v10  ;;  %v14949_v10 = vrot.slane %v14781_v29, 4  ;;  %v14951_v2 = vld [vmem:[#allocation71_spill] sm:$0xff]  ;;  %v14956_v33 = vld [vmem:[#allocation72_spill] sm:$0xff] }
 0x25e   :  { %v10817_v5 = vsel %vm2034_vm3, %v14931_v17, -inf  ;;  %14934 = vst [vmem:[#allocation32_spill] sm:$0xff] %v10822_v43  ;;  %v10835_v17 = vmax.f32 %v14770_v21, %v14938_v12  ;;  %v14947_v21 = vrot.slane %v10179_v51, 4  ;;  %v14952_v54 = vrot.slane %v14951_v2, 4 }
 0x25f   :  { %14932 = vst [vmem:[#allocation67_spill] sm:$0xff] %v10817_v5  ;;  %v10830_v47 = vsel %vm2034_vm3, %v14936_v48, -inf  ;;  %v14940_v5 = vld [vmem:[#allocation68_spill] sm:$0xff]  ;;  %v10843_v28 = vsel %vm2034_vm3, %v14943_v16, -inf  ;;  %v14945_v48 = vrot.slane %v10175_v53, 4  ;;  %v10861_v16 = vmax.f32 %v14781_v29, %v14949_v10  ;;  %v14958_v29 = vld [vmem:[#allocation51_spill] sm:$0xff] }
 0x260   :  { %14937 = vst [vmem:[#allocation36_spill] sm:$0xff] %v10830_v47  ;;  %14939 = vst [vmem:[#allocation100_spill] sm:$0xff] %v10835_v17  ;;  %v10854_v12 = vmax.f32 %v10179_v51, %v14947_v21  ;;  %v14954_v51 = vrot.slane %v10197_v15, 4  ;;  %v14957_v63 = vrot.slane %v14956_v33, 4  ;;  %v15108_v17 = vrot.slane %v14948_v30, 4 }
 0x261   :  { %14944 = vst [vmem:[#allocation68_spill] sm:$0xff] %v10843_v28  ;;  %v10849_v47 = vmax.f32 %v10175_v53, %v14945_v48  ;;  %14950 = vst [vmem:[#allocation49_spill] sm:$0xff] %v10861_v16  ;;  %v10866_v28 = vmax.f32 %v14951_v2, %v14952_v54  ;;  %v14953_v53 = vld [vmem:[#allocation70_spill] sm:$0xff]  ;;  %v14959_v54 = vrot.slane %v14792_v20, 4  ;;  %v14966_v16 = vld [vmem:[#allocation75_spill] sm:$0xff] }
 0x262   :  { %v10873_v21 = vmax.f32 %v10197_v15, %v14954_v51  ;;  %v10878_v49 = vmax.f32 %v14956_v33, %v14957_v63  ;;  %v14963_v15 = vld [vmem:[#allocation38_spill] sm:$0xff]  ;;  %v14964_v33 = vrot.slane %v14798_v9, 4  ;;  %v14967_v10 = vrot.slane %v14966_v16, 4 }
 0x263   :  { %14946 = vst [vmem:[#allocation37_spill] sm:$0xff] %v10849_v47  ;;  %v10885_v2 = vmax.f32 %v14792_v20, %v14959_v54  ;;  %v14961_v47 = vld [vmem:[#allocation73_spill] sm:$0xff]  ;;  %v14968_v20 = vld [vmem:[#allocation74_spill] sm:$0xff] }
 0x264   :  { %14955 = vst [vmem:[#allocation71_spill] sm:$0xff] %v10873_v21  ;;  %v14962_v48 = vrot.slane %v14961_v47, 4  ;;  %v10897_v63 = vmax.f32 %v14798_v9, %v14964_v33  ;;  %v10902_v60 = vmax.f32 %v14966_v16, %v14967_v10  ;;  %v14971_v21 = vld [vmem:[#allocation76_spill] sm:$0xff]  ;;  %v14973_v9 = vld [vmem:[#allocation39_spill] sm:$0xff]  ;;  %v14974_v16 = vrot.slane %v14810_v4, 4 }
 0x265   :  { %14960 = vst [vmem:[#allocation70_spill] sm:$0xff] %v10885_v2  ;;  %v14972_v51 = vrot.slane %v14971_v21, 4  ;;  %v14976_v2 = vld [vmem:[#allocation77_spill] sm:$0xff] }
 0x266   :  { %v10890_v41 = vmax.f32 %v14961_v47, %v14962_v48  ;;  %14965 = vst [vmem:[#allocation72_spill] sm:$0xff] %v10897_v63  ;;  %v14969_v47 = vrot.slane %v14804_v50, 4  ;;  %v10921_v10 = vmax.f32 %v14810_v4, %v14974_v16  ;;  %v14977_v54 = vrot.slane %v14976_v2, 4  ;;  %v14981_v63 = vld [vmem:[#allocation78_spill] sm:$0xff]  ;;  %v14983_v4 = vld [vmem:[#allocation41_spill] sm:$0xff] }
 0x267   :  { %v10914_v56 = vmax.f32 %v14971_v21, %v14972_v51  ;;  %v14979_v21 = vrot.slane %v14816_v31, 4  ;;  %v14982_v33 = vrot.slane %v14981_v63, 4 }
 0x268   :  { %v10909_v48 = vmax.f32 %v14804_v50, %v14969_v47  ;;  %14975 = vst [vmem:[#allocation73_spill] sm:$0xff] %v10921_v10  ;;  %v10926_v42 = vmax.f32 %v14976_v2, %v14977_v54  ;;  %v14978_v50 = vld [vmem:[#allocation40_spill] sm:$0xff]  ;;  %v14984_v2 = vrot.slane %v14822_v7, 4 }
 0x269   :  { %v10933_v51 = vmax.f32 %v14816_v31, %v14979_v21  ;;  %v10938_v23 = vmax.f32 %v14981_v63, %v14982_v33  ;;  %v14988_v31 = vld [vmem:[#allocation13_spill] sm:$0xff]  ;;  %v14989_v63 = vrot.slane %v14828_v24, 4  ;;  %v14991_v10 = vld [vmem:[#allocation80_spill] sm:$0xff] }
 0x26a   :  { %14970 = vst [vmem:[#allocation51_spill] sm:$0xff] %v10909_v48  ;;  %v10945_v54 = vmax.f32 %v14822_v7, %v14984_v2  ;;  %v14986_v48 = vld [vmem:[#allocation79_spill] sm:$0xff]  ;;  %v14992_v16 = vrot.slane %v14991_v10, 4 }
 0x26b   :  { %14980 = vst [vmem:[#allocation38_spill] sm:$0xff] %v10933_v51  ;;  %v14987_v47 = vrot.slane %v14986_v48, 4  ;;  %v10957_v33 = vmax.f32 %v14828_v24, %v14989_v63  ;;  %v14993_v7 = vld [vmem:[#allocation11_spill] sm:$0xff]  ;;  %v14996_v51 = vld [vmem:[#allocation81_spill] sm:$0xff]  ;;  %v14999_v24 = vld [vmem:[#allocation12_spill] sm:$0xff] }
 0x26c   :  { %14985 = vst [vmem:[#allocation75_spill] sm:$0xff] %v10945_v54  ;;  %v10962_v22 = vmax.f32 %v14991_v10, %v14992_v16  ;;  %v14997_v21 = vrot.slane %v14996_v51, 4  ;;  %v15000_v10 = vrot.slane %v14840_v36, 4  ;;  %v15002_v54 = vld [vmem:[#allocation82_spill] sm:$0xff] }
 0x26d   :  { %v10950_v61 = vmax.f32 %v14986_v48, %v14987_v47  ;;  %14990 = vst [vmem:[#allocation74_spill] sm:$0xff] %v10957_v33  ;;  %v14994_v48 = vrot.slane %v14834_v6, 4  ;;  %v15003_v2 = vrot.slane %v15002_v54, 4  ;;  %v15008_v33 = vld [vmem:[#allocation83_spill] sm:$0xff] }
 0x26e   :  { %v10974_v14 = vmax.f32 %v14996_v51, %v14997_v21  ;;  %v10981_v16 = vmax.f32 %v14840_v36, %v15000_v10  ;;  %v15006_v51 = vrot.slane %v14846_v34, 4  ;;  %v15009_v63 = vrot.slane %v15008_v33, 4  ;;  %v15011_v36 = vld [vmem:[#allocation17_spill] sm:$0xff] }
 0x26f   :  { %v10969_v47 = vmax.f32 %v14834_v6, %v14994_v48  ;;  %v10986_v13 = vmax.f32 %v15002_v54, %v15003_v2  ;;  %v15005_v6 = vld [vmem:[#allocation15_spill] sm:$0xff]  ;;  %v15012_v54 = vrot.slane %v14852_v0, 4 }
 0x270   :  { %14998 = vst [vmem:[#allocation39_spill] sm:$0xff] %v10974_v14  ;;  %15001 = vst [vmem:[#allocation77_spill] sm:$0xff] %v10981_v16  ;;  %v10993_v21 = vmax.f32 %v14846_v34, %v15006_v51  ;;  %v10998_v45 = vmax.f32 %v15008_v33, %v15009_v63  ;;  %v15017_v34 = vld [vmem:[#allocation14_spill] sm:$0xff]  ;;  %v15018_v33 = vrot.slane %v14858_v52, 4  ;;  %v15020_v16 = vld [vmem:[#allocation85_spill] sm:$0xff] }
 0x271   :  { %14995 = vst [vmem:[#allocation76_spill] sm:$0xff] %v10969_v47  ;;  %15004 = vst [vmem:[#allocation40_spill] sm:$0xff] %v10986_v13  ;;  %v11005_v2 = vmax.f32 %v14852_v0, %v15012_v54  ;;  %v15014_v47 = vld [vmem:[#allocation84_spill] sm:$0xff]  ;;  %v15021_v10 = vrot.slane %v15020_v16, 4 }
 0x272   :  { %15007 = vst [vmem:[#allocation78_spill] sm:$0xff] %v10993_v21  ;;  %15010 = vst [vmem:[#allocation41_spill] sm:$0xff] %v10998_v45  ;;  %v15015_v48 = vrot.slane %v15014_v47, 4  ;;  %v11017_v63 = vmax.f32 %v14858_v52, %v15018_v33  ;;  %v15022_v0 = vld [vmem:[#allocation16_spill] sm:$0xff]  ;;  %v15025_v21 = vld [vmem:[#allocation86_spill] sm:$0xff] }
 0x273   :  { %15013 = vst [vmem:[#allocation79_spill] sm:$0xff] %v11005_v2  ;;  %v11022_v59 = vmax.f32 %v15020_v16, %v15021_v10  ;;  %v15026_v51 = vrot.slane %v15025_v21, 4  ;;  %v15028_v52 = vld [vmem:[#allocation19_spill] sm:$0xff]  ;;  %v15029_v16 = vrot.slane %v14870_v19, 4  ;;  %v15155_v14 = vld [vmem:[#allocation60_spill] sm:$0xff] }
 0x274   :  { %v11010_v1 = vmax.f32 %v15014_v47, %v15015_v48  ;;  %15019 = vst [vmem:[#allocation80_spill] sm:$0xff] %v11017_v63  ;;  %v15023_v47 = vrot.slane %v14864_v58, 4  ;;  %v15031_v2 = vld [vmem:[#allocation87_spill] sm:$0xff]  ;;  %v15037_v63 = vld [vmem:[#allocation88_spill] sm:$0xff] }
 0x275   :  { %v11034_v39 = vmax.f32 %v15025_v21, %v15026_v51  ;;  %v11041_v10 = vmax.f32 %v14870_v19, %v15029_v16  ;;  %v15032_v54 = vrot.slane %v15031_v2, 4  ;;  %v15035_v21 = vrot.slane %v14876_v8, 4 }
 0x276   :  { %15016 = vst [vmem:[#allocation13_spill] sm:$0xff] %v11010_v1  ;;  %v11029_v48 = vmax.f32 %v14864_v58, %v15023_v47  ;;  %v15034_v58 = vld [vmem:[#allocation21_spill] sm:$0xff]  ;;  %v15038_v33 = vrot.slane %v15037_v63, 4 }
 0x277   :  { %15027 = vst [vmem:[#allocation81_spill] sm:$0xff] %v11034_v39  ;;  %15030 = vst [vmem:[#allocation12_spill] sm:$0xff] %v11041_v10  ;;  %v11046_v46 = vmax.f32 %v15031_v2, %v15032_v54  ;;  %v11053_v51 = vmax.f32 %v14876_v8, %v15035_v21  ;;  %v15041_v2 = vrot.slane %v14882_v25, 4  ;;  %v15050_v10 = vld [vmem:[#allocation90_spill] sm:$0xff] }
 0x278   :  { %15024 = vst [vmem:[#allocation11_spill] sm:$0xff] %v11029_v48  ;;  %v11058_v18 = vmax.f32 %v15037_v63, %v15038_v33  ;;  %v15043_v48 = vld [vmem:[#allocation89_spill] sm:$0xff]  ;;  %v15047_v63 = vld [vmem:[#allocation23_spill] sm:$0xff]  ;;  %v15051_v32 = vrot.slane %v15050_v10, 4  ;;  %v15188_v39 = vld [vmem:[#allocation18_spill] sm:$0xff] }
 0x279   :  { %15033 = vst [vmem:[#allocation82_spill] sm:$0xff] %v11046_v46  ;;  %15036 = vst [vmem:[#allocation15_spill] sm:$0xff] %v11053_v51  ;;  %v11065_v54 = vmax.f32 %v14882_v25, %v15041_v2  ;;  %v15044_v47 = vrot.slane %v15043_v48, 4  ;;  %v15048_v33 = vrot.slane %v15047_v63, 4  ;;  %v15057_v51 = vld [vmem:[#allocation91_spill] sm:$0xff]  ;;  %v15191_v46 = vld [vmem:[#allocation24_spill] sm:$0xff] }
 0x27a   :  { %15039 = vst [vmem:[#allocation83_spill] sm:$0xff] %v11058_v18  ;;  %v11082_v19 = vmax.f32 %v15050_v10, %v15051_v32  ;;  %v15058_v37 = vrot.slane %v15057_v51, 4  ;;  %v15061_v32 = vld [vmem:[#allocation43_spill] sm:$0xff] }
 0x27b   :  { %15042 = vst [vmem:[#allocation17_spill] sm:$0xff] %v11065_v54  ;;  %v11070_v3 = vmax.f32 %v15043_v48, %v15044_v47  ;;  %v11077_v16 = vmax.f32 %v15047_v63, %v15048_v33  ;;  %v15054_v48 = vld [vmem:[#allocation42_spill] sm:$0xff]  ;;  %v15062_v10 = vrot.slane %v15061_v32, 4  ;;  %v15064_v54 = vld [vmem:[#allocation92_spill] sm:$0xff]  ;;  %v15198_v18 = vld [vmem:[#allocation27_spill] sm:$0xff] }
 0x27c   :  { %15052 = vst [vmem:[#allocation85_spill] sm:$0xff] %v11082_v19  ;;  %v15055_v47 = vrot.slane %v15054_v48, 4  ;;  %v11094_v8 = vmax.f32 %v15057_v51, %v15058_v37  ;;  %v15065_v40 = vrot.slane %v15064_v54, 4  ;;  %v15068_v37 = vld [vmem:[#allocation44_spill] sm:$0xff]  ;;  %v15210_v19 = vld [vmem:[#allocation26_spill] sm:$0xff] }
 0x27d   :  { %15045 = vst [vmem:[#allocation84_spill] sm:$0xff] %v11070_v3  ;;  %15049 = vst [vmem:[#allocation14_spill] sm:$0xff] %v11077_v16  ;;  %v11101_v2 = vmax.f32 %v15061_v32, %v15062_v10  ;;  %v15069_v51 = vrot.slane %v15068_v37, 4  ;;  %v15071_v16 = vld [vmem:[#allocation93_spill] sm:$0xff] }
 0x27e   :  { %v11089_v21 = vmax.f32 %v15054_v48, %v15055_v47  ;;  %15059 = vst [vmem:[#allocation86_spill] sm:$0xff] %v11094_v8  ;;  %v11106_v25 = vmax.f32 %v15064_v54, %v15065_v40  ;;  %v15072_v62 = vrot.slane %v15071_v16, 4  ;;  %v15075_v40 = vld [vmem:[#allocation45_spill] sm:$0xff] }
 0x27f   :  { %15063 = vst [vmem:[#allocation19_spill] sm:$0xff] %v11101_v2  ;;  %v11113_v33 = vmax.f32 %v15068_v37, %v15069_v51  ;;  %v15076_v54 = vrot.slane %v15075_v40, 4  ;;  %v15084_v2 = vrot.slane %v10446_v27, 4 }
 0x280   :  { %15056 = vst [vmem:[#allocation16_spill] sm:$0xff] %v11089_v21  ;;  %15066 = vst [vmem:[#allocation87_spill] sm:$0xff] %v11106_v25  ;;  %v11118_v63 = vmax.f32 %v15071_v16, %v15072_v62  ;;  %v15078_v21 = vld [vmem:[#allocation94_spill] sm:$0xff]  ;;  %v15082_v62 = vrot.slane %v14922_v26, 4 }
 0x281   :  { %15070 = vst [vmem:[#allocation21_spill] sm:$0xff] %v11113_v33  ;;  %v11125_v47 = vmax.f32 %v15075_v40, %v15076_v54  ;;  %v15079_v11 = vrot.slane %v15078_v21, 4  ;;  %v11142_v10 = vmax.f32 %v10446_v27, %v15084_v2  ;;  %v15090_v33 = vld [vmem:[#allocation95_spill] sm:$0xff]  ;;  %v15094_v27 = vrot.slane %v10464_v57, 4 }
 0x282   :  { %15073 = vst [vmem:[#allocation88_spill] sm:$0xff] %v11118_v63  ;;  %v11137_v16 = vmax.f32 %v14922_v26, %v15082_v62  ;;  %v15091_v55 = vrot.slane %v15090_v33, 4 }
 0x283   :  { %15077 = vst [vmem:[#allocation89_spill] sm:$0xff] %v11125_v47  ;;  %v11130_v48 = vmax.f32 %v15078_v21, %v15079_v11  ;;  %15085 = vst [vmem:[#allocation42_spill] sm:$0xff] %v11142_v10  ;;  %v15087_v11 = vld [vmem:[#allocation47_spill] sm:$0xff]  ;;  %v11161_v2 = vmax.f32 %v10464_v57, %v15094_v27  ;;  %v15096_v47 = vrot.slane %v10468_v35, 4  ;;  %v2136_v27 = vrot.slane %v10866_v28, 2 }
 0x284   :  { %15083 = vst [vmem:[#allocation90_spill] sm:$0xff] %v11137_v16  ;;  %v15088_v21 = vrot.slane %v15087_v11, 4  ;;  %v11154_v37 = vmax.f32 %v15090_v33, %v15091_v55  ;;  %v15099_v55 = vrot.slane %v14940_v5, 4  ;;  %v15101_v16 = vld [vmem:[#allocation48_spill] sm:$0xff]  ;;  %v15112_v57 = vrot.slane %v14953_v53, 4 }
 0x285   :  { %15080 = vst [vmem:[#allocation23_spill] sm:$0xff] %v11130_v48  ;;  %15095 = vst [vmem:[#allocation92_spill] sm:$0xff] %v11161_v2  ;;  %v11166_v54 = vmax.f32 %v10468_v35, %v15096_v47  ;;  %v15102_v62 = vrot.slane %v15101_v16, 4  ;;  %v15105_v2 = vld [vmem:[#allocation69_spill] sm:$0xff] }
 0x286   :  { %v11149_v51 = vmax.f32 %v15087_v11, %v15088_v21  ;;  %15092 = vst [vmem:[#allocation43_spill] sm:$0xff] %v11154_v37  ;;  %v11173_v33 = vmax.f32 %v14940_v5, %v15099_v55  ;;  %v15106_v26 = vrot.slane %v15105_v2, 2  ;;  %v15107_v47 = vld [vmem:[#allocation37_spill] sm:$0xff]  ;;  %v2114_v5 = vmax.f32 %v14948_v30, %v15108_v17  ;;  %v15109_v55 = vld [vmem:[#allocation96_spill] sm:$0xff] }
 0x287   :  { %15097 = vst [vmem:[#allocation44_spill] sm:$0xff] %v11166_v54  ;;  %v11178_v43 = vmax.f32 %v15101_v16, %v15102_v62  ;;  %v2101_v21 = vrot.slane %v15107_v47, 2  ;;  %v15111_v16 = vld [vmem:[#allocation49_spill] sm:$0xff]  ;;  %v2137_v17 = vmax.f32 %v10866_v28, %v2136_v27  ;;  %v15115_v27 = vld [vmem:[#allocation71_spill] sm:$0xff] }
 0x288   :  { %15089 = vst [vmem:[#allocation91_spill] sm:$0xff] %v11149_v51  ;;  %15100 = vst [vmem:[#allocation93_spill] sm:$0xff] %v11173_v33  ;;  %v2095_v35 = vmax.f32 %v15105_v2, %v15106_v26  ;;  %v2108_v51 = vrot.slane %v10854_v12, 2  ;;  %v15110_v33 = vrot.slane %v15109_v55, 2  ;;  %v2129_v62 = vrot.slane %v15111_v16, 2 }
 0x289   :  { %15103 = vst [vmem:[#allocation45_spill] sm:$0xff] %v11178_v43  ;;  %v2142_v26 = vmax.f32 %v14953_v53, %v15112_v57  ;;  %v2102_v43 = vmax.f32 %v15107_v47, %v2101_v21  ;;  %v2115_v37 = vrot.slane %v2114_v5, 2  ;;  %v2138_v63 = vrot.slane %v2137_v17, 1  ;;  %v15113_v47 = vld [vmem:[#allocation50_spill] sm:$0xff] }
 0x28a   :  { %v2123_v11 = vmax.f32 %v15109_v55, %v15110_v33  ;;  %v2096_v2 = vrot.slane %v2095_v35, 1  ;;  %v2109_v54 = vmax.f32 %v10854_v12, %v2108_v51  ;;  %v2130_v30 = vmax.f32 %v15111_v16, %v2129_v62 }
 0x28b   :  { %v2143_v33 = vrot.slane %v2142_v26, 2  ;;  %v2103_v40 = vrot.slane %v2102_v43, 1  ;;  %v2116_v48 = vmax.f32 %v2114_v5, %v2115_v37  ;;  %v15114_v12 = vrot.slane %v15113_v47, 2 }
 0x28c   :  { %v2124_v38 = vrot.slane %v2123_v11, 1  ;;  %v2097_v55 = vmax.f32 %v2095_v35, %v2096_v2  ;;  %v2110_v10 = vrot.slane %v2109_v54, 1  ;;  %v2131_v32 = vrot.slane %v2130_v30, 1 }
 0x28d   :  { %v2144_v53 = vmax.f32 %v2142_v26, %v2143_v33  ;;  %v2104_v57 = vmax.f32 %v2102_v43, %v2103_v40  ;;  %v2117_v21 = vrot.slane %v2116_v48, 1  ;;  %v11204_v51 = vmax.f32 %v15113_v47, %v15114_v12 }
 0x28e   :  { %v2125_v44 = vmax.f32 %v2123_v11, %v2124_v38  ;;  %v2111_v25 = vmax.f32 %v2109_v54, %v2110_v10  ;;  %v2132_v16 = vmax.f32 %v2130_v30, %v2131_v32  ;;  %v2139_v62 = vmax.f32 %v2137_v17, %v2138_v63  ;;  %v15117_v54 = vld [vmem:[#allocation97_spill] sm:$0xff]  ;;  %v15119_v32 = vld [vmem:[#allocation70_spill] sm:$0xff] }
 0x28f   :  { %v2145_v28 = vrot.slane %v2144_v53, 1  ;;  %v2118_v2 = vmax.f32 %v2116_v48, %v2117_v21  ;;  %v3116_v37 = vsel %vm3102_vm5, %v2104_v57, %v2097_v55  ;;  %v15116_v11 = vrot.slane %v14958_v29, 4  ;;  %v15123_v57 = vld [vmem:[#allocation72_spill] sm:$0xff]  ;;  %v15165_v21 = vld [vmem:[#allocation62_spill] sm:$0xff] }
 0x290   :  { %v3117_v40 = vsel %vm3104_vm6, %v2111_v25, %v3116_v37  ;;  %v15118_v5 = vrot.slane %v15117_v54, 2  ;;  %v15120_v17 = vrot.slane %v14963_v15, 4  ;;  %v15124_v12 = vrot.slane %v14968_v20, 4 }
 0x291   :  { %v11212_v43 = vmax.f32 %v14958_v29, %v15116_v11  ;;  %v2146_v10 = vmax.f32 %v2144_v53, %v2145_v28  ;;  %v3118_v48 = vsel %vm3106_vm7, %v2118_v2, %v3117_v40  ;;  %v15121_v29 = vld [vmem:[#allocation52_spill] sm:$0xff]  ;;  %v15127_v40 = vld [vmem:[#allocation51_spill] sm:$0xff]  ;;  %v15148_v35 = vrot.slane %v14999_v24, 4 }
 0x292   :  { %v11218_v63 = vmax.f32 %v15117_v54, %v15118_v5  ;;  %v11226_v33 = vmax.f32 %v14963_v15, %v15120_v17  ;;  %v15122_v55 = vrot.slane %v15121_v29, 2  ;;  %v3119_v53 = vsel %vm3108_vm8, %v2125_v44, %v3118_v48  ;;  %v15125_v15 = vld [vmem:[#allocation53_spill] sm:$0xff]  ;;  %v15149_v54 = vld [vmem:[#allocation59_spill] sm:$0xff] }
 0x293   :  { %v11239_v28 = vmax.f32 %v14968_v20, %v15124_v12  ;;  %v3120_v2 = vsel %vm3110_vm9, %v2132_v16, %v3119_v53  ;;  %v15126_v37 = vrot.slane %v15125_v15, 2  ;;  %v15128_v48 = vrot.slane %v14973_v9, 4  ;;  %v15129_v20 = vld [vmem:[#allocation54_spill] sm:$0xff] }
 0x294   :  { %v11231_v25 = vmax.f32 %v15121_v29, %v15122_v55  ;;  %v3121_v5 = vsel %vm3112_vm10, %v2139_v62, %v3120_v2  ;;  %v15130_v29 = vrot.slane %v15129_v20, 2  ;;  %v15131_v55 = vld [vmem:[#allocation73_spill] sm:$0xff]  ;;  %v15133_v2 = vld [vmem:[#allocation55_spill] sm:$0xff]  ;;  %v15150_v47 = vrot.slane %v15149_v54, 2 }
 0x295   :  { %v11245_v11 = vmax.f32 %v15125_v15, %v15126_v37  ;;  %v11253_v17 = vmax.f32 %v14973_v9, %v15128_v48  ;;  %v3122_v12 = vsel %vm3114_vm11, %v2146_v10, %v3121_v5  ;;  %v15132_v37 = vrot.slane %v14978_v50, 4  ;;  %v15135_v48 = vld [vmem:[#allocation38_spill] sm:$0xff]  ;;  %v15137_v15 = vld [vmem:[#allocation56_spill] sm:$0xff] }
 0x296   :  { %v11258_v16 = vmax.f32 %v15129_v20, %v15130_v29  ;;  %v15134_v30 = vrot.slane %v15133_v2, 2  ;;  %3238 = vst.msk [vmem:[#allocation2 + $0x21] sm:$0xff] %vm688_vm2, %v3122_v12  ;;  %v15136_v10 = vrot.slane %v14983_v4, 4  ;;  %v15138_v53 = vrot.slane %v15137_v15, 2  ;;  %v15141_v29 = vld [vmem:[#allocation57_spill] sm:$0xff] }
 0x297   :  { %v11266_v62 = vmax.f32 %v14978_v50, %v15132_v37  ;;  %v15139_v37 = vld [vmem:[#allocation75_spill] sm:$0xff]  ;;  %v15140_v12 = vrot.slane %v14988_v31, 4  ;;  %v15142_v20 = vrot.slane %v15141_v29, 2  ;;  %v15166_v45 = vrot.slane %v15165_v21, 2 }
 0x298   :  { %v11271_v9 = vmax.f32 %v15133_v2, %v15134_v30  ;;  %v11279_v5 = vmax.f32 %v14983_v4, %v15136_v10  ;;  %v11284_v50 = vmax.f32 %v15137_v15, %v15138_v53  ;;  %v3774_v4 = vld [vmem:[#allocation2 + $0x92] sm:$0xff]  ;;  %v15143_v10 = vld [vmem:[#allocation74_spill] sm:$0xff]  ;;  %v15144_v15 = vrot.slane %v14993_v7, 4 }
 0x299   :  { %v11291_v2 = vmax.f32 %v14988_v31, %v15140_v12  ;;  %v11296_v38 = vmax.f32 %v15141_v29, %v15142_v20  ;;  %v15145_v30 = vld [vmem:[#allocation58_spill] sm:$0xff]  ;;  %3790 = vst.msk [vmem:[#allocation3 + $0x138] sm:$0xff] %vm688_vm2, %v3774_v4  ;;  %v15147_v12 = vld [vmem:[#allocation76_spill] sm:$0xff]  ;;  %v11316_v53 = vmax.f32 %v14999_v24, %v15148_v35  ;;  %v15153_v20 = vrot.slane %v15005_v6, 4 }
 0x29a   :  { %v11303_v26 = vmax.f32 %v14993_v7, %v15144_v15  ;;  %v15146_v44 = vrot.slane %v15145_v30, 2  ;;  %v11321_v7 = vmax.f32 %v15149_v54, %v15150_v47  ;;  %v11323_v15 = vld [vmem:[#allocation2 + $0x122] sm:$0xff]  ;;  %v15156_v24 = vrot.slane %v15155_v14, 2 }
 0x29b   :  { %15151 = vst [vmem:[#allocation94_spill] sm:$0xff] %v11323_v15  ;;  %v11330_v29 = vmax.f32 %v15005_v6, %v15153_v20  ;;  %3797 = vst.msk [vmem:[#allocation3 + $0x250] sm:$0xff] %vm688_vm2, %v11323_v15  ;;  %v15158_v4 = vrot.slane %v15011_v36, 4  ;;  %v15160_v6 = vld [vmem:[#allocation61_spill] sm:$0xff]  ;;  %v11362_v47 = vmax.f32 %v15165_v21, %v15166_v45  ;;  %v15170_v15 = vld [vmem:[#allocation63_spill] sm:$0xff] }
 0x29c   :  { %v11308_v31 = vmax.f32 %v15145_v30, %v15146_v44  ;;  %v3782_v44 = vld [vmem:[#allocation2 + $0x132] sm:$0xff]  ;;  %v15152_v30 = vld [vmem:[#allocation77_spill] sm:$0xff]  ;;  %v11335_v35 = vmax.f32 %v15155_v14, %v15156_v24  ;;  %v15161_v20 = vrot.slane %v15160_v6, 2  ;;  %v15162_v14 = vld [vmem:[#allocation79_spill] sm:$0xff]  ;;  %v15171_v1 = vrot.slane %v15170_v15, 2 }
 0x29d   :  { %15154 = vst [vmem:[#allocation47_spill] sm:$0xff] %v11330_v29  ;;  %3798 = vst.msk [vmem:[#allocation3 + $0x278] sm:$0xff] %vm688_vm2, %v3782_v44  ;;  %v11345_v13 = vmax.f32 %v15011_v36, %v15158_v4  ;;  %v15163_v44 = vrot.slane %v15017_v34, 4  ;;  %v3415_v36 = vld [vmem:[#allocation2 + $0x20] sm:$0xff]  ;;  %v15167_v4 = vld [vmem:[#allocation80_spill] sm:$0xff] }
 0x29e   :  { %v11350_v29 = vmax.f32 %v15160_v6, %v15161_v20  ;;  %v15168_v20 = vrot.slane %v15022_v0, 4  ;;  %3448 = vrot.lane.b32.xlu0 %v3415_v36, %s8041_s25  ;;  %v15174_v45 = vld [vmem:[#allocation11_spill] sm:$0xff]  ;;  %v15189_v36 = vrot.slane %v15188_v39, 4 }
 0x29f   :  { %15159 = vst [vmem:[#allocation95_spill] sm:$0xff] %v11345_v13  ;;  %v11357_v54 = vmax.f32 %v15017_v34, %v15163_v44  ;;  %v11374_v34 = vmax.f32 %v15170_v15, %v15171_v1  ;;  %v11376_v44 = vld [vmem:[#allocation2 + $0x22] sm:$0xff]  ;;  %v15175_v13 = vrot.slane %v15028_v52, 4  ;;  %v15192_v15 = vrot.slane %v15191_v46, 2 }
 0x2a0   :  { %v11369_v24 = vmax.f32 %v15022_v0, %v15168_v20  ;;  %15172 = vst [vmem:[#allocation37_spill] sm:$0xff] %v11376_v44  ;;  %v15177_v20 = vld [vmem:[#allocation25_spill] sm:$0xff]  ;;  %3783 = vst.msk [vmem:[#allocation3 + $0x20] sm:$0xff] %vm688_vm2, %v11376_v44  ;;  %v11418_v6 = vmax.f32 %v15188_v39, %v15189_v36  ;;  %v15199_v39 = vrot.slane %v15198_v18, 2 }
 0x2a1   :  { %15164 = vst [vmem:[#allocation48_spill] sm:$0xff] %v11357_v54  ;;  %v11378_v54 = vld [vmem:[#allocation2 + $0x21] sm:$0xff]  ;;  %v11386_v0 = vmax.f32 %v15028_v52, %v15175_v13  ;;  %3400 = vst.msk [vmem:[#allocation3 + $0x58] sm:$0xff] %vm688_vm2, %v11376_v44  ;;  %v15181_v13 = vrot.slane %v15034_v58, 4 }
 0x2a2   :  { %15169 = vst [vmem:[#allocation69_spill] sm:$0xff] %v11369_v24  ;;  %15173 = vst [vmem:[#allocation96_spill] sm:$0xff] %v11378_v54  ;;  %v15178_v24 = vrot.slane %v15177_v20, 2  ;;  %v11437_v36 = vmax.f32 %v15198_v18, %v15199_v39  ;;  %v3255_v18 = vld [vmem:[#allocation2 + $0x20] sm:$0xff]  ;;  %v3510_v39 = vld [vmem:[#allocation2 + $0x11] sm:$0xff] }
 0x2a3   :  { %15176 = vst [vmem:[#allocation49_spill] sm:$0xff] %v11386_v0  ;;  %3527 = vst.msk [vmem:[#allocation3 + $0x38] sm:$0xff] %vm688_vm2, %v11378_v54  ;;  %v11404_v52 = vmax.f32 %v15034_v58, %v15181_v13  ;;  %v11423_v58 = vmax.f32 %v15191_v46, %v15192_v15  ;;  %v15195_v0 = vld [vmem:[#allocation20_spill] sm:$0xff]  ;;  %v15211_v46 = vrot.slane %v15210_v19, 4  ;;  %v15229_v15 = vld [vmem:[#allocation65_spill] sm:$0xff] }
 0x2a4   :  { %v11391_v1 = vmax.f32 %v15177_v20, %v15178_v24  ;;  %v15183_v24 = vld [vmem:[#allocation22_spill] sm:$0xff]  ;;  %15190 = vst [vmem:[#allocation52_spill] sm:$0xff] %v11418_v6  ;;  %v15196_v44 = vrot.slane %v15195_v0, 4  ;;  %15200 = vst [vmem:[#allocation51_spill] sm:$0xff] %v11437_v36  ;;  %v3254_v6 = vld [vmem:[#allocation2 + $0x10] sm:$0xff] }
 0x2a5   :  { %15182 = vst [vmem:[#allocation71_spill] sm:$0xff] %v11404_v52  ;;  %v15184_v20 = vrot.slane %v15183_v24, 2  ;;  %15193 = vst [vmem:[#allocation72_spill] sm:$0xff] %v11423_v58  ;;  %v15230_v58 = vrot.slane %v15229_v15, 2  ;;  %v15237_v36 = vld [vmem:[#allocation66_spill] sm:$0xff] }
 0x2a6   :  { %15179 = vst [vmem:[#allocation50_spill] sm:$0xff] %v11391_v1  ;;  %v11411_v1 = vld [vmem:[#allocation2 + $0x12] sm:$0xff]  ;;  %v11432_v54 = vmax.f32 %v15195_v0, %v15196_v44  ;;  %3270 = vst.msk [vmem:[#allocation3 + $0x28] sm:$0xff] %vm688_vm2, %v3254_v6  ;;  %v11452_v0 = vld [vmem:[#allocation2 + $0x121] sm:$0xff] }
 0x2a7   :  { %v11409_v21 = vmax.f32 %v15183_v24, %v15184_v20  ;;  %15186 = vst [vmem:[#allocation70_spill] sm:$0xff] %v11411_v1  ;;  %3399 = vst.msk [vmem:[#allocation3 + $0x30] sm:$0xff] %vm688_vm2, %v11411_v1  ;;  %v15202_v1 = vld [vmem:[#allocation29_spill] sm:$0xff]  ;;  %v15205_v20 = vld [vmem:[#allocation98_spill] sm:$0xff]  ;;  %v11493_v6 = vmax.f32 %v15229_v15, %v15230_v58 }
 0x2a8   :  { %15197 = vst [vmem:[#allocation53_spill] sm:$0xff] %v11432_v54  ;;  %v15206_v3 = vrot.slane %v15205_v20, 2  ;;  %15208 = vst [vmem:[#allocation55_spill] sm:$0xff] %v11452_v0  ;;  %v15242_v15 = vld [vmem:[#allocation46_spill] sm:$0xff] }
 0x2a9   :  { %15185 = vst [vmem:[#allocation97_spill] sm:$0xff] %v11409_v21  ;;  %v15203_v21 = vrot.slane %v15202_v1, 4  ;;  %3271 = vst.msk [vmem:[#allocation3 + $0x50] sm:$0xff] %vm688_vm2, %v3255_v18  ;;  %v15245_v54 = vld [vmem:[#allocation30_spill] sm:$0xff] }
 0x2aa   :  { %v11449_v44 = vmax.f32 %v15205_v20, %v15206_v3  ;;  %3655 = vst.msk [vmem:[#allocation3 + $0x18] sm:$0xff] %vm688_vm2, %v3255_v18  ;;  %3526 = vst.msk [vmem:[#allocation3 + $0x10] sm:$0xff] %vm688_vm2, %v3510_v39  ;;  %v15238_v39 = vrot.slane %v15237_v36, 2 }
 0x2ab   :  { %v11444_v24 = vmax.f32 %v15202_v1, %v15203_v21  ;;  %v11459_v21 = vmax.f32 %v15210_v19, %v15211_v46  ;;  %v15213_v1 = vld [vmem:[#allocation99_spill] sm:$0xff]  ;;  %3541 = vst.msk [vmem:[#allocation3 + $0x268] sm:$0xff] %vm688_vm2, %v11452_v0  ;;  %v15218_v19 = vld [vmem:[#allocation28_spill] sm:$0xff]  ;;  %15231 = vst [vmem:[#allocation58_spill] sm:$0xff] %v11493_v6  ;;  %v15243_v6 = vrot.slane %v15242_v15, 4 }
 0x2ac   :  { %15207 = vst [vmem:[#allocation73_spill] sm:$0xff] %v11449_v44  ;;  %v15219_v46 = vrot.slane %v15218_v19, 4  ;;  %v15226_v44 = vld [vmem:[#allocation31_spill] sm:$0xff]  ;;  %v11505_v18 = vmax.f32 %v15237_v36, %v15238_v39 }
 0x2ad   :  { %15204 = vst [vmem:[#allocation54_spill] sm:$0xff] %v11444_v24  ;;  %15212 = vst [vmem:[#allocation38_spill] sm:$0xff] %v11459_v21  ;;  %v15214_v24 = vrot.slane %v15213_v1, 2  ;;  %v15227_v0 = vrot.slane %v15226_v44, 4 }
 0x2ae   :  { %v11476_v21 = vmax.f32 %v15218_v19, %v15219_v46  ;;  %15239 = vst [vmem:[#allocation59_spill] sm:$0xff] %v11505_v18  ;;  %v11512_v46 = vmax.f32 %v15242_v15, %v15243_v6  ;;  %v15261_v18 = vld [vmem:[#allocation100_spill] sm:$0xff] }
 0x2af   :  { %v11464_v3 = vmax.f32 %v15213_v1, %v15214_v24  ;;  %v15221_v24 = vld [vmem:[#allocation64_spill] sm:$0xff]  ;;  %v11488_v20 = vmax.f32 %v15226_v44, %v15227_v0  ;;  %v3653_v44 = vld [vmem:[#allocation2 + $0x120] sm:$0xff]  ;;  %v15262_v39 = vrot.slane %v15261_v18, 2 }
 0x2b0   :  { %15220 = vst [vmem:[#allocation75_spill] sm:$0xff] %v11476_v21  ;;  %v15222_v1 = vrot.slane %v15221_v24, 2  ;;  %15244 = vst [vmem:[#allocation77_spill] sm:$0xff] %v11512_v46  ;;  %v15246_v21 = vrot.slane %v15245_v54, 2 }
 0x2b1   :  { %15215 = vst [vmem:[#allocation56_spill] sm:$0xff] %v11464_v3  ;;  %15228 = vst [vmem:[#allocation74_spill] sm:$0xff] %v11488_v20 }
 0x2b2   :  { %v11481_v3 = vmax.f32 %v15221_v24, %v15222_v1  ;;  %v15234_v24 = vld [vmem:[#allocation33_spill] sm:$0xff]  ;;  %3669 = vst.msk [vmem:[#allocation3 + $0x248] sm:$0xff] %vm688_vm2, %v3653_v44 }
 0x2b3   :  { %v15235_v1 = vrot.slane %v15234_v24, 4 }
 0x2b4   :  { %15223 = vst [vmem:[#allocation57_spill] sm:$0xff] %v11481_v3  ;;  %v15253_v3 = vld [vmem:[#allocation32_spill] sm:$0xff] }
 0x2b5   :  { %v11500_v8 = vmax.f32 %v15234_v24, %v15235_v1  ;;  %v11517_v24 = vmax.f32 %v15245_v54, %v15246_v21  ;;  %v15254_v0 = vrot.slane %v15253_v3, 2  ;;  %v11542_v1 = vmax.f32 %v15261_v18, %v15262_v39 }
 0x2b6   :  { %v2208_v21 = vrot.slane %v11231_v25, 1  ;;  %v15269_v54 = vrot.slane %v15123_v57, 2  ;;  %v2227_v39 = vrot.slane %v11239_v28, 2 }
 0x2b7   :  { %15236 = vst [vmem:[#allocation76_spill] sm:$0xff] %v11500_v8  ;;  %15247 = vst [vmem:[#allocation60_spill] sm:$0xff] %v11517_v24  ;;  %v15250_v8 = vld [vmem:[#allocation67_spill] sm:$0xff]  ;;  %v11530_v6 = vmax.f32 %v15253_v3, %v15254_v0  ;;  %v15258_v24 = vld [vmem:[#allocation36_spill] sm:$0xff] }
 0x2b8   :  { %v15251_v20 = vrot.slane %v15250_v8, 4  ;;  %v15259_v44 = vrot.slane %v15258_v24, 4  ;;  %15263 = vst [vmem:[#allocation80_spill] sm:$0xff] %v11542_v1  ;;  %v15266_v3 = vld [vmem:[#allocation68_spill] sm:$0xff]  ;;  %v2209_v19 = vmax.f32 %v11231_v25, %v2208_v21 }
 0x2b9   :  { %15255 = vst [vmem:[#allocation79_spill] sm:$0xff] %v11530_v6  ;;  %v15267_v0 = vrot.slane %v15266_v3, 4  ;;  %v15273_v6 = vrot.slane %v15115_v27, 2 }
 0x2ba   :  { %v11525_v58 = vmax.f32 %v15250_v8, %v15251_v20  ;;  %v11537_v36 = vmax.f32 %v15258_v24, %v15259_v44  ;;  %v2214_v24 = vmax.f32 %v15123_v57, %v15269_v54  ;;  %v15270_v44 = vrot.slane %v10902_v60, 2 }
 0x2bb   :  { %v11549_v46 = vmax.f32 %v15266_v3, %v15267_v0  ;;  %v2236_v20 = vrot.slane %v11245_v11, 1  ;;  %v15272_v0 = vrot.slane %v10914_v56, 2  ;;  %v2255_v57 = vrot.slane %v11253_v17, 2 }
 0x2bc   :  { %15252 = vst [vmem:[#allocation61_spill] sm:$0xff] %v11525_v58  ;;  %15260 = vst [vmem:[#allocation62_spill] sm:$0xff] %v11537_v36  ;;  %v2221_v18 = vmax.f32 %v10902_v60, %v15270_v44  ;;  %v15271_v58 = vrot.slane %v15127_v40, 2  ;;  %v2215_v54 = vrot.slane %v2214_v24, 1  ;;  %v2228_v60 = vmax.f32 %v11239_v28, %v2227_v39 }
 0x2bd   :  { %15268 = vst [vmem:[#allocation63_spill] sm:$0xff] %v11549_v46  ;;  %v2249_v46 = vmax.f32 %v10914_v56, %v15272_v0  ;;  %v2237_v44 = vmax.f32 %v11245_v11, %v2236_v20  ;;  %v2256_v25 = vmax.f32 %v11253_v17, %v2255_v57  ;;  %v11575_v56 = vmax.f32 %v15115_v27, %v15273_v6  ;;  %v15312_v6 = vld [vmem:[#allocation82_spill] sm:$0xff] }
 0x2be   :  { %v2242_v3 = vmax.f32 %v15127_v40, %v15271_v58  ;;  %v2222_v8 = vrot.slane %v2221_v18, 1  ;;  %v2216_v15 = vmax.f32 %v2214_v24, %v2215_v54  ;;  %v2229_v58 = vrot.slane %v2228_v60, 1  ;;  %v15327_v24 = vld [vmem:[#allocation17_spill] sm:$0xff] }
 0x2bf   :  { %v2250_v36 = vrot.slane %v2249_v46, 1  ;;  %v2257_v52 = vrot.slane %v2256_v25, 1  ;;  %v15274_v28 = vrot.slane %v10878_v49, 2  ;;  %v15275_v27 = vrot.slane %v15119_v32, 2 }
 0x2c0   :  { %v2243_v1 = vrot.slane %v2242_v3, 1  ;;  %v2223_v40 = vmax.f32 %v2221_v18, %v2222_v8  ;;  %v2230_v20 = vmax.f32 %v2228_v60, %v2229_v58  ;;  %v3130_v17 = vsel %vm3102_vm5, %v2216_v15, %v2209_v19  ;;  %v15354_v8 = vld [vmem:[#allocation87_spill] sm:$0xff] }
 0x2c1   :  { %v2251_v13 = vmax.f32 %v2249_v46, %v2250_v36  ;;  %v11580_v11 = vmax.f32 %v10878_v49, %v15274_v28  ;;  %v2258_v18 = vmax.f32 %v2256_v25, %v2257_v52  ;;  %v11589_v46 = vmax.f32 %v15119_v32, %v15275_v27 }
 0x2c2   :  { %v2244_v0 = vmax.f32 %v2242_v3, %v2243_v1  ;;  %v3131_v39 = vsel %vm3104_vm6, %v2223_v40, %v3130_v17  ;;  %v15276_v1 = vrot.slane %v10890_v41, 2  ;;  %v15277_v52 = vrot.slane %v15131_v55, 2 }
 0x2c3   :  { %v3132_v36 = vsel %vm3106_vm7, %v2230_v20, %v3131_v39  ;;  %v15278_v32 = vrot.slane %v10926_v42, 2  ;;  %v15279_v25 = vrot.slane %v15135_v48, 2  ;;  %v15281_v20 = vrot.slane %v15139_v37, 2 }
 0x2c4   :  { %v11594_v49 = vmax.f32 %v10890_v41, %v15276_v1  ;;  %v11602_v15 = vmax.f32 %v15131_v55, %v15277_v52  ;;  %v3133_v3 = vsel %vm3108_vm8, %v2237_v44, %v3132_v36  ;;  %v15280_v55 = vrot.slane %v10938_v23, 2 }
 0x2c5   :  { %v11608_v57 = vmax.f32 %v10926_v42, %v15278_v32  ;;  %v3134_v60 = vsel %vm3110_vm9, %v2244_v0, %v3133_v3  ;;  %v11616_v40 = vmax.f32 %v15135_v48, %v15279_v25  ;;  %v11629_v0 = vmax.f32 %v15139_v37, %v15281_v20  ;;  %v15286_v32 = vld [vmem:[#allocation39_spill] sm:$0xff]  ;;  %v15289_v20 = vld [vmem:[#allocation40_spill] sm:$0xff] }
 0x2c6   :  { %v11621_v44 = vmax.f32 %v10938_v23, %v15280_v55  ;;  %v3135_v42 = vsel %vm3112_vm10, %v2251_v13, %v3134_v60  ;;  %v15282_v17 = vrot.slane %v10950_v61, 2  ;;  %v15283_v13 = vrot.slane %v15143_v10, 2  ;;  %v15294_v55 = vld [vmem:[#allocation41_spill] sm:$0xff] }
 0x2c7   :  { %v3136_v39 = vsel %vm3114_vm11, %v2258_v18, %v3135_v42  ;;  %v15284_v37 = vrot.slane %v10962_v22, 2  ;;  %v15285_v52 = vrot.slane %v15147_v12, 2  ;;  %v15287_v60 = vrot.slane %v15286_v32, 2  ;;  %v15305_v23 = vld [vmem:[#allocation81_spill] sm:$0xff] }
 0x2c8   :  { %v11634_v48 = vmax.f32 %v10950_v61, %v15282_v17  ;;  %v11642_v1 = vmax.f32 %v15143_v10, %v15283_v13  ;;  %3240 = vst.msk [vmem:[#allocation2 + $0x41] sm:$0xff] %vm688_vm2, %v3136_v39  ;;  %v15290_v17 = vrot.slane %v15289_v20, 2  ;;  %v15295_v25 = vrot.slane %v15294_v55, 2 }
 0x2c9   :  { %v11648_v36 = vmax.f32 %v10962_v22, %v15284_v37  ;;  %v11655_v3 = vmax.f32 %v15147_v12, %v15285_v52  ;;  %v11660_v10 = vmax.f32 %v15286_v32, %v15287_v60  ;;  %v15288_v22 = vrot.slane %v15152_v30, 2  ;;  %v15291_v12 = vld [vmem:[#allocation47_spill] sm:$0xff]  ;;  %v15292_v52 = vld [vmem:[#allocation78_spill] sm:$0xff]  ;;  %v15298_v37 = vld [vmem:[#allocation13_spill] sm:$0xff] }
 0x2ca   :  { %v11672_v39 = vmax.f32 %v15289_v20, %v15290_v17  ;;  %v15293_v32 = vrot.slane %v15292_v52, 2  ;;  %v11684_v18 = vmax.f32 %v15294_v55, %v15295_v25  ;;  %v15297_v20 = vrot.slane %v15162_v14, 2 }
 0x2cb   :  { %v11667_v42 = vmax.f32 %v15152_v30, %v15288_v22  ;;  %v15296_v30 = vld [vmem:[#allocation95_spill] sm:$0xff]  ;;  %v15299_v13 = vrot.slane %v15298_v37, 2  ;;  %v15301_v25 = vrot.slane %v15167_v4, 2  ;;  %v15302_v61 = vrot.slane %v11022_v59, 2 }
 0x2cc   :  { %v11679_v60 = vmax.f32 %v15292_v52, %v15293_v32  ;;  %v11691_v17 = vmax.f32 %v15162_v14, %v15297_v20  ;;  %v15300_v52 = vld [vmem:[#allocation48_spill] sm:$0xff]  ;;  %v15303_v14 = vld [vmem:[#allocation69_spill] sm:$0xff]  ;;  %v15306_v32 = vrot.slane %v15305_v23, 2  ;;  %v15313_v19 = vrot.slane %v15312_v6, 2 }
 0x2cd   :  { %v11696_v27 = vmax.f32 %v15298_v37, %v15299_v13  ;;  %v11703_v55 = vmax.f32 %v15167_v4, %v15301_v25  ;;  %v11708_v22 = vmax.f32 %v11022_v59, %v15302_v61  ;;  %v15304_v13 = vrot.slane %v15174_v45, 2  ;;  %v15309_v59 = vld [vmem:[#allocation12_spill] sm:$0xff] }
 0x2ce   :  { %v11720_v58 = vmax.f32 %v15305_v23, %v15306_v32  ;;  %v15310_v61 = vrot.slane %v15309_v59, 2  ;;  %v15317_v32 = vld [vmem:[#allocation15_spill] sm:$0xff]  ;;  %v15343_v23 = vld [vmem:[#allocation16_spill] sm:$0xff] }
 0x2cf   :  { %v11715_v37 = vmax.f32 %v15174_v45, %v15304_v13  ;;  %v3417_v28 = vld [vmem:[#allocation2 + $0x40] sm:$0xff]  ;;  %v11732_v45 = vmax.f32 %v15312_v6, %v15313_v19  ;;  %v15318_v21 = vrot.slane %v15317_v32, 2  ;;  %v15362_v4 = vld [vmem:[#allocation88_spill] sm:$0xff] }
 0x2d0   :  { %v11727_v20 = vmax.f32 %v15309_v59, %v15310_v61  ;;  %v11741_v41 = vld [vmem:[#allocation2 + $0x42] sm:$0xff]  ;;  %3452 = vrot.lane.b32.xlu1 %v3417_v28, %s8041_s25  ;;  %v15322_v59 = vld [vmem:[#allocation83_spill] sm:$0xff] }
 0x2d1   :  { %15314 = vst [vmem:[#allocation25_spill] sm:$0xff] %v11732_v45  ;;  %v11739_v25 = vmax.f32 %v15317_v32, %v15318_v21  ;;  %15320 = vst [vmem:[#allocation18_spill] sm:$0xff] %v11741_v41  ;;  %v11743_v54 = vld [vmem:[#allocation2 + $0x41] sm:$0xff]  ;;  %v15323_v61 = vrot.slane %v15322_v59, 2  ;;  %v15328_v45 = vrot.slane %v15327_v24, 2  ;;  %v15330_v32 = vld [vmem:[#allocation84_spill] sm:$0xff] }
 0x2d2   :  { %15311 = vst [vmem:[#allocation11_spill] sm:$0xff] %v11727_v20  ;;  %15321 = vst [vmem:[#allocation24_spill] sm:$0xff] %v11743_v54  ;;  %v3257_v28 = vld [vmem:[#allocation2 + $0x40] sm:$0xff]  ;;  %v15363_v20 = vrot.slane %v15362_v4, 2 }
 0x2d3   :  { %15319 = vst [vmem:[#allocation22_spill] sm:$0xff] %v11739_v25  ;;  %v11749_v19 = vmax.f32 %v15322_v59, %v15323_v61  ;;  %v11756_v21 = vmax.f32 %v15327_v24, %v15328_v45  ;;  %3785 = vst.msk [vmem:[#allocation3 + $0x70] sm:$0xff] %vm688_vm2, %v11741_v41  ;;  %v15331_v59 = vrot.slane %v15330_v32, 2  ;;  %v15335_v45 = vld [vmem:[#allocation14_spill] sm:$0xff]  ;;  %v15344_v24 = vrot.slane %v15343_v23, 2 }
 0x2d4   :  { %3402 = vst.msk [vmem:[#allocation3 + $0xa8] sm:$0xff] %vm688_vm2, %v11741_v41  ;;  %3529 = vst.msk [vmem:[#allocation3 + $0x88] sm:$0xff] %vm688_vm2, %v11743_v54  ;;  %v15338_v41 = vld [vmem:[#allocation85_spill] sm:$0xff] }
 0x2d5   :  { %15324 = vst [vmem:[#allocation20_spill] sm:$0xff] %v11749_v19  ;;  %15329 = vst [vmem:[#allocation27_spill] sm:$0xff] %v11756_v21  ;;  %v11767_v61 = vmax.f32 %v15330_v32, %v15331_v59  ;;  %v15336_v21 = vrot.slane %v15335_v45, 2  ;;  %v15339_v54 = vrot.slane %v15338_v41, 2  ;;  %v11788_v13 = vmax.f32 %v15343_v23, %v15344_v24 }
 0x2d6   :  { %3273 = vst.msk [vmem:[#allocation3 + $0xa0] sm:$0xff] %vm688_vm2, %v3257_v28  ;;  %3657 = vst.msk [vmem:[#allocation3 + $0x68] sm:$0xff] %vm688_vm2, %v3257_v28  ;;  %v11817_v28 = vmax.f32 %v15362_v4, %v15363_v20  ;;  %v15375_v20 = vld [vmem:[#allocation90_spill] sm:$0xff] }
 0x2d7   :  { %15332 = vst [vmem:[#allocation29_spill] sm:$0xff] %v11767_v61  ;;  %v11774_v6 = vmax.f32 %v15335_v45, %v15336_v21  ;;  %v11781_v19 = vmax.f32 %v15338_v41, %v15339_v54  ;;  %15345 = vst [vmem:[#allocation99_spill] sm:$0xff] %v11788_v13  ;;  %v15346_v21 = vld [vmem:[#allocation86_spill] sm:$0xff]  ;;  %v15351_v41 = vld [vmem:[#allocation19_spill] sm:$0xff]  ;;  %v15355_v61 = vrot.slane %v15354_v8, 2  ;;  %v15376_v4 = vrot.slane %v15375_v20, 2 }
 0x2d8   :  { %v15347_v45 = vrot.slane %v15346_v21, 2  ;;  %v15352_v54 = vrot.slane %v15351_v41, 2  ;;  %15364 = vst [vmem:[#allocation33_spill] sm:$0xff] %v11817_v28  ;;  %v15393_v28 = vld [vmem:[#allocation44_spill] sm:$0xff] }
 0x2d9   :  { %15337 = vst [vmem:[#allocation98_spill] sm:$0xff] %v11774_v6  ;;  %15340 = vst [vmem:[#allocation26_spill] sm:$0xff] %v11781_v19  ;;  %v11805_v32 = vmax.f32 %v15354_v8, %v15355_v61  ;;  %v15367_v8 = vld [vmem:[#allocation89_spill] sm:$0xff]  ;;  %v15370_v19 = vld [vmem:[#allocation23_spill] sm:$0xff] }
 0x2da   :  { %v11793_v6 = vmax.f32 %v15346_v21, %v15347_v45  ;;  %v11800_v59 = vmax.f32 %v15351_v41, %v15352_v54  ;;  %v15359_v21 = vld [vmem:[#allocation21_spill] sm:$0xff]  ;;  %v15368_v61 = vrot.slane %v15367_v8, 2  ;;  %v15371_v13 = vrot.slane %v15370_v19, 2 }
 0x2db   :  { %15356 = vst [vmem:[#allocation31_spill] sm:$0xff] %v11805_v32  ;;  %v15360_v45 = vrot.slane %v15359_v21, 2  ;;  %v11836_v54 = vmax.f32 %v15375_v20, %v15376_v4  ;;  %v15386_v32 = vld [vmem:[#allocation43_spill] sm:$0xff] }
 0x2dc   :  { %15348 = vst [vmem:[#allocation28_spill] sm:$0xff] %v11793_v6  ;;  %15353 = vst [vmem:[#allocation64_spill] sm:$0xff] %v11800_v59  ;;  %v11824_v24 = vmax.f32 %v15367_v8, %v15368_v61  ;;  %v11829_v23 = vmax.f32 %v15370_v19, %v15371_v13  ;;  %v15378_v6 = vld [vmem:[#allocation42_spill] sm:$0xff]  ;;  %v15383_v13 = vld [vmem:[#allocation91_spill] sm:$0xff] }
 0x2dd   :  { %v11812_v25 = vmax.f32 %v15359_v21, %v15360_v45  ;;  %15377 = vst [vmem:[#allocation30_spill] sm:$0xff] %v11836_v54  ;;  %v15379_v59 = vrot.slane %v15378_v6, 2  ;;  %v15384_v19 = vrot.slane %v15383_v13, 2 }
 0x2de   :  { %15369 = vst [vmem:[#allocation66_spill] sm:$0xff] %v11824_v24  ;;  %15372 = vst [vmem:[#allocation46_spill] sm:$0xff] %v11829_v23  ;;  %v15394_v24 = vrot.slane %v15393_v28, 2  ;;  %v15399_v23 = vld [vmem:[#allocation45_spill] sm:$0xff] }
 0x2df   :  { %15361 = vst [vmem:[#allocation65_spill] sm:$0xff] %v11812_v25  ;;  %v11841_v41 = vmax.f32 %v15378_v6, %v15379_v59  ;;  %v11848_v45 = vmax.f32 %v15383_v13, %v15384_v19  ;;  %v15387_v25 = vrot.slane %v15386_v32, 2  ;;  %v15390_v6 = vld [vmem:[#allocation92_spill] sm:$0xff]  ;;  %v15395_v13 = vld [vmem:[#allocation62_spill] sm:$0xff]  ;;  %v15400_v54 = vrot.slane %v15399_v23, 2 }
 0x2e0   :  { %v15391_v59 = vrot.slane %v15390_v6, 2  ;;  %v11865_v8 = vmax.f32 %v15393_v28, %v15394_v24  ;;  %v15404_v19 = vrot.slane %v11212_v43, 2 }
 0x2e1   :  { %15380 = vst [vmem:[#allocation67_spill] sm:$0xff] %v11841_v41  ;;  %15385 = vst [vmem:[#allocation32_spill] sm:$0xff] %v11848_v45  ;;  %v11853_v21 = vmax.f32 %v15386_v32, %v15387_v25  ;;  %v15396_v45 = vld [vmem:[#allocation80_spill] sm:$0xff]  ;;  %v15397_v25 = vld [vmem:[#allocation93_spill] sm:$0xff]  ;;  %v11877_v20 = vmax.f32 %v15399_v23, %v15400_v54  ;;  %v15408_v41 = vrot.slane %v11258_v16, 1 }
 0x2e2   :  { %v11860_v61 = vmax.f32 %v15390_v6, %v15391_v59  ;;  %v15398_v32 = vrot.slane %v15397_v25, 2  ;;  %v15401_v6 = vld [vmem:[#allocation63_spill] sm:$0xff]  ;;  %v15411_v59 = vrot.slane %v11271_v9, 1 }
 0x2e3   :  { %v11907_v24 = vmax.f32 %v11258_v16, %v15408_v41  ;;  %v15413_v16 = vrot.slane %v11279_v5, 2 }
 0x2e4   :  { %15392 = vst [vmem:[#allocation36_spill] sm:$0xff] %v11860_v61  ;;  %v11872_v4 = vmax.f32 %v15397_v25, %v15398_v32  ;;  %v15402_v61 = vrot.slane %v11204_v51, 1  ;;  %v11890_v25 = vmax.f32 %v11212_v43, %v15404_v19  ;;  %v15405_v32 = vrot.slane %v11218_v63, 1 }
 0x2e5   :  { %15409 = vst [vmem:[#allocation39_spill] sm:$0xff] %v11907_v24  ;;  %v11919_v54 = vmax.f32 %v11271_v9, %v15411_v59  ;;  %v11926_v41 = vmax.f32 %v11279_v5, %v15413_v16  ;;  %v15414_v19 = vrot.slane %v11284_v50, 1  ;;  %v15416_v9 = vrot.slane %v11291_v2, 2 }
 0x2e6   :  { %v11883_v28 = vmax.f32 %v11204_v51, %v15402_v61  ;;  %v11895_v23 = vmax.f32 %v11218_v63, %v15405_v32  ;;  %v15407_v51 = vrot.slane %v11226_v33, 2  ;;  %v15410_v63 = vrot.slane %v11266_v62, 2 }
 0x2e7   :  { %15412 = vst [vmem:[#allocation40_spill] sm:$0xff] %v11919_v54  ;;  %v11931_v43 = vmax.f32 %v11284_v50, %v15414_v19  ;;  %v11938_v59 = vmax.f32 %v11291_v2, %v15416_v9  ;;  %v15419_v50 = vrot.slane %v11303_v26, 2  ;;  %v15423_v16 = vrot.slane %v11321_v7, 1  ;;  %v15454_v54 = vld [vmem:[#allocation72_spill] sm:$0xff] }
 0x2e8   :  { %15403 = vst [vmem:[#allocation100_spill] sm:$0xff] %v11883_v28  ;;  %15406 = vst [vmem:[#allocation68_spill] sm:$0xff] %v11895_v23  ;;  %v11902_v61 = vmax.f32 %v11226_v33, %v15407_v51  ;;  %v11914_v32 = vmax.f32 %v11266_v62, %v15410_v63  ;;  %v15417_v51 = vrot.slane %v11296_v38, 1  ;;  %v15420_v63 = vrot.slane %v11308_v31, 1  ;;  %v15470_v23 = vld [vmem:[#allocation73_spill] sm:$0xff] }
 0x2e9   :  { %15415 = vst [vmem:[#allocation47_spill] sm:$0xff] %v11931_v43  ;;  %v11950_v19 = vmax.f32 %v11303_v26, %v15419_v50  ;;  %v11967_v5 = vmax.f32 %v11321_v7, %v15423_v16  ;;  %v15426_v9 = vrot.slane %v11335_v35, 1  ;;  %v15428_v7 = vrot.slane %v15296_v30, 2 }
 0x2ea   :  { %v11943_v33 = vmax.f32 %v11296_v38, %v15417_v51  ;;  %v11955_v62 = vmax.f32 %v11308_v31, %v15420_v63  ;;  %v15422_v38 = vrot.slane %v11316_v53, 2  ;;  %v15425_v31 = vrot.slane %v15291_v12, 2 }
 0x2eb   :  { %15424 = vst [vmem:[#allocation95_spill] sm:$0xff] %v11967_v5  ;;  %v11979_v2 = vmax.f32 %v11335_v35, %v15426_v9  ;;  %v11986_v16 = vmax.f32 %v15296_v30, %v15428_v7  ;;  %v15429_v50 = vrot.slane %v11350_v29, 1  ;;  %v15431_v35 = vrot.slane %v15300_v52, 2  ;;  %v15439_v7 = vld [vmem:[#allocation50_spill] sm:$0xff] }
 0x2ec   :  { %15418 = vst [vmem:[#allocation78_spill] sm:$0xff] %v11943_v33  ;;  %15421 = vst [vmem:[#allocation41_spill] sm:$0xff] %v11955_v62  ;;  %v11962_v51 = vmax.f32 %v11316_v53, %v15422_v38  ;;  %v11974_v63 = vmax.f32 %v15291_v12, %v15425_v31  ;;  %v15432_v38 = vrot.slane %v11362_v47, 1  ;;  %v15435_v31 = vrot.slane %v11374_v34, 1  ;;  %v15443_v33 = vld [vmem:[#allocation25_spill] sm:$0xff]  ;;  %v15462_v62 = vld [vmem:[#allocation51_spill] sm:$0xff] }
 0x2ed   :  { %15427 = vst [vmem:[#allocation13_spill] sm:$0xff] %v11979_v2  ;;  %v11991_v26 = vmax.f32 %v11350_v29, %v15429_v50  ;;  %v11998_v9 = vmax.f32 %v15300_v52, %v15431_v35  ;;  %v15434_v29 = vrot.slane %v15303_v14, 2  ;;  %v15446_v35 = vld [vmem:[#allocation97_spill] sm:$0xff]  ;;  %v15478_v2 = vld [vmem:[#allocation56_spill] sm:$0xff] }
 0x2ee   :  { %v12003_v53 = vmax.f32 %v11362_v47, %v15432_v38  ;;  %v12015_v12 = vmax.f32 %v11374_v34, %v15435_v31  ;;  %v15437_v47 = vld [vmem:[#allocation49_spill] sm:$0xff]  ;;  %v15444_v34 = vld [vmem:[#allocation71_spill] sm:$0xff] }
 0x2ef   :  { %15430 = vst [vmem:[#allocation48_spill] sm:$0xff] %v11991_v26  ;;  %v12010_v50 = vmax.f32 %v15303_v14, %v15434_v29  ;;  %v15438_v38 = vrot.slane %v15437_v47, 2  ;;  %v15440_v26 = vrot.slane %v15439_v7, 1  ;;  %v15442_v14 = vld [vmem:[#allocation11_spill] sm:$0xff]  ;;  %v15445_v31 = vrot.slane %v15444_v34, 2 }
 0x2f0   :  { %15433 = vst [vmem:[#allocation69_spill] sm:$0xff] %v12003_v53  ;;  %15436 = vst [vmem:[#allocation81_spill] sm:$0xff] %v12015_v12  ;;  %v15447_v12 = vrot.slane %v15446_v35, 1 }
 0x2f1   :  { %v12022_v30 = vmax.f32 %v15437_v47, %v15438_v38  ;;  %v12027_v5 = vmax.f32 %v15439_v7, %v15440_v26  ;;  %v12034_v52 = vmax.f32 %v15444_v34, %v15445_v31  ;;  %v15449_v47 = vld [vmem:[#allocation22_spill] sm:$0xff]  ;;  %v15451_v26 = vld [vmem:[#allocation52_spill] sm:$0xff]  ;;  %v15486_v34 = vld [vmem:[#allocation57_spill] sm:$0xff] }
 0x2f2   :  { %v12039_v53 = vmax.f32 %v15446_v35, %v15447_v12  ;;  %v15452_v7 = vrot.slane %v15451_v26, 2  ;;  %v15459_v12 = vld [vmem:[#allocation53_spill] sm:$0xff] }
 0x2f3   :  { %15441 = vst [vmem:[#allocation12_spill] sm:$0xff] %v12027_v5  ;;  %v15455_v5 = vrot.slane %v15454_v54, 1  ;;  %v15460_v35 = vrot.slane %v15459_v12, 2 }
 0x2f4   :  { %15448 = vst [vmem:[#allocation82_spill] sm:$0xff] %v12039_v53  ;;  %v12046_v29 = vmax.f32 %v15451_v26, %v15452_v7  ;;  %v15463_v53 = vrot.slane %v15462_v62, 1  ;;  %v15494_v26 = vld [vmem:[#allocation58_spill] sm:$0xff] }
 0x2f5   :  { %v12051_v43 = vmax.f32 %v15454_v54, %v15455_v5  ;;  %v12058_v38 = vmax.f32 %v15459_v12, %v15460_v35  ;;  %v15467_v54 = vld [vmem:[#allocation54_spill] sm:$0xff]  ;;  %v15502_v12 = vld [vmem:[#allocation59_spill] sm:$0xff] }
 0x2f6   :  { %15453 = vst [vmem:[#allocation15_spill] sm:$0xff] %v12046_v29  ;;  %v12063_v28 = vmax.f32 %v15462_v62, %v15463_v53  ;;  %v15468_v5 = vrot.slane %v15467_v54, 2  ;;  %v15475_v62 = vld [vmem:[#allocation38_spill] sm:$0xff] }
 0x2f7   :  { %15456 = vst [vmem:[#allocation83_spill] sm:$0xff] %v12051_v43  ;;  %15461 = vst [vmem:[#allocation17_spill] sm:$0xff] %v12058_v38  ;;  %v15471_v43 = vrot.slane %v15470_v23, 1  ;;  %v15476_v53 = vrot.slane %v15475_v62, 2 }
 0x2f8   :  { %15464 = vst [vmem:[#allocation84_spill] sm:$0xff] %v12063_v28  ;;  %v12070_v31 = vmax.f32 %v15467_v54, %v15468_v5  ;;  %v15479_v28 = vrot.slane %v15478_v2, 1  ;;  %v15510_v54 = vld [vmem:[#allocation60_spill] sm:$0xff] }
 0x2f9   :  { %v12075_v24 = vmax.f32 %v15470_v23, %v15471_v43  ;;  %v12082_v7 = vmax.f32 %v15475_v62, %v15476_v53  ;;  %v15483_v23 = vld [vmem:[#allocation75_spill] sm:$0xff] }
 0x2fa   :  { %15469 = vst [vmem:[#allocation14_spill] sm:$0xff] %v12070_v31  ;;  %v12087_v29 = vmax.f32 %v15478_v2, %v15479_v28  ;;  %v15484_v43 = vrot.slane %v15483_v23, 2  ;;  %v15491_v28 = vld [vmem:[#allocation74_spill] sm:$0xff]  ;;  %v15516_v62 = vld [vmem:[#allocation79_spill] sm:$0xff] }
 0x2fb   :  { %15472 = vst [vmem:[#allocation85_spill] sm:$0xff] %v12075_v24  ;;  %15477 = vst [vmem:[#allocation16_spill] sm:$0xff] %v12082_v7  ;;  %v15487_v24 = vrot.slane %v15486_v34, 1  ;;  %v15492_v2 = vrot.slane %v15491_v28, 2 }
 0x2fc   :  { %15480 = vst [vmem:[#allocation86_spill] sm:$0xff] %v12087_v29  ;;  %v12094_v35 = vmax.f32 %v15483_v23, %v15484_v43  ;;  %v15495_v29 = vrot.slane %v15494_v26, 1  ;;  %v15497_v23 = vld [vmem:[#allocation66_spill] sm:$0xff] }
 0x2fd   :  { %v12099_v38 = vmax.f32 %v15486_v34, %v15487_v24  ;;  %v12106_v5 = vmax.f32 %v15491_v28, %v15492_v2  ;;  %v15499_v24 = vld [vmem:[#allocation76_spill] sm:$0xff]  ;;  %v15505_v28 = vld [vmem:[#allocation30_spill] sm:$0xff] }
 0x2fe   :  { %15485 = vst [vmem:[#allocation19_spill] sm:$0xff] %v12094_v35  ;;  %v12111_v31 = vmax.f32 %v15494_v26, %v15495_v29  ;;  %v15500_v34 = vrot.slane %v15499_v24, 2  ;;  %v15507_v29 = vld [vmem:[#allocation77_spill] sm:$0xff] }
 0x2ff   :  { %15488 = vst [vmem:[#allocation87_spill] sm:$0xff] %v12099_v38  ;;  %15493 = vst [vmem:[#allocation21_spill] sm:$0xff] %v12106_v5  ;;  %v15503_v38 = vrot.slane %v15502_v12, 1  ;;  %v15508_v26 = vrot.slane %v15507_v29, 2 }
 0x300   :  { %15496 = vst [vmem:[#allocation88_spill] sm:$0xff] %v12111_v31  ;;  %v12118_v53 = vmax.f32 %v15499_v24, %v15500_v34  ;;  %v15511_v31 = vrot.slane %v15510_v54, 1  ;;  %v15513_v24 = vld [vmem:[#allocation32_spill] sm:$0xff] }
 0x301   :  { %v12123_v7 = vmax.f32 %v15502_v12, %v15503_v38  ;;  %v12130_v43 = vmax.f32 %v15507_v29, %v15508_v26  ;;  %v15514_v38 = vld [vmem:[#allocation61_spill] sm:$0xff]  ;;  %v15518_v29 = vld [vmem:[#allocation36_spill] sm:$0xff] }
 0x302   :  { %15501 = vst [vmem:[#allocation89_spill] sm:$0xff] %v12118_v53  ;;  %v12135_v35 = vmax.f32 %v15510_v54, %v15511_v31  ;;  %v15515_v12 = vrot.slane %v15514_v38, 2  ;;  %v15519_v31 = vrot.slane %v15395_v13, 2  ;;  %v15520_v53 = vrot.slane %v15396_v45, 1 }
 0x303   :  { %15504 = vst [vmem:[#allocation23_spill] sm:$0xff] %v12123_v7  ;;  %15509 = vst [vmem:[#allocation90_spill] sm:$0xff] %v12130_v43  ;;  %v15517_v7 = vrot.slane %v15516_v62, 1  ;;  %v15523_v43 = vrot.slane %v11575_v56, 1 }
 0x304   :  { %15512 = vst [vmem:[#allocation42_spill] sm:$0xff] %v12135_v35  ;;  %v12142_v2 = vmax.f32 %v15514_v38, %v15515_v12  ;;  %v12154_v54 = vmax.f32 %v15395_v13, %v15519_v31  ;;  %v12159_v34 = vmax.f32 %v15396_v45, %v15520_v53  ;;  %v15524_v13 = vrot.slane %v11580_v11, 1 }
 0x305   :  { %v12147_v5 = vmax.f32 %v15516_v62, %v15517_v7  ;;  %v15522_v7 = vrot.slane %v15401_v6, 2  ;;  %v12171_v26 = vmax.f32 %v11575_v56, %v15523_v43  ;;  %v15525_v53 = vrot.slane %v11589_v46, 1 }
 0x306   :  { %15521 = vst [vmem:[#allocation91_spill] sm:$0xff] %v12159_v34  ;;  %v12176_v31 = vmax.f32 %v11580_v11, %v15524_v13  ;;  %v15527_v43 = vrot.slane %v11602_v15, 1  ;;  %v15528_v11 = vrot.slane %v11608_v57, 1 }
 0x307   :  { %v12166_v62 = vmax.f32 %v15401_v6, %v15522_v7  ;;  %v12182_v12 = vmax.f32 %v11589_v46, %v15525_v53  ;;  %v15526_v6 = vrot.slane %v11594_v49, 1  ;;  %v15529_v53 = vrot.slane %v11616_v40, 1 }
 0x308   :  { %v12193_v38 = vmax.f32 %v11602_v15, %v15527_v43  ;;  %v12198_v13 = vmax.f32 %v11608_v57, %v15528_v11  ;;  %v15533_v43 = vrot.slane %v11629_v0, 1  ;;  %v15534_v57 = vrot.slane %v11634_v48, 1 }
 0x309   :  { %v12187_v7 = vmax.f32 %v11594_v49, %v15526_v6  ;;  %v12204_v45 = vmax.f32 %v11616_v40, %v15529_v53  ;;  %v15531_v49 = vrot.slane %v11621_v44, 1  ;;  %v15535_v53 = vrot.slane %v11642_v1, 1 }
 0x30a   :  { %v12215_v56 = vmax.f32 %v11629_v0, %v15533_v43  ;;  %v12220_v11 = vmax.f32 %v11634_v48, %v15534_v57  ;;  %v15539_v43 = vrot.slane %v11655_v3, 1  ;;  %v15540_v48 = vrot.slane %v11660_v10, 1 }
 0x30b   :  { %15530 = vst [vmem:[#allocation43_spill] sm:$0xff] %v12204_v45  ;;  %v12209_v6 = vmax.f32 %v11621_v44, %v15531_v49  ;;  %v12226_v46 = vmax.f32 %v11642_v1, %v15535_v53  ;;  %v15537_v44 = vrot.slane %v11648_v36, 1  ;;  %v15542_v53 = vrot.slane %v11667_v42, 1 }
 0x30c   :  { %v12237_v15 = vmax.f32 %v11655_v3, %v15539_v43  ;;  %v12242_v57 = vmax.f32 %v11660_v10, %v15540_v48  ;;  %v7861_v3 = vld [vmem:[%s13998_s4] sm:$0xff]   ;;  %v15546_v48 = vrot.slane %v11679_v60, 1  ;;  %v15601_v45 = vrot.slane %v15497_v23, 1 }
 0x30d   :  { %15532 = vst [vmem:[#allocation92_spill] sm:$0xff] %v12209_v6  ;;  %15536 = vst [vmem:[#allocation44_spill] sm:$0xff] %v12226_v46  ;;  %v12231_v49 = vmax.f32 %v11648_v36, %v15537_v44  ;;  %v12248_v40 = vmax.f32 %v11667_v42, %v15542_v53  ;;  %v7860_v36 = vld [vmem:[%s13998_s4 + $0x40] sm:$0xff]   ;;  %v15544_v44 = vrot.slane %v11672_v39, 1  ;;  %v15547_v53 = vrot.slane %v11684_v18, 1 }
 0x30e   :  { %15541 = vst [vmem:[#allocation80_spill] sm:$0xff] %v12242_v57  ;;  %v12265_v42 = vmax.f32 %v11679_v60, %v15546_v48  ;;  %7429 = vmatprep.subr.bf16.mxu1 %v7860_v36  ;;  %v15553_v48 = vrot.slane %v11703_v55, 1  ;;  %v15558_v36 = vrot.slane %v11720_v58, 1  ;;  %v15569_v60 = vld [vmem:[#allocation27_spill] sm:$0xff] }
 0x30f   :  { %15538 = vst [vmem:[#allocation62_spill] sm:$0xff] %v12231_v49  ;;  %15543 = vst [vmem:[#allocation93_spill] sm:$0xff] %v12248_v40  ;;  %v12259_v10 = vmax.f32 %v11672_v39, %v15544_v44  ;;  %v12270_v1 = vmax.f32 %v11684_v18, %v15547_v53  ;;  %v15549_v49 = vrot.slane %v11691_v17, 1  ;;  %v15551_v39 = vrot.slane %v11696_v27, 1  ;;  %7430 = vmatpush3.bf16.msra.mxu1 %v7861_v3 }
 0x310   :  { %v12287_v18 = vmax.f32 %v11703_v55, %v15553_v48  ;;  %v15554_v53 = vrot.slane %v11708_v22, 1  ;;  %v15560_v48 = vrot.slane %v15442_v14, 1  ;;  %v15570_v43 = vrot.slane %v15569_v60, 1 }
 0x311   :  { %15545 = vst [vmem:[#allocation45_spill] sm:$0xff] %v12259_v10  ;;  %15548 = vst [vmem:[#allocation63_spill] sm:$0xff] %v12270_v1  ;;  %v12276_v40 = vmax.f32 %v11691_v17, %v15549_v49  ;;  %v12281_v44 = vmax.f32 %v11696_v27, %v15551_v39  ;;  %v15556_v49 = vrot.slane %v11715_v37, 1  ;;  %v12303_v39 = vmax.f32 %v11720_v58, %v15558_v36  ;;  %v7863_v58 = vld [vmem:[%s13998_s4 + $0x8] sm:$0xff]   ;;  %v15565_v36 = vld [vmem:[#allocation20_spill] sm:$0xff] }
 0x312   :  { %v12292_v0 = vmax.f32 %v11708_v22, %v15554_v53  ;;  %v12309_v22 = vmax.f32 %v15442_v14, %v15560_v48  ;;  %v15561_v53 = vrot.slane %v15443_v33, 1  ;;  %v15566_v48 = vrot.slane %v15565_v36, 1  ;;  %v15574_v10 = vld [vmem:[#allocation17_spill] sm:$0xff] }
 0x313   :  { %15550 = vst [vmem:[#allocation49_spill] sm:$0xff] %v12276_v40  ;;  %15552 = vst [vmem:[#allocation50_spill] sm:$0xff] %v12281_v44  ;;  %v12298_v27 = vmax.f32 %v11715_v37, %v15556_v49  ;;  %v7862_v37 = vld [vmem:[%s13998_s4 + $0x48] sm:$0xff]   ;;  %v15563_v49 = vrot.slane %v15449_v47, 1  ;;  %v15571_v44 = vld [vmem:[#allocation29_spill] sm:$0xff] }
 0x314   :  { %15555 = vst [vmem:[#allocation11_spill] sm:$0xff] %v12292_v0  ;;  %15559 = vst [vmem:[#allocation71_spill] sm:$0xff] %v12303_v39  ;;  %v12314_v17 = vmax.f32 %v15443_v33, %v15561_v53  ;;  %v12331_v33 = vmax.f32 %v15565_v36, %v15566_v48  ;;  %v15568_v53 = vld [vmem:[#allocation15_spill] sm:$0xff]  ;;  %v12337_v39 = vmax.f32 %v15569_v60, %v15570_v43  ;;  %7431 = vmatprep.subr.bf16.mxu1 %v7862_v37  ;;  %v15578_v36 = vld [vmem:[#allocation26_spill] sm:$0xff] }
 0x315   :  { %15557 = vst [vmem:[#allocation25_spill] sm:$0xff] %v12298_v27  ;;  %v12326_v14 = vmax.f32 %v15449_v47, %v15563_v49  ;;  %v15572_v27 = vrot.slane %v15571_v44, 1  ;;  %v15575_v49 = vld [vmem:[#allocation98_spill] sm:$0xff]  ;;  %v15579_v48 = vrot.slane %v15578_v36, 1  ;;  %7432 = vmatpush3.bf16.msra.mxu1 %v7863_v58  ;;  %v7865_v58 = vld [vmem:[%s13998_s4 + $0x10] sm:$0xff]   ;;  %v15606_v1 = vld [vmem:[#allocation89_spill] sm:$0xff] }
 0x316   :  { %15562 = vst [vmem:[#allocation97_spill] sm:$0xff] %v12314_v17  ;;  %15567 = vst [vmem:[#allocation52_spill] sm:$0xff] %v12331_v33  ;;  %v15581_v43 = vld [vmem:[#allocation14_spill] sm:$0xff]  ;;  %v15582_v33 = vld [vmem:[#allocation99_spill] sm:$0xff] }
 0x317   :  { %15564 = vst [vmem:[#allocation22_spill] sm:$0xff] %v12326_v14  ;;  %v12342_v3 = vmax.f32 %v15571_v44, %v15572_v27  ;;  %v15576_v14 = vrot.slane %v15575_v49, 1  ;;  %v12353_v55 = vmax.f32 %v15578_v36, %v15579_v48  ;;  %v2649_v60 = vrot.slane %v15581_v43, 1  ;;  %v15584_v27 = vld [vmem:[#allocation28_spill] sm:$0xff]  ;;  %v15591_v48 = vld [vmem:[#allocation31_spill] sm:$0xff] }
 0x318   :  { %v15583_v46 = vrot.slane %v15582_v33, 1  ;;  %v15585_v47 = vrot.slane %v15584_v27, 1 }
 0x319   :  { %15573 = vst [vmem:[#allocation72_spill] sm:$0xff] %v12342_v3  ;;  %v12348_v40 = vmax.f32 %v15575_v49, %v15576_v14  ;;  %15580 = vst [vmem:[#allocation51_spill] sm:$0xff] %v12353_v55  ;;  %v15587_v14 = vld [vmem:[#allocation16_spill] sm:$0xff]  ;;  %v15592_v55 = vrot.slane %v15591_v48, 1  ;;  %v15603_v3 = vld [vmem:[#allocation46_spill] sm:$0xff] }
 0x31a   :  { %v12359_v44 = vmax.f32 %v15582_v33, %v15583_v46  ;;  %v12364_v34 = vmax.f32 %v15584_v27, %v15585_v47  ;;  %v2677_v37 = vrot.slane %v15587_v14, 1  ;;  %v15588_v49 = vld [vmem:[#allocation64_spill] sm:$0xff]  ;;  %v15594_v46 = vld [vmem:[#allocation19_spill] sm:$0xff]  ;;  %v15595_v27 = vld [vmem:[#allocation65_spill] sm:$0xff]  ;;  %v15604_v17 = vrot.slane %v15603_v3, 1 }
 0x31b   :  { %15577 = vst [vmem:[#allocation53_spill] sm:$0xff] %v12348_v40  ;;  %v15589_v40 = vrot.slane %v15588_v49, 1  ;;  %v12375_v35 = vmax.f32 %v15591_v48, %v15592_v55  ;;  %v2705_v33 = vrot.slane %v15594_v46, 1  ;;  %v7864_v47 = vld [vmem:[%s13998_s4 + $0x50] sm:$0xff]   ;;  %v15596_v6 = vrot.slane %v15595_v27, 1  ;;  %v15600_v48 = vld [vmem:[#allocation21_spill] sm:$0xff] }
 0x31c   :  { %15586 = vst [vmem:[#allocation54_spill] sm:$0xff] %v12364_v34  ;;  %v12398_v34 = vmax.f32 %v15497_v23, %v15601_v45  ;;  %v12403_v0 = vmax.f32 %v15603_v3, %v15604_v17  ;;  %7433 = vmatprep.subr.bf16.mxu1 %v7864_v47  ;;  %v15611_v23 = vld [vmem:[#allocation90_spill] sm:$0xff]  ;;  %v15614_v3 = vrot.slane %v11853_v21, 1  ;;  %v15617_v47 = vrot.slane %v11865_v8, 1 }
 0x31d   :  { %v12370_v36 = vmax.f32 %v15588_v49, %v15589_v40  ;;  %15593 = vst [vmem:[#allocation38_spill] sm:$0xff] %v12375_v35  ;;  %v12387_v40 = vmax.f32 %v15595_v27, %v15596_v6  ;;  %v15597_v49 = vld [vmem:[#allocation33_spill] sm:$0xff]  ;;  %v2733_v35 = vrot.slane %v15600_v48, 1  ;;  %v2761_v6 = vrot.slane %v15606_v1, 1  ;;  %7434 = vmatpush3.bf16.msra.mxu1 %v7865_v58 }
 0x31e   :  { %15602 = vst [vmem:[#allocation75_spill] sm:$0xff] %v12398_v34  ;;  %15605 = vst [vmem:[#allocation57_spill] sm:$0xff] %v12403_v0  ;;  %v15607_v27 = vrot.slane %v15505_v28, 1  ;;  %v2789_v45 = vrot.slane %v15611_v23, 1  ;;  %v15612_v34 = vrot.slane %v15513_v24, 1  ;;  %v12425_v0 = vmax.f32 %v11853_v21, %v15614_v3  ;;  %v7866_v58 = vld [vmem:[%s13998_s4 + $0x58] sm:$0xff]  }
 0x31f   :  { %15590 = vst [vmem:[#allocation73_spill] sm:$0xff] %v12370_v36  ;;  %v15598_v36 = vrot.slane %v15597_v49, 1  ;;  %v3253_v3 = vld [vmem:[#allocation2] sm:$0xff]  ;;  %7435 = vmatprep.subr.bf16.mxu1 %v7866_v58 }
 0x320   :  { %v12409_v57 = vmax.f32 %v15505_v28, %v15607_v27  ;;  %v12420_v17 = vmax.f32 %v15513_v24, %v15612_v34  ;;  %15615 = vst [vmem:[#allocation66_spill] sm:$0xff] %v12425_v0  ;;  %v2817_v28 = vrot.slane %v12142_v2, 1  ;;  %v15616_v27 = vrot.slane %v15518_v29, 1  ;;  %3269 = vst.msk [vmem:[#allocation3] sm:$0xff] %vm688_vm2, %v3253_v3 }
 0x321   :  { %v12392_v55 = vmax.f32 %v15597_v49, %v15598_v36  ;;  %v15608_v36 = vld [vmem:[#allocation67_spill] sm:$0xff]  ;;  %v2845_v24 = vrot.slane %v12154_v54, 1  ;;  %v15619_v34 = vrot.slane %v11872_v4, 1  ;;  %v15623_v0 = vrot.slane %v11890_v25, 1 }
 0x322   :  { %v15609_v49 = vrot.slane %v15608_v36, 1  ;;  %15613 = vst [vmem:[#allocation58_spill] sm:$0xff] %v12420_v17  ;;  %v15625_v17 = vld [vmem:[#allocation100_spill] sm:$0xff] }
 0x323   :  { %15599 = vst [vmem:[#allocation56_spill] sm:$0xff] %v12392_v55  ;;  %v12442_v21 = vmax.f32 %v11872_v4, %v15619_v34  ;;  %v2174_v4 = vmax.f32 %v11890_v25, %v15623_v0  ;;  %v15624_v34 = vrot.slane %v11902_v61, 1  ;;  %v15628_v25 = vrot.slane %v11938_v59, 1 }
 0x324   :  { %v12414_v55 = vmax.f32 %v15608_v36, %v15609_v49  ;;  %v12431_v36 = vmax.f32 %v15518_v29, %v15616_v27  ;;  %v12436_v49 = vmax.f32 %v11865_v8, %v15617_v47  ;;  %v7867_v29 = vld [vmem:[%s13998_s4 + $0x18] sm:$0xff]   ;;  %v15621_v27 = vrot.slane %v11877_v20, 1 }
 0x325   :  { %15620 = vst [vmem:[#allocation59_spill] sm:$0xff] %v12442_v21  ;;  %v2873_v47 = vrot.slane %v12166_v62, 1  ;;  %v2202_v21 = vmax.f32 %v11902_v61, %v15624_v34  ;;  %v12479_v61 = vmax.f32 %v11938_v59, %v15628_v25  ;;  %7436 = vmatpush3.bf16.msra.mxu1 %v7867_v29  ;;  %v7869_v29 = vld [vmem:[%s13998_s4 + $0x20] sm:$0xff]   ;;  %v15636_v25 = vrot.slane %v12022_v30, 1 }
 0x326   :  { %15610 = vst [vmem:[#allocation74_spill] sm:$0xff] %v12414_v55  ;;  %15618 = vst [vmem:[#allocation76_spill] sm:$0xff] %v12436_v49  ;;  %v12453_v8 = vmax.f32 %v11877_v20, %v15621_v27  ;;  %v3123_v49 = vsel %vm3102_vm5, %v12171_v26, %v15625_v17  ;;  %v15626_v55 = vrot.slane %v11914_v32, 1  ;;  %v15627_v27 = vrot.slane %v11926_v41, 1 }
 0x327   :  { %v3124_v0 = vsel %vm3104_vm6, %v12176_v31, %v3123_v49  ;;  %v15629_v26 = vrot.slane %v11950_v19, 1  ;;  %v15632_v31 = vrot.slane %v11986_v16, 1 }
 0x328   :  { %15622 = vst [vmem:[#allocation30_spill] sm:$0xff] %v12453_v8  ;;  %v12469_v20 = vmax.f32 %v11914_v32, %v15626_v55  ;;  %v12474_v8 = vmax.f32 %v11926_v41, %v15627_v27  ;;  %v15630_v32 = vrot.slane %v11962_v51, 1  ;;  %v15631_v41 = vrot.slane %v11974_v63, 1  ;;  %v15635_v27 = vld [vmem:[#allocation68_spill] sm:$0xff] }
 0x329   :  { %v12486_v17 = vmax.f32 %v11950_v19, %v15629_v26  ;;  %v3125_v59 = vsel %vm3106_vm7, %v2174_v4, %v3124_v0  ;;  %v2454_v49 = vmax.f32 %v11986_v16, %v15632_v31  ;;  %v15633_v19 = vrot.slane %v11998_v9, 1  ;;  %v3382_v4 = vld [vmem:[#allocation2 + $0x2] sm:$0xff] }
 0x32a   :  { %v12491_v55 = vmax.f32 %v11962_v51, %v15630_v32  ;;  %v12496_v3 = vmax.f32 %v11974_v63, %v15631_v41  ;;  %v15634_v51 = vrot.slane %v12010_v50, 1  ;;  %v7868_v63 = vld [vmem:[%s13998_s4 + $0x60] sm:$0xff]   ;;  %v3126_v16 = vsel %vm3108_vm8, %v15635_v27, %v3125_v59  ;;  %3398 = vst.msk [vmem:[#allocation3 + $0x8] sm:$0xff] %vm688_vm2, %v3382_v4 }
 0x32b   :  { %v12505_v58 = vmax.f32 %v11998_v9, %v15633_v19  ;;  %v12521_v9 = vmax.f32 %v12022_v30, %v15636_v25  ;;  %v15637_v0 = vrot.slane %v12034_v52, 1  ;;  %v15638_v26 = vrot.slane %v15568_v53, 1  ;;  %7437 = vmatprep.subr.bf16.mxu1 %v7868_v63  ;;  %v15648_v63 = vld [vmem:[#allocation87_spill] sm:$0xff]  ;;  %v15653_v25 = vld [vmem:[#allocation97_spill] sm:$0xff] }
 0x32c   :  { %v2510_v34 = vmax.f32 %v12010_v50, %v15634_v51  ;;  %v3127_v41 = vsel %vm3110_vm9, %v12182_v12, %v3126_v16  ;;  %v15639_v59 = vrot.slane %v15574_v10, 1  ;;  %v12540_v31 = vmax.f32 %v15581_v43, %v2649_v60  ;;  %7438 = vmatpush3.bf16.msra.mxu1 %v7869_v29  ;;  %v15649_v29 = vld [vmem:[#allocation23_spill] sm:$0xff] }
 0x32d   :  { %v12526_v50 = vmax.f32 %v12034_v52, %v15637_v0  ;;  %v12531_v32 = vmax.f32 %v15568_v53, %v15638_v26  ;;  %v2678_v52 = vmax.f32 %v15587_v14, %v2677_v37  ;;  %v3128_v19 = vsel %vm3112_vm10, %v12187_v7, %v3127_v41  ;;  %v7870_v7 = vld [vmem:[%s13998_s4 + $0x68] sm:$0xff]   ;;  %v15654_v26 = vld [vmem:[#allocation72_spill] sm:$0xff] }
 0x32e   :  { %v2622_v30 = vmax.f32 %v15574_v10, %v15639_v59  ;;  %v12546_v53 = vmax.f32 %v15594_v46, %v2705_v33  ;;  %v2734_v51 = vmax.f32 %v15600_v48, %v2733_v35  ;;  %v12550_v12 = vmax.f32 %v15606_v1, %v2761_v6  ;;  %v7871_v35 = vld [vmem:[%s13998_s4 + $0x28] sm:$0xff]   ;;  %v15642_v33 = vld [vmem:[#allocation41_spill] sm:$0xff]  ;;  %v3318_v6 = vpop.permute.xlu1 %3317  ;;  %7439 = vmatprep.subr.bf16.mxu1 %v7870_v7 }
 0x32f   :  { %v3129_v10 = vsel %vm3114_vm11, %v2202_v21, %v3128_v19  ;;  %v2790_v43 = vmax.f32 %v15611_v23, %v2789_v45  ;;  %v12555_v60 = vmax.f32 %v12142_v2, %v2817_v28  ;;  %v2846_v14 = vmax.f32 %v12154_v54, %v2845_v24  ;;  %v15640_v37 = vld [vmem:[#allocation39_spill] sm:$0xff]  ;;  %v15643_v23 = vld [vmem:[#allocation13_spill] sm:$0xff]  ;;  %v15645_v24 = vld [vmem:[#allocation12_spill] sm:$0xff]  ;;  %3366 = vst.msk [vmem:[#allocation3] sm:$0xff] %vm3365_vm12, %v3318_v6 }
 0x330   :  { %3239 = vst.msk [vmem:[#allocation2 + $0x31] sm:$0xff] %vm688_vm2, %v3129_v10  ;;  %v12566_v1 = vmax.f32 %v12166_v62, %v2873_v47  ;;  %v3137_v2 = vsel %vm3102_vm5, %v12193_v38, %v15640_v37  ;;  %v15641_v46 = vld [vmem:[#allocation47_spill] sm:$0xff]  ;;  %v3151_v48 = vsel %vm3102_vm5, %v12237_v15, %v15642_v33  ;;  %v3158_v45 = vsel %vm3102_vm5, %v12265_v42, %v15643_v23  ;;  %v15644_v28 = vld [vmem:[#allocation69_spill] sm:$0xff]  ;;  %v15655_v59 = vld [vmem:[#allocation54_spill] sm:$0xff] }
 0x331   :  { %v3144_v54 = vsel %vm3102_vm5, %v12215_v56, %v15641_v46  ;;  %v3165_v62 = vsel %vm3102_vm5, %v12287_v18, %v15644_v28  ;;  %v3172_v38 = vsel %vm3102_vm5, %v12309_v22, %v15645_v24  ;;  %v15646_v21 = vld [vmem:[#allocation83_spill] sm:$0xff]  ;;  %v15647_v47 = vld [vmem:[#allocation85_spill] sm:$0xff]  ;;  %v3193_v42 = vsel %vm3102_vm5, %v12387_v40, %v15648_v63  ;;  %7440 = vmatpush3.bf16.msra.mxu1 %v7871_v35  ;;  %v15656_v10 = vld [vmem:[#allocation56_spill] sm:$0xff]  ;;  %v3447_v28 = vpop.permute.xlu0 %3446 }
 0x332   :  { %v3179_v56 = vsel %vm3102_vm5, %v12337_v39, %v15646_v21  ;;  %v3186_v15 = vsel %vm3102_vm5, %v12359_v44, %v15647_v47  ;;  %v3200_v18 = vsel %vm3102_vm5, %v12409_v57, %v15649_v29  ;;  %v3207_v22 = vsel %vm3102_vm5, %v12431_v36, %v12147_v5  ;;  %v15650_v44 = vld [vmem:[#allocation80_spill] sm:$0xff]  ;;  %v15651_v16 = vld [vmem:[#allocation63_spill] sm:$0xff]  ;;  %v15657_v35 = vld [vmem:[#allocation74_spill] sm:$0xff]  ;;  %3494 = vst.msk [vmem:[#allocation3 + $0x8] sm:$0xff] %vm3365_vm12, %v3447_v28 }
 0x333   :  { %v3138_v39 = vsel %vm3104_vm6, %v12198_v13, %v3137_v2  ;;  %v3145_v4 = vsel %vm3104_vm6, %v12220_v11, %v3144_v54  ;;  %v3152_v27 = vsel %vm3104_vm6, %v15650_v44, %v3151_v48  ;;  %v3159_v40 = vsel %vm3104_vm6, %v15651_v16, %v3158_v45  ;;  %v7872_v57 = vld [vmem:[%s13998_s4 + $0x70] sm:$0xff]   ;;  %v7874_v13 = vld [vmem:[%s13998_s4 + $0x78] sm:$0xff]   ;;  %v15666_v16 = vld [vmem:[#allocation82_spill] sm:$0xff] }
 0x334   :  { %v7873_v5 = vld [vmem:[%s13998_s4 + $0x30] sm:$0xff]   ;;  %v3173_v0 = vsel %vm3104_vm6, %v15653_v25, %v3172_v38  ;;  %v3180_v41 = vsel %vm3104_vm6, %v15654_v26, %v3179_v56  ;;  %v3187_v19 = vsel %vm3104_vm6, %v15655_v59, %v3186_v15  ;;  %v3194_v7 = vsel %vm3104_vm6, %v15656_v10, %v3193_v42  ;;  %7441 = vmatprep.subr.bf16.mxu1 %v7872_v57  ;;  %v7875_v24 = vld [vmem:[%s13998_s4 + $0x38] sm:$0xff]   ;;  %v15661_v42 = vld [vmem:[#allocation78_spill] sm:$0xff] }
 0x335   :  { %v15652_v36 = vld [vmem:[#allocation11_spill] sm:$0xff]  ;;  %v3201_v37 = vsel %vm3104_vm6, %v15657_v35, %v3200_v18  ;;  %v15658_v2 = vld [vmem:[#allocation76_spill] sm:$0xff]  ;;  %v3139_v54 = vsel %vm3106_vm7, %v12469_v20, %v3138_v39  ;;  %v3146_v33 = vsel %vm3106_vm7, %v12479_v61, %v3145_v4  ;;  %v3153_v48 = vsel %vm3106_vm7, %v12491_v55, %v3152_v27  ;;  %7442 = vmatpush3.bf16.msra.mxu1 %v7873_v5  ;;  %v15665_v44 = vld [vmem:[#allocation81_spill] sm:$0xff] }
 0x336   :  { %v3166_v11 = vsel %vm3104_vm6, %v15652_v36, %v3165_v62  ;;  %v3208_v46 = vsel %vm3104_vm6, %v15658_v2, %v3207_v22  ;;  %v3160_v23 = vsel %vm3106_vm7, %v2454_v49, %v3159_v40  ;;  %v3320_v62 = vpop.permute.xlu1 %3319  ;;  %v3174_v61 = vsel %vm3106_vm7, %v12526_v50, %v3173_v0  ;;  %7443 = vmatprep.subr.bf16.mxu1 %v7874_v13  ;;  %v15659_v50 = vld [vmem:[#allocation40_spill] sm:$0xff]  ;;  %v15660_v15 = vld [vmem:[#allocation43_spill] sm:$0xff]  ;;  %v7876_v5 = vld [vmem:[%s13998_s4 + $0xc0] sm:$0xff]  }
 0x337   :  { %v3167_v45 = vsel %vm3106_vm7, %v2510_v34, %v3166_v11  ;;  %v3416_v38 = vld [vmem:[#allocation2 + $0x30] sm:$0xff]  ;;  %v3181_v55 = vsel %vm3106_vm7, %v2622_v30, %v3180_v41  ;;  %v3188_v49 = vsel %vm3106_vm7, %v2678_v52, %v3187_v19  ;;  %v3195_v34 = vsel %vm3106_vm7, %v2734_v51, %v3194_v7  ;;  %3367 = vst.msk [vmem:[#allocation3 + $0x28] sm:$0xff] %vm3365_vm12, %v3320_v62  ;;  %v15668_v36 = vld [vmem:[#allocation86_spill] sm:$0xff]  ;;  %v15673_v35 = vld [vmem:[#allocation93_spill] sm:$0xff] }
 0x338   :  { %v12643_v20 = vld [vmem:[#allocation2 + $0x31] sm:$0xff]  ;;  %3450 = vrot.lane.b32.xlu0 %v3416_v38, %s8041_s25  ;;  %v3202_v56 = vsel %vm3106_vm7, %v2790_v43, %v3201_v37  ;;  %v3209_v47 = vsel %vm3106_vm7, %v2846_v14, %v3208_v46  ;;  %v3140_v30 = vsel %vm3108_vm8, %v15659_v50, %v3139_v54  ;;  %3272 = vst.msk [vmem:[#allocation3 + $0x78] sm:$0xff] %vm688_vm2, %v3416_v38  ;;  %v15670_v26 = vld [vmem:[#allocation42_spill] sm:$0xff]  ;;  %v15674_v37 = vld [vmem:[#allocation49_spill] sm:$0xff] }
 0x339   :  { %v12645_v21 = vld [vmem:[#allocation2 + $0x32] sm:$0xff]  ;;  %3323 = vrot.lane.b32.xlu1 %v12643_v20, %s8041_s25  ;;  %v3141_v63 = vsel %vm3110_vm9, %v15660_v15, %v3140_v30  ;;  %v3147_v29 = vsel %vm3108_vm8, %v15661_v42, %v3146_v33  ;;  %v15662_v43 = vld [vmem:[#allocation95_spill] sm:$0xff]  ;;  %v3168_v27 = vsel %vm3108_vm8, %v15665_v44, %v3167_v45  ;;  %v3175_v40 = vsel %vm3108_vm8, %v15666_v16, %v3174_v61  ;;  %v3803_v54 = vld [vmem:[#allocation3 + $0x20] sm:$0xff] }
 0x33a   :  { %3784 = vst.msk [vmem:[#allocation3 + $0x48] sm:$0xff] %vm688_vm2, %v12645_v21  ;;  %3401 = vst.msk [vmem:[#allocation3 + $0x80] sm:$0xff] %vm688_vm2, %v12645_v21  ;;  %v3640_v52 = vld [vmem:[#allocation2 + $0x30] sm:$0xff]  ;;  %v3154_v14 = vsel %vm3108_vm8, %v15662_v43, %v3153_v48  ;;  %7444 = vmatpush3.bf16.msra.mxu1 %v7875_v24  ;;  %v3189_v11 = vsel %vm3108_vm8, %v15668_v36, %v3188_v49  ;;  %v3203_v41 = vsel %vm3108_vm8, %v15670_v26, %v3202_v56  ;;  %v15676_v33 = vld [vmem:[#allocation62_spill] sm:$0xff] }
 0x33b   :  { %v3512_v51 = vld [vmem:[#allocation2 + $0x31] sm:$0xff]  ;;  %3656 = vst.msk [vmem:[#allocation3 + $0x40] sm:$0xff] %vm688_vm2, %v3640_v52  ;;  %v15678_v28 = vld [vmem:[#allocation25_spill] sm:$0xff]  ;;  %v15679_v24 = vld [vmem:[#allocation22_spill] sm:$0xff]  ;;  %7493 = vmatprep.subr.bf16.mxu1 %v7876_v5 }
 0x33c   :  { %v15663_v18 = vld [vmem:[#allocation48_spill] sm:$0xff]  ;;  %3528 = vst.msk [vmem:[#allocation3 + $0x60] sm:$0xff] %vm688_vm2, %v3512_v51  ;;  %v15671_v59 = vld [vmem:[#allocation91_spill] sm:$0xff]  ;;  %v3169_v62 = vsel %vm3110_vm9, %v15678_v28, %v3168_v27  ;;  %v3176_v38 = vsel %vm3110_vm9, %v15679_v24, %v3175_v40  ;;  %v15680_v49 = vld [vmem:[#allocation53_spill] sm:$0xff] }
 0x33d   :  { %v3161_v22 = vsel %vm3108_vm8, %v15663_v18, %v3160_v23  ;;  %v15664_v39 = vld [vmem:[#allocation92_spill] sm:$0xff]  ;;  %v3210_v19 = vsel %vm3108_vm8, %v15671_v59, %v3209_v47  ;;  %v15677_v23 = vld [vmem:[#allocation45_spill] sm:$0xff]  ;;  %v15682_v30 = vld [vmem:[#allocation75_spill] sm:$0xff] }
 0x33e   :  { %v3142_v4 = vsel %vm3112_vm10, %v15664_v39, %v3141_v63  ;;  %v15667_v57 = vld [vmem:[#allocation84_spill] sm:$0xff]  ;;  %v3162_v2 = vsel %vm3110_vm9, %v15674_v37, %v3161_v22  ;;  %v15681_v56 = vld [vmem:[#allocation73_spill] sm:$0xff]  ;;  %v15683_v51 = vld [vmem:[#allocation58_spill] sm:$0xff] }
 0x33f   :  { %v3182_v6 = vsel %vm3108_vm8, %v15667_v57, %v3181_v55  ;;  %v3143_v13 = vsel %vm3114_vm11, %v12474_v8, %v3142_v4  ;;  %v15669_v25 = vld [vmem:[#allocation88_spill] sm:$0xff]  ;;  %v3155_v8 = vsel %vm3110_vm9, %v15673_v35, %v3154_v14  ;;  %v3190_v47 = vsel %vm3110_vm9, %v15681_v56, %v3189_v11  ;;  %v15684_v15 = vld [vmem:[#allocation59_spill] sm:$0xff]  ;;  %v15685_v63 = vld [vmem:[#allocation50_spill] sm:$0xff] }
 0x340   :  { %v3196_v0 = vsel %vm3108_vm8, %v15669_v25, %v3195_v34  ;;  %3241 = vst.msk [vmem:[#allocation2 + $0x51] sm:$0xff] %vm688_vm2, %v3143_v13  ;;  %v15672_v10 = vld [vmem:[#allocation44_spill] sm:$0xff]  ;;  %v3156_v45 = vsel %vm3112_vm10, %v15677_v23, %v3155_v8  ;;  %v3183_v34 = vsel %vm3110_vm9, %v15680_v49, %v3182_v6  ;;  %v3163_v42 = vsel %vm3112_vm10, %v15685_v63, %v3162_v2  ;;  %v15686_v43 = vld [vmem:[#allocation71_spill] sm:$0xff]  ;;  %v15689_v44 = vld [vmem:[#allocation38_spill] sm:$0xff] }
 0x341   :  { %v3148_v7 = vsel %vm3110_vm9, %v15672_v10, %v3147_v29  ;;  %v15675_v46 = vld [vmem:[#allocation96_spill] sm:$0xff]  ;;  %v3157_v55 = vsel %vm3114_vm11, %v12496_v3, %v3156_v45  ;;  %v3808_v50 = vld [vmem:[#allocation3 + $0x48] sm:$0xff]  ;;  %v3197_v52 = vsel %vm3110_vm9, %v15682_v30, %v3196_v0  ;;  %v3211_v3 = vsel %vm3110_vm9, %v15684_v15, %v3210_v19  ;;  %v15690_v16 = vld [vmem:[#allocation57_spill] sm:$0xff] }
 0x342   :  { %3321 = vrot.lane.b32.xlu0 %v15675_v46, %s8041_s25  ;;  %v3149_v48 = vsel %vm3112_vm10, %v15676_v33, %v3148_v7  ;;  %3243 = vst.msk [vmem:[#allocation2 + $0x71] sm:$0xff] %vm688_vm2, %v3157_v55  ;;  %v3883_v29 = vpack.c.bf16 %v3808_v50, %v3803_v54  ;;  %v3170_v14 = vsel %vm3112_vm10, %v15686_v43, %v3169_v62  ;;  %v15687_v18 = vld [vmem:[#allocation52_spill] sm:$0xff]  ;;  %v15688_v39 = vld [vmem:[#allocation51_spill] sm:$0xff]  ;;  %v15691_v57 = vld [vmem:[#allocation66_spill] sm:$0xff] }
 0x343   :  { %v3150_v61 = vsel %vm3114_vm11, %v12486_v17, %v3149_v48  ;;  %v3204_v17 = vsel %vm3110_vm9, %v15683_v51, %v3203_v41  ;;  %v3177_v22 = vsel %vm3112_vm10, %v15687_v18, %v3176_v38  ;;  %v3184_v4 = vsel %vm3112_vm10, %v15688_v39, %v3183_v34  ;;  %v15692_v5 = vld [vmem:[#allocation30_spill] sm:$0xff]  ;;  %v15693_v7 = vld [vmem:[#allocation24_spill] sm:$0xff] }
 0x344   :  { %3242 = vst.msk [vmem:[#allocation2 + $0x61] sm:$0xff] %vm688_vm2, %v3150_v61  ;;  %v3191_v27 = vsel %vm3112_vm10, %v15689_v44, %v3190_v47  ;;  %v3198_v40 = vsel %vm3112_vm10, %v15690_v16, %v3197_v52  ;;  %v3205_v6 = vsel %vm3112_vm10, %v15691_v57, %v3204_v17  ;;  %v3212_v13 = vsel %vm3112_vm10, %v15692_v5, %v3211_v3  ;;  %v3813_v37 = vld [vmem:[#allocation3 + $0x70] sm:$0xff]  ;;  %v3838_v51 = vld [vmem:[#allocation3 + $0x138] sm:$0xff]  ;;  %v3293_v18 = vld [vmem:[#allocation2 + $0xa1] sm:$0xff] }
 0x345   :  { %7763 = vmatprep.mubr.msk.bf16.mxu0 %vm688_vm2, %v3883_v29  ;;  %v3164_v36 = vsel %vm3114_vm11, %v12505_v58, %v3163_v42  ;;  %v3171_v11 = vsel %vm3114_vm11, %v12521_v9, %v3170_v14  ;;  %v3178_v25 = vsel %vm3114_vm11, %v12531_v32, %v3177_v22  ;;  %v3185_v0 = vsel %vm3114_vm11, %v12540_v31, %v3184_v4  ;;  %v3449_v32 = vpop.permute.xlu0 %3448  ;;  %v3799_v4 = vld [vmem:[#allocation3] sm:$0xff]  ;;  %v3804_v44 = vld [vmem:[#allocation3 + $0x28] sm:$0xff] }
 0x346   :  { %v3192_v41 = vsel %vm3114_vm11, %v12546_v53, %v3191_v27  ;;  %v3199_v59 = vsel %vm3114_vm11, %v12550_v12, %v3198_v40  ;;  %v3206_v58 = vsel %vm3114_vm11, %v12555_v60, %v3205_v6  ;;  %v3213_v9 = vsel %vm3114_vm11, %v12566_v1, %v3212_v13  ;;  %3244 = vst.msk [vmem:[#allocation2 + $0x81] sm:$0xff] %vm688_vm2, %v3164_v36  ;;  %v7877_v27 = vld [vmem:[%s13998_s4 + $0x80] sm:$0xff]   ;;  %v3800_v57 = vld [vmem:[#allocation3 + $0x8] sm:$0xff] }
 0x347   :  { %v12756_v26 = vld [vmem:[#allocation2 + $0x52] sm:$0xff]  ;;  %3245 = vst.msk [vmem:[#allocation2 + $0xb1] sm:$0xff] %vm688_vm2, %v3171_v11  ;;  %3246 = vst.msk [vmem:[#allocation2 + $0xc1] sm:$0xff] %vm688_vm2, %v3178_v25  ;;  %v7878_v13 = vld [vmem:[%s13998_s4 + $0xc8] sm:$0xff]  }
 0x348   :  { %v3418_v19 = vld [vmem:[#allocation2 + $0x50] sm:$0xff]  ;;  %3247 = vst.msk [vmem:[#allocation2 + $0xd1] sm:$0xff] %vm688_vm2, %v3185_v0  ;;  %3786 = vst.msk [vmem:[#allocation3 + $0x98] sm:$0xff] %vm688_vm2, %v12756_v26  ;;  %v3390_v36 = vld [vmem:[#allocation2 + $0xa2] sm:$0xff] }
 0x349   :  { %3454 = vrot.lane.b32.xlu0 %v3418_v19, %s8041_s25  ;;  %3248 = vst.msk [vmem:[#allocation2 + $0xe1] sm:$0xff] %vm688_vm2, %v3192_v41  ;;  %3249 = vst.msk [vmem:[#allocation2 + $0xf1] sm:$0xff] %vm688_vm2, %v3199_v59  ;;  %v3514_v31 = vld [vmem:[#allocation2 + $0x51] sm:$0xff]  ;;  %v3261_v11 = vld [vmem:[#allocation2 + $0xa0] sm:$0xff]  ;;  %v3879_v41 = vpack.c.bf16 %v3804_v44, %v3799_v4 }
 0x34a   :  { %3250 = vst.msk [vmem:[#allocation2 + $0x101] sm:$0xff] %vm688_vm2, %v3206_v58  ;;  %3251 = vst.msk [vmem:[#allocation2 + $0x111] sm:$0xff] %vm688_vm2, %v3213_v9  ;;  %v12785_v12 = vld [vmem:[#allocation2 + $0x72] sm:$0xff]  ;;  %v7886_v4 = vld [vmem:[%s13998_s4 + $0xe8] sm:$0xff]  }
 0x34b   :  { %3403 = vst.msk [vmem:[#allocation3 + $0xd0] sm:$0xff] %vm688_vm2, %v12756_v26  ;;  %3274 = vst.msk [vmem:[#allocation3 + $0xc8] sm:$0xff] %vm688_vm2, %v3418_v19  ;;  %v12783_v53 = vld [vmem:[#allocation2 + $0x62] sm:$0xff]  ;;  %v3420_v1 = vld [vmem:[#allocation2 + $0x70] sm:$0xff] }
 0x34c   :  { %3658 = vst.msk [vmem:[#allocation3 + $0x90] sm:$0xff] %vm688_vm2, %v3418_v19  ;;  %3530 = vst.msk [vmem:[#allocation3 + $0xb0] sm:$0xff] %vm688_vm2, %v3514_v31  ;;  %v3419_v60 = vld [vmem:[#allocation2 + $0x60] sm:$0xff]  ;;  %v3516_v8 = vld [vmem:[#allocation2 + $0x71] sm:$0xff] }
 0x34d   :  { %3495 = vst.msk [vmem:[#allocation3 + $0x30] sm:$0xff] %vm3365_vm12, %v3449_v32  ;;  %3456 = vrot.lane.b32.xlu1 %v3419_v60, %s8041_s25  ;;  %v12792_v10 = vld [vmem:[#allocation2 + $0x61] sm:$0xff]  ;;  %3325 = vrot.lane.b32.xlu0 %v15693_v7, %s8041_s25  ;;  %v12805_v2 = vld [vmem:[#allocation2 + $0x51] sm:$0xff] }
 0x34e   :  { %3787 = vst.msk [vmem:[#allocation3 + $0xc0] sm:$0xff] %vm688_vm2, %v12783_v53  ;;  %3788 = vst.msk [vmem:[#allocation3 + $0xe8] sm:$0xff] %vm688_vm2, %v12785_v12  ;;  %v3643_v35 = vld [vmem:[#allocation2 + $0x60] sm:$0xff]  ;;  %v3422_v49 = vld [vmem:[#allocation2 + $0xb0] sm:$0xff] }
 0x34f   :  { %3405 = vst.msk [vmem:[#allocation3 + $0x120] sm:$0xff] %vm688_vm2, %v12785_v12  ;;  %3404 = vst.msk [vmem:[#allocation3 + $0xf8] sm:$0xff] %vm688_vm2, %v12783_v53  ;;  %v12809_v54 = vld [vmem:[#allocation2 + $0x82] sm:$0xff]  ;;  %v12813_v48 = vld [vmem:[#allocation2 + $0xd2] sm:$0xff] }
 0x350   :  { %3275 = vst.msk [vmem:[#allocation3 + $0xf0] sm:$0xff] %vm688_vm2, %v3419_v60  ;;  %3276 = vst.msk [vmem:[#allocation3 + $0x118] sm:$0xff] %vm688_vm2, %v3420_v1  ;;  %v12811_v33 = vld [vmem:[#allocation2 + $0xc2] sm:$0xff]  ;;  %v3818_v23 = vld [vmem:[#allocation3 + $0x98] sm:$0xff] }
 0x351   :  { %3660 = vst.msk [vmem:[#allocation3 + $0xe0] sm:$0xff] %vm688_vm2, %v3420_v1  ;;  %3531 = vst.msk [vmem:[#allocation3 + $0xd8] sm:$0xff] %vm688_vm2, %v12792_v10  ;;  %3327 = vrot.lane.b32.xlu1 %v12805_v2, %s8041_s25  ;;  %v12823_v45 = vld [vmem:[#allocation2 + $0xe2] sm:$0xff]  ;;  %v3888_v28 = vpack.c.bf16 %v3818_v23, %v3813_v37  ;;  %3458 = vrot.lane.b32.xlu0 %v3420_v1, %s8041_s25  ;;  %v12830_v62 = vld [vmem:[#allocation2 + $0xf2] sm:$0xff] }
 0x352   :  { %3659 = vst.msk [vmem:[#allocation3 + $0xb8] sm:$0xff] %vm688_vm2, %v3643_v35  ;;  %3532 = vst.msk [vmem:[#allocation3 + $0x100] sm:$0xff] %vm688_vm2, %v3516_v8  ;;  %v12834_v24 = vld [vmem:[#allocation2 + $0x102] sm:$0xff]  ;;  %v12836_v38 = vld [vmem:[#allocation2 + $0x112] sm:$0xff] }
 0x353   :  { %3789 = vst.msk [vmem:[#allocation3 + $0x110] sm:$0xff] %vm688_vm2, %v12809_v54  ;;  %3791 = vst.msk [vmem:[#allocation3 + $0x160] sm:$0xff] %vm688_vm2, %v12811_v33  ;;  %v3421_v61 = vld [vmem:[#allocation2 + $0x80] sm:$0xff]  ;;  %7764 = vmatmul.mubr.msk.bf16.vlgmr.msra.gmra.mrb[64].mxu0 %vm688_vm2, %v3888_v28  ;;  %v12858_v30 = vld [vmem:[#allocation2 + $0xd0] sm:$0xff] }
 0x354   :  { %3792 = vst.msk [vmem:[#allocation3 + $0x188] sm:$0xff] %vm688_vm2, %v12813_v48  ;;  %3409 = vst.msk [vmem:[#allocation3 + $0x1c0] sm:$0xff] %vm688_vm2, %v12813_v48  ;;  %v3423_v55 = vld [vmem:[#allocation2 + $0xc0] sm:$0xff]  ;;  %v12868_v15 = vld [vmem:[#allocation2 + $0xf0] sm:$0xff] }
 0x355   :  { %3408 = vst.msk [vmem:[#allocation3 + $0x198] sm:$0xff] %vm688_vm2, %v12811_v33  ;;  %3793 = vst.msk [vmem:[#allocation3 + $0x1b0] sm:$0xff] %vm688_vm2, %v12823_v45  ;;  %v3823_v34 = vld [vmem:[#allocation3 + $0xc0] sm:$0xff]  ;;  %v3828_v56 = vld [vmem:[#allocation3 + $0xe8] sm:$0xff]  ;;  %3460 = vrot.lane.b32.xlu1 %v3421_v61, %s8041_s25  ;;  %3329 = vrot.lane.b32.xlu0 %v12792_v10, %s8041_s25 }
 0x356   :  { %3410 = vst.msk [vmem:[#allocation3 + $0x1e8] sm:$0xff] %vm688_vm2, %v12823_v45  ;;  %3794 = vst.msk [vmem:[#allocation3 + $0x1d8] sm:$0xff] %vm688_vm2, %v12830_v62  ;;  %v12853_v47 = vld [vmem:[#allocation2 + $0xe0] sm:$0xff]  ;;  %v3893_v50 = vpack.c.bf16 %v3828_v56, %v3823_v34  ;;  %v12877_v3 = vld [vmem:[#allocation2 + $0x71] sm:$0xff] }
 0x357   :  { %3795 = vst.msk [vmem:[#allocation3 + $0x200] sm:$0xff] %vm688_vm2, %v12834_v24  ;;  %3796 = vst.msk [vmem:[#allocation3 + $0x228] sm:$0xff] %vm688_vm2, %v12836_v38  ;;  %v12860_v52 = vld [vmem:[#allocation2 + $0xc1] sm:$0xff]  ;;  %v12881_v42 = vld [vmem:[#allocation2 + $0x110] sm:$0xff] }
 0x358   :  { %3411 = vst.msk [vmem:[#allocation3 + $0x210] sm:$0xff] %vm688_vm2, %v12830_v62  ;;  %3413 = vst.msk [vmem:[#allocation3 + $0x260] sm:$0xff] %vm688_vm2, %v12836_v38  ;;  %v12866_v17 = vld [vmem:[#allocation2 + $0x100] sm:$0xff]  ;;  %7767 = vmatprep.mubr.msk.bf16.mxu0 %vm688_vm2, %v3893_v50  ;;  %v12903_v40 = vld [vmem:[#allocation2 + $0xb2] sm:$0xff] }
 0x359   :  { %3412 = vst.msk [vmem:[#allocation3 + $0x238] sm:$0xff] %vm688_vm2, %v12834_v24  ;;  %3278 = vst.msk [vmem:[#allocation3 + $0x168] sm:$0xff] %vm688_vm2, %v3422_v49  ;;  %v12879_v63 = vld [vmem:[#allocation2 + $0xe1] sm:$0xff]  ;;  %3331 = vrot.lane.b32.xlu1 %v12877_v3, %s8041_s25  ;;  %3462 = vrot.lane.b32.xlu0 %v3422_v49, %s8041_s25  ;;  %v3805_v6 = vld [vmem:[#allocation3 + $0x30] sm:$0xff] }
 0x35a   :  { %3279 = vst.msk [vmem:[#allocation3 + $0x190] sm:$0xff] %vm688_vm2, %v3423_v55  ;;  %3281 = vst.msk [vmem:[#allocation3 + $0x1e0] sm:$0xff] %vm688_vm2, %v12853_v47  ;;  %v3833_v29 = vld [vmem:[#allocation3 + $0x110] sm:$0xff]  ;;  %v3843_v43 = vld [vmem:[#allocation3 + $0x160] sm:$0xff]  ;;  %v3880_v5 = vpack.c.bf16 %v3805_v6, %v3800_v57 }
 0x35b   :  { %3280 = vst.msk [vmem:[#allocation3 + $0x1b8] sm:$0xff] %vm688_vm2, %v12858_v30  ;;  %3664 = vst.msk [vmem:[#allocation3 + $0x180] sm:$0xff] %vm688_vm2, %v12858_v30  ;;  %v3848_v14 = vld [vmem:[#allocation3 + $0x188] sm:$0xff]  ;;  %v3898_v39 = vpack.c.bf16 %v3838_v51, %v3833_v29  ;;  %v3645_v59 = vld [vmem:[#allocation2 + $0x80] sm:$0xff] }
 0x35c   :  { %3535 = vst.msk [vmem:[#allocation3 + $0x178] sm:$0xff] %vm688_vm2, %v12860_v52  ;;  %3282 = vst.msk [vmem:[#allocation3 + $0x208] sm:$0xff] %vm688_vm2, %v12868_v15  ;;  %v12895_v22 = vld [vmem:[#allocation2 + $0x81] sm:$0xff]  ;;  %v3903_v16 = vpack.c.bf16 %v3848_v14, %v3843_v43  ;;  %v3853_v25 = vld [vmem:[#allocation3 + $0x1b0] sm:$0xff]  ;;  %4263 = vmatprep.mubr.bf16.mxu1 %v3880_v5 }
 0x35d   :  { %3283 = vst.msk [vmem:[#allocation3 + $0x230] sm:$0xff] %vm688_vm2, %v12866_v17  ;;  %3666 = vst.msk [vmem:[#allocation3 + $0x1d0] sm:$0xff] %vm688_vm2, %v12868_v15  ;;  %7768 = vmatmul.mubr.msk.bf16.gmra.mrb[68].mxu0 %vm688_vm2, %v3898_v39  ;;  %v3858_v0 = vld [vmem:[#allocation3 + $0x1d8] sm:$0xff]  ;;  %3464 = vrot.lane.b32.xlu1 %v3423_v55, %s8041_s25  ;;  %v7879_v19 = vld [vmem:[%s13998_s4 + $0x88] sm:$0xff]  }
 0x35e   :  { %3284 = vst.msk [vmem:[#allocation3 + $0x258] sm:$0xff] %vm688_vm2, %v12881_v42  ;;  %3537 = vst.msk [vmem:[#allocation3 + $0x1c8] sm:$0xff] %vm688_vm2, %v12879_v63  ;;  %7771 = vmatprep.mubr.msk.bf16.mxu0 %vm688_vm2, %v3903_v16  ;;  %v3863_v58 = vld [vmem:[#allocation3 + $0x200] sm:$0xff]  ;;  %v3294_v9 = vld [vmem:[#allocation2 + $0xb1] sm:$0xff]  ;;  %3333 = vrot.lane.b32.xlu0 %v3293_v18, %s8041_s25  ;;  %v3908_v55 = vpack.c.bf16 %v3858_v0, %v3853_v25  ;;  %v3453_v18 = vpop.permute.xlu1 %3452 }
 0x35f   :  { %3533 = vst.msk [vmem:[#allocation3 + $0x128] sm:$0xff] %vm688_vm2, %v12895_v22  ;;  %3407 = vst.msk [vmem:[#allocation3 + $0x170] sm:$0xff] %vm688_vm2, %v12903_v40  ;;  %v3647_v32 = vld [vmem:[#allocation2 + $0xc0] sm:$0xff]  ;;  %v3518_v31 = vld [vmem:[#allocation2 + $0xb1] sm:$0xff]  ;;  %4264 = vmatmul.mubr.bf16.vlgmr.msra.gmra.mrb[0].mxu1 %v3879_v41 }
 0x360   :  { %3406 = vst.msk [vmem:[#allocation3 + $0x148] sm:$0xff] %vm688_vm2, %v3390_v36  ;;  %3277 = vst.msk [vmem:[#allocation3 + $0x140] sm:$0xff] %vm688_vm2, %v3261_v11  ;;  %v3649_v60 = vld [vmem:[#allocation2 + $0xe0] sm:$0xff]  ;;  %v3520_v1 = vld [vmem:[#allocation2 + $0xd1] sm:$0xff]  ;;  %7494 = vmatpush3.bf16.msra.mxu1 %v7877_v27 }
 0x361   :  { %3661 = vst.msk [vmem:[#allocation3 + $0x108] sm:$0xff] %vm688_vm2, %v3645_v59  ;;  %3663 = vst.msk [vmem:[#allocation3 + $0x158] sm:$0xff] %vm688_vm2, %v3647_v32  ;;  %v3652_v35 = vld [vmem:[#allocation2 + $0x110] sm:$0xff]  ;;  %v3651_v8 = vld [vmem:[#allocation2 + $0x100] sm:$0xff]  ;;  %3335 = vrot.lane.b32.xlu1 %v3294_v9, %s8041_s25  ;;  %7495 = vmatprep.subr.bf16.mxu1 %v7878_v13 }
 0x362   :  { %3534 = vst.msk [vmem:[#allocation3 + $0x150] sm:$0xff] %vm688_vm2, %v3518_v31  ;;  %3665 = vst.msk [vmem:[#allocation3 + $0x1a8] sm:$0xff] %vm688_vm2, %v3649_v60  ;;  %v3868_v37 = vld [vmem:[#allocation3 + $0x228] sm:$0xff]  ;;  %v3522_v28 = vld [vmem:[#allocation2 + $0xf1] sm:$0xff]  ;;  %3466 = vrot.lane.b32.xlu0 %v12858_v30, %s8041_s25 }
 0x363   :  { %3536 = vst.msk [vmem:[#allocation3 + $0x1a0] sm:$0xff] %vm688_vm2, %v3520_v1  ;;  %3668 = vst.msk [vmem:[#allocation3 + $0x220] sm:$0xff] %vm688_vm2, %v3652_v35  ;;  %v3523_v23 = vld [vmem:[#allocation2 + $0x101] sm:$0xff]  ;;  %v3524_v61 = vld [vmem:[#allocation2 + $0x111] sm:$0xff]  ;;  %v3913_v34 = vpack.c.bf16 %v3868_v37, %v3863_v58 }
 0x364   :  { %3667 = vst.msk [vmem:[#allocation3 + $0x1f8] sm:$0xff] %vm688_vm2, %v3651_v8  ;;  %3539 = vst.msk [vmem:[#allocation3 + $0x218] sm:$0xff] %vm688_vm2, %v3523_v23  ;;  %v7880_v49 = vld [vmem:[%s13998_s4 + $0xd0] sm:$0xff]   ;;  %7496 = vmatpush3.bf16.msra.mxu1 %v7879_v19  ;;  %v7882_v50 = vld [vmem:[%s13998_s4 + $0xd8] sm:$0xff]  }
 0x365   :  { %3538 = vst.msk [vmem:[#allocation3 + $0x1f0] sm:$0xff] %vm688_vm2, %v3522_v28  ;;  %3540 = vst.msk [vmem:[#allocation3 + $0x240] sm:$0xff] %vm688_vm2, %v3524_v61  ;;  %7772 = vmatmul.mubr.msk.bf16.gmra.mrb[72].mxu0 %vm688_vm2, %v3908_v55  ;;  %v7881_v56 = vld [vmem:[%s13998_s4 + $0x90] sm:$0xff]   ;;  %3468 = vrot.lane.b32.xlu1 %v12853_v47, %s8041_s25  ;;  %v3878_v51 = vld [vmem:[#allocation3 + $0x278] sm:$0xff] }
 0x366   :  { %7775 = vmatprep.mubr.msk.bf16.mxu0 %vm688_vm2, %v3913_v34  ;;  %3337 = vrot.lane.b32.xlu0 %v12860_v52, %s8041_s25  ;;  %v3873_v30 = vld [vmem:[#allocation3 + $0x250] sm:$0xff]  ;;  %v7883_v43 = vld [vmem:[%s13998_s4 + $0x98] sm:$0xff]   ;;  %v7884_v47 = vld [vmem:[%s13998_s4 + $0xe0] sm:$0xff]   ;;  %3497 = vst.msk [vmem:[#allocation3 + $0x80] sm:$0xff] %vm3365_vm12, %v3453_v18 }
 0x367   :  { %7497 = vmatprep.subr.bf16.mxu1 %v7880_v49  ;;  %v3296_v29 = vld [vmem:[#allocation2 + $0xd1] sm:$0xff]  ;;  %v3918_v14 = vpack.c.bf16 %v3878_v51, %v3873_v30  ;;  %v7885_v39 = vld [vmem:[%s13998_s4 + $0xa0] sm:$0xff]   ;;  %v7887_v44 = vld [vmem:[%s13998_s4 + $0xa8] sm:$0xff]  }
 0x368   :  { %7498 = vmatpush3.bf16.msra.mxu1 %v7881_v56  ;;  %v3429_v27 = vld [vmem:[#allocation2 + $0x120] sm:$0xff]  ;;  %v7889_v16 = vld [vmem:[%s13998_s4 + $0xb0] sm:$0xff]   ;;  %v7890_v5 = vld [vmem:[%s13998_s4 + $0xf8] sm:$0xff]  }
 0x369   :  { %3339 = vrot.lane.b32.xlu1 %v3296_v29, %s8041_s25  ;;  %7499 = vmatprep.subr.bf16.mxu1 %v7882_v50  ;;  %v3299_v57 = vld [vmem:[#allocation2 + $0x101] sm:$0xff]  ;;  %v3300_v6 = vld [vmem:[#allocation2 + $0x111] sm:$0xff] }
 0x36a   :  { %3470 = vrot.lane.b32.xlu0 %v12868_v15, %s8041_s25  ;;  %v3298_v15 = vld [vmem:[#allocation2 + $0xf1] sm:$0xff]  ;;  %v15694_v13 = vld [vmem:[#allocation70_spill] sm:$0xff]  ;;  %v15695_v36 = vld [vmem:[#allocation37_spill] sm:$0xff] }
 0x36b   :  { %v3646_v11 = vld [vmem:[#allocation2 + $0x90] sm:$0xff] }
 0x36c   :  { %7500 = vmatpush3.bf16.msra.mxu1 %v7883_v43  ;;  %3662 = vst.msk [vmem:[#allocation3 + $0x130] sm:$0xff] %vm688_vm2, %v3646_v11 }
 0x36d   :  { %7776 = vmatmul.mubr.msk.bf16.gmra.mrb[76].mxu0 %vm688_vm2, %v3918_v14  ;;  %3472 = vrot.lane.b32.xlu1 %v12866_v17, %s8041_s25  ;;  %v7888_v17 = vld [vmem:[%s13998_s4 + $0xf0] sm:$0xff]  }
 0x36e   :  { %7501 = vmatprep.subr.bf16.mxu1 %v7884_v47  ;;  %3341 = vrot.lane.b32.xlu0 %v12879_v63, %s8041_s25 }
 0x370   :  { %7502 = vmatpush3.bf16.msra.mxu1 %v7885_v39 }
 0x371   :  { %3343 = vrot.lane.b32.xlu1 %v3298_v15, %s8041_s25  ;;  %7503 = vmatprep.subr.bf16.mxu1 %v7886_v4 }
 0x372   :  { %3474 = vrot.lane.b32.xlu0 %v12881_v42, %s8041_s25  ;;  %v7891_v42 = vld [vmem:[%s13998_s4 + $0xb8] sm:$0xff]  }
 0x374   :  { %7504 = vmatpush3.bf16.msra.mxu1 %v7887_v44 }
 0x375   :  { %3476 = vrot.lane.b32.xlu1 %v3429_v27, %s8041_s25  ;;  %7505 = vmatprep.subr.bf16.mxu1 %v7888_v17 }
 0x376   :  { %3345 = vrot.lane.b32.xlu0 %v3299_v57, %s8041_s25 }
 0x378   :  { %7506 = vmatpush3.bf16.msra.mxu1 %v7889_v16 }
 0x379   :  { %3347 = vrot.lane.b32.xlu1 %v3300_v6, %s8041_s25  ;;  %7507 = vmatprep.subr.bf16.mxu1 %v7890_v5 }
 0x37a   :  { %3703 = vrot.lane.b32.xlu0 %v15675_v46, %s8041_s25  ;;  %v3678_v46 = vld [vmem:[#allocation2 + $0x91] sm:$0xff] }
 0x37c   :  { %7508 = vmatpush3.bf16.msra.mxu1 %v7891_v42 }
 0x37d   :  { %3705 = vrot.lane.b32.xlu1 %v12643_v20, %s8041_s25  ;;  %v15696_v20 = vld [vmem:[#allocation18_spill] sm:$0xff] }
 0x37e   :  { %3574 = vrot.lane.b32.xlu0 %v15694_v13, %s8041_s25 }
 0x381   :  { %3576 = vrot.lane.b32.xlu1 %v15695_v36, %s8041_s25 }
 0x382   :  { %3707 = vrot.lane.b32.xlu0 %v15693_v7, %s8041_s25 }
 0x385   :  { %3709 = vrot.lane.b32.xlu1 %v12805_v2, %s8041_s25 }
 0x386   :  { %3578 = vrot.lane.b32.xlu0 %v12645_v21, %s8041_s25  ;;  %v3654_v21 = vld [vmem:[#allocation2 + $0x130] sm:$0xff] }
 0x387   :  { %3670 = vst.msk [vmem:[#allocation3 + $0x270] sm:$0xff] %vm688_vm2, %v3654_v21 }
 0x389   :  { %3580 = vrot.lane.b32.xlu1 %v15696_v20, %s8041_s25 }
 0x38a   :  { %3711 = vrot.lane.b32.xlu0 %v12792_v10, %s8041_s25  ;;  %v15697_v10 = vld [vmem:[#allocation55_spill] sm:$0xff] }
 0x38d   :  { %3713 = vrot.lane.b32.xlu1 %v12877_v3, %s8041_s25 }
 0x38e   :  { %3582 = vrot.lane.b32.xlu0 %v12756_v26, %s8041_s25 }
 0x391   :  { %3584 = vrot.lane.b32.xlu1 %v12783_v53, %s8041_s25 }
 0x392   :  { %3715 = vrot.lane.b32.xlu0 %v12895_v22, %s8041_s25 }
 0x395   :  { %3717 = vrot.lane.b32.xlu1 %v3678_v46, %s8041_s25 }
 0x396   :  { %3586 = vrot.lane.b32.xlu0 %v12785_v12, %s8041_s25  ;;  %v3686_v12 = vld [vmem:[#allocation2 + $0x131] sm:$0xff] }
 0x399   :  { %3588 = vrot.lane.b32.xlu1 %v12809_v54, %s8041_s25  ;;  %v3815_v54 = vld [vmem:[#allocation3 + $0x80] sm:$0xff] }
 0x39a   :  { %3719 = vrot.lane.b32.xlu0 %v12860_v52, %s8041_s25 }
 0x39d   :  { %3721 = vrot.lane.b32.xlu1 %v3296_v29, %s8041_s25 }
 0x39e   :  { %3590 = vrot.lane.b32.xlu0 %v12903_v40, %s8041_s25 }
 0x3a1   :  { %3592 = vrot.lane.b32.xlu1 %v12811_v33, %s8041_s25  ;;  %v15698_v33 = vld [vmem:[#allocation94_spill] sm:$0xff] }
 0x3a2   :  { %3723 = vrot.lane.b32.xlu0 %v12879_v63, %s8041_s25 }
 0x3a5   :  { %3725 = vrot.lane.b32.xlu1 %v3298_v15, %s8041_s25 }
 0x3a6   :  { %3594 = vrot.lane.b32.xlu0 %v12813_v48, %s8041_s25 }
 0x3a9   :  { %3596 = vrot.lane.b32.xlu1 %v12823_v45, %s8041_s25 }
 0x3aa   :  { %3727 = vrot.lane.b32.xlu0 %v3299_v57, %s8041_s25  ;;  %v3451_v26 = vpop.permute.xlu0 %3450 }
 0x3ab   :  { %v3324_v53 = vpop.permute.xlu1 %3323  ;;  %3496 = vst.msk [vmem:[#allocation3 + $0x58] sm:$0xff] %vm3365_vm12, %v3451_v26 }
 0x3ac   :  { %3369 = vst.msk [vmem:[#allocation3 + $0x78] sm:$0xff] %vm3365_vm12, %v3324_v53 }
 0x3ad   :  { %3729 = vrot.lane.b32.xlu1 %v3300_v6, %s8041_s25 }
 0x3ae   :  { %3598 = vrot.lane.b32.xlu0 %v12830_v62, %s8041_s25 }
 0x3b1   :  { %3600 = vrot.lane.b32.xlu1 %v12834_v24, %s8041_s25 }
 0x3b2   :  { %3731 = vrot.lane.b32.xlu0 %v15697_v10, %s8041_s25  ;;  %v3810_v2 = vld [vmem:[#allocation3 + $0x58] sm:$0xff] }
 0x3b3   :  { %v3885_v48 = vpack.c.bf16 %v3815_v54, %v3810_v2  ;;  %v3814_v24 = vld [vmem:[#allocation3 + $0x78] sm:$0xff] }
 0x3b4   :  { %v3322_v7 = vpop.permute.xlu0 %3321 }
 0x3b5   :  { %3733 = vrot.lane.b32.xlu1 %v3686_v12, %s8041_s25  ;;  %3368 = vst.msk [vmem:[#allocation3 + $0x50] sm:$0xff] %vm3365_vm12, %v3322_v7  ;;  %4271 = vmatprep.mubr.bf16.mxu1 %v3885_v48 }
 0x3b6   :  { %3602 = vrot.lane.b32.xlu0 %v12836_v38, %s8041_s25 }
 0x3b9   :  { %3604 = vrot.lane.b32.xlu1 %v15698_v33, %s8041_s25 }
 0x3bb   :  { %v3455_v45 = vpop.permute.xlu0 %3454 }
 0x3bc   :  { %v3809_v62 = vld [vmem:[#allocation3 + $0x50] sm:$0xff]  ;;  %3498 = vst.msk [vmem:[#allocation3 + $0xa8] sm:$0xff] %vm3365_vm12, %v3455_v45 }
 0x3bd   :  { %v3884_v52 = vpack.c.bf16 %v3814_v24, %v3809_v62 }
 0x3bf   :  { %v3457_v3 = vpop.permute.xlu1 %3456  ;;  %4272 = vmatmul.mubr.bf16.gmra.mrb[4].mxu1 %v3884_v52  ;;  %v3326_v63 = vpop.permute.xlu0 %3325 }
 0x3c0   :  { %3499 = vst.msk [vmem:[#allocation3 + $0xd0] sm:$0xff] %vm3365_vm12, %v3457_v3  ;;  %3370 = vst.msk [vmem:[#allocation3 + $0xa0] sm:$0xff] %vm3365_vm12, %v3326_v63 }
 0x3c3   :  { %v3328_v38 = vpop.permute.xlu1 %3327  ;;  %v3459_v22 = vpop.permute.xlu0 %3458  ;;  %v3820_v40 = vld [vmem:[#allocation3 + $0xa8] sm:$0xff] }
 0x3c4   :  { %3371 = vst.msk [vmem:[#allocation3 + $0xc8] sm:$0xff] %vm3365_vm12, %v3328_v38  ;;  %3500 = vst.msk [vmem:[#allocation3 + $0xf8] sm:$0xff] %vm3365_vm12, %v3459_v22 }
 0x3c7   :  { %v3461_v25 = vpop.permute.xlu1 %3460  ;;  %v3825_v0 = vld [vmem:[#allocation3 + $0xd0] sm:$0xff]  ;;  %v3330_v59 = vpop.permute.xlu0 %3329  ;;  %v3819_v58 = vld [vmem:[#allocation3 + $0xa0] sm:$0xff] }
 0x3c8   :  { %3501 = vst.msk [vmem:[#allocation3 + $0x120] sm:$0xff] %vm3365_vm12, %v3461_v25  ;;  %v3890_v41 = vpack.c.bf16 %v3825_v0, %v3820_v40  ;;  %3372 = vst.msk [vmem:[#allocation3 + $0xf0] sm:$0xff] %vm3365_vm12, %v3330_v59 }
 0x3ca   :  { %4279 = vmatprep.mubr.bf16.mxu1 %v3890_v41 }
 0x3cb   :  { %v3332_v9 = vpop.permute.xlu1 %3331  ;;  %v3824_v19 = vld [vmem:[#allocation3 + $0xc8] sm:$0xff]  ;;  %v3463_v32 = vpop.permute.xlu0 %3462  ;;  %v3830_v60 = vld [vmem:[#allocation3 + $0xf8] sm:$0xff] }
 0x3cc   :  { %3373 = vst.msk [vmem:[#allocation3 + $0x118] sm:$0xff] %vm3365_vm12, %v3332_v9  ;;  %v3889_v31 = vpack.c.bf16 %v3824_v19, %v3819_v58  ;;  %3502 = vst.msk [vmem:[#allocation3 + $0x148] sm:$0xff] %vm3365_vm12, %v3463_v32 }
 0x3ce   :  { %4280 = vmatmul.mubr.bf16.gmra.mrb[8].mxu1 %v3889_v31 }
 0x3cf   :  { %v3465_v1 = vpop.permute.xlu1 %3464  ;;  %v3835_v35 = vld [vmem:[#allocation3 + $0x120] sm:$0xff]  ;;  %v3829_v23 = vld [vmem:[#allocation3 + $0xf0] sm:$0xff] }
 0x3d0   :  { %3503 = vst.msk [vmem:[#allocation3 + $0x170] sm:$0xff] %vm3365_vm12, %v3465_v1  ;;  %v3895_v8 = vpack.c.bf16 %v3835_v35, %v3830_v60  ;;  %v3334_v37 = vpop.permute.xlu0 %3333 }
 0x3d1   :  { %3374 = vst.msk [vmem:[#allocation3 + $0x140] sm:$0xff] %vm3365_vm12, %v3334_v37 }
 0x3d2   :  { %4287 = vmatprep.mubr.bf16.mxu1 %v3895_v8 }
 0x3d3   :  { %v3336_v28 = vpop.permute.xlu1 %3335  ;;  %v3834_v61 = vld [vmem:[#allocation3 + $0x118] sm:$0xff]  ;;  %v3840_v34 = vld [vmem:[#allocation3 + $0x148] sm:$0xff] }
 0x3d4   :  { %3375 = vst.msk [vmem:[#allocation3 + $0x168] sm:$0xff] %vm3365_vm12, %v3336_v28  ;;  %v3467_v55 = vpop.permute.xlu0 %3466  ;;  %v3894_v49 = vpack.c.bf16 %v3834_v61, %v3829_v23 }
 0x3d5   :  { %3504 = vst.msk [vmem:[#allocation3 + $0x198] sm:$0xff] %vm3365_vm12, %v3467_v55 }
 0x3d6   :  { %4288 = vmatmul.mubr.bf16.gmra.mrb[12].mxu1 %v3894_v49 }
 0x3d7   :  { %v3469_v56 = vpop.permute.xlu1 %3468  ;;  %v3845_v50 = vld [vmem:[#allocation3 + $0x170] sm:$0xff] }
 0x3d8   :  { %3505 = vst.msk [vmem:[#allocation3 + $0x1c0] sm:$0xff] %vm3365_vm12, %v3469_v56  ;;  %v3900_v30 = vpack.c.bf16 %v3845_v50, %v3840_v34  ;;  %v3338_v51 = vpop.permute.xlu0 %3337  ;;  %v3839_v29 = vld [vmem:[#allocation3 + $0x140] sm:$0xff] }
 0x3d9   :  { %3376 = vst.msk [vmem:[#allocation3 + $0x190] sm:$0xff] %vm3365_vm12, %v3338_v51 }
 0x3da   :  { %4295 = vmatprep.mubr.bf16.mxu1 %v3900_v30 }
 0x3db   :  { %v3340_v43 = vpop.permute.xlu1 %3339  ;;  %v3844_v47 = vld [vmem:[#allocation3 + $0x168] sm:$0xff] }
 0x3dc   :  { %3377 = vst.msk [vmem:[#allocation3 + $0x1b8] sm:$0xff] %vm3365_vm12, %v3340_v43  ;;  %v3471_v14 = vpop.permute.xlu0 %3470  ;;  %v3899_v18 = vpack.c.bf16 %v3844_v47, %v3839_v29  ;;  %v3850_v39 = vld [vmem:[#allocation3 + $0x198] sm:$0xff] }
 0x3dd   :  { %3506 = vst.msk [vmem:[#allocation3 + $0x1e8] sm:$0xff] %vm3365_vm12, %v3471_v14 }
 0x3de   :  { %4296 = vmatmul.mubr.bf16.gmra.mrb[16].mxu1 %v3899_v18 }
 0x3df   :  { %v3473_v4 = vpop.permute.xlu1 %3472  ;;  %v3855_v15 = vld [vmem:[#allocation3 + $0x1c0] sm:$0xff] }
 0x3e0   :  { %3507 = vst.msk [vmem:[#allocation3 + $0x210] sm:$0xff] %vm3365_vm12, %v3473_v4  ;;  %v3905_v44 = vpack.c.bf16 %v3855_v15, %v3850_v39  ;;  %v3342_v17 = vpop.permute.xlu0 %3341  ;;  %v3849_v27 = vld [vmem:[#allocation3 + $0x190] sm:$0xff] }
 0x3e1   :  { %3378 = vst.msk [vmem:[#allocation3 + $0x1e0] sm:$0xff] %vm3365_vm12, %v3342_v17 }
 0x3e2   :  { %4303 = vmatprep.mubr.bf16.mxu1 %v3905_v44 }
 0x3e3   :  { %v3344_v16 = vpop.permute.xlu1 %3343  ;;  %v3854_v57 = vld [vmem:[#allocation3 + $0x1b8] sm:$0xff] }
 0x3e4   :  { %3379 = vst.msk [vmem:[#allocation3 + $0x208] sm:$0xff] %vm3365_vm12, %v3344_v16  ;;  %v3475_v6 = vpop.permute.xlu0 %3474  ;;  %v3904_v5 = vpack.c.bf16 %v3854_v57, %v3849_v27  ;;  %v3860_v42 = vld [vmem:[#allocation3 + $0x1e8] sm:$0xff] }
 0x3e5   :  { %3508 = vst.msk [vmem:[#allocation3 + $0x238] sm:$0xff] %vm3365_vm12, %v3475_v6 }
 0x3e6   :  { %4304 = vmatmul.mubr.bf16.gmra.mrb[20].mxu1 %v3904_v5 }
 0x3e7   :  { %v3477_v13 = vpop.permute.xlu1 %3476  ;;  %v3865_v36 = vld [vmem:[#allocation3 + $0x210] sm:$0xff] }
 0x3e8   :  { %3509 = vst.msk [vmem:[#allocation3 + $0x260] sm:$0xff] %vm3365_vm12, %v3477_v13  ;;  %v3910_v11 = vpack.c.bf16 %v3865_v36, %v3860_v42  ;;  %v3346_v20 = vpop.permute.xlu0 %3345  ;;  %v3859_v46 = vld [vmem:[#allocation3 + $0x1e0] sm:$0xff] }
 0x3e9   :  { %3380 = vst.msk [vmem:[#allocation3 + $0x230] sm:$0xff] %vm3365_vm12, %v3346_v20 }
 0x3ea   :  { %4311 = vmatprep.mubr.bf16.mxu1 %v3910_v11 }
 0x3eb   :  { %v3348_v21 = vpop.permute.xlu1 %3347  ;;  %v3864_v26 = vld [vmem:[#allocation3 + $0x208] sm:$0xff] }
 0x3ec   :  { %3381 = vst.msk [vmem:[#allocation3 + $0x258] sm:$0xff] %vm3365_vm12, %v3348_v21  ;;  %v3704_v53 = vpop.permute.xlu0 %3703  ;;  %v3909_v12 = vpack.c.bf16 %v3864_v26, %v3859_v46  ;;  %v3870_v10 = vld [vmem:[#allocation3 + $0x238] sm:$0xff] }
 0x3ed   :  { %3751 = vst.msk [vmem:[#allocation3 + $0x18] sm:$0xff] %vm3365_vm12, %v3704_v53 }
 0x3ee   :  { %4312 = vmatmul.mubr.bf16.gmra.mrb[24].mxu1 %v3909_v12 }
 0x3ef   :  { %v3706_v7 = vpop.permute.xlu1 %3705  ;;  %v3875_v2 = vld [vmem:[#allocation3 + $0x260] sm:$0xff] }
 0x3f0   :  { %3752 = vst.msk [vmem:[#allocation3 + $0x40] sm:$0xff] %vm3365_vm12, %v3706_v7  ;;  %v3915_v54 = vpack.c.bf16 %v3875_v2, %v3870_v10  ;;  %v3575_v33 = vpop.permute.xlu0 %3574  ;;  %v3869_v48 = vld [vmem:[#allocation3 + $0x230] sm:$0xff] }
 0x3f1   :  { %3622 = vst.msk [vmem:[#allocation3 + $0x10] sm:$0xff] %vm3365_vm12, %v3575_v33 }
 0x3f2   :  { %4319 = vmatprep.mubr.bf16.mxu1 %v3915_v54 }
 0x3f3   :  { %v3577_v45 = vpop.permute.xlu1 %3576  ;;  %v3874_v62 = vld [vmem:[#allocation3 + $0x258] sm:$0xff] }
 0x3f4   :  { %3623 = vst.msk [vmem:[#allocation3 + $0x38] sm:$0xff] %vm3365_vm12, %v3577_v45  ;;  %v3708_v24 = vpop.permute.xlu0 %3707  ;;  %v3914_v52 = vpack.c.bf16 %v3874_v62, %v3869_v48  ;;  %v3802_v3 = vld [vmem:[#allocation3 + $0x18] sm:$0xff] }
 0x3f5   :  { %3753 = vst.msk [vmem:[#allocation3 + $0x68] sm:$0xff] %vm3365_vm12, %v3708_v24 }
 0x3f6   :  { %4320 = vmatmul.mubr.bf16.gmra.mrb[28].mxu1 %v3914_v52 }
 0x3f7   :  { %v3710_v63 = vpop.permute.xlu1 %3709  ;;  %v3807_v38 = vld [vmem:[#allocation3 + $0x40] sm:$0xff] }
 0x3f8   :  { %3754 = vst.msk [vmem:[#allocation3 + $0x90] sm:$0xff] %vm3365_vm12, %v3710_v63  ;;  %v3882_v22 = vpack.c.bf16 %v3807_v38, %v3802_v3  ;;  %v3579_v40 = vpop.permute.xlu0 %3578  ;;  %v3801_v25 = vld [vmem:[#allocation3 + $0x10] sm:$0xff] }
 0x3f9   :  { %3624 = vst.msk [vmem:[#allocation3 + $0x60] sm:$0xff] %vm3365_vm12, %v3579_v40 }
 0x3fa   :  { %4360 = vmatprep.mubr.bf16.mxu1 %v3882_v22 }
 0x3fb   :  { %v3581_v0 = vpop.permute.xlu1 %3580  ;;  %v3806_v41 = vld [vmem:[#allocation3 + $0x38] sm:$0xff] }
 0x3fc   :  { %3625 = vst.msk [vmem:[#allocation3 + $0x88] sm:$0xff] %vm3365_vm12, %v3581_v0  ;;  %v3712_v59 = vpop.permute.xlu0 %3711  ;;  %v3881_v58 = vpack.c.bf16 %v3806_v41, %v3801_v25  ;;  %v3812_v9 = vld [vmem:[#allocation3 + $0x68] sm:$0xff] }
 0x3fd   :  { %3755 = vst.msk [vmem:[#allocation3 + $0xb8] sm:$0xff] %vm3365_vm12, %v3712_v59 }
 0x3fe   :  { %4361 = vmatmul.mubr.bf16.vlgmr.msra.gmra.mrb[32].mxu1 %v3881_v58 }
 0x3ff   :  { %v3714_v19 = vpop.permute.xlu1 %3713  ;;  %v3817_v32 = vld [vmem:[#allocation3 + $0x90] sm:$0xff] }
 0x400   :  { %3756 = vst.msk [vmem:[#allocation3 + $0xe0] sm:$0xff] %vm3365_vm12, %v3714_v19  ;;  %v3887_v31 = vpack.c.bf16 %v3817_v32, %v3812_v9  ;;  %v3583_v60 = vpop.permute.xlu0 %3582  ;;  %v3811_v1 = vld [vmem:[#allocation3 + $0x60] sm:$0xff] }
 0x401   :  { %3626 = vst.msk [vmem:[#allocation3 + $0xb0] sm:$0xff] %vm3365_vm12, %v3583_v60 }
 0x402   :  { %4368 = vmatprep.mubr.bf16.mxu1 %v3887_v31 }
 0x403   :  { %v3585_v35 = vpop.permute.xlu1 %3584  ;;  %v3816_v8 = vld [vmem:[#allocation3 + $0x88] sm:$0xff] }
 0x404   :  { %3627 = vst.msk [vmem:[#allocation3 + $0xd8] sm:$0xff] %vm3365_vm12, %v3585_v35  ;;  %v3716_v37 = vpop.permute.xlu0 %3715  ;;  %v3886_v23 = vpack.c.bf16 %v3816_v8, %v3811_v1  ;;  %v3822_v28 = vld [vmem:[#allocation3 + $0xb8] sm:$0xff] }
 0x405   :  { %3757 = vst.msk [vmem:[#allocation3 + $0x108] sm:$0xff] %vm3365_vm12, %v3716_v37 }
 0x406   :  { %4369 = vmatmul.mubr.bf16.gmra.mrb[36].mxu1 %v3886_v23 }
 0x407   :  { %v3718_v61 = vpop.permute.xlu1 %3717  ;;  %v3827_v55 = vld [vmem:[#allocation3 + $0xe0] sm:$0xff] }
 0x408   :  { %3758 = vst.msk [vmem:[#allocation3 + $0x130] sm:$0xff] %vm3365_vm12, %v3718_v61  ;;  %v3892_v49 = vpack.c.bf16 %v3827_v55, %v3822_v28  ;;  %v3587_v34 = vpop.permute.xlu0 %3586  ;;  %v3821_v56 = vld [vmem:[#allocation3 + $0xb0] sm:$0xff] }
 0x409   :  { %3628 = vst.msk [vmem:[#allocation3 + $0x100] sm:$0xff] %vm3365_vm12, %v3587_v34 }
 0x40a   :  { %4376 = vmatprep.mubr.bf16.mxu1 %v3892_v49 }
 0x40b   :  { %v3589_v50 = vpop.permute.xlu1 %3588  ;;  %v3826_v30 = vld [vmem:[#allocation3 + $0xd8] sm:$0xff] }
 0x40c   :  { %3629 = vst.msk [vmem:[#allocation3 + $0x128] sm:$0xff] %vm3365_vm12, %v3589_v50  ;;  %v3720_v51 = vpop.permute.xlu0 %3719  ;;  %v3891_v29 = vpack.c.bf16 %v3826_v30, %v3821_v56  ;;  %v3832_v43 = vld [vmem:[#allocation3 + $0x108] sm:$0xff] }
 0x40d   :  { %3759 = vst.msk [vmem:[#allocation3 + $0x158] sm:$0xff] %vm3365_vm12, %v3720_v51 }
 0x40e   :  { %4377 = vmatmul.mubr.bf16.gmra.mrb[40].mxu1 %v3891_v29 }
 0x40f   :  { %v3722_v47 = vpop.permute.xlu1 %3721  ;;  %v3837_v14 = vld [vmem:[#allocation3 + $0x130] sm:$0xff] }
 0x410   :  { %3760 = vst.msk [vmem:[#allocation3 + $0x180] sm:$0xff] %vm3365_vm12, %v3722_v47  ;;  %v3897_v18 = vpack.c.bf16 %v3837_v14, %v3832_v43  ;;  %v3591_v39 = vpop.permute.xlu0 %3590  ;;  %v3831_v4 = vld [vmem:[#allocation3 + $0x100] sm:$0xff] }
 0x411   :  { %3630 = vst.msk [vmem:[#allocation3 + $0x150] sm:$0xff] %vm3365_vm12, %v3591_v39 }
 0x412   :  { %4384 = vmatprep.mubr.bf16.mxu1 %v3897_v18 }
 0x413   :  { %v3593_v15 = vpop.permute.xlu1 %3592  ;;  %v3836_v44 = vld [vmem:[#allocation3 + $0x128] sm:$0xff] }
 0x414   :  { %3631 = vst.msk [vmem:[#allocation3 + $0x178] sm:$0xff] %vm3365_vm12, %v3593_v15  ;;  %v3724_v17 = vpop.permute.xlu0 %3723  ;;  %v3896_v27 = vpack.c.bf16 %v3836_v44, %v3831_v4  ;;  %v3842_v16 = vld [vmem:[#allocation3 + $0x158] sm:$0xff] }
 0x415   :  { %3761 = vst.msk [vmem:[#allocation3 + $0x1a8] sm:$0xff] %vm3365_vm12, %v3724_v17 }
 0x416   :  { %4385 = vmatmul.mubr.bf16.gmra.mrb[44].mxu1 %v3896_v27 }
 0x417   :  { %v3726_v57 = vpop.permute.xlu1 %3725  ;;  %v3847_v6 = vld [vmem:[#allocation3 + $0x180] sm:$0xff] }
 0x418   :  { %3762 = vst.msk [vmem:[#allocation3 + $0x1d0] sm:$0xff] %vm3365_vm12, %v3726_v57  ;;  %v3902_v5 = vpack.c.bf16 %v3847_v6, %v3842_v16  ;;  %v3595_v42 = vpop.permute.xlu0 %3594  ;;  %v3841_v13 = vld [vmem:[#allocation3 + $0x150] sm:$0xff] }
 0x419   :  { %3632 = vst.msk [vmem:[#allocation3 + $0x1a0] sm:$0xff] %vm3365_vm12, %v3595_v42 }
 0x41a   :  { %4392 = vmatprep.mubr.bf16.mxu1 %v3902_v5 }
 0x41b   :  { %v3597_v36 = vpop.permute.xlu1 %3596  ;;  %v3846_v11 = vld [vmem:[#allocation3 + $0x178] sm:$0xff] }
 0x41c   :  { %3633 = vst.msk [vmem:[#allocation3 + $0x1c8] sm:$0xff] %vm3365_vm12, %v3597_v36  ;;  %v3728_v20 = vpop.permute.xlu0 %3727  ;;  %v3901_v46 = vpack.c.bf16 %v3846_v11, %v3841_v13  ;;  %v3852_v21 = vld [vmem:[#allocation3 + $0x1a8] sm:$0xff] }
 0x41d   :  { %3763 = vst.msk [vmem:[#allocation3 + $0x1f8] sm:$0xff] %vm3365_vm12, %v3728_v20 }
 0x41e   :  { %4393 = vmatmul.mubr.bf16.gmra.mrb[48].mxu1 %v3901_v46 }
 0x41f   :  { %v3730_v26 = vpop.permute.xlu1 %3729  ;;  %v3857_v53 = vld [vmem:[#allocation3 + $0x1d0] sm:$0xff] }
 0x420   :  { %3764 = vst.msk [vmem:[#allocation3 + $0x220] sm:$0xff] %vm3365_vm12, %v3730_v26  ;;  %v3907_v12 = vpack.c.bf16 %v3857_v53, %v3852_v21  ;;  %v3599_v10 = vpop.permute.xlu0 %3598  ;;  %v3851_v7 = vld [vmem:[#allocation3 + $0x1a0] sm:$0xff] }
 0x421   :  { %3634 = vst.msk [vmem:[#allocation3 + $0x1f0] sm:$0xff] %vm3365_vm12, %v3599_v10 }
 0x422   :  { %4400 = vmatprep.mubr.bf16.mxu1 %v3907_v12 }
 0x423   :  { %v3601_v2 = vpop.permute.xlu1 %3600  ;;  %v3856_v54 = vld [vmem:[#allocation3 + $0x1c8] sm:$0xff] }
 0x424   :  { %3635 = vst.msk [vmem:[#allocation3 + $0x218] sm:$0xff] %vm3365_vm12, %v3601_v2  ;;  %v3732_v33 = vpop.permute.xlu0 %3731  ;;  %v3906_v48 = vpack.c.bf16 %v3856_v54, %v3851_v7  ;;  %v3862_v45 = vld [vmem:[#allocation3 + $0x1f8] sm:$0xff] }
 0x425   :  { %3765 = vst.msk [vmem:[#allocation3 + $0x248] sm:$0xff] %vm3365_vm12, %v3732_v33 }
 0x426   :  { %4401 = vmatmul.mubr.bf16.gmra.mrb[52].mxu1 %v3906_v48  ;;  %v13105_v62 = vpop.f32.mrb[64].mxu0 }
 0x427   :  { %v3734_v24 = vpop.permute.xlu1 %3733  ;;  %v3867_v52 = vld [vmem:[#allocation3 + $0x220] sm:$0xff]  ;;  %v13107_v3 = vpop.f32.mrb[65].mxu0 }
 0x428   :  { %3766 = vst.msk [vmem:[#allocation3 + $0x270] sm:$0xff] %vm3365_vm12, %v3734_v24  ;;  %v3912_v63 = vpack.c.bf16 %v3867_v52, %v3862_v45  ;;  %v3603_v38 = vpop.permute.xlu0 %3602  ;;  %v13110_v22 = vpop.f32.mrb[66].mxu0  ;;  %v3861_v40 = vld [vmem:[#allocation3 + $0x1f0] sm:$0xff] }
 0x429   :  { %3636 = vst.msk [vmem:[#allocation3 + $0x240] sm:$0xff] %vm3365_vm12, %v3603_v38  ;;  %v13113_v25 = vpop.f32.mrb[67].mxu0 }
 0x42a   :  { %4408 = vmatprep.mubr.bf16.mxu1 %v3912_v63 }
 0x42b   :  { %v3605_v0 = vpop.permute.xlu1 %3604  ;;  %v3866_v41 = vld [vmem:[#allocation3 + $0x218] sm:$0xff] }
 0x42c   :  { %3637 = vst.msk [vmem:[#allocation3 + $0x268] sm:$0xff] %vm3365_vm12, %v3605_v0  ;;  %v3911_v59 = vpack.c.bf16 %v3866_v41, %v3861_v40  ;;  %v3872_v58 = vld [vmem:[#allocation3 + $0x248] sm:$0xff] }
 0x42e   :  { %4409 = vmatmul.mubr.bf16.gmra.mrb[56].mxu1 %v3911_v59 }
 0x42f   :  { %v3877_v19 = vld [vmem:[#allocation3 + $0x270] sm:$0xff] }
 0x430   :  { %v13116_v9 = vpop.f32.mrb[68].mxu0  ;;  %v3917_v31 = vpack.c.bf16 %v3877_v19, %v3872_v58  ;;  %v3871_v1 = vld [vmem:[#allocation3 + $0x240] sm:$0xff] }
 0x431   :  { %v13118_v32 = vpop.f32.mrb[69].mxu0 }
 0x432   :  { %v13120_v60 = vpop.f32.mrb[70].mxu0  ;;  %4416 = vmatprep.mubr.bf16.mxu1 %v3917_v31  ;;  %v7445_v8 = vpop.f32.mrb[0].mxu1 }
 0x433   :  { %v13122_v35 = vpop.f32.mrb[71].mxu0  ;;  %v3876_v37 = vld [vmem:[#allocation3 + $0x268] sm:$0xff]  ;;  %v7446_v23 = vpop.f32.mrb[1].mxu1 }
 0x434   :  { %v3916_v28 = vpack.c.bf16 %v3876_v37, %v3871_v1  ;;  %v7447_v61 = vadd.f32 %v7446_v23, %v7445_v8  ;;  %v7448_v55 = vpop.f32.mrb[2].mxu1 }
 0x435   :  { %v7449_v49 = vpop.f32.mrb[3].mxu1 }
 0x436   :  { %4417 = vmatmul.mubr.bf16.gmra.mrb[60].mxu1 %v3916_v28  ;;  %v7450_v34 = vadd.f32 %v7449_v49, %v7448_v55 }
 0x438   :  { %v13124_v56 = vpop.f32.mrb[72].mxu0 }
 0x439   :  { %v13126_v50 = vpop.f32.mrb[73].mxu0 }
 0x43a   :  { %v13128_v30 = vpop.f32.mrb[74].mxu0 }
 0x43b   :  { %v13130_v51 = vpop.f32.mrb[75].mxu0 }
 0x440   :  { %v13132_v29 = vpop.f32.mrb[76].mxu0 }
 0x441   :  { %v13134_v43 = vpop.f32.mrb[77].mxu0 }
 0x442   :  { %v13136_v47 = vpop.f32.mrb[78].mxu0 }
 0x443   :  { %v13138_v14 = vpop.f32.mrb[79].mxu0 }
 0x492   :  { %v7451_v18 = vpop.f32.mrb[4].mxu1 }
 0x493   :  { %v7452_v39 = vpop.f32.mrb[5].mxu1 }
 0x494   :  { %v13140_v4 = vadd.f32 %v7452_v39, %v7451_v18  ;;  %v7454_v15 = vpop.f32.mrb[6].mxu1 }
 0x495   :  { %v7455_v44 = vpop.f32.mrb[7].mxu1 }
 0x496   :  { %v13142_v17 = vadd.f32 %v7455_v44, %v7454_v15 }
 0x4a1   :  { %v7457_v27 = vpop.f32.mrb[8].mxu1 }
 0x4a2   :  { %v7458_v16 = vpop.f32.mrb[9].mxu1 }
 0x4a3   :  { %v13144_v57 = vadd.f32 %v7458_v16, %v7457_v27  ;;  %v7460_v6 = vpop.f32.mrb[10].mxu1 }
 0x4a4   :  { %v7461_v5 = vpop.f32.mrb[11].mxu1 }
 0x4a5   :  { %v13146_v42 = vadd.f32 %v7461_v5, %v7460_v6 }
 0x4a9   :  { %v7463_v13 = vpop.f32.mrb[12].mxu1 }
 0x4aa   :  { %v7464_v36 = vpop.f32.mrb[13].mxu1 }
 0x4ab   :  { %v13148_v11 = vadd.f32 %v7464_v36, %v7463_v13  ;;  %v7466_v20 = vpop.f32.mrb[14].mxu1  ;;  %v15699_v13 = vmov 0.0  }
 0x4ac   :  { %v7467_v46 = vpop.f32.mrb[15].mxu1  ;;  %6209 = vst.msk [vmem:[#allocation6] sm:$0xf] %vm5196_vm13, %v15699_v13  ;;  %6210 = vst.msk [vmem:[#allocation6 + $0x10] sm:$0xf] %vm5196_vm13, %v15699_v13 }
 0x4ad   :  { %v13150_v21 = vadd.f32 %v7467_v46, %v7466_v20  ;;  %6212 = vst.msk [vmem:[#allocation6 + $0xc] sm:$0xf] %vm5196_vm13, %v15699_v13  ;;  %6213 = vst.msk [vmem:[#allocation6 + $0x1c] sm:$0xf] %vm5196_vm13, %v15699_v13 }
 0x4ae   :  { %5110 = vst.msk [vmem:[#allocation4] sm:$0x3f] %vm5109_vm14, %v15699_v13  ;;  %5111 = vst.msk [vmem:[#allocation4 + $0x30] sm:$0x3f] %vm5109_vm14, %v15699_v13 }
 0x4af   :  { %5113 = vst.msk [vmem:[#allocation4 + $0x28] sm:$0x3f] %vm5109_vm14, %v15699_v13  ;;  %5114 = vst.msk [vmem:[#allocation4 + $0x58] sm:$0x3f] %vm5109_vm14, %v15699_v13 }
 0x4b1   :  { %v7469_v26 = vpop.f32.mrb[16].mxu1 }
 0x4b2   :  { %v7470_v53 = vpop.f32.mrb[17].mxu1 }
 0x4b3   :  { %v13152_v12 = vadd.f32 %v7470_v53, %v7469_v26  ;;  %v7472_v10 = vpop.f32.mrb[18].mxu1 }
 0x4b4   :  { %v7473_v7 = vpop.f32.mrb[19].mxu1 }
 0x4b5   :  { %v13154_v2 = vadd.f32 %v7473_v7, %v7472_v10  ;;  %v5221_v7 = vld [vmem:[#allocation4 + $0x1] sm:$0xf] }
 0x4b6   :  { %5237 = vrot.lane.b32.xlu0 %v5221_v7, %s8041_s25 }
 0x4b9   :  { %v7475_v54 = vpop.f32.mrb[20].mxu1 }
 0x4ba   :  { %v7476_v33 = vpop.f32.mrb[21].mxu1 }
 0x4bb   :  { %v13156_v48 = vadd.f32 %v7476_v33, %v7475_v54  ;;  %v7478_v45 = vpop.f32.mrb[22].mxu1 }
 0x4bc   :  { %v7479_v24 = vpop.f32.mrb[23].mxu1 }
 0x4bd   :  { %v13158_v52 = vadd.f32 %v7479_v24, %v7478_v45 }
 0x4c1   :  { %v7481_v63 = vpop.f32.mrb[24].mxu1 }
 0x4c2   :  { %v7482_v38 = vpop.f32.mrb[25].mxu1 }
 0x4c3   :  { %v13160_v40 = vadd.f32 %v7482_v38, %v7481_v63  ;;  %v7484_v0 = vpop.f32.mrb[26].mxu1  ;;  %v5225_v63 = vld [vmem:[#allocation4 + $0x31] sm:$0xf] }
 0x4c4   :  { %v7485_v41 = vpop.f32.mrb[27].mxu1  ;;  %5245 = vrot.lane.b32.xlu0 %v5225_v63, %s8041_s25 }
 0x4c5   :  { %v13162_v59 = vadd.f32 %v7485_v41, %v7484_v0 }
 0x4c9   :  { %v7487_v58 = vpop.f32.mrb[28].mxu1 }
 0x4ca   :  { %v7488_v19 = vpop.f32.mrb[29].mxu1 }
 0x4cb   :  { %v13164_v31 = vadd.f32 %v7488_v19, %v7487_v58  ;;  %v7490_v1 = vpop.f32.mrb[30].mxu1 }
 0x4cc   :  { %v7491_v8 = vpop.f32.mrb[31].mxu1 }
 0x4cd   :  { %v13166_v37 = vadd.f32 %v7491_v8, %v7490_v1 }
 0x4d1   :  { %v7509_v23 = vpop.f32.mrb[32].mxu1 }
 0x4d2   :  { %v7510_v28 = vpop.f32.mrb[33].mxu1 }
 0x4d3   :  { %v7511_v55 = vadd.f32 %v7510_v28, %v7509_v23  ;;  %v7512_v49 = vpop.f32.mrb[34].mxu1 }
 0x4d4   :  { %v7513_v18 = vpop.f32.mrb[35].mxu1 }
 0x4d5   :  { %v4363_v39 = vadd.f32 %v7511_v55, %v7447_v61  ;;  %v7514_v15 = vadd.f32 %v7513_v18, %v7512_v49 }
 0x4d7   :  { %v13169_v44 = vadd.f32 %v13107_v3, %v4363_v39  ;;  %v4366_v27 = vadd.f32 %v7514_v15, %v7450_v34 }
 0x4d9   :  { %v13172_v16 = vadd.f32 %v13113_v25, %v4366_v27  ;;  %v7515_v6 = vpop.f32.mrb[36].mxu1  ;;  %v4524_v41 = vsel %vm688_vm2, %v13169_v44, 0.0 }
 0x4da   :  { %v7516_v5 = vpop.f32.mrb[37].mxu1 }
 0x4db   :  { %v7517_v3 = vadd.f32 %v7516_v5, %v7515_v6  ;;  %v7518_v61 = vpop.f32.mrb[38].mxu1  ;;  %v4564_v54 = vmul.f32 %v13172_v16, %v13172_v16 }
 0x4dc   :  { %v7519_v25 = vpop.f32.mrb[39].mxu1 }
 0x4dd   :  { %v4371_v34 = vadd.f32 %v7517_v3, %v13140_v4  ;;  %v7520_v36 = vadd.f32 %v7519_v25, %v7518_v61  ;;  %v5418_v4 = vld [vmem:[#allocation4 + $0x29] sm:$0xf]  ;;  %v4580_v58 = vsel %vm688_vm2, %v4564_v54, 0.0 }
 0x4de   :  { %5437 = vrot.lane.b32.xlu1 %v5418_v4, %s8041_s25 }
 0x4df   :  { %v13188_v20 = vadd.f32 %v13105_v62, %v4371_v34  ;;  %v4374_v46 = vadd.f32 %v7520_v36, %v13142_v17  ;;  %v4563_v62 = vmul.f32 %v13169_v44, %v13169_v44 }
 0x4e1   :  { %v13192_v26 = vadd.f32 %v13110_v22, %v4374_v46  ;;  %v7521_v53 = vpop.f32.mrb[40].mxu1  ;;  %v4525_v22 = vsel %vm688_vm2, %v13172_v16, 0.0  ;;  %v4565_v17 = vmul.f32 %v13188_v20, %v13188_v20  ;;  %v4527_v19 = vsel %vm688_vm2, %v13188_v20, 0.0 }
 0x4e2   :  { %v7522_v10 = vpop.f32.mrb[41].mxu1  ;;  %v4526_v23 = vadd.f32 %v4525_v22, %v4524_v41  ;;  %v4579_v28 = vsel %vm688_vm2, %v4563_v62, 0.0 }
 0x4e3   :  { %v7523_v33 = vadd.f32 %v7522_v10, %v7521_v53  ;;  %v7524_v45 = vpop.f32.mrb[42].mxu1  ;;  %v4566_v55 = vmul.f32 %v13192_v26, %v13192_v26  ;;  %v4581_v39 = vadd.f32 %v4580_v58, %v4579_v28 }
 0x4e4   :  { %v7525_v24 = vpop.f32.mrb[43].mxu1  ;;  %v4528_v15 = vadd.f32 %v4527_v19, %v4526_v23 }
 0x4e5   :  { %v4379_v38 = vadd.f32 %v7523_v33, %v13144_v57  ;;  %v7526_v0 = vadd.f32 %v7525_v24, %v7524_v45  ;;  %v4582_v57 = vsel %vm688_vm2, %v4565_v17, 0.0  ;;  %v4584_v25 = vsel %vm688_vm2, %v4566_v55, 0.0 }
 0x4e6   :  { %v4583_v3 = vadd.f32 %v4582_v57, %v4581_v39 }
 0x4e7   :  { %v13211_v1 = vadd.f32 %v13118_v32, %v4379_v38  ;;  %v4382_v8 = vadd.f32 %v7526_v0, %v13146_v42  ;;  %v4529_v42 = vsel %vm688_vm2, %v13192_v26, 0.0 }
 0x4e8   :  { %v4530_v46 = vadd.f32 %v4529_v42, %v4528_v15  ;;  %v4585_v33 = vadd.f32 %v4584_v25, %v4583_v3 }
 0x4e9   :  { %v13220_v49 = vadd.f32 %v13122_v35, %v4382_v8  ;;  %v7527_v18 = vpop.f32.mrb[44].mxu1  ;;  %v4567_v27 = vmul.f32 %v13211_v1, %v13211_v1  ;;  %v4531_v35 = vsel %vm688_vm2, %v13211_v1, 0.0 }
 0x4ea   :  { %v7528_v32 = vpop.f32.mrb[45].mxu1  ;;  %v4532_v45 = vadd.f32 %v4531_v35, %v4530_v46 }
 0x4eb   :  { %v7529_v6 = vadd.f32 %v7528_v32, %v7527_v18  ;;  %v7530_v5 = vpop.f32.mrb[46].mxu1  ;;  %v4586_v53 = vsel %vm688_vm2, %v4567_v27, 0.0  ;;  %v4568_v10 = vmul.f32 %v13220_v49, %v13220_v49  ;;  %v4533_v4 = vsel %vm688_vm2, %v13220_v49, 0.0 }
 0x4ec   :  { %v7531_v61 = vpop.f32.mrb[47].mxu1  ;;  %v4587_v63 = vadd.f32 %v4586_v53, %v4585_v33  ;;  %v4534_v0 = vadd.f32 %v4533_v4, %v4532_v45 }
 0x4ed   :  { %v4387_v34 = vadd.f32 %v7529_v6, %v13148_v11  ;;  %v7532_v36 = vadd.f32 %v7531_v61, %v7530_v5  ;;  %v4588_v17 = vsel %vm688_vm2, %v4568_v10, 0.0 }
 0x4ee   :  { %v4589_v23 = vadd.f32 %v4588_v17, %v4587_v63 }
 0x4ef   :  { %v13234_v7 = vadd.f32 %v13116_v9, %v4387_v34  ;;  %v4390_v54 = vadd.f32 %v7532_v36, %v13150_v21 }
 0x4f1   :  { %v4569_v11 = vmul.f32 %v13234_v7, %v13234_v7  ;;  %v13242_v62 = vadd.f32 %v13120_v60, %v4390_v54  ;;  %v7533_v24 = vpop.f32.mrb[48].mxu1  ;;  %v4535_v9 = vsel %vm688_vm2, %v13234_v7, 0.0 }
 0x4f2   :  { %v7534_v22 = vpop.f32.mrb[49].mxu1  ;;  %v4536_v28 = vadd.f32 %v4535_v9, %v4534_v0 }
 0x4f3   :  { %v7535_v21 = vadd.f32 %v7534_v22, %v7533_v24  ;;  %v7536_v38 = vpop.f32.mrb[50].mxu1  ;;  %v4590_v58 = vsel %vm688_vm2, %v4569_v11, 0.0  ;;  %v4570_v19 = vmul.f32 %v13242_v62, %v13242_v62  ;;  %v4537_v57 = vsel %vm688_vm2, %v13242_v62, 0.0 }
 0x4f4   :  { %v7537_v41 = vpop.f32.mrb[51].mxu1  ;;  %v4591_v39 = vadd.f32 %v4590_v58, %v4589_v23  ;;  %v4538_v6 = vadd.f32 %v4537_v57, %v4536_v28 }
 0x4f5   :  { %v4395_v60 = vadd.f32 %v7535_v21, %v13152_v12  ;;  %v7538_v8 = vadd.f32 %v7537_v41, %v7536_v38  ;;  %v4592_v15 = vsel %vm688_vm2, %v4570_v19, 0.0 }
 0x4f6   :  { %v4593_v25 = vadd.f32 %v4592_v15, %v4591_v39 }
 0x4f7   :  { %v13254_v55 = vadd.f32 %v13126_v50, %v4395_v60  ;;  %v4398_v18 = vadd.f32 %v7538_v8, %v13154_v2 }
 0x4f9   :  { %v4539_v32 = vsel %vm688_vm2, %v13254_v55, 0.0  ;;  %v4571_v12 = vmul.f32 %v13254_v55, %v13254_v55  ;;  %v13263_v42 = vadd.f32 %v13130_v51, %v4398_v18  ;;  %v7539_v27 = vpop.f32.mrb[52].mxu1 }
 0x4fa   :  { %v7540_v5 = vpop.f32.mrb[53].mxu1  ;;  %v4540_v35 = vadd.f32 %v4539_v32, %v4538_v6 }
 0x4fb   :  { %v4594_v50 = vsel %vm688_vm2, %v4571_v12, 0.0  ;;  %v4572_v2 = vmul.f32 %v13263_v42, %v13263_v42  ;;  %v7541_v3 = vadd.f32 %v7540_v5, %v7539_v27  ;;  %v7542_v61 = vpop.f32.mrb[54].mxu1  ;;  %v4541_v36 = vsel %vm688_vm2, %v13263_v42, 0.0 }
 0x4fc   :  { %v7543_v34 = vpop.f32.mrb[55].mxu1  ;;  %v4595_v53 = vadd.f32 %v4594_v50, %v4593_v25  ;;  %v4542_v45 = vadd.f32 %v4541_v36, %v4540_v35 }
 0x4fd   :  { %v4403_v46 = vadd.f32 %v7541_v3, %v13156_v48  ;;  %v7544_v51 = vadd.f32 %v7543_v34, %v7542_v61  ;;  %v4596_v10 = vsel %vm688_vm2, %v4572_v2, 0.0 }
 0x4fe   :  { %v4597_v63 = vadd.f32 %v4596_v10, %v4595_v53 }
 0x4ff   :  { %v13273_v54 = vadd.f32 %v13124_v56, %v4403_v46  ;;  %v4406_v33 = vadd.f32 %v7544_v51, %v13158_v52 }
 0x501   :  { %v4543_v4 = vsel %vm688_vm2, %v13273_v54, 0.0  ;;  %v4573_v11 = vmul.f32 %v13273_v54, %v13273_v54  ;;  %v13281_v24 = vadd.f32 %v13128_v30, %v4406_v33  ;;  %v7545_v48 = vpop.f32.mrb[56].mxu1 }
 0x502   :  { %v4544_v22 = vadd.f32 %v4543_v4, %v4542_v45  ;;  %v7546_v17 = vpop.f32.mrb[57].mxu1 }
 0x503   :  { %v4598_v9 = vsel %vm688_vm2, %v4573_v11, 0.0  ;;  %v4545_v56 = vsel %vm688_vm2, %v13281_v24, 0.0  ;;  %v4574_v52 = vmul.f32 %v13281_v24, %v13281_v24  ;;  %v7547_v21 = vadd.f32 %v7546_v17, %v7545_v48  ;;  %v7548_v38 = vpop.f32.mrb[58].mxu1 }
 0x504   :  { %v4599_v0 = vadd.f32 %v4598_v9, %v4597_v63  ;;  %v4546_v41 = vadd.f32 %v4545_v56, %v4544_v22  ;;  %v7549_v58 = vpop.f32.mrb[59].mxu1 }
 0x505   :  { %v4600_v30 = vsel %vm688_vm2, %v4574_v52, 0.0  ;;  %v4411_v19 = vadd.f32 %v7547_v21, %v13160_v40  ;;  %v7550_v60 = vadd.f32 %v7549_v58, %v7548_v38 }
 0x506   :  { %v4601_v8 = vadd.f32 %v4600_v30, %v4599_v0 }
 0x507   :  { %v13291_v23 = vadd.f32 %v13134_v43, %v4411_v19  ;;  %v4414_v28 = vadd.f32 %v7550_v60, %v13162_v59  ;;  %v5466_v19 = vld [vmem:[#allocation4 + $0x2a] sm:$0xf] }
 0x508   :  { %5474 = vst.msk [vmem:[#allocation5 + $0x4c] sm:$0xf] %vm5196_vm13, %v5466_v19 }
 0x509   :  { %v4547_v57 = vsel %vm688_vm2, %v13291_v23, 0.0  ;;  %v4575_v18 = vmul.f32 %v13291_v23, %v13291_v23  ;;  %v13299_v39 = vadd.f32 %v13138_v14, %v4414_v28  ;;  %v7551_v15 = vpop.f32.mrb[60].mxu1 }
 0x50a   :  { %v7552_v32 = vpop.f32.mrb[61].mxu1  ;;  %v4548_v6 = vadd.f32 %v4547_v57, %v4546_v41 }
 0x50b   :  { %v4602_v40 = vsel %vm688_vm2, %v4575_v18, 0.0  ;;  %v4576_v12 = vmul.f32 %v13299_v39, %v13299_v39  ;;  %v7553_v43 = vadd.f32 %v7552_v32, %v7551_v15  ;;  %v7554_v27 = vpop.f32.mrb[62].mxu1  ;;  %v4549_v5 = vsel %vm688_vm2, %v13299_v39, 0.0  ;;  %v4522_v18 = vld [vmem:[%s13999_s5] sm:$0x1] }
 0x50c   :  { %v7555_v59 = vpop.f32.mrb[63].mxu1  ;;  %v4603_v3 = vadd.f32 %v4602_v40, %v4601_v8  ;;  %v4550_v35 = vadd.f32 %v4549_v5, %v4548_v6  ;;  %v5470_v8 = vld [vmem:[#allocation4 + $0x5a] sm:$0xf]  ;;  %v4523_v40 = vld [vmem:[%s14000_s6] sm:$0x1] }
 0x50d   :  { %v4419_v50 = vadd.f32 %v7553_v43, %v13164_v31  ;;  %v7556_v2 = vadd.f32 %v7555_v59, %v7554_v27  ;;  %v4604_v14 = vsel %vm688_vm2, %v4576_v12, 0.0  ;;  %5478 = vst.msk [vmem:[#allocation5 + $0x9c] sm:$0xf] %vm5196_vm13, %v5470_v8  ;;  %v15700_v43 = vld [vmem:[#allocation34_spill] sm:$0xff] }
 0x50e   :  { %v4605_v51 = vadd.f32 %v4604_v14, %v4603_v3 }
 0x50f   :  { %v4516_v61 = vadd.f32 %v13132_v29, %v4419_v50  ;;  %v4422_v25 = vadd.f32 %v7556_v2, %v13166_v37 }
 0x511   :  { %v4551_v34 = vsel %vm688_vm2, %v4516_v61, 0.0  ;;  %v4577_v36 = vmul.f32 %v4516_v61, %v4516_v61  ;;  %v4519_v46 = vadd.f32 %v13136_v47, %v4422_v25 }
 0x512   :  { %v4552_v53 = vadd.f32 %v4551_v34, %v4550_v35 }
 0x513   :  { %v4606_v10 = vsel %vm688_vm2, %v4577_v36, 0.0  ;;  %v4553_v31 = vsel %vm688_vm2, %v4519_v46, 0.0  ;;  %v4578_v33 = vmul.f32 %v4519_v46, %v4519_v46 }
 0x514   :  { %v4607_v45 = vadd.f32 %v4606_v10, %v4605_v51  ;;  %v4554_v4 = vadd.f32 %v4553_v31, %v4552_v53 }
 0x515   :  { %v4608_v11 = vsel %vm688_vm2, %v4578_v33, 0.0 }
 0x516   :  { %v4555_v29 = vrot.slane %v4554_v4, 4  ;;  %v4609_v48 = vadd.f32 %v4608_v11, %v4607_v45 }
 0x518   :  { %v4556_v37 = vadd.f32 %v4555_v29, %v4554_v4  ;;  %v4610_v63 = vrot.slane %v4609_v48, 4 }
 0x51a   :  { %v4557_v22 = vrot.slane %v4556_v37, 2  ;;  %v4611_v17 = vadd.f32 %v4610_v63, %v4609_v48 }
 0x51c   :  { %v4558_v9 = vadd.f32 %v4557_v22, %v4556_v37  ;;  %v4612_v56 = vrot.slane %v4611_v17, 2 }
 0x51e   :  { %v4559_v47 = vrot.slane %v4558_v9, 1  ;;  %v4613_v52 = vadd.f32 %v4612_v56, %v4611_v17 }
 0x520   :  { %v4560_v21 = vadd.f32 %v4559_v47, %v4558_v9  ;;  %v4614_v38 = vrot.slane %v4613_v52, 1 }
 0x522   :  { %v4562_v0 = vmul.f32 0.0078125, %v4560_v21  ;;  %v4615_v41 = vadd.f32 %v4614_v38, %v4613_v52 }
 0x524   :  { %v4616_v58 = vmul.f32 0.0078125, %v4615_v41  ;;  %v4617_v30 = vmul.f32 %v4562_v0, %v4562_v0 }
 0x526   :  { %v4618_v60 = vsub.f32 %v4616_v58, %v4617_v30 }
 0x528   :  { %v4619_v28 = vmax.f32 %v4618_v60, 0.0 }
 0x52a   :  { %v4620_v57 = vadd.f32 1e-05, %v4619_v28 }
 0x52c   :  { %8006 = vrsqrt.f32 %v4620_v57 }
 0x536   :  { %v8007_v15 = vpop.eup %8006 }
 0x537   :  { %v4622_v32 = vmul.f32 %v8007_v15, %v4522_v18 }
 0x539   :  { %v4623_v12 = vmul.f32 %v4622_v32, %v4562_v0  ;;  %v13324_v27 = vrot.slane %v4622_v32, %v15700_v43  ;;  %v15701_v0 = vld [vmem:[#allocation35_spill] sm:$0xff] }
 0x53b   :  { %v4624_v6 = vsub.f32 %v4523_v40, %v4623_v12  ;;  %v4645_v59 = vmul.f32 %v13324_v27, %v4516_v61  ;;  %v4646_v5 = vmul.f32 %v13324_v27, %v4519_v46  ;;  %v4633_v50 = vmul.f32 %v13324_v27, %v13188_v20 }
 0x53c   :  { %v4634_v2 = vmul.f32 %v13324_v27, %v13192_v26  ;;  %v4631_v3 = vmul.f32 %v13324_v27, %v13169_v44  ;;  %v4632_v14 = vmul.f32 %v13324_v27, %v13172_v16  ;;  %v4635_v25 = vmul.f32 %v13324_v27, %v13211_v1 }
 0x53d   :  { %v13339_v35 = vrot.slane %v4624_v6, %v15700_v43  ;;  %v4636_v61 = vmul.f32 %v13324_v27, %v13220_v49  ;;  %v4641_v20 = vmul.f32 %v13324_v27, %v13273_v54  ;;  %v4642_v26 = vmul.f32 %v13324_v27, %v13281_v24 }
 0x53e   :  { %v13349_v44 = vmul.f32 %v13324_v27, %v13234_v7  ;;  %v13353_v16 = vmul.f32 %v13324_v27, %v13242_v62  ;;  %v13357_v1 = vmul.f32 %v13324_v27, %v13254_v55  ;;  %v13361_v49 = vmul.f32 %v13324_v27, %v13263_v42 }
 0x53f   :  { %v4667_v54 = vadd.f32 %v13339_v35, %v4645_v59  ;;  %v4668_v24 = vadd.f32 %v13339_v35, %v4646_v5  ;;  %v4655_v34 = vadd.f32 %v13339_v35, %v4633_v50  ;;  %v4656_v7 = vadd.f32 %v13339_v35, %v4634_v2  ;;  %v7892_v5 = vld [vmem:[%s14001_s7 + $0x40] sm:$0xff]  }
 0x540   :  { %v4653_v36 = vadd.f32 %v13339_v35, %v4631_v3  ;;  %v4654_v62 = vadd.f32 %v13339_v35, %v4632_v14  ;;  %v4657_v46 = vadd.f32 %v13339_v35, %v4635_v25  ;;  %v4658_v55 = vadd.f32 %v13339_v35, %v4636_v61  ;;  %v7893_v50 = vld [vmem:[%s14001_s7] sm:$0xff]   ;;  %7569 = vmatprep.subr.bf16.mxu1 %v7892_v5 }
 0x541   :  { %v4683_v51 = vmax.f32 %v4667_v54, 0.0  ;;  %v4684_v53 = vmax.f32 %v4668_v24, 0.0  ;;  %v4671_v42 = vmax.f32 %v4655_v34, 0.0  ;;  %v4672_v10 = vmax.f32 %v4656_v7, 0.0  ;;  %v5205_v2 = vld [vmem:[#allocation4] sm:$0xf]  ;;  %7570 = vmatpush3.bf16.msra.mxu1 %v7893_v50 }
 0x542   :  { %v4669_v31 = vmax.f32 %v4653_v36, 0.0  ;;  %v4670_v33 = vmax.f32 %v4654_v62, 0.0  ;;  %v4673_v45 = vmax.f32 %v4657_v46, 0.0  ;;  %v4674_v4 = vmax.f32 %v4658_v55, 0.0  ;;  %5213 = vst.msk [vmem:[#allocation5] sm:$0xf] %vm5196_vm13, %v5205_v2 }
 0x543   :  { %v4706_v11 = vsel %vm688_vm2, %v4683_v51, -inf  ;;  %v4707_v29 = vsel %vm688_vm2, %v4684_v53, -inf  ;;  %v4688_v48 = vsel %vm688_vm2, %v4671_v42, -inf  ;;  %v4689_v37 = vsel %vm688_vm2, %v4672_v10, -inf  ;;  %v7894_v36 = vld [vmem:[%s14001_s7 + $0x48] sm:$0xff]  }
 0x544   :  { %v4708_v63 = vmax.f32 %v4706_v11, %v4707_v29  ;;  %v4690_v22 = vmax.f32 %v4688_v48, %v4689_v37  ;;  %v4685_v17 = vsel %vm688_vm2, %v4669_v31, -inf  ;;  %v4686_v9 = vsel %vm688_vm2, %v4670_v33, -inf  ;;  %v7895_v53 = vld [vmem:[%s14001_s7 + $0x8] sm:$0xff]   ;;  %7571 = vmatprep.subr.bf16.mxu1 %v7894_v36 }
 0x545   :  { %v4687_v56 = vmax.f32 %v4685_v17, %v4686_v9  ;;  %v4691_v47 = vsel %vm688_vm2, %v4673_v45, -inf  ;;  %v4692_v52 = vsel %vm688_vm2, %v4674_v4, -inf  ;;  %v13380_v21 = vadd.f32 %v13339_v35, %v4641_v20  ;;  %v5209_v20 = vld [vmem:[#allocation4 + $0x30] sm:$0xf]  ;;  %7572 = vmatpush3.bf16.msra.mxu1 %v7895_v53 }
 0x546   :  { %v4836_v38 = vcombine.high %v4708_v63, %v4708_v63  ;;  %v4843_v41 = vrot.slane %v4708_v63, %v15701_v0  ;;  %v4734_v58 = vcombine.high %v4690_v22, %v4690_v22  ;;  %v4741_v30 = vrot.slane %v4690_v22, %v15701_v0  ;;  %5217 = vst.msk [vmem:[#allocation5 + $0x50] sm:$0xf] %vm5196_vm13, %v5209_v20 }
 0x547   :  { %v4717_v19 = vcombine.high %v4687_v56, %v4687_v56  ;;  %v13385_v60 = vrot.slane %v4687_v56, %v15701_v0  ;;  %v13387_v8 = vmax.f32 %v4691_v47, %v4692_v52  ;;  %v13390_v28 = vadd.f32 %v13339_v35, %v4642_v26  ;;  %v5402_v26 = vld [vmem:[#allocation4 + $0x28] sm:$0xf] }
 0x548   :  { %v4850_v57 = vrot.slane %v4836_v38, %v15701_v0  ;;  %v4851_v18 = vcombine.high %v4843_v41, %v4843_v41  ;;  %v5081_v15 = vsel %vm2034_vm3, %v4843_v41, -inf  ;;  %v4748_v32 = vrot.slane %v4734_v58, %v15701_v0  ;;  %5410 = vst.msk [vmem:[#allocation5 + $0x48] sm:$0xf] %vm5196_vm13, %v5402_v26 }
 0x549   :  { %v5082_v40 = vrot.slane %v5081_v15, 4  ;;  %v4749_v12 = vcombine.high %v4741_v30, %v4741_v30  ;;  %v4913_v6 = vsel %vm2034_vm3, %v4741_v30, -inf  ;;  %v13397_v59 = vrot.slane %v4717_v19, %v15701_v0 }
 0x54a   :  { %v4852_v3 = vcombine.high %v4850_v57, %v4850_v57  ;;  %v5088_v14 = vsel %vm2034_vm3, %v4851_v18, -inf  ;;  %v5095_v25 = vsel %vm2034_vm3, %v4850_v57, -inf  ;;  %v4750_v61 = vcombine.high %v4748_v32, %v4748_v32 }
 0x54b   :  { %v5083_v54 = vmax.f32 %v5081_v15, %v5082_v40  ;;  %v5089_v24 = vrot.slane %v5088_v14, 4  ;;  %v5096_v34 = vrot.slane %v5095_v25, 4  ;;  %v4914_v7 = vrot.slane %v4913_v6, 4 }
 0x54c   :  { %v5102_v62 = vsel %vm2034_vm3, %v4852_v3, -inf  ;;  %v4920_v46 = vsel %vm2034_vm3, %v4749_v12, -inf  ;;  %v4927_v55 = vsel %vm2034_vm3, %v4748_v32, -inf  ;;  %v4934_v51 = vsel %vm2034_vm3, %v4750_v61, -inf }
 0x54d   :  { %v5084_v42 = vrot.slane %v5083_v54, 2  ;;  %v5090_v10 = vmax.f32 %v5088_v14, %v5089_v24  ;;  %v5097_v31 = vmax.f32 %v5095_v25, %v5096_v34  ;;  %v5103_v33 = vrot.slane %v5102_v62, 4 }
 0x54e   :  { %v4915_v45 = vmax.f32 %v4913_v6, %v4914_v7  ;;  %v4921_v4 = vrot.slane %v4920_v46, 4  ;;  %v4928_v11 = vrot.slane %v4927_v55, 4  ;;  %v4935_v29 = vrot.slane %v4934_v51, 4 }
 0x54f   :  { %v5085_v48 = vmax.f32 %v5083_v54, %v5084_v42  ;;  %v5091_v37 = vrot.slane %v5090_v10, 2  ;;  %v5098_v63 = vrot.slane %v5097_v31, 2  ;;  %v5104_v22 = vmax.f32 %v5102_v62, %v5103_v33 }
 0x550   :  { %v4916_v17 = vrot.slane %v4915_v45, 2  ;;  %v4922_v9 = vmax.f32 %v4920_v46, %v4921_v4  ;;  %v4929_v56 = vmax.f32 %v4927_v55, %v4928_v11  ;;  %v4936_v47 = vmax.f32 %v4934_v51, %v4935_v29 }
 0x551   :  { %v5086_v52 = vrot.slane %v5085_v48, 1  ;;  %v5092_v38 = vmax.f32 %v5090_v10, %v5091_v37  ;;  %v5099_v41 = vmax.f32 %v5097_v31, %v5098_v63  ;;  %v5105_v58 = vrot.slane %v5104_v22, 2 }
 0x552   :  { %v4917_v30 = vmax.f32 %v4915_v45, %v4916_v17  ;;  %v4923_v19 = vrot.slane %v4922_v9, 2  ;;  %v4930_v57 = vrot.slane %v4929_v56, 2  ;;  %v4937_v18 = vrot.slane %v4936_v47, 2 }
 0x553   :  { %v5087_v15 = vmax.f32 %v5085_v48, %v5086_v52  ;;  %v5093_v32 = vrot.slane %v5092_v38, 1  ;;  %v5100_v40 = vrot.slane %v5099_v41, 1  ;;  %v5106_v12 = vmax.f32 %v5104_v22, %v5105_v58 }
 0x554   :  { %v4918_v6 = vrot.slane %v4917_v30, 1  ;;  %v4924_v5 = vmax.f32 %v4922_v9, %v4923_v19  ;;  %v4931_v50 = vmax.f32 %v4929_v56, %v4930_v57  ;;  %v4938_v2 = vmax.f32 %v4936_v47, %v4937_v18 }
 0x555   :  { %v5094_v3 = vmax.f32 %v5092_v38, %v5093_v32  ;;  %v5101_v14 = vmax.f32 %v5099_v41, %v5100_v40  ;;  %v5107_v25 = vrot.slane %v5106_v12, 1  ;;  %v4732_v61 = vcombine.high %v13385_v60, %v13385_v60 }
 0x556   :  { %v4919_v20 = vmax.f32 %v4917_v30, %v4918_v6  ;;  %v4925_v26 = vrot.slane %v4924_v5, 1  ;;  %v4932_v54 = vrot.slane %v4931_v50, 1  ;;  %v4939_v24 = vrot.slane %v4938_v2, 1 }
 0x557   :  { %v5108_v34 = vmax.f32 %v5106_v12, %v5107_v25  ;;  %v5185_v7 = vsel %vm3102_vm5, %v5094_v3, %v5087_v15  ;;  %v4733_v36 = vcombine.high %v13397_v59, %v13397_v59  ;;  %v4885_v62 = vsel %vm2034_vm3, %v13385_v60, -inf }
 0x558   :  { %v5186_v46 = vsel %vm3104_vm6, %v5101_v14, %v5185_v7  ;;  %v4926_v55 = vmax.f32 %v4924_v5, %v4925_v26  ;;  %v4933_v51 = vmax.f32 %v4931_v50, %v4932_v54  ;;  %v4940_v53 = vmax.f32 %v4938_v2, %v4939_v24 }
 0x559   :  { %v5187_v42 = vsel %vm3106_vm7, %v5108_v34, %v5186_v46  ;;  %v4886_v10 = vrot.slane %v4885_v62, 4  ;;  %v4892_v31 = vsel %vm2034_vm3, %v4732_v61, -inf  ;;  %v4899_v33 = vsel %vm2034_vm3, %v13397_v59, -inf }
 0x55a   :  { %5204 = vst.msk [vmem:[#allocation4 + $0x51] sm:$0xf] %vm5196_vm13, %v5187_v42  ;;  %v5167_v45 = vsel %vm3102_vm5, %v4926_v55, %v4919_v20  ;;  %v4893_v4 = vrot.slane %v4892_v31, 4  ;;  %v4900_v11 = vrot.slane %v4899_v33, 4  ;;  %v4906_v60 = vsel %vm2034_vm3, %v4733_v36, -inf }
 0x55b   :  { %v5168_v29 = vsel %vm3104_vm6, %v4933_v51, %v5167_v45  ;;  %v4887_v48 = vmax.f32 %v4885_v62, %v4886_v10  ;;  %v4907_v37 = vrot.slane %v4906_v60, 4  ;;  %v4751_v63 = vcombine.high %v13387_v8, %v13387_v8 }
 0x55c   :  { %v5169_v22 = vsel %vm3106_vm7, %v4940_v53, %v5168_v29  ;;  %v4894_v17 = vmax.f32 %v4892_v31, %v4893_v4  ;;  %v4901_v9 = vmax.f32 %v4899_v33, %v4900_v11  ;;  %v4758_v59 = vrot.slane %v13387_v8, %v15701_v0  ;;  %v7896_v53 = vld [vmem:[%s14001_s7 + $0x50] sm:$0xff]  }
 0x55d   :  { %5198 = vst.msk [vmem:[#allocation4 + $0x11] sm:$0xf] %vm5196_vm13, %v5169_v22  ;;  %v4888_v56 = vrot.slane %v4887_v48, 2  ;;  %v4908_v47 = vmax.f32 %v4906_v60, %v4907_v37  ;;  %v4765_v52 = vrot.slane %v4751_v63, %v15701_v0  ;;  %v4679_v38 = vmax.f32 %v13380_v21, 0.0  ;;  %7573 = vmatprep.subr.bf16.mxu1 %v7896_v53 }
 0x55e   :  { %v4895_v41 = vrot.slane %v4894_v17, 2  ;;  %v4902_v58 = vrot.slane %v4901_v9, 2  ;;  %v4766_v30 = vcombine.high %v4758_v59, %v4758_v59  ;;  %v4941_v19 = vsel %vm2034_vm3, %v4758_v59, -inf }
 0x55f   :  { %v4889_v57 = vmax.f32 %v4887_v48, %v4888_v56  ;;  %v4909_v18 = vrot.slane %v4908_v47, 2  ;;  %v4767_v15 = vcombine.high %v4765_v52, %v4765_v52  ;;  %v4942_v32 = vrot.slane %v4941_v19, 4  ;;  %v7897_v48 = vld [vmem:[%s14001_s7 + $0x10] sm:$0xff]  }
 0x560   :  { %v4896_v40 = vmax.f32 %v4894_v17, %v4895_v41  ;;  %v4903_v12 = vmax.f32 %v4901_v9, %v4902_v58  ;;  %v4948_v8 = vsel %vm2034_vm3, %v4766_v30, -inf  ;;  %v4955_v6 = vsel %vm2034_vm3, %v4765_v52, -inf  ;;  %7574 = vmatpush3.bf16.msra.mxu1 %v7897_v48 }
 0x561   :  { %v4890_v5 = vrot.slane %v4889_v57, 1  ;;  %v4910_v50 = vmax.f32 %v4908_v47, %v4909_v18  ;;  %v4943_v2 = vmax.f32 %v4941_v19, %v4942_v32  ;;  %v4949_v3 = vrot.slane %v4948_v8, 4  ;;  %v5341_v34 = vld [vmem:[#allocation4 + $0x51] sm:$0xf] }
 0x562   :  { %v4897_v21 = vrot.slane %v4896_v40, 1  ;;  %v4904_v14 = vrot.slane %v4903_v12, 1  ;;  %v4956_v25 = vrot.slane %v4955_v6, 4  ;;  %v4962_v61 = vsel %vm2034_vm3, %v4767_v15, -inf  ;;  %v5469_v7 = vld [vmem:[#allocation4 + $0x52] sm:$0xf] }
 0x563   :  { %v4891_v20 = vmax.f32 %v4889_v57, %v4890_v5  ;;  %v4911_v26 = vrot.slane %v4910_v50, 1  ;;  %v4944_v54 = vrot.slane %v4943_v2, 2  ;;  %v4950_v24 = vmax.f32 %v4948_v8, %v4949_v3  ;;  %5349 = vst.msk [vmem:[#allocation5 + $0x94] sm:$0xf] %vm5196_vm13, %v5341_v34  ;;  %5477 = vst.msk [vmem:[#allocation5 + $0x88] sm:$0xf] %vm5196_vm13, %v5469_v7 }
 0x564   :  { %v5223_v36 = vld [vmem:[#allocation4 + $0x11] sm:$0xf]  ;;  %v4898_v62 = vmax.f32 %v4896_v40, %v4897_v21  ;;  %v4905_v46 = vmax.f32 %v4903_v12, %v4904_v14  ;;  %v4957_v55 = vmax.f32 %v4955_v6, %v4956_v25  ;;  %v4963_v51 = vrot.slane %v4962_v61, 4  ;;  %v7898_v14 = vld [vmem:[%s14001_s7 + $0x58] sm:$0xff]  }
 0x565   :  { %5241 = vrot.lane.b32.xlu0 %v5223_v36, %s8041_s25  ;;  %v4912_v42 = vmax.f32 %v4910_v50, %v4911_v26  ;;  %v4945_v10 = vmax.f32 %v4943_v2, %v4944_v54  ;;  %v4951_v31 = vrot.slane %v4950_v24, 2  ;;  %v4680_v33 = vmax.f32 %v13390_v28, 0.0  ;;  %v5207_v29 = vld [vmem:[#allocation4 + $0x10] sm:$0xf]  ;;  %v5270_v28 = vld [vmem:[#allocation4 + $0x2] sm:$0xf]  ;;  %7575 = vmatprep.subr.bf16.mxu1 %v7898_v14 }
 0x566   :  { %v5164_v45 = vsel %vm3102_vm5, %v4898_v62, %v4891_v20  ;;  %v4958_v4 = vrot.slane %v4957_v55, 2  ;;  %v4964_v11 = vmax.f32 %v4962_v61, %v4963_v51  ;;  %v4700_v60 = vsel %vm688_vm2, %v4679_v38, -inf  ;;  %5215 = vst.msk [vmem:[#allocation5 + $0x28] sm:$0xf] %vm5196_vm13, %v5207_v29  ;;  %v5272_v9 = vld [vmem:[#allocation4 + $0x12] sm:$0xf] }
 0x567   :  { %v5165_v37 = vsel %vm3104_vm6, %v4905_v46, %v5164_v45  ;;  %v4946_v63 = vrot.slane %v4945_v10, 1  ;;  %v4952_v22 = vmax.f32 %v4950_v24, %v4951_v31  ;;  %v4701_v17 = vsel %vm688_vm2, %v4680_v33, -inf  ;;  %5278 = vst.msk [vmem:[#allocation5 + $0x4] sm:$0xf] %vm5196_vm13, %v5270_v28  ;;  %5280 = vst.msk [vmem:[#allocation5 + $0x2c] sm:$0xf] %vm5196_vm13, %v5272_v9 }
 0x568   :  { %v5166_v59 = vsel %vm3106_vm7, %v4912_v42, %v5165_v37  ;;  %v4959_v56 = vmax.f32 %v4957_v55, %v4958_v4  ;;  %v4965_v47 = vrot.slane %v4964_v11, 2  ;;  %v4702_v52 = vmax.f32 %v4700_v60, %v4701_v17  ;;  %v5399_v38 = vld [vmem:[#allocation4 + $0x10] sm:$0xf]  ;;  %v7899_v25 = vld [vmem:[%s14001_s7 + $0x18] sm:$0xff]   ;;  %v7900_v17 = vld [vmem:[%s14001_s7 + $0x60] sm:$0xff]  }
 0x569   :  { %v5335_v41 = vld [vmem:[#allocation4 + $0x11] sm:$0xf]  ;;  %5197 = vst.msk [vmem:[#allocation4 + $0x9] sm:$0xf] %vm5196_vm13, %v5166_v59  ;;  %v4947_v58 = vmax.f32 %v4945_v10, %v4946_v63  ;;  %v4953_v30 = vrot.slane %v4952_v22, 1  ;;  %v4659_v19 = vadd.f32 %v13339_v35, %v13349_v44  ;;  %v4660_v57 = vadd.f32 %v13339_v35, %v13353_v16  ;;  %7576 = vmatpush3.bf16.msra.mxu1 %v7899_v25  ;;  %v7901_v28 = vld [vmem:[%s14001_s7 + $0x20] sm:$0xff]  }
 0x56a   :  { %5407 = vst.msk [vmem:[#allocation5 + $0xc] sm:$0xf] %vm5196_vm13, %v5399_v38  ;;  %5343 = vst.msk [vmem:[#allocation5 + $0x1c] sm:$0xf] %vm5196_vm13, %v5335_v41  ;;  %v5463_v18 = vld [vmem:[#allocation4 + $0x12] sm:$0xf]  ;;  %v4966_v40 = vmax.f32 %v4964_v11, %v4965_v47  ;;  %v4802_v12 = vcombine.high %v4702_v52, %v4702_v52  ;;  %v4809_v8 = vrot.slane %v4702_v52, %v15701_v0  ;;  %7577 = vmatprep.subr.bf16.mxu1 %v7900_v17 }
 0x56b   :  { %v5405_v15 = vld [vmem:[#allocation4 + $0x50] sm:$0xf]  ;;  %v4960_v32 = vrot.slane %v4959_v56, 1  ;;  %5471 = vst.msk [vmem:[#allocation5 + $0x10] sm:$0xf] %vm5196_vm13, %v5463_v18  ;;  %v4954_v6 = vmax.f32 %v4952_v22, %v4953_v30  ;;  %v4675_v44 = vmax.f32 %v4659_v19, 0.0  ;;  %v13478_v16 = vadd.f32 %v13339_v35, %v13357_v1 }
 0x56c   :  { %5413 = vst.msk [vmem:[#allocation5 + $0x84] sm:$0xf] %vm5196_vm13, %v5405_v15  ;;  %v4676_v5 = vmax.f32 %v4660_v57, 0.0  ;;  %v4967_v2 = vrot.slane %v4966_v40, 1  ;;  %v4816_v3 = vrot.slane %v4802_v12, %v15701_v0  ;;  %v4817_v21 = vcombine.high %v4809_v8, %v4809_v8 }
 0x56d   :  { %v4961_v50 = vmax.f32 %v4959_v56, %v4960_v32  ;;  %v5170_v61 = vsel %vm3102_vm5, %v4954_v6, %v4947_v58  ;;  %v5025_v20 = vsel %vm2034_vm3, %v4809_v8, -inf  ;;  %v4694_v1 = vsel %vm688_vm2, %v4675_v44, -inf  ;;  %7578 = vmatpush3.bf16.msra.mxu1 %v7901_v28 }
 0x56e   :  { %v4695_v26 = vsel %vm688_vm2, %v4676_v5, -inf  ;;  %v4968_v54 = vmax.f32 %v4966_v40, %v4967_v2  ;;  %v4818_v34 = vcombine.high %v4816_v3, %v4816_v3  ;;  %v5026_v7 = vrot.slane %v5025_v20, 4 }
 0x56f   :  { %v5171_v24 = vsel %vm3104_vm6, %v4961_v50, %v5170_v61  ;;  %v5032_v36 = vsel %vm2034_vm3, %v4817_v21, -inf  ;;  %v5039_v62 = vsel %vm2034_vm3, %v4816_v3, -inf  ;;  %v4696_v46 = vmax.f32 %v4694_v1, %v4695_v26 }
 0x570   :  { %v13496_v55 = vadd.f32 %v13339_v35, %v13361_v49  ;;  %v5222_v51 = vld [vmem:[#allocation4 + $0x9] sm:$0xf]  ;;  %v5172_v42 = vsel %vm3106_vm7, %v4968_v54, %v5171_v24  ;;  %v5027_v10 = vmax.f32 %v5025_v20, %v5026_v7  ;;  %v5033_v31 = vrot.slane %v5032_v36, 4 }
 0x571   :  { %v5286_v53 = vld [vmem:[#allocation4 + $0x8] sm:$0xf]  ;;  %v5040_v33 = vrot.slane %v5039_v62, 4  ;;  %5239 = vrot.lane.b32.xlu1 %v5222_v51, %s8041_s25  ;;  %5199 = vst.msk [vmem:[#allocation4 + $0x19] sm:$0xf] %vm5196_vm13, %v5172_v42  ;;  %v5046_v45 = vsel %vm2034_vm3, %v4818_v34, -inf  ;;  %v4768_v4 = vcombine.high %v4696_v46, %v4696_v46  ;;  %v4775_v49 = vrot.slane %v4696_v46, %v15701_v0  ;;  %v5238_v42 = vpop.permute.xlu0 %5237 }
 0x572   :  { %5302 = vrot.lane.b32.xlu0 %v5286_v53, %s8041_s25  ;;  %v4677_v11 = vmax.f32 %v13478_v16, 0.0  ;;  %v5206_v60 = vld [vmem:[#allocation4 + $0x8] sm:$0xf]  ;;  %v5028_v29 = vrot.slane %v5027_v10, 2  ;;  %v5034_v48 = vmax.f32 %v5032_v36, %v5033_v31  ;;  %v5047_v63 = vrot.slane %v5046_v45, 4 }
 0x573   :  { %v5041_v37 = vmax.f32 %v5039_v62, %v5040_v33  ;;  %5214 = vst.msk [vmem:[#allocation5 + $0x14] sm:$0xf] %vm5196_vm13, %v5206_v60  ;;  %v5271_v22 = vld [vmem:[#allocation4 + $0xa] sm:$0xf]  ;;  %v4782_v9 = vrot.slane %v4768_v4, %v15701_v0  ;;  %v4783_v59 = vcombine.high %v4775_v49, %v4775_v49  ;;  %v4969_v56 = vsel %vm2034_vm3, %v4775_v49, -inf }
 0x574   :  { %v4678_v47 = vmax.f32 %v13496_v55, 0.0  ;;  %5279 = vst.msk [vmem:[#allocation5 + $0x18] sm:$0xf] %vm5196_vm13, %v5271_v22  ;;  %v5334_v52 = vld [vmem:[#allocation4 + $0x9] sm:$0xf]  ;;  %v5029_v38 = vmax.f32 %v5027_v10, %v5028_v29  ;;  %v5035_v41 = vrot.slane %v5034_v48, 2  ;;  %v5048_v30 = vmax.f32 %v5046_v45, %v5047_v63 }
 0x575   :  { %v5042_v58 = vrot.slane %v5041_v37, 2  ;;  %5342 = vst.msk [vmem:[#allocation5 + $0x8] sm:$0xf] %vm5196_vm13, %v5334_v52  ;;  %v4784_v19 = vcombine.high %v4782_v9, %v4782_v9  ;;  %v4970_v57 = vrot.slane %v4969_v56, 4  ;;  %v4976_v18 = vsel %vm2034_vm3, %v4783_v59, -inf  ;;  %v5438_v52 = vpop.permute.xlu1 %5437 }
 0x576   :  { %v4983_v15 = vsel %vm2034_vm3, %v4782_v9, -inf  ;;  %v5030_v32 = vrot.slane %v5029_v38, 1  ;;  %v5036_v40 = vmax.f32 %v5034_v48, %v5035_v41  ;;  %v5049_v8 = vrot.slane %v5048_v30, 2  ;;  %v5287_v33 = vld [vmem:[#allocation4 + $0x10] sm:$0xf] }
 0x577   :  { %v5043_v12 = vmax.f32 %v5041_v37, %v5042_v58  ;;  %v4971_v6 = vmax.f32 %v4969_v56, %v4970_v57  ;;  %v4977_v44 = vrot.slane %v4976_v18, 4  ;;  %v4984_v5 = vrot.slane %v4983_v15, 4  ;;  %5262 = vst.msk [vmem:[#allocation5] sm:$0xf] %vm5261_vm15, %v5238_v42  ;;  %5458 = vst.msk [vmem:[#allocation5 + $0x48] sm:$0xf] %vm5261_vm15, %v5438_v52 }
 0x578   :  { %v4990_v16 = vsel %vm2034_vm3, %v4784_v19, -inf  ;;  %v5224_v50 = vld [vmem:[#allocation4 + $0x19] sm:$0xf]  ;;  %v5031_v3 = vmax.f32 %v5029_v38, %v5030_v32  ;;  %v5037_v21 = vrot.slane %v5036_v40, 1  ;;  %v5050_v25 = vmax.f32 %v5048_v30, %v5049_v8  ;;  %v5274_v8 = vld [vmem:[#allocation4 + $0x32] sm:$0xf] }
 0x579   :  { %v5288_v2 = vld [vmem:[#allocation4 + $0x18] sm:$0xf]  ;;  %v5044_v14 = vrot.slane %v5043_v12, 1  ;;  %5243 = vrot.lane.b32.xlu1 %v5224_v50, %s8041_s25  ;;  %v4972_v61 = vrot.slane %v4971_v6, 2  ;;  %v4978_v20 = vmax.f32 %v4976_v18, %v4977_v44  ;;  %v4985_v1 = vmax.f32 %v4983_v15, %v4984_v5  ;;  %v5246_v15 = vpop.permute.xlu0 %5245  ;;  %5282 = vst.msk [vmem:[#allocation5 + $0x54] sm:$0xf] %vm5196_vm13, %v5274_v8 }
 0x57a   :  { %5306 = vrot.lane.b32.xlu0 %v5288_v2, %s8041_s25  ;;  %v4991_v26 = vrot.slane %v4990_v16, 4  ;;  %v5038_v54 = vmax.f32 %v5036_v40, %v5037_v21  ;;  %v5051_v34 = vrot.slane %v5050_v25, 1  ;;  %v4697_v7 = vsel %vm688_vm2, %v4677_v11, -inf  ;;  %v5208_v36 = vld [vmem:[#allocation4 + $0x18] sm:$0xf]  ;;  %v7905_v8 = vld [vmem:[%s14001_s7 + $0x30] sm:$0xff]  }
 0x57b   :  { %v5045_v24 = vmax.f32 %v5043_v12, %v5044_v14  ;;  %v5273_v62 = vld [vmem:[#allocation4 + $0x1a] sm:$0xf]  ;;  %v4973_v46 = vmax.f32 %v4971_v6, %v4972_v61  ;;  %v4979_v55 = vrot.slane %v4978_v20, 2  ;;  %v4986_v51 = vrot.slane %v4985_v1, 2  ;;  %5216 = vst.msk [vmem:[#allocation5 + $0x3c] sm:$0xf] %vm5196_vm13, %v5208_v36 }
 0x57c   :  { %v4992_v53 = vmax.f32 %v4990_v16, %v4991_v26  ;;  %5281 = vst.msk [vmem:[#allocation5 + $0x40] sm:$0xf] %vm5196_vm13, %v5273_v62  ;;  %v5336_v10 = vld [vmem:[#allocation4 + $0x19] sm:$0xf]  ;;  %v5052_v45 = vmax.f32 %v5050_v25, %v5051_v34  ;;  %v5179_v4 = vsel %vm3102_vm5, %v5038_v54, %v5031_v3  ;;  %v4698_v49 = vsel %vm688_vm2, %v4678_v47, -inf  ;;  %v7903_v12 = vld [vmem:[%s14001_s7 + $0x28] sm:$0xff]  }
 0x57d   :  { %v5400_v31 = vld [vmem:[#allocation4 + $0x18] sm:$0xf]  ;;  %v4643_v11 = vmul.f32 %v13324_v27, %v13291_v23  ;;  %5344 = vst.msk [vmem:[#allocation5 + $0x30] sm:$0xf] %vm5196_vm13, %v5336_v10  ;;  %5304 = vrot.lane.b32.xlu1 %v5287_v33, %s8041_s25  ;;  %v5180_v29 = vsel %vm3104_vm6, %v5045_v24, %v5179_v4  ;;  %v4974_v48 = vrot.slane %v4973_v46, 1  ;;  %v4980_v37 = vmax.f32 %v4978_v20, %v4979_v55 }
 0x57e   :  { %5408 = vst.msk [vmem:[#allocation5 + $0x20] sm:$0xf] %vm5196_vm13, %v5400_v31  ;;  %v5464_v60 = vld [vmem:[#allocation4 + $0x1a] sm:$0xf]  ;;  %v4987_v63 = vmax.f32 %v4985_v1, %v4986_v51  ;;  %v5181_v22 = vsel %vm3106_vm7, %v5052_v45, %v5180_v29  ;;  %v4993_v17 = vrot.slane %v4992_v53, 2  ;;  %v4699_v28 = vmax.f32 %v4697_v7, %v4698_v49 }
 0x57f   :  { %5472 = vst.msk [vmem:[#allocation5 + $0x24] sm:$0xf] %vm5196_vm13, %v5464_v60  ;;  %v4644_v23 = vmul.f32 %v13324_v27, %v13299_v39  ;;  %5202 = vst.msk [vmem:[#allocation4 + $0x41] sm:$0xf] %vm5196_vm13, %v5181_v22  ;;  %v4975_v9 = vmax.f32 %v4973_v46, %v4974_v48  ;;  %v4981_v59 = vrot.slane %v4980_v37, 1  ;;  %v4665_v47 = vadd.f32 %v13339_v35, %v4643_v11 }
 0x580   :  { %v4988_v56 = vrot.slane %v4987_v63, 1  ;;  %v4994_v38 = vmax.f32 %v4992_v53, %v4993_v17  ;;  %v4785_v41 = vcombine.high %v4699_v28, %v4699_v28  ;;  %v4792_v58 = vrot.slane %v4699_v28, %v15701_v0  ;;  %5266 = vst.msk [vmem:[#allocation5 + $0x50] sm:$0xf] %vm5261_vm15, %v5246_v15 }
 0x581   :  { %v4666_v30 = vadd.f32 %v13339_v35, %v4644_v23  ;;  %v4982_v19 = vmax.f32 %v4980_v37, %v4981_v59  ;;  %v4681_v18 = vmax.f32 %v4665_v47, 0.0  ;;  %v7902_v35 = vld [vmem:[%s14001_s7 + $0x68] sm:$0xff]  }
 0x582   :  { %v4989_v57 = vmax.f32 %v4987_v63, %v4988_v56  ;;  %v4995_v39 = vrot.slane %v4994_v38, 1  ;;  %v4799_v27 = vrot.slane %v4785_v41, %v15701_v0  ;;  %v4800_v32 = vcombine.high %v4792_v58, %v4792_v58  ;;  %7579 = vmatprep.subr.bf16.mxu1 %v7902_v35 }
 0x583   :  { %v4997_v40 = vsel %vm2034_vm3, %v4792_v58, -inf  ;;  %v5173_v6 = vsel %vm3102_vm5, %v4982_v19, %v4975_v9  ;;  %v4682_v5 = vmax.f32 %v4666_v30, 0.0  ;;  %v4703_v16 = vsel %vm688_vm2, %v4681_v18, -inf  ;;  %7580 = vmatpush3.bf16.msra.mxu1 %v7903_v12 }
 0x584   :  { %v4998_v44 = vrot.slane %v4997_v40, 4  ;;  %v4996_v50 = vmax.f32 %v4994_v38, %v4995_v39  ;;  %v5174_v2 = vsel %vm3104_vm6, %v4989_v57, %v5173_v6  ;;  %v4801_v3 = vcombine.high %v4799_v27, %v4799_v27 }
 0x585   :  { %v5004_v21 = vsel %vm2034_vm3, %v4800_v32, -inf  ;;  %v5011_v61 = vsel %vm2034_vm3, %v4799_v27, -inf  ;;  %v4704_v20 = vsel %vm688_vm2, %v4682_v5, -inf  ;;  %v7904_v32 = vld [vmem:[%s14001_s7 + $0x70] sm:$0xff]  }
 0x586   :  { %v4999_v14 = vmax.f32 %v4997_v40, %v4998_v44  ;;  %v5005_v25 = vrot.slane %v5004_v21, 4  ;;  %v5227_v1 = vld [vmem:[#allocation4 + $0x41] sm:$0xf]  ;;  %v5175_v26 = vsel %vm3106_vm7, %v4996_v50, %v5174_v2  ;;  %v5012_v54 = vrot.slane %v5011_v61, 4  ;;  %7581 = vmatprep.subr.bf16.mxu1 %v7904_v32  ;;  %v7934_v32 = vld [vmem:[%s14001_s7 + $0xa8] sm:$0xff]  }
 0x587   :  { %v5018_v24 = vsel %vm2034_vm3, %v4801_v3, -inf  ;;  %v4705_v34 = vmax.f32 %v4703_v16, %v4704_v20  ;;  %5249 = vrot.lane.b32.xlu0 %v5227_v1, %s8041_s25  ;;  %5200 = vst.msk [vmem:[#allocation4 + $0x21] sm:$0xf] %vm5196_vm13, %v5175_v26  ;;  %v5211_v53 = vld [vmem:[#allocation4 + $0x40] sm:$0xf]  ;;  %7582 = vmatpush3.bf16.msra.mxu1 %v7905_v8  ;;  %v7939_v8 = vld [vmem:[%s14001_s7 + $0xb0] sm:$0xff]  }
 0x588   :  { %v5000_v7 = vrot.slane %v4999_v14, 2  ;;  %v5006_v36 = vmax.f32 %v5004_v21, %v5005_v25  ;;  %v5019_v62 = vrot.slane %v5018_v24, 4  ;;  %v5013_v46 = vmax.f32 %v5011_v61, %v5012_v54  ;;  %v5276_v42 = vld [vmem:[#allocation4 + $0x42] sm:$0xf]  ;;  %5219 = vst.msk [vmem:[#allocation5 + $0x78] sm:$0xf] %vm5196_vm13, %v5211_v53 }
 0x589   :  { %v4819_v55 = vcombine.high %v4705_v34, %v4705_v34  ;;  %v4826_v51 = vrot.slane %v4705_v34, %v15701_v0  ;;  %v5339_v10 = vld [vmem:[#allocation4 + $0x41] sm:$0xf]  ;;  %5284 = vst.msk [vmem:[#allocation5 + $0x7c] sm:$0xf] %vm5196_vm13, %v5276_v42  ;;  %v7908_v42 = vld [vmem:[%s14001_s7 + $0x38] sm:$0xff]  }
 0x58a   :  { %v5001_v31 = vmax.f32 %v4999_v14, %v5000_v7  ;;  %v5007_v33 = vrot.slane %v5006_v36, 2  ;;  %v5020_v45 = vmax.f32 %v5018_v24, %v5019_v62  ;;  %5347 = vst.msk [vmem:[#allocation5 + $0x6c] sm:$0xf] %vm5196_vm13, %v5339_v10  ;;  %v5403_v4 = vld [vmem:[#allocation4 + $0x40] sm:$0xf]  ;;  %v5014_v11 = vrot.slane %v5013_v46, 2 }
 0x58b   :  { %v5467_v49 = vld [vmem:[#allocation4 + $0x42] sm:$0xf]  ;;  %v4833_v60 = vrot.slane %v4819_v55, %v15701_v0  ;;  %v4834_v29 = vcombine.high %v4826_v51, %v4826_v51  ;;  %v5053_v48 = vsel %vm2034_vm3, %v4826_v51, -inf  ;;  %5411 = vst.msk [vmem:[#allocation5 + $0x5c] sm:$0xf] %vm5196_vm13, %v5403_v4  ;;  %v7906_v51 = vld [vmem:[%s14001_s7 + $0x78] sm:$0xff]  }
 0x58c   :  { %5475 = vst.msk [vmem:[#allocation5 + $0x60] sm:$0xf] %vm5196_vm13, %v5467_v49  ;;  %v5002_v37 = vrot.slane %v5001_v31, 1  ;;  %v5008_v63 = vmax.f32 %v5006_v36, %v5007_v33  ;;  %v5021_v22 = vrot.slane %v5020_v45, 2  ;;  %v5054_v17 = vrot.slane %v5053_v48, 4  ;;  %v7907_v53 = vld [vmem:[%s14001_s7 + $0xc0] sm:$0xff]   ;;  %7583 = vmatprep.subr.bf16.mxu1 %v7906_v51 }
 0x58d   :  { %v5015_v28 = vmax.f32 %v5013_v46, %v5014_v11  ;;  %v4835_v23 = vcombine.high %v4833_v60, %v4833_v60  ;;  %v5060_v9 = vsel %vm2034_vm3, %v4834_v29, -inf  ;;  %v5067_v59 = vsel %vm2034_vm3, %v4833_v60, -inf  ;;  %7597 = vmatprep.subr.bf16.mxu0 %v7907_v53  ;;  %7584 = vmatpush3.bf16.msra.mxu1 %v7908_v42 }
 0x58e   :  { %v5003_v56 = vmax.f32 %v5001_v31, %v5002_v37  ;;  %v5009_v47 = vrot.slane %v5008_v63, 1  ;;  %v5022_v52 = vmax.f32 %v5020_v45, %v5021_v22  ;;  %v5055_v38 = vmax.f32 %v5053_v48, %v5054_v17  ;;  %v5289_v41 = vld [vmem:[#allocation4 + $0x20] sm:$0xf]  ;;  %v7916_v48 = vld [vmem:[%s14001_s7 + $0xc8] sm:$0xff]   ;;  %v7918_v22 = vld [vmem:[%s14001_s7 + $0xd0] sm:$0xff]  }
 0x58f   :  { %v5016_v58 = vrot.slane %v5015_v28, 1  ;;  %v5061_v30 = vrot.slane %v5060_v9, 4  ;;  %v5068_v19 = vrot.slane %v5067_v59, 4  ;;  %v5074_v57 = vsel %vm2034_vm3, %v4835_v23, -inf  ;;  %5308 = vrot.lane.b32.xlu1 %v5289_v41, %s8041_s25  ;;  %v5401_v6 = vld [vmem:[#allocation4 + $0x20] sm:$0xf] }
 0x590   :  { %v5010_v18 = vmax.f32 %v5008_v63, %v5009_v47  ;;  %v5023_v15 = vrot.slane %v5022_v52, 1  ;;  %v5056_v39 = vrot.slane %v5055_v38, 2  ;;  %v5075_v27 = vrot.slane %v5074_v57, 4  ;;  %5409 = vst.msk [vmem:[#allocation5 + $0x34] sm:$0xf] %vm5196_vm13, %v5401_v6  ;;  %v7909_v31 = vld [vmem:[%s14001_s7 + $0x80] sm:$0xff]  }
 0x591   :  { %v5017_v40 = vmax.f32 %v5015_v28, %v5016_v58  ;;  %v5062_v35 = vmax.f32 %v5060_v9, %v5061_v30  ;;  %v5069_v12 = vmax.f32 %v5067_v59, %v5068_v19  ;;  %v5337_v2 = vld [vmem:[#allocation4 + $0x21] sm:$0xf]  ;;  %7598 = vmatpush3.bf16.msra.mxu0 %v7909_v31  ;;  %v7917_v37 = vld [vmem:[%s14001_s7 + $0x88] sm:$0xff]   ;;  %v7919_v17 = vld [vmem:[%s14001_s7 + $0x90] sm:$0xff]  }
 0x592   :  { %v5024_v44 = vmax.f32 %v5022_v52, %v5023_v15  ;;  %v5176_v5 = vsel %vm3102_vm5, %v5010_v18, %v5003_v56  ;;  %v5057_v16 = vmax.f32 %v5055_v38, %v5056_v39  ;;  %v5076_v50 = vmax.f32 %v5074_v57, %v5075_v27  ;;  %v5465_v3 = vld [vmem:[#allocation4 + $0x22] sm:$0xf]  ;;  %5345 = vst.msk [vmem:[#allocation5 + $0x44] sm:$0xf] %vm5196_vm13, %v5337_v2  ;;  %v7920_v56 = vld [vmem:[%s14001_s7 + $0xd8] sm:$0xff]   ;;  %v7932_v27 = vld [vmem:[%s14001_s7 + $0xe8] sm:$0xff]  }
 0x593   :  { %v5177_v21 = vsel %vm3104_vm6, %v5017_v40, %v5176_v5  ;;  %v5063_v14 = vrot.slane %v5062_v35, 2  ;;  %v5070_v25 = vrot.slane %v5069_v12, 2  ;;  %5473 = vst.msk [vmem:[#allocation5 + $0x38] sm:$0xf] %vm5196_vm13, %v5465_v3  ;;  %7599 = vmatprep.subr.bf16.mxu0 %v7916_v48  ;;  %v13631_v47 = vld [vmem:[%s14001_s7 + $0x100] sm:$0xff]   ;;  %v7922_v52 = vld [vmem:[%s14001_s7 + $0x98] sm:$0xff]  }
 0x594   :  { %v5178_v61 = vsel %vm3106_vm7, %v5024_v44, %v5177_v21  ;;  %v5077_v20 = vrot.slane %v5076_v50, 2  ;;  %v5058_v1 = vrot.slane %v5057_v16, 1  ;;  %v5350_v30 = vld [vmem:[#allocation4 + $0xa] sm:$0xf]  ;;  %v5291_v19 = vld [vmem:[#allocation4 + $0x40] sm:$0xf]  ;;  %7779 = vmatprep.subr.bf16.mxu1 %v13631_v47 }
 0x595   :  { %5201 = vst.msk [vmem:[#allocation4 + $0x39] sm:$0xf] %vm5196_vm13, %v5178_v61  ;;  %v5064_v26 = vmax.f32 %v5062_v35, %v5063_v14  ;;  %v5071_v54 = vmax.f32 %v5069_v12, %v5070_v25  ;;  %7600 = vmatpush3.bf16.msra.mxu0 %v7917_v37  ;;  %v7923_v57 = vld [vmem:[%s14001_s7 + $0xe0] sm:$0xff]   ;;  %v5352_v15 = vld [vmem:[#allocation4 + $0x1a] sm:$0xf]  ;;  %v7937_v12 = vld [vmem:[%s14001_s7 + $0xf0] sm:$0xff]  }
 0x596   :  { %v5078_v24 = vmax.f32 %v5076_v50, %v5077_v20  ;;  %v5059_v62 = vmax.f32 %v5057_v16, %v5058_v1  ;;  %7601 = vmatprep.subr.bf16.mxu0 %v7918_v22  ;;  %v7925_v18 = vld [vmem:[%s14001_s7 + $0xa0] sm:$0xff]   ;;  %v5293_v39 = vld [vmem:[#allocation4 + $0x50] sm:$0xf]  ;;  %v7940_v5 = vld [vmem:[%s14001_s7 + $0xf8] sm:$0xff]  }
 0x597   :  { %v5065_v34 = vrot.slane %v5064_v26, 1  ;;  %v5072_v7 = vrot.slane %v5071_v54, 1  ;;  %v5415_v40 = vld [vmem:[#allocation4 + $0x11] sm:$0xf]  ;;  %v5417_v6 = vld [vmem:[#allocation4 + $0x21] sm:$0xf] }
 0x598   :  { %v5079_v36 = vrot.slane %v5078_v24, 1  ;;  %v5351_v35 = vld [vmem:[#allocation4 + $0x12] sm:$0xf]  ;;  %v5353_v44 = vld [vmem:[#allocation4 + $0x22] sm:$0xf]  ;;  %v7943_v16 = vld [vmem:[%s14001_s7 + $0xb8] sm:$0xff]  }
 0x599   :  { %v5066_v46 = vmax.f32 %v5064_v26, %v5065_v34  ;;  %v5073_v55 = vmax.f32 %v5071_v54, %v5072_v7  ;;  %7602 = vmatpush3.bf16.msra.mxu0 %v7919_v17  ;;  %v5416_v2 = vld [vmem:[#allocation4 + $0x19] sm:$0xf]  ;;  %v5355_v14 = vld [vmem:[#allocation4 + $0x42] sm:$0xf]  ;;  %v5357_v61 = vld [vmem:[#allocation4 + $0x52] sm:$0xf] }
 0x59a   :  { %v5080_v10 = vmax.f32 %v5078_v24, %v5079_v36  ;;  %7603 = vmatprep.subr.bf16.mxu0 %v7920_v56  ;;  %v5406_v3 = vld [vmem:[#allocation4 + $0x58] sm:$0xf]  ;;  %v5419_v25 = vld [vmem:[#allocation4 + $0x41] sm:$0xf]  ;;  %v5421_v20 = vld [vmem:[#allocation4 + $0x51] sm:$0xf] }
 0x59b   :  { %v5182_v33 = vsel %vm3102_vm5, %v5066_v46, %v5059_v62  ;;  %5414 = vst.msk [vmem:[#allocation5 + $0x98] sm:$0xf] %vm5196_vm13, %v5406_v3  ;;  %v5422_v26 = vld [vmem:[#allocation4 + $0x59] sm:$0xf] }
 0x59c   :  { %v5290_v45 = vld [vmem:[#allocation4 + $0x38] sm:$0xf]  ;;  %v5183_v49 = vsel %vm3104_vm6, %v5073_v55, %v5182_v33 }
 0x59d   :  { %v5226_v4 = vld [vmem:[#allocation4 + $0x39] sm:$0xf]  ;;  %5310 = vrot.lane.b32.xlu0 %v5290_v45, %s8041_s25  ;;  %v5184_v11 = vsel %vm3106_vm7, %v5080_v10, %v5183_v49  ;;  %7604 = vmatpush3.bf16.msra.mxu0 %v7922_v52  ;;  %v7924_v45 = vld [vmem:[%s14001_s7 + $0x108] sm:$0xff]  }
 0x59e   :  { %5247 = vrot.lane.b32.xlu1 %v5226_v4, %s8041_s25  ;;  %v5210_v60 = vld [vmem:[#allocation4 + $0x38] sm:$0xf]  ;;  %5203 = vst.msk [vmem:[#allocation4 + $0x49] sm:$0xf] %vm5196_vm13, %v5184_v11  ;;  %7605 = vmatprep.subr.bf16.mxu0 %v7923_v57  ;;  %v7933_v11 = vld [vmem:[%s14001_s7 + $0x110] sm:$0xff]  }
 0x59f   :  { %v5275_v29 = vld [vmem:[#allocation4 + $0x3a] sm:$0xf]  ;;  %5218 = vst.msk [vmem:[#allocation5 + $0x64] sm:$0xf] %vm5196_vm13, %v5210_v60 }
 0x5a0   :  { %5283 = vst.msk [vmem:[#allocation5 + $0x68] sm:$0xf] %vm5196_vm13, %v5275_v29  ;;  %v5338_v63 = vld [vmem:[#allocation4 + $0x39] sm:$0xf] }
 0x5a1   :  { %5346 = vst.msk [vmem:[#allocation5 + $0x58] sm:$0xf] %vm5196_vm13, %v5338_v63  ;;  %7606 = vmatpush3.bf16.msra.mxu0 %v7925_v18  ;;  %v5354_v50 = vld [vmem:[#allocation4 + $0x3a] sm:$0xf] }
 0x5a2   :  { %7607 = vmatprep.subr.bf16.mxu0 %v7932_v27  ;;  %v7938_v60 = vld [vmem:[%s14001_s7 + $0x118] sm:$0xff]  }
 0x5a3   :  { %v7942_v27 = vld [vmem:[#allocation5 + $0x88] ss:$20 sps:$4 sm:$0xff]  }
 0x5a5   :  { %v5292_v28 = vld [vmem:[#allocation4 + $0x48] sm:$0xf]  ;;  %7608 = vmatpush3.bf16.msra.mxu0 %v7934_v32 }
 0x5a6   :  { %v5228_v23 = vld [vmem:[#allocation4 + $0x49] sm:$0xf]  ;;  %5314 = vrot.lane.b32.xlu0 %v5292_v28, %s8041_s25  ;;  %7609 = vmatprep.subr.bf16.mxu0 %v7937_v12 }
 0x5a7   :  { %5251 = vrot.lane.b32.xlu1 %v5228_v23, %s8041_s25  ;;  %v5212_v9 = vld [vmem:[#allocation4 + $0x48] sm:$0xf] }
 0x5a8   :  { %v5277_v59 = vld [vmem:[#allocation4 + $0x4a] sm:$0xf]  ;;  %5220 = vst.msk [vmem:[#allocation5 + $0x8c] sm:$0xf] %vm5196_vm13, %v5212_v9  ;;  %v7935_v9 = vld [vmem:[#allocation5 + $0x10] ss:$20 sps:$4 sm:$0xff]  }
 0x5a9   :  { %5285 = vst.msk [vmem:[#allocation5 + $0x90] sm:$0xf] %vm5196_vm13, %v5277_v59  ;;  %v5340_v38 = vld [vmem:[#allocation4 + $0x49] sm:$0xf]  ;;  %7610 = vmatpush3.bf16.msra.mxu0 %v7939_v8 }
 0x5aa   :  { %v5468_v41 = vld [vmem:[#allocation4 + $0x4a] sm:$0xf]  ;;  %5348 = vst.msk [vmem:[#allocation5 + $0x80] sm:$0xf] %vm5196_vm13, %v5340_v38  ;;  %5366 = vrot.lane.b32.xlu0 %v5350_v30, %s8041_s25  ;;  %7611 = vmatprep.subr.bf16.mxu0 %v7940_v5 }
 0x5ab   :  { %v5404_v58 = vld [vmem:[#allocation4 + $0x48] sm:$0xf]  ;;  %5476 = vst.msk [vmem:[#allocation5 + $0x74] sm:$0xf] %vm5196_vm13, %v5468_v41  ;;  %5312 = vrot.lane.b32.xlu1 %v5291_v19, %s8041_s25 }
 0x5ac   :  { %5412 = vst.msk [vmem:[#allocation5 + $0x70] sm:$0xf] %vm5196_vm13, %v5404_v58  ;;  %v5356_v21 = vld [vmem:[#allocation4 + $0x4a] sm:$0xf] }
 0x5ad   :  { %7612 = vmatpush3.bf16.msra.mxu0 %v7943_v16  ;;  %v5420_v1 = vld [vmem:[#allocation4 + $0x49] sm:$0xf] }
 0x5ae   :  { %5370 = vrot.lane.b32.xlu0 %v5352_v15, %s8041_s25 }
 0x5af   :  { %5316 = vrot.lane.b32.xlu1 %v5293_v39, %s8041_s25 }
 0x5b2   :  { %5431 = vrot.lane.b32.xlu0 %v5415_v40, %s8041_s25  ;;  %v7941_v39 = vld [vmem:[#allocation5 + $0x60] ss:$20 sps:$4 sm:$0xff]  }
 0x5b3   :  { %5368 = vrot.lane.b32.xlu1 %v5351_v35, %s8041_s25  ;;  %v5576_v35 = vpack.c.bf16 %v7942_v27, %v7941_v39 }
 0x5b6   :  { %5435 = vrot.lane.b32.xlu0 %v5417_v6, %s8041_s25 }
 0x5b7   :  { %5372 = vrot.lane.b32.xlu1 %v5353_v44, %s8041_s25 }
 0x5ba   :  { %5374 = vrot.lane.b32.xlu0 %v5354_v50, %s8041_s25 }
 0x5bb   :  { %5433 = vrot.lane.b32.xlu1 %v5416_v2, %s8041_s25 }
 0x5be   :  { %5378 = vrot.lane.b32.xlu0 %v5356_v21, %s8041_s25 }
 0x5bf   :  { %5376 = vrot.lane.b32.xlu1 %v5355_v14, %s8041_s25 }
 0x5c2   :  { %5439 = vrot.lane.b32.xlu0 %v5419_v25, %s8041_s25 }
 0x5c3   :  { %5380 = vrot.lane.b32.xlu1 %v5357_v61, %s8041_s25 }
 0x5c6   :  { %5443 = vrot.lane.b32.xlu0 %v5421_v20, %s8041_s25 }
 0x5c7   :  { %5441 = vrot.lane.b32.xlu1 %v5420_v1, %s8041_s25 }
 0x5cb   :  { %5445 = vrot.lane.b32.xlu1 %v5422_v26, %s8041_s25 }
 0x5d7   :  { %v5242_v54 = vpop.permute.xlu0 %5241 }
 0x5d8   :  { %5264 = vst.msk [vmem:[#allocation5 + $0x28] sm:$0xf] %vm5261_vm15, %v5242_v54 }
 0x5e3   :  { %v5240_v24 = vpop.permute.xlu1 %5239 }
 0x5e4   :  { %v5303_v34 = vpop.permute.xlu0 %5302  ;;  %5263 = vst.msk [vmem:[#allocation5 + $0x14] sm:$0xf] %vm5261_vm15, %v5240_v24 }
 0x5e5   :  { %5326 = vst.msk [vmem:[#allocation5 + $0x4] sm:$0xf] %vm5261_vm15, %v5303_v34 }
 0x5eb   :  { %v5244_v7 = vpop.permute.xlu1 %5243  ;;  %v7910_v51 = vld [vmem:[#allocation5] ss:$20 sps:$4 sm:$0xff]  }
 0x5ec   :  { %v5307_v36 = vpop.permute.xlu0 %5306  ;;  %5265 = vst.msk [vmem:[#allocation5 + $0x3c] sm:$0xf] %vm5261_vm15, %v5244_v7 }
 0x5ed   :  { %5328 = vst.msk [vmem:[#allocation5 + $0x2c] sm:$0xf] %vm5261_vm15, %v5307_v36 }
 0x5ef   :  { %v5305_v62 = vpop.permute.xlu1 %5304 }
 0x5f0   :  { %5327 = vst.msk [vmem:[#allocation5 + $0x18] sm:$0xf] %vm5261_vm15, %v5305_v62 }
 0x5f3   :  { %v7913_v42 = vld [vmem:[#allocation5 + $0x28] ss:$20 sps:$4 sm:$0xff]  }
 0x5f4   :  { %v5567_v31 = vpack.c.bf16 %v7913_v42, %v7910_v51  ;;  %v7337_v51 = vld.sshfl [vmem:[#allocation6 + $0x11] sm:$0x3 pattern:$0x76325410] }
 0x5f7   :  { %v7912_v53 = vld [vmem:[#allocation5 + $0x4] ss:$20 sps:$4 sm:$0xff]  }
 0x5f9   :  { %v5250_v46 = vpop.permute.xlu0 %5249 }
 0x5fa   :  { %5268 = vst.msk [vmem:[#allocation5 + $0x78] sm:$0xf] %vm5261_vm15, %v5250_v46 }
 0x601   :  { %v5309_v55 = vpop.permute.xlu1 %5308 }
 0x602   :  { %5329 = vst.msk [vmem:[#allocation5 + $0x40] sm:$0xf] %vm5261_vm15, %v5309_v55  ;;  %v7335_v55 = vld.sshfl [vmem:[#allocation6 + $0x1] sm:$0x3 pattern:$0x76325410] }
 0x603   :  { %6287 = vrot.lane.b32.xlu0 %v7335_v55, %s8041_s25 }
 0x607   :  { %6291 = vrot.lane.b32.xlu0 %v7337_v51, %s8041_s25 }
 0x609   :  { %v7915_v10 = vld [vmem:[#allocation5 + $0x2c] ss:$20 sps:$4 sm:$0xff]  }
 0x60a   :  { %v5568_v33 = vpack.c.bf16 %v7915_v10, %v7912_v53  ;;  %v7348_v53 = vld.sshfl [vmem:[#allocation6 + $0xd] sm:$0x3 pattern:$0x76325410] }
 0x60b   :  { %6471 = vrot.lane.b32.xlu1 %v7348_v53, %s8041_s25 }
 0x60c   :  { %5903 = vmatprep.mubr.bf16.mxu1 %v5568_v33 }
 0x60d   :  { %5904 = vmatmul.mubr.bf16.vlgmr.msra.gmra.mrb[64].mxu1 %v5567_v31 }
 0x60e   :  { %7780 = vmatpush3.bf16.msra.mxu1 %v13631_v47  ;;  %v7936_v47 = vld [vmem:[#allocation5 + $0x38] ss:$20 sps:$4 sm:$0xff]  }
 0x60f   :  { %v5311_v4 = vpop.permute.xlu0 %5310  ;;  %7781 = vmatprep.subr.bf16.mxu1 %v7924_v45  ;;  %v5571_v15 = vpack.c.bf16 %v7936_v47, %v7935_v9  ;;  %v6245_v9 = vld [vmem:[#allocation6 + $0x10] sm:$0x3]  ;;  %v6304_v47 = vld [vmem:[#allocation6 + $0x2] sm:$0x3] }
 0x610   :  { %v5248_v49 = vpop.permute.xlu1 %5247  ;;  %5330 = vst.msk [vmem:[#allocation5 + $0x54] sm:$0xf] %vm5261_vm15, %v5311_v4 }
 0x611   :  { %5267 = vst.msk [vmem:[#allocation5 + $0x64] sm:$0xf] %vm5261_vm15, %v5248_v49 }
 0x612   :  { %7782 = vmatpush3.bf16.msra.mxu1 %v7924_v45  ;;  %6249 = vst.msk [vmem:[#allocation7 + $0x14] sm:$0x3] %vm2034_vm3, %v6245_v9  ;;  %6308 = vst.msk [vmem:[#allocation7 + $0x2] sm:$0x3] %vm2034_vm3, %v6304_v47 }
 0x613   :  { %7783 = vmatprep.subr.bf16.mxu1 %v7933_v11 }
 0x616   :  { %7784 = vmatpush3.bf16.msra.mxu1 %v7933_v11 }
 0x617   :  { %7785 = vmatprep.subr.bf16.mxu1 %v7938_v60 }
 0x618   :  { %v5315_v29 = vpop.permute.xlu0 %5314  ;;  %v7930_v56 = vld [vmem:[#allocation5 + $0x50] ss:$20 sps:$4 sm:$0xff]  }
 0x619   :  { %v5252_v48 = vpop.permute.xlu1 %5251  ;;  %5332 = vst.msk [vmem:[#allocation5 + $0x7c] sm:$0xf] %vm5261_vm15, %v5315_v29 }
 0x61a   :  { %5269 = vst.msk [vmem:[#allocation5 + $0x8c] sm:$0xf] %vm5261_vm15, %v5252_v48  ;;  %7786 = vmatpush3.bf16.msra.mxu1 %v7938_v60  ;;  %v6486_v48 = vld [vmem:[#allocation6 + $0xe] sm:$0x3] }
 0x61b   :  { %6490 = vst.msk [vmem:[#allocation7 + $0x12] sm:$0x3] %vm2034_vm3, %v6486_v48 }
 0x61c   :  { %v5367_v37 = vpop.permute.xlu0 %5366 }
 0x61d   :  { %v5313_v63 = vpop.permute.xlu1 %5312  ;;  %5390 = vst.msk [vmem:[#allocation5 + $0x8] sm:$0xf] %vm5261_vm15, %v5367_v37  ;;  %v6488_v37 = vld [vmem:[#allocation6 + $0x1e] sm:$0x3] }
 0x61e   :  { %5331 = vst.msk [vmem:[#allocation5 + $0x68] sm:$0xf] %vm5261_vm15, %v5313_v63 }
 0x61f   :  { %6492 = vst.msk [vmem:[#allocation7 + $0x26] sm:$0x3] %vm2034_vm3, %v6488_v37  ;;  %v6018_v37 = vld [vmem:[%s14002_s8] sm:$0x1] }
 0x620   :  { %v5371_v22 = vpop.permute.xlu0 %5370 }
 0x621   :  { %v5317_v17 = vpop.permute.xlu1 %5316  ;;  %5392 = vst.msk [vmem:[#allocation5 + $0x30] sm:$0xf] %vm5261_vm15, %v5371_v22  ;;  %v7931_v58 = vld [vmem:[#allocation5 + $0x78] ss:$20 sps:$4 sm:$0xff]  }
 0x622   :  { %5333 = vst.msk [vmem:[#allocation5 + $0x90] sm:$0xf] %vm5261_vm15, %v5317_v17  ;;  %v5572_v19 = vpack.c.bf16 %v7931_v58, %v7930_v56  ;;  %v6426_v56 = vld [vmem:[#allocation6 + $0xc] sm:$0x3] }
 0x623   :  { %6430 = vst.msk [vmem:[#allocation7 + $0x10] sm:$0x3] %vm2034_vm3, %v6426_v56 }
 0x624   :  { %v5432_v28 = vpop.permute.xlu0 %5431 }
 0x625   :  { %v5369_v23 = vpop.permute.xlu1 %5368  ;;  %5455 = vst.msk [vmem:[#allocation5 + $0xc] sm:$0xf] %vm5261_vm15, %v5432_v28  ;;  %v7926_v59 = vld [vmem:[#allocation5 + $0x54] ss:$20 sps:$4 sm:$0xff]  }
 0x626   :  { %5391 = vst.msk [vmem:[#allocation5 + $0x1c] sm:$0xf] %vm5261_vm15, %v5369_v23  ;;  %v6243_v23 = vld [vmem:[#allocation6] sm:$0x3] }
 0x627   :  { %6247 = vst.msk [vmem:[#allocation7] sm:$0x3] %vm2034_vm3, %v6243_v23 }
 0x628   :  { %v5436_v52 = vpop.permute.xlu0 %5435 }
 0x629   :  { %v5373_v38 = vpop.permute.xlu1 %5372  ;;  %v7928_v41 = vld [vmem:[#allocation5 + $0x7c] ss:$20 sps:$4 sm:$0xff]   ;;  %5457 = vst.msk [vmem:[#allocation5 + $0x34] sm:$0xf] %vm5261_vm15, %v5436_v52 }
 0x62a   :  { %5393 = vst.msk [vmem:[#allocation5 + $0x44] sm:$0xf] %vm5261_vm15, %v5373_v38  ;;  %v5573_v30 = vpack.c.bf16 %v7928_v41, %v7926_v59 }
 0x62c   :  { %v5375_v57 = vpop.permute.xlu0 %5374  ;;  %5911 = vmatprep.mubr.bf16.mxu1 %v5573_v30 }
 0x62d   :  { %v5434_v18 = vpop.permute.xlu1 %5433  ;;  %5394 = vst.msk [vmem:[#allocation5 + $0x58] sm:$0xf] %vm5261_vm15, %v5375_v57  ;;  %5912 = vmatmul.mubr.bf16.gmra.mrb[68].mxu1 %v5572_v19  ;;  %v7944_v5 = vld [vmem:[#allocation5 + $0x8] ss:$20 sps:$4 sm:$0xff]  }
 0x62e   :  { %5456 = vst.msk [vmem:[#allocation5 + $0x20] sm:$0xf] %vm5261_vm15, %v5434_v18  ;;  %7787 = vmatprep.mubr.msk.bf16.mxu1 %vm688_vm2, %v5571_v15 }
 0x630   :  { %v5379_v32 = vpop.permute.xlu0 %5378  ;;  %v7949_v8 = vld [vmem:[#allocation5 + $0x34] ss:$20 sps:$4 sm:$0xff]  }
 0x631   :  { %v5377_v40 = vpop.permute.xlu1 %5376  ;;  %5396 = vst.msk [vmem:[#allocation5 + $0x80] sm:$0xf] %vm5261_vm15, %v5379_v32  ;;  %v7947_v12 = vld [vmem:[#allocation5 + $0x30] ss:$20 sps:$4 sm:$0xff]  }
 0x632   :  { %5395 = vst.msk [vmem:[#allocation5 + $0x6c] sm:$0xf] %vm5261_vm15, %v5377_v40  ;;  %v5569_v50 = vpack.c.bf16 %v7947_v12, %v7944_v5 }
 0x634   :  { %v5440_v6 = vpop.permute.xlu0 %5439 }
 0x635   :  { %v5381_v44 = vpop.permute.xlu1 %5380  ;;  %v7946_v16 = vld [vmem:[#allocation5 + $0xc] ss:$20 sps:$4 sm:$0xff]   ;;  %5459 = vst.msk [vmem:[#allocation5 + $0x5c] sm:$0xf] %vm5261_vm15, %v5440_v6  ;;  %7788 = vmatmul.mubr.msk.bf16.vlgmr.msra.gmra.mrb[72].mxu1 %vm688_vm2, %v5576_v35 }
 0x636   :  { %5397 = vst.msk [vmem:[#allocation5 + $0x94] sm:$0xf] %vm5261_vm15, %v5381_v44  ;;  %v5570_v2 = vpack.c.bf16 %v7949_v8, %v7946_v16 }
 0x638   :  { %v5444_v3 = vpop.permute.xlu0 %5443  ;;  %5952 = vmatprep.mubr.bf16.mxu0 %v5570_v2 }
 0x639   :  { %v5442_v21 = vpop.permute.xlu1 %5441  ;;  %5461 = vst.msk [vmem:[#allocation5 + $0x84] sm:$0xf] %vm5261_vm15, %v5444_v3  ;;  %5953 = vmatmul.mubr.bf16.vlgmr.msra.gmra.mrb[80].mxu0 %v5569_v50  ;;  %v7954_v61 = vld [vmem:[#allocation5 + $0x58] ss:$20 sps:$4 sm:$0xff]  }
 0x63a   :  { %5460 = vst.msk [vmem:[#allocation5 + $0x70] sm:$0xf] %vm5261_vm15, %v5442_v21 }
 0x63d   :  { %v5446_v14 = vpop.permute.xlu1 %5445  ;;  %v7955_v1 = vld [vmem:[#allocation5 + $0x80] ss:$20 sps:$4 sm:$0xff]  }
 0x63e   :  { %5462 = vst.msk [vmem:[#allocation5 + $0x98] sm:$0xf] %vm5261_vm15, %v5446_v14  ;;  %v5574_v54 = vpack.c.bf16 %v7955_v1, %v7954_v61 }
 0x641   :  { %v7950_v25 = vld [vmem:[#allocation5 + $0x5c] ss:$20 sps:$4 sm:$0xff]  }
 0x645   :  { %v7952_v20 = vld [vmem:[#allocation5 + $0x84] ss:$20 sps:$4 sm:$0xff]  }
 0x646   :  { %v5575_v26 = vpack.c.bf16 %v7952_v20, %v7950_v25 }
 0x648   :  { %5960 = vmatprep.mubr.bf16.mxu0 %v5575_v26 }
 0x649   :  { %5961 = vmatmul.mubr.bf16.gmra.mrb[84].mxu0 %v5574_v54 }
 0x6e0   :  { %v7585_v24 = vpop.f32.mrb[64].mxu1 }
 0x6e1   :  { %v7586_v34 = vpop.f32.mrb[65].mxu1 }
 0x6e2   :  { %v7587_v7 = vadd.f32 %v7586_v34, %v7585_v24  ;;  %v7588_v36 = vpop.f32.mrb[66].mxu1 }
 0x6e3   :  { %v7589_v62 = vpop.f32.mrb[67].mxu1 }
 0x6e4   :  { %v7590_v46 = vadd.f32 %v7589_v62, %v7588_v36 }
 0x700   :  { %v7591_v42 = vpop.f32.mrb[68].mxu1 }
 0x701   :  { %v7592_v10 = vpop.f32.mrb[69].mxu1 }
 0x702   :  { %v7593_v31 = vadd.f32 %v7592_v10, %v7591_v42  ;;  %v7594_v33 = vpop.f32.mrb[70].mxu1 }
 0x703   :  { %v7595_v45 = vpop.f32.mrb[71].mxu1 }
 0x704   :  { %v7596_v4 = vadd.f32 %v7595_v45, %v7594_v33 }
 0x708   :  { %v7789_v49 = vpop.f32.mrb[72].mxu1 }
 0x709   :  { %v6003_v11 = vpop.f32.mrb[73].mxu1 }
 0x70a   :  { %v7790_v60 = vpop.f32.mrb[74].mxu1 }
 0x70b   :  { %v6006_v29 = vpop.f32.mrb[75].mxu1 }
 0x70c   :  { %v7613_v63 = vpop.f32.mrb[80].mxu0 }
 0x70d   :  { %v7614_v22 = vpop.f32.mrb[81].mxu0 }
 0x70e   :  { %v7615_v17 = vadd.f32 %v7614_v22, %v7613_v63  ;;  %v7616_v28 = vpop.f32.mrb[82].mxu0 }
 0x70f   :  { %v7617_v59 = vpop.f32.mrb[83].mxu0 }
 0x710   :  { %v5955_v52 = vadd.f32 %v7615_v17, %v7587_v7  ;;  %v7618_v38 = vadd.f32 %v7617_v59, %v7616_v28  ;;  %v6019_v17 = vld [vmem:[%s14003_s9] sm:$0x1] }
 0x712   :  { %v6004_v41 = vadd.f32 %v6003_v11, %v5955_v52  ;;  %v5958_v58 = vadd.f32 %v7618_v38, %v7590_v46 }
 0x714   :  { %v6035_v30 = vmul.f32 %v6004_v41, %v6004_v41  ;;  %v6007_v19 = vadd.f32 %v6006_v29, %v5958_v58  ;;  %v6020_v57 = vsel %vm688_vm2, %v6004_v41, 0.0 }
 0x716   :  { %v6021_v18 = vsel %vm688_vm2, %v6007_v19, 0.0  ;;  %v6036_v15 = vmul.f32 %v6007_v19, %v6007_v19  ;;  %v6039_v27 = vsel %vm688_vm2, %v6035_v30, 0.0 }
 0x717   :  { %v6022_v39 = vadd.f32 %v6021_v18, %v6020_v57 }
 0x718   :  { %v6040_v32 = vsel %vm688_vm2, %v6036_v15, 0.0 }
 0x719   :  { %v6041_v40 = vadd.f32 %v6040_v32, %v6039_v27 }
 0x71c   :  { %v7619_v35 = vpop.f32.mrb[84].mxu0 }
 0x71d   :  { %v7620_v12 = vpop.f32.mrb[85].mxu0 }
 0x71e   :  { %v7621_v8 = vadd.f32 %v7620_v12, %v7619_v35  ;;  %v7622_v6 = vpop.f32.mrb[86].mxu0 }
 0x71f   :  { %v7623_v44 = vpop.f32.mrb[87].mxu0 }
 0x720   :  { %v5963_v5 = vadd.f32 %v7621_v8, %v7593_v31  ;;  %v7624_v16 = vadd.f32 %v7623_v44, %v7622_v6 }
 0x722   :  { %v6012_v50 = vadd.f32 %v7789_v49, %v5963_v5  ;;  %v5966_v2 = vadd.f32 %v7624_v16, %v7596_v4 }
 0x724   :  { %v6023_v3 = vsel %vm688_vm2, %v6012_v50, 0.0  ;;  %v6037_v21 = vmul.f32 %v6012_v50, %v6012_v50  ;;  %v6015_v14 = vadd.f32 %v7790_v60, %v5966_v2 }
 0x725   :  { %v6024_v25 = vadd.f32 %v6023_v3, %v6022_v39 }
 0x726   :  { %v6042_v61 = vsel %vm688_vm2, %v6037_v21, 0.0  ;;  %v6025_v20 = vsel %vm688_vm2, %v6015_v14, 0.0  ;;  %v6038_v1 = vmul.f32 %v6015_v14, %v6015_v14 }
 0x727   :  { %v6043_v26 = vadd.f32 %v6042_v61, %v6041_v40  ;;  %v6026_v54 = vadd.f32 %v6025_v20, %v6024_v25 }
 0x728   :  { %v6044_v24 = vsel %vm688_vm2, %v6038_v1, 0.0 }
 0x729   :  { %v6027_v34 = vrot.slane %v6026_v54, 4  ;;  %v6045_v7 = vadd.f32 %v6044_v24, %v6043_v26 }
 0x72b   :  { %v6028_v36 = vadd.f32 %v6027_v34, %v6026_v54  ;;  %v6046_v62 = vrot.slane %v6045_v7, 4 }
 0x72d   :  { %v6029_v46 = vrot.slane %v6028_v36, 2  ;;  %v6047_v55 = vadd.f32 %v6046_v62, %v6045_v7 }
 0x72f   :  { %v6030_v51 = vadd.f32 %v6029_v46, %v6028_v36  ;;  %v6048_v53 = vrot.slane %v6047_v55, 2 }
 0x731   :  { %v6031_v42 = vrot.slane %v6030_v51, 1  ;;  %v6049_v10 = vadd.f32 %v6048_v53, %v6047_v55 }
 0x733   :  { %v6032_v31 = vadd.f32 %v6031_v42, %v6030_v51  ;;  %v6050_v33 = vrot.slane %v6049_v10, 1 }
 0x735   :  { %v6034_v45 = vmul.f32 0.03125, %v6032_v31  ;;  %v6051_v4 = vadd.f32 %v6050_v33, %v6049_v10 }
 0x737   :  { %v6052_v49 = vmul.f32 0.03125, %v6051_v4  ;;  %v6053_v11 = vmul.f32 %v6034_v45, %v6034_v45 }
 0x739   :  { %v6054_v60 = vsub.f32 %v6052_v49, %v6053_v11 }
 0x73b   :  { %v6055_v29 = vmax.f32 %v6054_v60, 0.0 }
 0x73d   :  { %v6056_v48 = vadd.f32 1e-05, %v6055_v29 }
 0x73f   :  { %8008 = vrsqrt.f32 %v6056_v48 }
 0x749   :  { %v8009_v63 = vpop.eup %8008 }
 0x74a   :  { %v6058_v22 = vmul.f32 %v8009_v63, %v6018_v37 }
 0x74c   :  { %v6059_v28 = vmul.f32 %v6058_v22, %v6034_v45  ;;  %v6065_v23 = vrot.slane %v6058_v22, %v15700_v43 }
 0x74e   :  { %v6060_v9 = vsub.f32 %v6019_v17, %v6059_v28  ;;  %v6067_v59 = vmul.f32 %v6065_v23, %v6004_v41  ;;  %v6068_v56 = vmul.f32 %v6065_v23, %v6007_v19  ;;  %v6069_v47 = vmul.f32 %v6065_v23, %v6012_v50 }
 0x74f   :  { %v6070_v52 = vmul.f32 %v6065_v23, %v6015_v14 }
 0x750   :  { %v6075_v38 = vrot.slane %v6060_v9, %v15700_v43 }
 0x752   :  { %v6077_v58 = vadd.f32 %v6075_v38, %v6067_v59  ;;  %v6078_v30 = vadd.f32 %v6075_v38, %v6068_v56  ;;  %v6079_v57 = vadd.f32 %v6075_v38, %v6069_v47  ;;  %v6080_v18 = vadd.f32 %v6075_v38, %v6070_v52  ;;  %v6288_v38 = vpop.permute.xlu0 %6287 }
 0x753   :  { %6300 = vst.msk [vmem:[#allocation7] sm:$0x3] %vm6299_vm0, %v6288_v38  ;;  %v7966_v38 = vld [vmem:[%s14004_s10 + $0xd0] sm:$0xff]  }
 0x754   :  { %v6081_v15 = vmax.f32 %v6077_v58, 0.0  ;;  %v6082_v39 = vmax.f32 %v6078_v30, 0.0  ;;  %v6083_v27 = vmax.f32 %v6079_v57, 0.0  ;;  %v6084_v32 = vmax.f32 %v6080_v18, 0.0 }
 0x756   :  { %v6089_v40 = vcombine.high %v6081_v15, %v6081_v15  ;;  %v6090_v35 = vcombine.high %v6082_v39, %v6082_v39  ;;  %v6091_v12 = vcombine.high %v6083_v27, %v6083_v27  ;;  %v6092_v8 = vcombine.high %v6084_v32, %v6084_v32 }
 0x757   :  { %v6097_v6 = vsel %vm5196_vm13, %v6081_v15, -inf  ;;  %v6100_v41 = vsel %vm5196_vm13, %v6082_v39, -inf  ;;  %v6103_v19 = vsel %vm5196_vm13, %v6083_v27, -inf  ;;  %v6106_v44 = vsel %vm5196_vm13, %v6084_v32, -inf }
 0x758   :  { %v6098_v5 = vsel %vm5196_vm13, %v6089_v40, -inf  ;;  %v6101_v16 = vsel %vm5196_vm13, %v6090_v35, -inf  ;;  %v6104_v50 = vsel %vm5196_vm13, %v6091_v12, -inf  ;;  %v6107_v2 = vsel %vm5196_vm13, %v6092_v8, -inf  ;;  %v6472_v40 = vpop.permute.xlu1 %6471 }
 0x759   :  { %v6099_v3 = vmax.f32 %v6097_v6, %v6098_v5  ;;  %v6102_v21 = vmax.f32 %v6100_v41, %v6101_v16  ;;  %v6105_v14 = vmax.f32 %v6103_v19, %v6104_v50  ;;  %v6108_v25 = vmax.f32 %v6106_v44, %v6107_v2  ;;  %6482 = vst.msk [vmem:[#allocation7 + $0x10] sm:$0x3] %vm6299_vm0, %v6472_v40  ;;  %v6292_v16 = vpop.permute.xlu0 %6291  ;;  %v7972_v40 = vld [vmem:[%s14004_s10 + $0x60] sm:$0xff]  }
 0x75a   :  { %6302 = vst.msk [vmem:[#allocation7 + $0x14] sm:$0x3] %vm6299_vm0, %v6292_v16 }
 0x75b   :  { %v6119_v61 = vrot.slane %v6099_v3, %v15701_v0  ;;  %v6127_v20 = vrot.slane %v6102_v21, %v15701_v0  ;;  %v6135_v1 = vrot.slane %v6105_v14, %v15701_v0  ;;  %v6143_v26 = vrot.slane %v6108_v25, %v15701_v0  ;;  %v6306_v21 = vld [vmem:[#allocation6 + $0x12] sm:$0x3] }
 0x75c   :  { %6310 = vst.msk [vmem:[#allocation7 + $0x16] sm:$0x3] %vm2034_vm3, %v6306_v21  ;;  %v7977_v21 = vld [vmem:[%s14004_s10 + $0x28] sm:$0xff]  }
 0x75d   :  { %v6120_v54 = vcombine.high %v6119_v61, %v6119_v61  ;;  %v6128_v24 = vcombine.high %v6127_v20, %v6127_v20  ;;  %v6136_v34 = vcombine.high %v6135_v1, %v6135_v1  ;;  %v6144_v7 = vcombine.high %v6143_v26, %v6143_v26 }
 0x75e   :  { %v6153_v36 = vsel %vm2034_vm3, %v6119_v61, -inf  ;;  %v6167_v62 = vsel %vm2034_vm3, %v6127_v20, -inf  ;;  %v6181_v46 = vsel %vm2034_vm3, %v6135_v1, -inf  ;;  %v6195_v55 = vsel %vm2034_vm3, %v6143_v26, -inf }
 0x75f   :  { %v6154_v51 = vrot.slane %v6153_v36, 4  ;;  %v6160_v53 = vsel %vm2034_vm3, %v6120_v54, -inf  ;;  %v6168_v42 = vrot.slane %v6167_v62, 4  ;;  %v6174_v10 = vsel %vm2034_vm3, %v6128_v24, -inf }
 0x760   :  { %v6161_v31 = vrot.slane %v6160_v53, 4  ;;  %v6175_v33 = vrot.slane %v6174_v10, 4  ;;  %v6182_v45 = vrot.slane %v6181_v46, 4  ;;  %v6188_v4 = vsel %vm2034_vm3, %v6136_v34, -inf }
 0x761   :  { %v6155_v49 = vmax.f32 %v6153_v36, %v6154_v51  ;;  %v6169_v11 = vmax.f32 %v6167_v62, %v6168_v42  ;;  %v6189_v60 = vrot.slane %v6188_v4, 4  ;;  %v6196_v29 = vrot.slane %v6195_v55, 4  ;;  %v7957_v51 = vld [vmem:[%s14004_s10] sm:$0xff]  }
 0x762   :  { %v6162_v48 = vmax.f32 %v6160_v53, %v6161_v31  ;;  %v6176_v37 = vmax.f32 %v6174_v10, %v6175_v33  ;;  %v6183_v63 = vmax.f32 %v6181_v46, %v6182_v45  ;;  %v6202_v22 = vsel %vm2034_vm3, %v6144_v7, -inf  ;;  %v7958_v53 = vld [vmem:[%s14004_s10 + $0xc0] sm:$0xff]  }
 0x763   :  { %v6156_v17 = vrot.slane %v6155_v49, 2  ;;  %v6170_v28 = vrot.slane %v6169_v11, 2  ;;  %v6190_v23 = vmax.f32 %v6188_v4, %v6189_v60  ;;  %v6197_v9 = vmax.f32 %v6195_v55, %v6196_v29  ;;  %v7956_v55 = vld [vmem:[%s14004_s10 + $0x40] sm:$0xff]   ;;  %7653 = vmatprep.subr.bf16.mxu1 %v7958_v53 }
 0x764   :  { %v6163_v59 = vrot.slane %v6162_v48, 2  ;;  %v6177_v56 = vrot.slane %v6176_v37, 2  ;;  %v6184_v47 = vrot.slane %v6183_v63, 2  ;;  %v6203_v52 = vrot.slane %v6202_v22, 4  ;;  %v7959_v42 = vld [vmem:[%s14004_s10 + $0x80] sm:$0xff]   ;;  %7631 = vmatprep.subr.bf16.mxu0 %v7956_v55 }
 0x765   :  { %v6157_v58 = vmax.f32 %v6155_v49, %v6156_v17  ;;  %v6171_v30 = vmax.f32 %v6169_v11, %v6170_v28  ;;  %v6191_v57 = vrot.slane %v6190_v23, 2  ;;  %v6198_v18 = vrot.slane %v6197_v9, 2  ;;  %7632 = vmatpush3.bf16.msra.mxu0 %v7957_v51  ;;  %7654 = vmatpush3.bf16.msra.mxu1 %v7959_v42  ;;  %v7963_v17 = vld [vmem:[%s14004_s10 + $0x88] sm:$0xff]  }
 0x766   :  { %v6164_v15 = vmax.f32 %v6162_v48, %v6163_v59  ;;  %v6178_v39 = vmax.f32 %v6176_v37, %v6177_v56  ;;  %v6185_v27 = vmax.f32 %v6183_v63, %v6184_v47  ;;  %v6204_v32 = vmax.f32 %v6202_v22, %v6203_v52  ;;  %v7960_v37 = vld [vmem:[%s14004_s10 + $0x48] sm:$0xff]   ;;  %v7964_v56 = vld [vmem:[%s14004_s10 + $0x50] sm:$0xff]  }
 0x767   :  { %v6158_v35 = vrot.slane %v6157_v58, 1  ;;  %v6172_v12 = vrot.slane %v6171_v30, 1  ;;  %v6192_v8 = vmax.f32 %v6190_v23, %v6191_v57  ;;  %v6199_v6 = vmax.f32 %v6197_v9, %v6198_v18  ;;  %v7961_v63 = vld [vmem:[%s14004_s10 + $0x8] sm:$0xff]   ;;  %7633 = vmatprep.subr.bf16.mxu0 %v7960_v37  ;;  %v7965_v47 = vld [vmem:[%s14004_s10 + $0x10] sm:$0xff]   ;;  %v7968_v18 = vld [vmem:[%s14004_s10 + $0x58] sm:$0xff]  }
 0x768   :  { %v6165_v41 = vrot.slane %v6164_v15, 1  ;;  %v6179_v19 = vrot.slane %v6178_v39, 1  ;;  %v6186_v44 = vrot.slane %v6185_v27, 1  ;;  %v6205_v5 = vrot.slane %v6204_v32, 2  ;;  %v7962_v22 = vld [vmem:[%s14004_s10 + $0xc8] sm:$0xff]  }
 0x769   :  { %v6159_v50 = vmax.f32 %v6157_v58, %v6158_v35  ;;  %v6173_v2 = vmax.f32 %v6171_v30, %v6172_v12  ;;  %v6193_v3 = vrot.slane %v6192_v8, 1  ;;  %v6200_v14 = vrot.slane %v6199_v6, 1  ;;  %7634 = vmatpush3.bf16.msra.mxu0 %v7961_v63  ;;  %7655 = vmatprep.subr.bf16.mxu1 %v7962_v22  ;;  %v7967_v58 = vld [vmem:[%s14004_s10 + $0x90] sm:$0xff]   ;;  %v7971_v35 = vld [vmem:[%s14004_s10 + $0x98] sm:$0xff]  }
 0x76a   :  { %v6206_v25 = vmax.f32 %v6204_v32, %v6205_v5  ;;  %v6166_v61 = vmax.f32 %v6164_v15, %v6165_v41  ;;  %v6180_v20 = vmax.f32 %v6178_v39, %v6179_v19  ;;  %v6187_v1 = vmax.f32 %v6185_v27, %v6186_v44  ;;  %7656 = vmatpush3.bf16.msra.mxu1 %v7963_v17  ;;  %v7969_v39 = vld [vmem:[%s14004_s10 + $0x18] sm:$0xff]   ;;  %v7973_v41 = vld [vmem:[%s14004_s10 + $0x20] sm:$0xff]   ;;  %v7976_v44 = vld [vmem:[%s14004_s10 + $0x68] sm:$0xff]  }
 0x76b   :  { %v6194_v26 = vmax.f32 %v6192_v8, %v6193_v3  ;;  %v6201_v36 = vmax.f32 %v6199_v6, %v6200_v14  ;;  %7635 = vmatprep.subr.bf16.mxu0 %v7964_v56  ;;  %v7970_v27 = vld [vmem:[%s14004_s10 + $0xd8] sm:$0xff]   ;;  %7657 = vmatprep.subr.bf16.mxu1 %v7966_v38  ;;  %v7974_v8 = vld [vmem:[%s14004_s10 + $0xe0] sm:$0xff]   ;;  %v7980_v14 = vld [vmem:[%s14004_s10 + $0x70] sm:$0xff]  }
 0x76c   :  { %v6207_v54 = vrot.slane %v6206_v25, 1  ;;  %v6231_v24 = vsel %vm3102_vm5, %v6166_v61, %v6159_v50  ;;  %v6232_v34 = vsel %vm3102_vm5, %v6180_v20, %v6173_v2  ;;  %v6428_v32 = vld [vmem:[#allocation6 + $0x1c] sm:$0x3]  ;;  %v7975_v5 = vld [vmem:[%s14004_s10 + $0xa0] sm:$0xff]   ;;  %v7978_v50 = vld [vmem:[%s14004_s10 + $0xe8] sm:$0xff]  }
 0x76d   :  { %6239 = vst.msk [vmem:[#allocation6 + $0x5] sm:$0x3] %vm2034_vm3, %v6231_v24  ;;  %v6233_v7 = vsel %vm3102_vm5, %v6194_v26, %v6187_v1  ;;  %6240 = vst.msk [vmem:[#allocation6 + $0x9] sm:$0x3] %vm2034_vm3, %v6232_v34  ;;  %7636 = vmatpush3.bf16.msra.mxu0 %v7965_v47  ;;  %v7979_v61 = vld [vmem:[%s14004_s10 + $0xa8] sm:$0xff]   ;;  %v7982_v20 = vld [vmem:[%s14004_s10 + $0xf0] sm:$0xff]  }
 0x76e   :  { %v6208_v62 = vmax.f32 %v6206_v25, %v6207_v54  ;;  %6241 = vst.msk [vmem:[#allocation6 + $0x15] sm:$0x3] %vm2034_vm3, %v6233_v7  ;;  %7658 = vmatpush3.bf16.msra.mxu1 %v7967_v58  ;;  %7637 = vmatprep.subr.bf16.mxu0 %v7968_v18  ;;  %6432 = vst.msk [vmem:[#allocation7 + $0x24] sm:$0x3] %vm2034_vm3, %v6428_v32  ;;  %v7981_v1 = vld [vmem:[%s14004_s10 + $0x30] sm:$0xff]   ;;  %v7984_v26 = vld [vmem:[%s14004_s10 + $0x78] sm:$0xff]  }
 0x76f   :  { %7659 = vmatprep.subr.bf16.mxu1 %v7970_v27  ;;  %v7350_v25 = vld.sshfl [vmem:[#allocation6 + $0x1d] sm:$0x3 pattern:$0x76325410]  ;;  %v7983_v54 = vld [vmem:[%s14004_s10 + $0xb0] sm:$0xff]   ;;  %v7994_v58 = vld [vmem:[%s14004_s10 + $0x100] sm:$0xff]  }
 0x770   :  { %v6234_v46 = vsel %vm3102_vm5, %v6208_v62, %v6201_v36  ;;  %v7986_v24 = vld [vmem:[%s14004_s10 + $0xf8] sm:$0xff]  }
 0x771   :  { %6242 = vst.msk [vmem:[#allocation6 + $0x19] sm:$0x3] %vm2034_vm3, %v6234_v46  ;;  %7638 = vmatpush3.bf16.msra.mxu0 %v7969_v39  ;;  %v7985_v34 = vld [vmem:[%s14004_s10 + $0x38] sm:$0xff]  }
 0x772   :  { %7639 = vmatprep.subr.bf16.mxu0 %v7972_v40  ;;  %7660 = vmatpush3.bf16.msra.mxu1 %v7971_v35  ;;  %v7987_v7 = vld [vmem:[%s14004_s10 + $0xb8] sm:$0xff]  }
 0x773   :  { %7661 = vmatprep.subr.bf16.mxu1 %v7974_v8  ;;  %v7997_v32 = vld [vmem:[%s14004_s10 + $0x118] sm:$0xff]   ;;  %v8001_v8 = vld [vmem:[%s14007_s13 + $0x8] sm:$0xff]  }
 0x774   :  { %v7339_v10 = vld.sshfl [vmem:[#allocation6 + $0x4] sm:$0x3 pattern:$0x76325410]  ;;  %v6305_v49 = vld [vmem:[#allocation6 + $0x6] sm:$0x3] }
 0x775   :  { %v6244_v31 = vld [vmem:[#allocation6 + $0x4] sm:$0x3]  ;;  %6348 = vrot.lane.b32.xlu0 %v7339_v10, %s8041_s25  ;;  %v6246_v45 = vld [vmem:[#allocation6 + $0x14] sm:$0x3]  ;;  %6309 = vst.msk [vmem:[#allocation7 + $0xc] sm:$0x3] %vm2034_vm3, %v6305_v49  ;;  %7640 = vmatpush3.bf16.msra.mxu0 %v7973_v41 }
 0x776   :  { %v7336_v33 = vld.sshfl [vmem:[#allocation6 + $0x5] sm:$0x3 pattern:$0x76325410]  ;;  %6248 = vst.msk [vmem:[#allocation7 + $0xa] sm:$0x3] %vm2034_vm3, %v6244_v31  ;;  %7641 = vmatprep.subr.bf16.mxu0 %v7976_v44  ;;  %7662 = vmatpush3.bf16.msra.mxu1 %v7975_v5 }
 0x777   :  { %6289 = vrot.lane.b32.xlu1 %v7336_v33, %s8041_s25  ;;  %6250 = vst.msk [vmem:[#allocation7 + $0x1e] sm:$0x3] %vm2034_vm3, %v6246_v45  ;;  %v6364_v4 = vld [vmem:[#allocation6 + $0x5] sm:$0x3]  ;;  %v6366_v60 = vld [vmem:[#allocation6 + $0x15] sm:$0x3]  ;;  %7663 = vmatprep.subr.bf16.mxu1 %v7978_v50 }
 0x778   :  { %6368 = vst.msk [vmem:[#allocation7 + $0x4] sm:$0x3] %vm2034_vm3, %v6364_v4  ;;  %v7341_v11 = vld.sshfl [vmem:[#allocation6 + $0x14] sm:$0x3 pattern:$0x76325410] }
 0x779   :  { %6352 = vrot.lane.b32.xlu0 %v7341_v11, %s8041_s25  ;;  %v7338_v29 = vld.sshfl [vmem:[#allocation6 + $0x15] sm:$0x3 pattern:$0x76325410]  ;;  %6370 = vst.msk [vmem:[#allocation7 + $0x18] sm:$0x3] %vm2034_vm3, %v6366_v60  ;;  %7642 = vmatpush3.bf16.msra.mxu0 %v7977_v21 }
 0x77a   :  { %v6307_v48 = vld [vmem:[#allocation6 + $0x16] sm:$0x3]  ;;  %v7343_v28 = vld.sshfl [vmem:[#allocation6 + $0x6] sm:$0x3 pattern:$0x76325410]  ;;  %7643 = vmatprep.subr.bf16.mxu0 %v7980_v14  ;;  %7664 = vmatpush3.bf16.msra.mxu1 %v7979_v61 }
 0x77b   :  { %6293 = vrot.lane.b32.xlu1 %v7338_v29, %s8041_s25  ;;  %6311 = vst.msk [vmem:[#allocation7 + $0x20] sm:$0x3] %vm2034_vm3, %v6307_v48  ;;  %v6425_v23 = vld [vmem:[#allocation6 + $0x8] sm:$0x3]  ;;  %v6427_v30 = vld [vmem:[#allocation6 + $0x18] sm:$0x3]  ;;  %7665 = vmatprep.subr.bf16.mxu1 %v7982_v20 }
 0x77c   :  { %v7340_v9 = vld.sshfl [vmem:[#allocation6 + $0x8] sm:$0x3 pattern:$0x76325410]  ;;  %6429 = vst.msk [vmem:[#allocation7 + $0x6] sm:$0x3] %vm2034_vm3, %v6425_v23 }
 0x77d   :  { %6408 = vrot.lane.b32.xlu0 %v7343_v28, %s8041_s25  ;;  %v6365_v59 = vld [vmem:[#allocation6 + $0x9] sm:$0x3]  ;;  %v7345_v52 = vld.sshfl [vmem:[#allocation6 + $0x16] sm:$0x3 pattern:$0x76325410]  ;;  %7644 = vmatpush3.bf16.msra.mxu0 %v7981_v1 }
 0x77e   :  { %6369 = vst.msk [vmem:[#allocation7 + $0xe] sm:$0x3] %vm2034_vm3, %v6365_v59  ;;  %v6367_v57 = vld [vmem:[#allocation6 + $0x19] sm:$0x3]  ;;  %6431 = vst.msk [vmem:[#allocation7 + $0x1a] sm:$0x3] %vm2034_vm3, %v6427_v30  ;;  %7645 = vmatprep.subr.bf16.mxu0 %v7984_v26  ;;  %7666 = vmatpush3.bf16.msra.mxu1 %v7983_v54 }
 0x77f   :  { %6350 = vrot.lane.b32.xlu1 %v7340_v9, %s8041_s25  ;;  %v7342_v15 = vld.sshfl [vmem:[#allocation6 + $0x18] sm:$0x3 pattern:$0x76325410]  ;;  %6371 = vst.msk [vmem:[#allocation7 + $0x22] sm:$0x3] %vm2034_vm3, %v6367_v57  ;;  %7667 = vmatprep.subr.bf16.mxu1 %v7986_v24 }
 0x780   :  { %v7347_v12 = vld.sshfl [vmem:[#allocation6 + $0x9] sm:$0x3 pattern:$0x76325410]  ;;  %v6487_v2 = vld [vmem:[#allocation6 + $0x1a] sm:$0x3] }
 0x781   :  { %6412 = vrot.lane.b32.xlu0 %v7345_v52, %s8041_s25  ;;  %v7344_v6 = vld.sshfl [vmem:[#allocation6 + $0xa] sm:$0x3 pattern:$0x76325410]  ;;  %6491 = vst.msk [vmem:[#allocation7 + $0x1c] sm:$0x3] %vm2034_vm3, %v6487_v2  ;;  %7646 = vmatpush3.bf16.msra.mxu0 %v7985_v34 }
 0x782   :  { %v7349_v19 = vld.sshfl [vmem:[#allocation6 + $0x19] sm:$0x3 pattern:$0x76325410]  ;;  %v6485_v16 = vld [vmem:[#allocation6 + $0xa] sm:$0x3]  ;;  %7791 = vmatprep.subr.bf16.mxu0 %v15699_v13  ;;  %7668 = vmatpush3.bf16.msra.mxu1 %v7987_v7 }
 0x783   :  { %6354 = vrot.lane.b32.xlu1 %v7342_v15, %s8041_s25  ;;  %6489 = vst.msk [vmem:[#allocation7 + $0x8] sm:$0x3] %vm2034_vm3, %v6485_v16  ;;  %v7346_v3 = vld.sshfl [vmem:[#allocation6 + $0x1a] sm:$0x3 pattern:$0x76325410]  ;;  %7803 = vmatprep.subr.bf16.mxu1 %v15699_v13 }
 0x784   :  { %v7995_v30 = vld [vmem:[%s14004_s10 + $0x108] sm:$0xff]   ;;  %v7996_v15 = vld [vmem:[%s14004_s10 + $0x110] sm:$0xff]   ;;  %v8003_v41 = vld [vmem:[%s14007_s13 + $0x18] sm:$0xff]  }
 0x785   :  { %6469 = vrot.lane.b32.xlu0 %v7347_v12, %s8041_s25  ;;  %v8000_v12 = vld [vmem:[%s14007_s13] sm:$0xff]  }
 0x787   :  { %6410 = vrot.lane.b32.xlu1 %v7344_v6, %s8041_s25  ;;  %v8002_v6 = vld [vmem:[%s14007_s13 + $0x10] sm:$0xff]  }
 0x788   :  { %v7999_v18 = vld [vmem:[#allocation7 + $0x1c] ss:$10 sps:$4 sm:$0x33]  }
 0x789   :  { %6473 = vrot.lane.b32.xlu0 %v7349_v19, %s8041_s25  ;;  %v6560_v27 = vrot.slane %v7999_v18, %v15701_v0 }
 0x78a   :  { %v7998_v57 = vld [vmem:[#allocation7 + $0x8] ss:$10 sps:$4 sm:$0x33]  }
 0x78b   :  { %6414 = vrot.lane.b32.xlu1 %v7346_v3, %s8041_s25  ;;  %v6553_v39 = vrot.slane %v7998_v57, %v15701_v0 }
 0x78d   :  { %v6561_v40 = vcombine.low %v6553_v39, %v6560_v27 }
 0x78f   :  { %6475 = vrot.lane.b32.xlu1 %v7350_v25, %s8041_s25  ;;  %v6571_v35 = vpack.c.bf16 %v6561_v40, %v6561_v40 }
 0x7e7   :  { %v6349_v36 = vpop.permute.xlu0 %6348 }
 0x7e8   :  { %6360 = vst.msk [vmem:[#allocation7 + $0x2] sm:$0x3] %vm6299_vm0, %v6349_v36 }
 0x7e9   :  { %v6290_v62 = vpop.permute.xlu1 %6289 }
 0x7ea   :  { %6301 = vst.msk [vmem:[#allocation7 + $0xa] sm:$0x3] %vm6299_vm0, %v6290_v62 }
 0x7eb   :  { %v6353_v46 = vpop.permute.xlu0 %6352 }
 0x7ec   :  { %6362 = vst.msk [vmem:[#allocation7 + $0x16] sm:$0x3] %vm6299_vm0, %v6353_v46 }
 0x7ed   :  { %v6294_v55 = vpop.permute.xlu1 %6293 }
 0x7ee   :  { %6303 = vst.msk [vmem:[#allocation7 + $0x1e] sm:$0x3] %vm6299_vm0, %v6294_v55 }
 0x7ef   :  { %v6409_v51 = vpop.permute.xlu0 %6408 }
 0x7f0   :  { %6420 = vst.msk [vmem:[#allocation7 + $0x4] sm:$0x3] %vm6299_vm0, %v6409_v51 }
 0x7f1   :  { %v6351_v53 = vpop.permute.xlu1 %6350 }
 0x7f2   :  { %6361 = vst.msk [vmem:[#allocation7 + $0xc] sm:$0x3] %vm6299_vm0, %v6351_v53 }
 0x7f3   :  { %v6413_v42 = vpop.permute.xlu0 %6412 }
 0x7f4   :  { %6422 = vst.msk [vmem:[#allocation7 + $0x18] sm:$0x3] %vm6299_vm0, %v6413_v42 }
 0x7f5   :  { %v6355_v10 = vpop.permute.xlu1 %6354 }
 0x7f6   :  { %6363 = vst.msk [vmem:[#allocation7 + $0x20] sm:$0x3] %vm6299_vm0, %v6355_v10 }
 0x7f7   :  { %v6470_v31 = vpop.permute.xlu0 %6469 }
 0x7f8   :  { %6481 = vst.msk [vmem:[#allocation7 + $0x6] sm:$0x3] %vm6299_vm0, %v6470_v31 }
 0x7f9   :  { %v6411_v33 = vpop.permute.xlu1 %6410  ;;  %v7988_v11 = vld [vmem:[#allocation7] ss:$10 sps:$4 sm:$0xff]  }
 0x7fa   :  { %6421 = vst.msk [vmem:[#allocation7 + $0xe] sm:$0x3] %vm6299_vm0, %v6411_v33  ;;  %v6519_v37 = vrot.slane %v7988_v11, %v15701_v0 }
 0x7fb   :  { %v6474_v45 = vpop.permute.xlu0 %6473 }
 0x7fc   :  { %6483 = vst.msk [vmem:[#allocation7 + $0x1a] sm:$0x3] %vm6299_vm0, %v6474_v45 }
 0x7fd   :  { %v6415_v4 = vpop.permute.xlu1 %6414  ;;  %v7990_v29 = vld [vmem:[#allocation7 + $0x14] ss:$10 sps:$4 sm:$0xff]  }
 0x7fe   :  { %6423 = vst.msk [vmem:[#allocation7 + $0x22] sm:$0x3] %vm6299_vm0, %v6415_v4  ;;  %v6533_v63 = vrot.slane %v7990_v29, %v15701_v0 }
 0x800   :  { %v6541_v28 = vcombine.low %v6519_v37, %v6533_v63  ;;  %v6542_v23 = vcombine.high %v6519_v37, %v6533_v63  ;;  %v6983_v63 = vld [vmem:[%s14005_s11] sm:$0x1] }
 0x801   :  { %v6476_v49 = vpop.permute.xlu1 %6475  ;;  %v7992_v60 = vld [vmem:[#allocation7 + $0x4] ss:$10 sps:$4 sm:$0xff]  }
 0x802   :  { %6484 = vst.msk [vmem:[#allocation7 + $0x24] sm:$0x3] %vm6299_vm0, %v6476_v49  ;;  %v6526_v22 = vrot.slane %v7992_v60, %v15701_v0  ;;  %v6567_v56 = vpack.c.bf16 %v6541_v28, %v6541_v28  ;;  %v6568_v47 = vpack.c.bf16 %v6542_v23, %v6542_v23  ;;  %v6984_v28 = vld [vmem:[%s14006_s12] sm:$0x1] }
 0x804   :  { %6895 = vmatprep.mubr.bf16.mxu0 %v6568_v47 }
 0x805   :  { %6896 = vmatmul.mubr.bf16.vlgmr.msra.gmra.mrb[88].mxu0 %v6567_v56 }
 0x806   :  { %7792 = vmatpush3.bf16.msra.mxu0 %v7994_v58  ;;  %7799 = vmatprep.mubr.msk.bf16.mxu0 %vm8043_vm1, %v15699_v13 }
 0x807   :  { %7793 = vmatprep.subr.bf16.mxu0 %v15699_v13 }
 0x809   :  { %v7993_v48 = vld [vmem:[#allocation7 + $0x18] ss:$10 sps:$4 sm:$0xff]  }
 0x80a   :  { %v6540_v17 = vrot.slane %v7993_v48, %v15701_v0  ;;  %7794 = vmatpush3.bf16.msra.mxu0 %v7995_v30 }
 0x80b   :  { %7795 = vmatprep.subr.bf16.mxu0 %v15699_v13 }
 0x80c   :  { %v6544_v9 = vcombine.high %v6526_v22, %v6540_v17  ;;  %v6543_v59 = vcombine.low %v6526_v22, %v6540_v17 }
 0x80e   :  { %v6570_v52 = vpack.c.bf16 %v6544_v9, %v6544_v9  ;;  %v6569_v38 = vpack.c.bf16 %v6543_v59, %v6543_v59  ;;  %7796 = vmatpush3.bf16.msra.mxu0 %v7996_v15 }
 0x80f   :  { %7797 = vmatprep.subr.bf16.mxu0 %v15699_v13 }
 0x810   :  { %6935 = vmatprep.mubr.bf16.mxu1 %v6570_v52 }
 0x811   :  { %6936 = vmatmul.mubr.bf16.vlgmr.msra.gmra.mrb[76].mxu1 %v6569_v38 }
 0x812   :  { %7811 = vmatprep.mubr.msk.bf16.mxu1 %vm8043_vm1, %v15699_v13  ;;  %7798 = vmatpush3.bf16.msra.mxu0 %v7997_v32 }
 0x813   :  { %7804 = vmatpush3.bf16.msra.mxu1 %v8000_v12 }
 0x814   :  { %7805 = vmatprep.subr.bf16.mxu1 %v15699_v13 }
 0x815   :  { %7800 = vmatmul.mubr.msk.bf16.vlgmr.msra.gmra.mrb[92].mxu0 %vm688_vm2, %v6571_v35 }
 0x817   :  { %7806 = vmatpush3.bf16.msra.mxu1 %v8001_v8 }
 0x818   :  { %7807 = vmatprep.subr.bf16.mxu1 %v15699_v13 }
 0x81b   :  { %7808 = vmatpush3.bf16.msra.mxu1 %v8002_v6 }
 0x81c   :  { %7809 = vmatprep.subr.bf16.mxu1 %v15699_v13 }
 0x81f   :  { %7810 = vmatpush3.bf16.msra.mxu1 %v8003_v41 }
 0x8d8   :  { %v7647_v19 = vpop.f32.mrb[88].mxu0 }
 0x8d9   :  { %v7648_v5 = vpop.f32.mrb[89].mxu0 }
 0x8da   :  { %v7649_v50 = vadd.f32 %v7648_v5, %v7647_v19  ;;  %v7650_v3 = vpop.f32.mrb[90].mxu0 }
 0x8db   :  { %v7651_v14 = vpop.f32.mrb[91].mxu0 }
 0x8e4   :  { %v7669_v44 = vpop.f32.mrb[76].mxu1 }
 0x8e5   :  { %v7670_v16 = vpop.f32.mrb[77].mxu1 }
 0x8e6   :  { %v7671_v2 = vadd.f32 %v7670_v16, %v7669_v44  ;;  %v7672_v21 = vpop.f32.mrb[78].mxu1 }
 0x8e7   :  { %v7673_v25 = vpop.f32.mrb[79].mxu1 }
 0x8e8   :  { %v6938_v61 = vadd.f32 %v7671_v2, %v7649_v50  ;;  %v6977_v20 = vpop.f32.mrb[92].mxu0 }
 0x8e9   :  { %v7801_v26 = vpop.f32.mrb[93].mxu0 }
 0x8ea   :  { %v6978_v1 = vadd.f32 %v6977_v20, %v6938_v61  ;;  %v6980_v54 = vpop.f32.mrb[94].mxu0 }
 0x8eb   :  { %v7802_v13 = vpop.f32.mrb[95].mxu0 }
 0x8ec   :  { %v6985_v24 = vsel %vm688_vm2, %v6978_v1, 0.0  ;;  %v6994_v34 = vmul.f32 %v6978_v1, %v6978_v1 }
 0x8ed   :  { %v6986_v7 = vrot.slane %v6985_v24, 4 }
 0x8ee   :  { %v6995_v36 = vsel %vm688_vm2, %v6994_v34, 0.0 }
 0x8ef   :  { %v6987_v62 = vadd.f32 %v6986_v7, %v6985_v24  ;;  %v6996_v46 = vrot.slane %v6995_v36, 4  ;;  %v7388_v24 = vld [vmem:[%s14008_s14] ss:$0 sm:$0xff]  ;;  %s8044_s14 = smov [#allocation8]  }
 0x8f0   :  { %s7178_s29 = sshll.u32 %s8044_s14, 4  ;;  %s7179_s29 = int_to_ptr.vmem [resolvable:$true] %s7178_s29 }
 0x8f1   :  { %v6988_v55 = vrot.slane %v6987_v62, 2  ;;  %v6997_v51 = vadd.f32 %v6996_v46, %v6995_v36  ;;  %s8016_s2 = scalar_lea.vmem %s7179_s29, 32  ;;  %p8021_p1 = scmp.lt.s32.totalorder %s7179_s29, %s7179_s29 }
 0x8f2   :  { %p8017_p0 = scmp.ne.s32.totalorder %s7179_s29, %s8016_s2  ;;  %p8022_p2 = scmp.lt.s32.totalorder %s8016_s2, %s8016_s2 }
 0x8f3   :  { %v6989_v53 = vadd.f32 %v6988_v55, %v6987_v62  ;;  %v6998_v42 = vrot.slane %v6997_v51, 2 }
 0x8f4   :  { %p8023_p3 = por %p8022_p2, %p8021_p1 }
 0x8f5   :  { %v6990_v10 = vrot.slane %v6989_v53, 1  ;;  %v6999_v31 = vadd.f32 %v6998_v42, %v6997_v51 }
 0x8f6   :  { %p8024_p4 = pnand %p8023_p3, %p8017_p0 }
 0x8f7   :  { %v6991_v33 = vadd.f32 %v6990_v10, %v6989_v53  ;;  %v7000_v45 = vrot.slane %v6999_v31, 1 }
 0x8f9   :  { %v6993_v4 = vmul.f32 0.125, %v6991_v33  ;;  %v7001_v49 = vadd.f32 %v7000_v45, %v6999_v31 }
 0x8fb   :  { %v7002_v11 = vmul.f32 0.125, %v7001_v49  ;;  %v7003_v60 = vmul.f32 %v6993_v4, %v6993_v4 }
 0x8fd   :  { %v7004_v29 = vsub.f32 %v7002_v11, %v7003_v60 }
 0x8ff   :  { %v7005_v48 = vmax.f32 %v7004_v29, 0.0 }
 0x901   :  { %v7006_v37 = vadd.f32 1e-05, %v7005_v48 }
 0x903   :  { %8010 = vrsqrt.f32 %v7006_v37 }
 0x90d   :  { %v8011_v22 = vpop.eup %8010 }
 0x90e   :  { %v7008_v17 = vmul.f32 %v8011_v22, %v6983_v63 }
 0x910   :  { %v7009_v23 = vmul.f32 %v7008_v17, %v6993_v4  ;;  %v7015_v9 = vrot.slane %v7008_v17, %v15700_v43 }
 0x912   :  { %v7010_v59 = vsub.f32 %v6984_v28, %v7009_v23  ;;  %v7017_v56 = vmul.f32 %v7015_v9, %v6978_v1 }
 0x914   :  { %v7022_v47 = vrot.slane %v7010_v59, %v15700_v43 }
 0x916   :  { %v7024_v52 = vadd.f32 %v7022_v47, %v7017_v56 }
 0x918   :  { %v7025_v38 = vmax.f32 %v7024_v52, 0.0 }
 0x91a   :  { %v7027_v58 = vcombine.high %v7025_v38, %v7025_v38  ;;  %v7034_v30 = vrot.slane %v7025_v38, %v15701_v0 }
 0x91c   :  { %v7041_v57 = vrot.slane %v7027_v58, %v15701_v0  ;;  %v7042_v18 = vcombine.high %v7034_v30, %v7034_v30  ;;  %v7048_v39 = vsel %vm2034_vm3, %v7034_v30, -inf }
 0x91e   :  { %v7043_v15 = vcombine.high %v7041_v57, %v7041_v57  ;;  %v7049_v27 = vsel %vm2034_vm3, %v7042_v18, -inf  ;;  %v7051_v40 = vsel %vm2034_vm3, %v7041_v57, -inf }
 0x91f   :  { %v7050_v32 = vmax.f32 %v7048_v39, %v7049_v27 }
 0x920   :  { %v7052_v35 = vsel %vm2034_vm3, %v7043_v15, -inf }
 0x921   :  { %v7053_v12 = vmax.f32 %v7051_v40, %v7052_v35  ;;  %v7054_v43 = vsel %vm2034_vm3, %v7050_v32, -inf }
 0x922   :  { %v7055_v8 = vrot.slane %v7054_v43, 4 }
 0x923   :  { %v7061_v6 = vsel %vm2034_vm3, %v7053_v12, -inf  ;;  %vm7158_vm3 = vcmask 33792  }
 0x924   :  { %v7056_v41 = vmax.f32 %v7054_v43, %v7055_v8  ;;  %v7062_v19 = vrot.slane %v7061_v6, 4 }
 0x926   :  { %v7057_v0 = vrot.slane %v7056_v41, 2  ;;  %v7063_v44 = vmax.f32 %v7061_v6, %v7062_v19 }
 0x928   :  { %v7058_v5 = vmax.f32 %v7056_v41, %v7057_v0  ;;  %v7064_v16 = vrot.slane %v7063_v44, 2 }
 0x92a   :  { %v7059_v50 = vrot.slane %v7058_v5, 1  ;;  %v7065_v2 = vmax.f32 %v7063_v44, %v7064_v16 }
 0x92c   :  { %v7060_v3 = vmax.f32 %v7058_v5, %v7059_v50  ;;  %v7066_v21 = vrot.slane %v7065_v2, 1 }
 0x92e   :  { %v7067_v14 = vmax.f32 %v7065_v2, %v7066_v21  ;;  %v7068_v25 = vpack.c.bf16 %v7060_v3, %v7060_v3 }
 0x930   :  { %v7069_v61 = vpack.c.bf16 %v7067_v14, %v7067_v14  ;;  %v7087_v20 = vunpack.c.l.b16 %v7068_v25 }
 0x932   :  { %v7088_v1 = vunpack.c.l.b16 %v7069_v61 }
 0x934   :  { %v7089_v26 = vsel %vm3102_vm5, %v7088_v1, %v7087_v20 }
 0x935   :  { %v7090_v54 = vpack.c.b16 %v7089_v26, %v7089_v26 }
 0x937   :  { %7812 = vmatmul.mubr.msk.bf16.vlgmr.msra.gmra.mrb[80].mxu1 %vm688_vm2, %v7090_v54 }
 0xa0a   :  { %v7152_v34 = vpop.f32.mrb[80].mxu1 }
 0xa0b   :  { %v7153_v13 = vadd.f32 %v7388_v24, %v7152_v34  ;;  %v7813_v7 = vpop.f32.mrb[81].mxu1 }
 0xa0c   :  { %v7155_v36 = vpop.f32.mrb[82].mxu1 }
 0xa0d   :  { %v7814_v62 = vpop.f32.mrb[83].mxu1  ;;  %v7159_v46 = vsel %vm7158_vm3, %v7153_v13, -inf }
 0xa0e   :  { %7160 = vmax.xlane.f32.xlu0 %v7159_v46 }
 0xa9b   :  { %v7161_v55 = vpop.xlane.xlu0 %7160 }
 0xa9c   :  { %v7162_v51 = vsub.f32 %v7153_v13, %v7161_v55 }
 0xa9e   :  { %v7163_v53 = vmul.f32 1.442695, %v7162_v51 }
 0xaa0   :  { %8012 = vpow2.f32 %v7163_v53 }
 0xaaa   :  { %v8013_v42 = vpop.eup %8012 }
 0xaab   :  { %v7165_v10 = vsel %vm7158_vm3, %v8013_v42, 0.0 }
 0xaac   :  { %7166 = vadd.xlane.f32.xlu1 %v7165_v10 }
 0xb39   :  { %v7167_v31 = vpop.xlane.xlu1 %7166 }
 0xb3a   :  { %8014 = vlog2.f32 %v7167_v31 }
 0xb44   :  { %v8015_v33 = vpop.eup %8014 }
 0xb45   :  { %v7169_v45 = vmul.f32 0.6931472, %v8015_v33 }
 0xb47   :  { %v7170_v4 = vsub.f32 %v7162_v51, %v7169_v45 }
 0xb49   :  { %7171 = vst.msk [vmem:[#allocation8] sm:$0x3] %vm7158_vm3, %v7170_v4 }
 0xb4a   :  { %8027 = shalt.err (!%p8024_p4)
}
 0xb4b   :  { %s8028_s1 = scalar_lea.hbm %s14009_s15, 32 }
 0xb4c   :  { %p8029_p5 = scmp.ne.s32.totalorder %s14009_s15, %s8028_s1  ;;  %p8032_p6 = scmp.lt.u32.totalorder %s8028_s1, %s14009_s15 }
 0xb4e   :  { %p8034_p7 = pnand %p8032_p6, %p8029_p5 }
 0xb50   :  { %8037 = shalt.err (!%p8034_p7)
}
 0xb51   :  { %7181 = dma.vmem_to_hbm [thread:$0]  %s7179_s29, 32, %s14009_s15, [#allocation9]  }
 0xb52   :  { %8038 = dma.done.wait [#allocation9], 32  }
 0xb53   :  { %8039 = vsyncadd [#allocation9], 4294967264 }
 0xb54   :  { %7185 = vsyncpa [#allocation9], 1 }

</bundles_post_ra>
